<compile_context>
chip_gen: v6e
topology: v6e:2x2x1
jax: 0.10.0
libtpu: 0.0.40
codegen_flags: <defaults>
</compile_context>

<pallas_src>
import jax
import jax.numpy as jnp
from jax.experimental import pallas as pl
from jax.experimental.pallas import tpu as pltpu

INPUT_DIM = 2560
H1, H2, H3 = 1024, 512, 256
NUM_CLASSES = 3
OUT_PAD = 128          # lane-dense padded output width (>= NUM_CLASSES)


def _round_up(x, m):
    return (x + m - 1) // m * m


def _device_defaults():
    """(default batch tile, vmem_limit_bytes) per TPU generation."""
    kind = ""
    try:
        kind = jax.devices()[0].device_kind.lower()
    except Exception:
        pass
    if "v5" in kind:
        # v5e: per-step compute already dominates grid overhead at TB=256;
        # explicit vmem limit because the default scoped VMEM is only 16 MiB.
        return 256, 48 << 20
    if "v6" in kind:
        # v6e: 128 MiB VMEM; big tile amortizes per-step overhead + small-K tails.
        return 1024, 80 << 20
    # v7x (64 MiB per-TC VMEM) and unknown chips: stay conservative.
    return 512, 48 << 20


def _select_tb(batch, tb_max):
    """Pick a batch tile that minimizes padded (wasted) MXU work."""
    if batch <= tb_max:
        # Single tile; round rows to 16 so bf16 sublane packing stays clean.
        return max(16, _round_up(batch, 16))
    candidates = [c for c in (128, 256, 512, 1024) if c <= tb_max]
    # Least padded rows wins; prefer the larger tile on ties.
    return min(candidates, key=lambda c: (_round_up(batch, c) - batch, -c))


def mlp_kernel(x_ref, w1_ref, b1_ref, w2_ref, b2_ref, w3_ref, b3_ref,
               w4_ref, b4_ref, o_ref):
    # One batch tile per grid step; all weights resident in VMEM across steps.
    x = x_ref[...]  # already bf16 (cast once in the wrapper)

    h = jnp.dot(x, w1_ref[...], preferred_element_type=jnp.float32) + b1_ref[...]
    h = jnp.maximum(h, 0.0)          # ReLU (dropout = identity in eval mode)

    h = jnp.dot(h.astype(jnp.bfloat16), w2_ref[...],
                preferred_element_type=jnp.float32) + b2_ref[...]
    h = jnp.maximum(h, 0.0)

    h = jnp.dot(h.astype(jnp.bfloat16), w3_ref[...],
                preferred_element_type=jnp.float32) + b3_ref[...]
    h = jnp.maximum(h, 0.0)

    out = jnp.dot(h.astype(jnp.bfloat16), w4_ref[...],
                  preferred_element_type=jnp.float32) + b4_ref[...]
    o_ref[...] = out.astype(o_ref.dtype)


def prepare_params(params):
    """One-time weight prep (do NOT call per forward): bf16 weights, padded last layer."""
    (w1, b1, w2, b2, w3, b3, w4, b4) = params
    w1b = w1.astype(jnp.bfloat16)
    w2b = w2.astype(jnp.bfloat16)
    w3b = w3.astype(jnp.bfloat16)
    w4b = jnp.pad(w4, ((0, 0), (0, OUT_PAD - NUM_CLASSES))).astype(jnp.bfloat16)
    b4p = jnp.pad(b4, ((0, 0), (0, OUT_PAD - NUM_CLASSES)))   # bias stays f32
    return (w1b, b1, w2b, b2, w3b, b3, w4b, b4p)


def mlp_classifier_forward(x, prepared, *, tb=None, vmem_limit_bytes=None):
    """x: (B, INPUT_DIM) f32. prepared: output of prepare_params(). Returns (B, 3) f32."""
    (w1b, b1, w2b, b2, w3b, b3, w4b, b4p) = prepared
    B = x.shape[0]

    d_tb, d_vmem = _device_defaults()
    tb = _select_tb(B, tb if tb is not None else d_tb)
    vmem_limit_bytes = vmem_limit_bytes if vmem_limit_bytes is not None else d_vmem

    b_pad = _round_up(B, tb)
    x_pad = jnp.pad(x, ((0, b_pad - B), (0, 0))).astype(jnp.bfloat16)
    grid = (b_pad // tb,)

    const = lambda i: (0, 0)   # weights/biases: fetched once, resident across steps
    single = pl.Buffered(1)    # no double-buffering for the resident operands
    in_specs = [
        pl.BlockSpec((tb, INPUT_DIM), lambda i: (i, 0)),     # x tile (double-buffered)
        pl.BlockSpec((INPUT_DIM, H1), const, pipeline_mode=single),
        pl.BlockSpec((1, H1), const, pipeline_mode=single),
        pl.BlockSpec((H1, H2), const, pipeline_mode=single),
        pl.BlockSpec((1, H2), const, pipeline_mode=single),
        pl.BlockSpec((H2, H3), const, pipeline_mode=single),
        pl.BlockSpec((1, H3), const, pipeline_mode=single),
        pl.BlockSpec((H3, OUT_PAD), const, pipeline_mode=single),
        pl.BlockSpec((1, OUT_PAD), const, pipeline_mode=single),
    ]
    out_specs = pl.BlockSpec((tb, OUT_PAD), lambda i: (i, 0))

    out_padded = pl.pallas_call(
        mlp_kernel,
        out_shape=jax.ShapeDtypeStruct((b_pad, OUT_PAD), jnp.bfloat16),
        grid=grid,
        in_specs=in_specs,
        out_specs=out_specs,
        compiler_params=pltpu.CompilerParams(
            dimension_semantics=("parallel",),     # lets v7x shard steps over its 2 TCs
            vmem_limit_bytes=vmem_limit_bytes,
        ),
    )(x_pad, w1b, b1, w2b, b2, w3b, b3, w4b, b4p)

    return out_padded[:B, :NUM_CLASSES].astype(jnp.float32)


def init_params(key):
    """Deterministic synthetic params, PyTorch-like init. Weights (in,out); biases (1,out)."""
    dims = [(INPUT_DIM, H1), (H1, H2), (H2, H3), (H3, NUM_CLASSES)]
    params = []
    keys = jax.random.split(key, len(dims) * 2)
    for i, (din, dout) in enumerate(dims):
        scale = 1.0 / jnp.sqrt(jnp.float32(din))
        w = jax.random.uniform(keys[2 * i], (din, dout), jnp.float32,
                               minval=-scale, maxval=scale)
        b = jax.random.uniform(keys[2 * i + 1], (1, dout), jnp.float32,
                               minval=-scale, maxval=scale)
        params += [w, b]
    return tuple(params)


def reference_forward_f32(x, params):
    (w1, b1, w2, b2, w3, b3, w4, b4) = params
    h = jnp.maximum(x @ w1 + b1, 0.0)
    h = jnp.maximum(h @ w2 + b2, 0.0)
    h = jnp.maximum(h @ w3 + b3, 0.0)
    return h @ w4 + b4


def reference_forward_bf16(x, params):
    """Mirrors the kernel's bf16-operand / f32-accumulate / bf16-output numerics."""
    (w1, b1, w2, b2, w3, b3, w4, b4) = params
    bf = jnp.bfloat16

    def lin(h, w, b):
        return jnp.dot(h.astype(bf), w.astype(bf),
                       preferred_element_type=jnp.float32) + b

    h = jnp.maximum(lin(x, w1, b1), 0.0)
    h = jnp.maximum(lin(h, w2, b2), 0.0)
    h = jnp.maximum(lin(h, w3, b3), 0.0)
    out = lin(h, w4, b4)
    return out.astype(bf).astype(jnp.float32)


if __name__ == "__main__":
    key = jax.random.PRNGKey(0)
    kx, kp = jax.random.split(key)

    B = 4  # small batch
    x = jax.random.normal(kx, (B, INPUT_DIM), jnp.float32)
    params = init_params(kp)
    prepared = prepare_params(params)   # one-time weight cast/pad (not per forward)

    out = mlp_classifier_forward(x, prepared)
    out = jax.block_until_ready(out)
    assert out.shape == (B, NUM_CLASSES), out.shape

    # Tight check against a bf16-matched JAX reference (same numerics as the kernel).
    ref_bf16 = reference_forward_bf16(x, params)
    assert jnp.allclose(out, ref_bf16, atol=2e-2, rtol=2e-2), \
        "mismatch vs bf16-matched JAX reference"

    # Loose check against the pure-f32 PyTorch-semantics reference
    # (difference is only bf16 weight/activation/output rounding).
    ref_f32 = reference_forward_f32(x, params)
    assert jnp.allclose(out, ref_f32, atol=1e-1, rtol=1e-1), \
        "mismatch vs f32 JAX reference"

    print("KERNEL_OK")
</pallas_src>

<mosaic_0001>
module attributes {stable_mosaic.version = 11 : i64} {
  func.func @mlp_kernel(%arg0: i32, %arg1: memref<16x2560xbf16, #tpu.memory_space<vmem>>, %arg2: memref<2560x1024xbf16, #tpu.memory_space<vmem>>, %arg3: memref<1x1024xf32, #tpu.memory_space<vmem>>, %arg4: memref<1024x512xbf16, #tpu.memory_space<vmem>>, %arg5: memref<1x512xf32, #tpu.memory_space<vmem>>, %arg6: memref<512x256xbf16, #tpu.memory_space<vmem>>, %arg7: memref<1x256xf32, #tpu.memory_space<vmem>>, %arg8: memref<256x128xbf16, #tpu.memory_space<vmem>>, %arg9: memref<1x128xf32, #tpu.memory_space<vmem>>, %arg10: memref<16x128xbf16, #tpu.memory_space<vmem>>) attributes {dimension_semantics = [#tpu.dimension_semantics<parallel>], iteration_bounds = array<i64: 1>, scalar_prefetch = 0 : i64, scratch_operands = 0 : i64, tpu.core_type = #tpu.core_type<tc>, window_params = [{transform_indices = @transform_0, window_bounds = array<i64: 16, 2560>}, {pipeline_mode = #tpu.pipeline_mode<synchronous>, transform_indices = @transform_1, window_bounds = array<i64: 2560, 1024>}, {pipeline_mode = #tpu.pipeline_mode<synchronous>, transform_indices = @transform_2, window_bounds = array<i64: 1, 1024>}, {pipeline_mode = #tpu.pipeline_mode<synchronous>, transform_indices = @transform_3, window_bounds = array<i64: 1024, 512>}, {pipeline_mode = #tpu.pipeline_mode<synchronous>, transform_indices = @transform_4, window_bounds = array<i64: 1, 512>}, {pipeline_mode = #tpu.pipeline_mode<synchronous>, transform_indices = @transform_5, window_bounds = array<i64: 512, 256>}, {pipeline_mode = #tpu.pipeline_mode<synchronous>, transform_indices = @transform_6, window_bounds = array<i64: 1, 256>}, {pipeline_mode = #tpu.pipeline_mode<synchronous>, transform_indices = @transform_7, window_bounds = array<i64: 256, 128>}, {pipeline_mode = #tpu.pipeline_mode<synchronous>, transform_indices = @transform_8, window_bounds = array<i64: 1, 128>}, {transform_indices = @transform_9, window_bounds = array<i64: 16, 128>}]} {
    %c0 = arith.constant 0 : index
    %c0_0 = arith.constant 0 : index
    %0 = vector.load %arg1[%c0, %c0_0] : memref<16x2560xbf16, #tpu.memory_space<vmem>>, vector<16x2560xbf16>
    %c0_1 = arith.constant 0 : index
    %c0_2 = arith.constant 0 : index
    %1 = vector.load %arg2[%c0_1, %c0_2] : memref<2560x1024xbf16, #tpu.memory_space<vmem>>, vector<2560x1024xbf16>
    %cst = arith.constant dense<0.000000e+00> : vector<16x1024xf32>
    %2 = tpu.matmul %0, %1, %cst {dimension_numbers = #tpu.dot_dimension_numbers<[1], [0], [0], [1], [0, 0, 1, 1], [], []>} : vector<16x2560xbf16>, vector<2560x1024xbf16>, vector<16x1024xf32> -> vector<16x1024xf32>
    %c0_3 = arith.constant 0 : index
    %c0_4 = arith.constant 0 : index
    %3 = vector.load %arg3[%c0_3, %c0_4] : memref<1x1024xf32, #tpu.memory_space<vmem>>, vector<1x1024xf32>
    %4 = vector.broadcast %3 : vector<1x1024xf32> to vector<16x1024xf32>
    %5 = arith.addf %2, %4 : vector<16x1024xf32>
    %cst_5 = arith.constant 0.000000e+00 : f32
    %6 = vector.broadcast %cst_5 : f32 to vector<16x1024xf32>
    %7 = arith.maximumf %5, %6 : vector<16x1024xf32>
    %8 = arith.truncf %7 : vector<16x1024xf32> to vector<16x1024xbf16>
    %c0_6 = arith.constant 0 : index
    %c0_7 = arith.constant 0 : index
    %9 = vector.load %arg4[%c0_6, %c0_7] : memref<1024x512xbf16, #tpu.memory_space<vmem>>, vector<1024x512xbf16>
    %cst_8 = arith.constant dense<0.000000e+00> : vector<16x512xf32>
    %10 = tpu.matmul %8, %9, %cst_8 {dimension_numbers = #tpu.dot_dimension_numbers<[1], [0], [0], [1], [0, 0, 1, 1], [], []>} : vector<16x1024xbf16>, vector<1024x512xbf16>, vector<16x512xf32> -> vector<16x512xf32>
    %c0_9 = arith.constant 0 : index
    %c0_10 = arith.constant 0 : index
    %11 = vector.load %arg5[%c0_9, %c0_10] : memref<1x512xf32, #tpu.memory_space<vmem>>, vector<1x512xf32>
    %12 = vector.broadcast %11 : vector<1x512xf32> to vector<16x512xf32>
    %13 = arith.addf %10, %12 : vector<16x512xf32>
    %cst_11 = arith.constant 0.000000e+00 : f32
    %14 = vector.broadcast %cst_11 : f32 to vector<16x512xf32>
    %15 = arith.maximumf %13, %14 : vector<16x512xf32>
    %16 = arith.truncf %15 : vector<16x512xf32> to vector<16x512xbf16>
    %c0_12 = arith.constant 0 : index
    %c0_13 = arith.constant 0 : index
    %17 = vector.load %arg6[%c0_12, %c0_13] : memref<512x256xbf16, #tpu.memory_space<vmem>>, vector<512x256xbf16>
    %cst_14 = arith.constant dense<0.000000e+00> : vector<16x256xf32>
    %18 = tpu.matmul %16, %17, %cst_14 {dimension_numbers = #tpu.dot_dimension_numbers<[1], [0], [0], [1], [0, 0, 1, 1], [], []>} : vector<16x512xbf16>, vector<512x256xbf16>, vector<16x256xf32> -> vector<16x256xf32>
    %c0_15 = arith.constant 0 : index
    %c0_16 = arith.constant 0 : index
    %19 = vector.load %arg7[%c0_15, %c0_16] : memref<1x256xf32, #tpu.memory_space<vmem>>, vector<1x256xf32>
    %20 = vector.broadcast %19 : vector<1x256xf32> to vector<16x256xf32>
    %21 = arith.addf %18, %20 : vector<16x256xf32>
    %cst_17 = arith.constant 0.000000e+00 : f32
    %22 = vector.broadcast %cst_17 : f32 to vector<16x256xf32>
    %23 = arith.maximumf %21, %22 : vector<16x256xf32>
    %24 = arith.truncf %23 : vector<16x256xf32> to vector<16x256xbf16>
    %c0_18 = arith.constant 0 : index
    %c0_19 = arith.constant 0 : index
    %25 = vector.load %arg8[%c0_18, %c0_19] : memref<256x128xbf16, #tpu.memory_space<vmem>>, vector<256x128xbf16>
    %cst_20 = arith.constant dense<0.000000e+00> : vector<16x128xf32>
    %26 = tpu.matmul %24, %25, %cst_20 {dimension_numbers = #tpu.dot_dimension_numbers<[1], [0], [0], [1], [0, 0, 1, 1], [], []>} : vector<16x256xbf16>, vector<256x128xbf16>, vector<16x128xf32> -> vector<16x128xf32>
    %c0_21 = arith.constant 0 : index
    %c0_22 = arith.constant 0 : index
    %27 = vector.load %arg9[%c0_21, %c0_22] : memref<1x128xf32, #tpu.memory_space<vmem>>, vector<1x128xf32>
    %28 = vector.broadcast %27 : vector<1x128xf32> to vector<16x128xf32>
    %29 = arith.addf %26, %28 : vector<16x128xf32>
    %30 = arith.truncf %29 : vector<16x128xf32> to vector<16x128xbf16>
    %c0_23 = arith.constant 0 : index
    %c0_24 = arith.constant 0 : index
    %31 = vector.load %arg10[%c0_23, %c0_24] : memref<16x128xbf16, #tpu.memory_space<vmem>>, vector<16x128xbf16>
    tpu.vector_store %arg10[%c0_23, %c0_24], %30 {strides = array<i32>} : memref<16x128xbf16, #tpu.memory_space<vmem>>, vector<16x128xbf16>,
    return
  }
  func.func @transform_0(%arg0: i32) -> (i32, i32) {
    %c0_i32 = arith.constant 0 : i32
    %c0_i32_0 = arith.constant 0 : i32
    return %arg0, %c0_i32 : i32, i32
  }
  func.func @transform_1(%arg0: i32) -> (i32, i32) {
    %c0_i32 = arith.constant 0 : i32
    %c0_i32_0 = arith.constant 0 : i32
    %c0_i32_1 = arith.constant 0 : i32
    return %c0_i32, %c0_i32_0 : i32, i32
  }
  func.func @transform_2(%arg0: i32) -> (i32, i32) {
    %c0_i32 = arith.constant 0 : i32
    %c0_i32_0 = arith.constant 0 : i32
    %c0_i32_1 = arith.constant 0 : i32
    return %c0_i32, %c0_i32_0 : i32, i32
  }
  func.func @transform_3(%arg0: i32) -> (i32, i32) {
    %c0_i32 = arith.constant 0 : i32
    %c0_i32_0 = arith.constant 0 : i32
    %c0_i32_1 = arith.constant 0 : i32
    return %c0_i32, %c0_i32_0 : i32, i32
  }
  func.func @transform_4(%arg0: i32) -> (i32, i32) {
    %c0_i32 = arith.constant 0 : i32
    %c0_i32_0 = arith.constant 0 : i32
    %c0_i32_1 = arith.constant 0 : i32
    return %c0_i32, %c0_i32_0 : i32, i32
  }
  func.func @transform_5(%arg0: i32) -> (i32, i32) {
    %c0_i32 = arith.constant 0 : i32
    %c0_i32_0 = arith.constant 0 : i32
    %c0_i32_1 = arith.constant 0 : i32
    return %c0_i32, %c0_i32_0 : i32, i32
  }
  func.func @transform_6(%arg0: i32) -> (i32, i32) {
    %c0_i32 = arith.constant 0 : i32
    %c0_i32_0 = arith.constant 0 : i32
    %c0_i32_1 = arith.constant 0 : i32
    return %c0_i32, %c0_i32_0 : i32, i32
  }
  func.func @transform_7(%arg0: i32) -> (i32, i32) {
    %c0_i32 = arith.constant 0 : i32
    %c0_i32_0 = arith.constant 0 : i32
    %c0_i32_1 = arith.constant 0 : i32
    return %c0_i32, %c0_i32_0 : i32, i32
  }
  func.func @transform_8(%arg0: i32) -> (i32, i32) {
    %c0_i32 = arith.constant 0 : i32
    %c0_i32_0 = arith.constant 0 : i32
    %c0_i32_1 = arith.constant 0 : i32
    return %c0_i32, %c0_i32_0 : i32, i32
  }
  func.func @transform_9(%arg0: i32) -> (i32, i32) {
    %c0_i32 = arith.constant 0 : i32
    %c0_i32_0 = arith.constant 0 : i32
    return %arg0, %c0_i32 : i32, i32
  }
}

</mosaic_0001>

<bundles_post_ra>
// kernel: tpu_custom_call.1
= control target key start
LH: loop header
LB: loop body
LE: loop exit
PB: predicated region body
PF: predicated region fallthrough
CT: control target
= control target key end

     0   :  { %14 = vsyncpa [#allocation3], 0  ;;  %s15266_s0 = inlined_call_operand.hbm [shape: bf16[16,2560], index: 0, kind: input, shape index: {}]   ;;  %s15267_s1 = inlined_call_operand.hbm [shape: bf16[2560,1024], index: 1, kind: input, shape index: {}]   ;;  %s15268_s2 = inlined_call_operand.hbm [shape: f32[1,1024], index: 2, kind: input, shape index: {}]   ;;  %s15269_s3 = inlined_call_operand.hbm [shape: bf16[1024,512], index: 3, kind: input, shape index: {}]   ;;  %s15270_s4 = inlined_call_operand.hbm [shape: f32[1,512], index: 4, kind: input, shape index: {}]   ;;  %s15271_s5 = inlined_call_operand.hbm [shape: bf16[512,256], index: 5, kind: input, shape index: {}]   ;;  %s15272_s6 = inlined_call_operand.hbm [shape: f32[1,256], index: 6, kind: input, shape index: {}]   ;;  %s15273_s7 = inlined_call_operand.hbm [shape: bf16[256,128], index: 7, kind: input, shape index: {}]   ;;  %s15274_s8 = inlined_call_operand.hbm [shape: f32[1,128], index: 8, kind: input, shape index: {}]   ;;  %s15275_s9 = inlined_call_operand.hbm [shape: bf16[16,128], index: 9, kind: output, shape index: {}]  }
   0x1   :  { %15 = vsyncpa [#allocation6], 0 }
   0x2   :  { %16 = vsyncpa [#allocation9], 0 }
   0x3   :  { %17 = vsyncpa [#allocation12], 0 }
   0x4   :  { %18 = vsyncpa [#allocation15], 0 }
   0x5   :  { %19 = vsyncpa [#allocation4], 0  ;;  %s14832_s30 = smov [#allocation5]  }
   0x6   :  { %s37_s10 = sshll.u32 %s14832_s30, 4  ;;  %s38_s10 = int_to_ptr.vmem [resolvable:$true] %s37_s10 }
   0x7   :  { %s14628_s11 = scalar_lea.vmem %s38_s10, 163840  ;;  %p14633_p1 = scmp.lt.s32.totalorder %s38_s10, %s38_s10 }
   0x8   :  { %p14629_p0 = scmp.ne.s32.totalorder %s38_s10, %s14628_s11  ;;  %p14634_p2 = scmp.lt.s32.totalorder %s14628_s11, %s14628_s11 }
   0xa   :  { %p14635_p3 = por %p14634_p2, %p14633_p1 }
   0xc   :  { %p14636_p4 = pnand %p14635_p3, %p14629_p0 }
   0xe   :  { %14639 = shalt.err (!%p14636_p4)
}
   0xf   :  { %s14833_s12 = smov 512   ;;  %s14834_s13 = smov 32  }
  0x10   :  { %43 = dma.hbm_to_vmem [thread:$0]  %s15267_s1, 163840, %s38_s10, [#allocation6], %s14833_s12, %s14833_s12, %s14834_s13  }
  0x11   :  { %s14835_s16 = smov [#allocation8]  }
  0x12   :  { %s59_s17 = sshll.u32 %s14835_s16, 4  ;;  %s60_s17 = int_to_ptr.vmem [resolvable:$true] %s59_s17 }
  0x13   :  { %s14648_s18 = scalar_lea.vmem %s60_s17, 32768  ;;  %p14653_p6 = scmp.lt.s32.totalorder %s60_s17, %s60_s17 }
  0x14   :  { %p14649_p5 = scmp.ne.s32.totalorder %s60_s17, %s14648_s18  ;;  %p14654_p7 = scmp.lt.s32.totalorder %s14648_s18, %s14648_s18 }
  0x16   :  { %p14655_p8 = por %p14654_p7, %p14653_p6 }
  0x18   :  { %p14656_p9 = pnand %p14655_p8, %p14649_p5 }
  0x1a   :  { %14659 = shalt.err (!%p14656_p9)
}
  0x1b   :  { %s14836_s19 = smov 256   ;;  %s14837_s20 = smov 16  }
  0x1c   :  { %65 = dma.hbm_to_vmem [thread:$0]  %s15269_s3, 32768, %s60_s17, [#allocation9], %s14836_s19, %s14836_s19, %s14837_s20  }
  0x1d   :  { %s14838_s23 = smov [#allocation11]  }
  0x1e   :  { %s81_s24 = sshll.u32 %s14838_s23, 4  ;;  %s82_s24 = int_to_ptr.vmem [resolvable:$true] %s81_s24 }
  0x1f   :  { %s14668_s1 = scalar_lea.vmem %s82_s24, 8192  ;;  %p14673_p11 = scmp.lt.s32.totalorder %s82_s24, %s82_s24 }
  0x20   :  { %p14669_p10 = scmp.ne.s32.totalorder %s82_s24, %s14668_s1  ;;  %p14674_p12 = scmp.lt.s32.totalorder %s14668_s1, %s14668_s1 }
  0x22   :  { %p14675_p13 = por %p14674_p12, %p14673_p11 }
  0x24   :  { %p14676_p0 = pnand %p14675_p13, %p14669_p10 }
  0x26   :  { %14679 = shalt.err (!%p14676_p0)
}
  0x27   :  { %s14839_s25 = smov 128   ;;  %s14840_s26 = smov 8  }
  0x28   :  { %87 = dma.hbm_to_vmem [thread:$0]  %s15271_s5, 8192, %s82_s24, [#allocation12], %s14839_s25, %s14839_s25, %s14840_s26  }
  0x29   :  { %s14841_s29 = smov [#allocation14]  }
  0x2a   :  { %s103_s30 = sshll.u32 %s14841_s29, 4  ;;  %s104_s30 = int_to_ptr.vmem [resolvable:$true] %s103_s30 }
  0x2b   :  { %s14688_s3 = scalar_lea.vmem %s104_s30, 2048  ;;  %p14693_p2 = scmp.lt.s32.totalorder %s104_s30, %s104_s30 }
  0x2c   :  { %p14689_p1 = scmp.ne.s32.totalorder %s104_s30, %s14688_s3  ;;  %p14694_p3 = scmp.lt.s32.totalorder %s14688_s3, %s14688_s3 }
  0x2e   :  { %p14695_p4 = por %p14694_p3, %p14693_p2 }
  0x30   :  { %p14696_p5 = pnand %p14695_p4, %p14689_p1 }
  0x32   :  { %14699 = shalt.err (!%p14696_p5)
}
  0x33   :  { %s14842_s10 = smov 64   ;;  %s14843_s11 = smov 4  }
  0x34   :  { %109 = dma.hbm_to_vmem [thread:$0]  %s15273_s7, 2048, %s104_s30, [#allocation15], %s14842_s10, %s14842_s10, %s14843_s11  }
  0x35   :  { %s14844_s5 = smov [#allocation2]  }
  0x36   :  { %s25_s14 = sshll.u32 %s14844_s5, 4  ;;  %s26_s14 = int_to_ptr.vmem [resolvable:$true] %s25_s14 }
  0x37   :  { %s14708_s15 = scalar_lea.vmem %s26_s14, 2560  ;;  %p14713_p7 = scmp.lt.s32.totalorder %s26_s14, %s26_s14 }
  0x38   :  { %p14709_p6 = scmp.ne.s32.totalorder %s26_s14, %s14708_s15  ;;  %p14714_p8 = scmp.lt.s32.totalorder %s14708_s15, %s14708_s15 }
  0x3a   :  { %p14715_p9 = por %p14714_p8, %p14713_p7 }
  0x3c   :  { %p14716_p10 = pnand %p14715_p9, %p14709_p6 }
  0x3e   :  { %14719 = shalt.err (!%p14716_p10)
}
  0x3f   :  { %s14845_s16 = smov 1280   ;;  %s14846_s17 = smov 80  }
  0x40   :  { %31 = dma.hbm_to_vmem [thread:$0]  %s15266_s0, 2560, %s26_s14, [#allocation3], %s14845_s16, %s14845_s16, %s14846_s17  }
  0x41   :  { %s14847_s20 = smov [#allocation7]   ;;  %s14848_s7 = smov [#allocation10]  }
  0x42   :  { %s50_s21 = sshll.u32 %s14847_s20, 4  ;;  %s72_s22 = sshll.u32 %s14848_s7, 4  ;;  %s51_s21 = int_to_ptr.vmem [resolvable:$true] %s50_s21  ;;  %s73_s22 = int_to_ptr.vmem [resolvable:$true] %s72_s22 }
  0x43   :  { %s14728_s23 = scalar_lea.vmem %s51_s21, 128  ;;  %p14733_p12 = scmp.lt.s32.totalorder %s51_s21, %s51_s21 }
  0x44   :  { %p14729_p11 = scmp.ne.s32.totalorder %s51_s21, %s14728_s23  ;;  %p14734_p13 = scmp.lt.s32.totalorder %s14728_s23, %s14728_s23 }
  0x46   :  { %p14735_p0 = por %p14734_p13, %p14733_p12 }
  0x48   :  { %p14736_p1 = pnand %p14735_p0, %p14729_p11 }
  0x4a   :  { %14739 = shalt.err (!%p14736_p1)
}
  0x4b   :  { %53 = dma.hbm_to_vmem [thread:$0]  %s15268_s2, 128, %s51_s21, [#allocation6]  }
  0x4c   :  { %s14748_s25 = scalar_lea.vmem %s73_s22, 64  ;;  %p14753_p3 = scmp.lt.s32.totalorder %s73_s22, %s73_s22 }
  0x4d   :  { %p14749_p2 = scmp.ne.s32.totalorder %s73_s22, %s14748_s25  ;;  %p14754_p4 = scmp.lt.s32.totalorder %s14748_s25, %s14748_s25 }
  0x4f   :  { %p14755_p5 = por %p14754_p4, %p14753_p3 }
  0x51   :  { %p14756_p6 = pnand %p14755_p5, %p14749_p2 }
  0x53   :  { %14759 = shalt.err (!%p14756_p6)
}
  0x54   :  { %75 = dma.hbm_to_vmem [thread:$0]  %s15270_s4, 64, %s73_s22, [#allocation9]  }
  0x55   :  { %s14849_s27 = smov [#allocation13]   ;;  %s14850_s29 = smov [#allocation16]  }
  0x56   :  { %s94_s28 = sshll.u32 %s14849_s27, 4  ;;  %s116_s30 = sshll.u32 %s14850_s29, 4  ;;  %s95_s28 = int_to_ptr.vmem [resolvable:$true] %s94_s28  ;;  %s117_s30 = int_to_ptr.vmem [resolvable:$true] %s116_s30 }
  0x57   :  { %s14768_s3 = scalar_lea.vmem %s95_s28, 32  ;;  %p14773_p8 = scmp.lt.s32.totalorder %s95_s28, %s95_s28 }
  0x58   :  { %p14769_p7 = scmp.ne.s32.totalorder %s95_s28, %s14768_s3  ;;  %p14774_p9 = scmp.lt.s32.totalorder %s14768_s3, %s14768_s3 }
  0x5a   :  { %p14775_p10 = por %p14774_p9, %p14773_p8 }
  0x5c   :  { %p14776_p11 = pnand %p14775_p10, %p14769_p7 }
  0x5e   :  { %14779 = shalt.err (!%p14776_p11)
}
  0x5f   :  { %97 = dma.hbm_to_vmem [thread:$0]  %s15272_s6, 32, %s95_s28, [#allocation12]  }
  0x60   :  { %s14788_s13 = scalar_lea.vmem %s117_s30, 16  ;;  %s14792_s4 = scalar_lea.vmem %s117_s30, 32 }
  0x61   :  { %p14789_p12 = scmp.ne.s32.totalorder %s117_s30, %s14788_s13  ;;  %p14793_p13 = scmp.lt.s32.totalorder %s117_s30, %s117_s30 }
  0x62   :  { %p14794_p0 = scmp.lt.s32.totalorder %s14792_s4, %s14788_s13 }
  0x64   :  { %p14795_p1 = por %p14794_p0, %p14793_p13 }
  0x66   :  { %p14796_p2 = pnand %p14795_p1, %p14789_p12 }
  0x68   :  { %14799 = shalt.err (!%p14796_p2)
}
  0x69   :  { %119 = dma.hbm_to_vmem [thread:$0]  %s15274_s8, 16, %s117_s30, [#allocation15]  }
  0x6a   :  { %14820 = dma.done.wait [#allocation3], 2560  }
  0x6b   :  { %14821 = vsyncadd [#allocation3], 4294964736 }
  0x6c   :  { %14822 = dma.done.wait [#allocation6], 163968  }
  0x6d   :  { %14823 = vsyncadd [#allocation6], 4294803328 }
  0x6e   :  { %14824 = dma.done.wait [#allocation9], 32832  }
  0x6f   :  { %14825 = vsyncadd [#allocation9], 4294934464 }
  0x70   :  { %14826 = dma.done.wait [#allocation12], 8224  }
  0x71   :  { %14827 = vsyncadd [#allocation12], 4294959072 }
  0x72   :  { %14828 = dma.done.wait [#allocation15], 2064  }
  0x73   :  { %14829 = vsyncadd [#allocation15], 4294965232  ;;  %v224_v0 = vld [vmem:[#allocation5 + $0x1c0] sm:$0xff]  ;;  %v14033_v59 = vld [vmem:[#allocation2 + $0xc] ss:$80 sps:$4 sm:$0xff]   ;;  %s14851_s6 = smov [#allocation17]  }
  0x74   :  { %v228_v1 = vld [vmem:[#allocation5 + $0x1e0] sm:$0xff]  ;;  %8065 = vmatprep.mubr.bf16.mxu1 %v14033_v59  ;;  %s12327_s8 = sshll.u32 %s14851_s6, 4  ;;  %s12328_s8 = int_to_ptr.vmem [resolvable:$true] %s12327_s8 }
  0x75   :  { %v352_v2 = vld [vmem:[#allocation5 + $0x5c0] sm:$0xff]  ;;  %v12420_v3 = vcombine.high %v224_v0, %v228_v1  ;;  %v12419_v5 = vcombine.low %v224_v0, %v228_v1  ;;  %s14800_s15 = scalar_lea.vmem %s12328_s8, 128  ;;  %p14805_p4 = scmp.lt.s32.totalorder %s12328_s8, %s12328_s8 }
  0x76   :  { %v356_v4 = vld [vmem:[#allocation5 + $0x5e0] sm:$0xff]  ;;  %p14801_p3 = scmp.ne.s32.totalorder %s12328_s8, %s14800_s15  ;;  %p14806_p5 = scmp.lt.s32.totalorder %s14800_s15, %s14800_s15 }
  0x77   :  { %v216_v6 = vld [vmem:[#allocation5 + $0x180] sm:$0xff]  ;;  %v12548_v8 = vcombine.high %v352_v2, %v356_v4  ;;  %v12547_v9 = vcombine.low %v352_v2, %v356_v4  ;;  %7990 = vmatprep.subr.bf16.mxu0 %v12420_v3 }
  0x78   :  { %v220_v7 = vld [vmem:[#allocation5 + $0x1a0] sm:$0xff]  ;;  %7991 = vmatpush1.bf16.msra.mxu0 %v12419_v5  ;;  %p14807_p6 = por %p14806_p5, %p14805_p4 }
  0x79   :  { %v12412_v10 = vcombine.high %v216_v6, %v220_v7  ;;  %v344_v11 = vld [vmem:[#allocation5 + $0x580] sm:$0xff]  ;;  %8033 = vmatprep.subr.bf16.mxu1 %v12548_v8  ;;  %v12411_v18 = vcombine.low %v216_v6, %v220_v7 }
  0x7a   :  { %v348_v12 = vld [vmem:[#allocation5 + $0x5a0] sm:$0xff]  ;;  %8034 = vmatpush1.bf16.msra.mxu1 %v12547_v9  ;;  %p14808_p7 = pnand %p14807_p6, %p14801_p3 }
  0x7b   :  { %v208_v13 = vld [vmem:[#allocation5 + $0x140] sm:$0xff]  ;;  %v12540_v14 = vcombine.high %v344_v11, %v348_v12  ;;  %7992 = vmatprep.subr.bf16.mxu0 %v12412_v10  ;;  %v12539_v19 = vcombine.low %v344_v11, %v348_v12 }
  0x7c   :  { %v212_v15 = vld [vmem:[#allocation5 + $0x160] sm:$0xff]  ;;  %7993 = vmatpush1.bf16.msra.mxu0 %v12411_v18 }
  0x7d   :  { %v336_v16 = vld [vmem:[#allocation5 + $0x540] sm:$0xff]  ;;  %v12404_v20 = vcombine.high %v208_v13, %v212_v15  ;;  %8035 = vmatprep.subr.bf16.mxu1 %v12540_v14  ;;  %v12403_v26 = vcombine.low %v208_v13, %v212_v15 }
  0x7e   :  { %v340_v17 = vld [vmem:[#allocation5 + $0x560] sm:$0xff]  ;;  %8036 = vmatpush1.bf16.msra.mxu1 %v12539_v19 }
  0x7f   :  { %v12532_v21 = vcombine.high %v336_v16, %v340_v17  ;;  %v200_v22 = vld [vmem:[#allocation5 + $0x100] sm:$0xff]  ;;  %7994 = vmatprep.subr.bf16.mxu0 %v12404_v20  ;;  %v12531_v27 = vcombine.low %v336_v16, %v340_v17 }
  0x80   :  { %v204_v23 = vld [vmem:[#allocation5 + $0x120] sm:$0xff]  ;;  %7995 = vmatpush1.bf16.msra.mxu0 %v12403_v26 }
  0x81   :  { %v328_v24 = vld [vmem:[#allocation5 + $0x500] sm:$0xff]  ;;  %v12396_v28 = vcombine.high %v200_v22, %v204_v23  ;;  %8037 = vmatprep.subr.bf16.mxu1 %v12532_v21  ;;  %v12395_v34 = vcombine.low %v200_v22, %v204_v23 }
  0x82   :  { %v332_v25 = vld [vmem:[#allocation5 + $0x520] sm:$0xff]  ;;  %8038 = vmatpush1.bf16.msra.mxu1 %v12531_v27 }
  0x83   :  { %v12524_v29 = vcombine.high %v328_v24, %v332_v25  ;;  %v192_v30 = vld [vmem:[#allocation5 + $0xc0] sm:$0xff]  ;;  %7996 = vmatprep.subr.bf16.mxu0 %v12396_v28  ;;  %v12523_v35 = vcombine.low %v328_v24, %v332_v25 }
  0x84   :  { %v196_v31 = vld [vmem:[#allocation5 + $0xe0] sm:$0xff]  ;;  %7997 = vmatpush1.bf16.msra.mxu0 %v12395_v34 }
  0x85   :  { %v320_v32 = vld [vmem:[#allocation5 + $0x4c0] sm:$0xff]  ;;  %v12388_v36 = vcombine.high %v192_v30, %v196_v31  ;;  %8039 = vmatprep.subr.bf16.mxu1 %v12524_v29  ;;  %v12387_v42 = vcombine.low %v192_v30, %v196_v31 }
  0x86   :  { %v324_v33 = vld [vmem:[#allocation5 + $0x4e0] sm:$0xff]  ;;  %8040 = vmatpush1.bf16.msra.mxu1 %v12523_v35 }
  0x87   :  { %v12516_v37 = vcombine.high %v320_v32, %v324_v33  ;;  %v184_v38 = vld [vmem:[#allocation5 + $0x80] sm:$0xff]  ;;  %7998 = vmatprep.subr.bf16.mxu0 %v12388_v36  ;;  %v12515_v43 = vcombine.low %v320_v32, %v324_v33 }
  0x88   :  { %v188_v39 = vld [vmem:[#allocation5 + $0xa0] sm:$0xff]  ;;  %7999 = vmatpush1.bf16.msra.mxu0 %v12387_v42 }
  0x89   :  { %v312_v40 = vld [vmem:[#allocation5 + $0x480] sm:$0xff]  ;;  %v12380_v44 = vcombine.high %v184_v38, %v188_v39  ;;  %8041 = vmatprep.subr.bf16.mxu1 %v12516_v37  ;;  %v12379_v50 = vcombine.low %v184_v38, %v188_v39 }
  0x8a   :  { %v316_v41 = vld [vmem:[#allocation5 + $0x4a0] sm:$0xff]  ;;  %8042 = vmatpush1.bf16.msra.mxu1 %v12515_v43 }
  0x8b   :  { %v12508_v45 = vcombine.high %v312_v40, %v316_v41  ;;  %v176_v46 = vld [vmem:[#allocation5 + $0x40] sm:$0xff]  ;;  %8000 = vmatprep.subr.bf16.mxu0 %v12380_v44  ;;  %v12507_v52 = vcombine.low %v312_v40, %v316_v41 }
  0x8c   :  { %v180_v47 = vld [vmem:[#allocation5 + $0x60] sm:$0xff]  ;;  %8001 = vmatpush1.bf16.msra.mxu0 %v12379_v50 }
  0x8d   :  { %v304_v48 = vld [vmem:[#allocation5 + $0x440] sm:$0xff]  ;;  %v12372_v53 = vcombine.high %v176_v46, %v180_v47  ;;  %8043 = vmatprep.subr.bf16.mxu1 %v12508_v45  ;;  %v12371_v60 = vcombine.low %v176_v46, %v180_v47 }
  0x8e   :  { %v308_v49 = vld [vmem:[#allocation5 + $0x460] sm:$0xff]  ;;  %8044 = vmatpush1.bf16.msra.mxu1 %v12507_v52 }
  0x8f   :  { %v168_v51 = vld [vmem:[#allocation5] sm:$0xff]  ;;  %v12500_v55 = vcombine.high %v304_v48, %v308_v49  ;;  %8002 = vmatprep.subr.bf16.mxu0 %v12372_v53  ;;  %v12499_v61 = vcombine.low %v304_v48, %v308_v49 }
  0x90   :  { %v172_v54 = vld [vmem:[#allocation5 + $0x20] sm:$0xff]  ;;  %8003 = vmatpush1.bf16.msra.mxu0 %v12371_v60 }
  0x91   :  { %v14031_v56 = vld [vmem:[#allocation2 + $0x4] ss:$80 sps:$4 sm:$0xff]   ;;  %v12364_v62 = vcombine.high %v168_v51, %v172_v54  ;;  %8045 = vmatprep.subr.bf16.mxu1 %v12500_v55  ;;  %v12363_v4 = vcombine.low %v168_v51, %v172_v54 }
  0x92   :  { %v296_v57 = vld [vmem:[#allocation5 + $0x400] sm:$0xff]  ;;  %8022 = vmatprep.mubr.bf16.mxu0 %v14031_v56  ;;  %8046 = vmatpush1.bf16.msra.mxu1 %v12499_v61 }
  0x93   :  { %v300_v58 = vld [vmem:[#allocation5 + $0x420] sm:$0xff]  ;;  %8004 = vmatprep.subr.bf16.mxu0 %v12364_v62 }
  0x94   :  { %v12492_v63 = vcombine.high %v296_v57, %v300_v58  ;;  %v288_v0 = vld [vmem:[#allocation5 + $0x3c0] sm:$0xff]  ;;  %v12491_v5 = vcombine.low %v296_v57, %v300_v58  ;;  %8005 = vmatpush1.bf16.msra.mxu0 %v12363_v4 }
  0x95   :  { %v292_v1 = vld [vmem:[#allocation5 + $0x3e0] sm:$0xff] }
  0x96   :  { %v416_v2 = vld [vmem:[#allocation5 + $0x7c0] sm:$0xff]  ;;  %v12484_v6 = vcombine.high %v288_v0, %v292_v1  ;;  %8047 = vmatprep.subr.bf16.mxu1 %v12492_v63  ;;  %v12483_v12 = vcombine.low %v288_v0, %v292_v1 }
  0x97   :  { %v420_v3 = vld [vmem:[#allocation5 + $0x7e0] sm:$0xff]  ;;  %8048 = vmatpush1.bf16.msra.mxu1 %v12491_v5 }
  0x98   :  { %v12612_v7 = vcombine.high %v416_v2, %v420_v3  ;;  %v280_v8 = vld [vmem:[#allocation5 + $0x380] sm:$0xff]  ;;  %8006 = vmatprep.subr.bf16.mxu0 %v12484_v6  ;;  %v12611_v13 = vcombine.low %v416_v2, %v420_v3 }
  0x99   :  { %v284_v9 = vld [vmem:[#allocation5 + $0x3a0] sm:$0xff]  ;;  %8007 = vmatpush2.bf16.msra.mxu0 %v12483_v12 }
  0x9a   :  { %v408_v10 = vld [vmem:[#allocation5 + $0x780] sm:$0xff]  ;;  %v12476_v14 = vcombine.high %v280_v8, %v284_v9  ;;  %8049 = vmatprep.subr.bf16.mxu1 %v12612_v7  ;;  %v12475_v20 = vcombine.low %v280_v8, %v284_v9 }
  0x9b   :  { %v412_v11 = vld [vmem:[#allocation5 + $0x7a0] sm:$0xff]  ;;  %8050 = vmatpush2.bf16.msra.mxu1 %v12611_v13  ;;  %v14036_v13 = vld [vmem:[#allocation2 + $0x8] ss:$80 sps:$4 sm:$0xff]  }
  0x9c   :  { %v12604_v15 = vcombine.high %v408_v10, %v412_v11  ;;  %v272_v16 = vld [vmem:[#allocation5 + $0x340] sm:$0xff]  ;;  %8008 = vmatprep.subr.bf16.mxu0 %v12476_v14  ;;  %v12603_v21 = vcombine.low %v408_v10, %v412_v11 }
  0x9d   :  { %v276_v17 = vld [vmem:[#allocation5 + $0x360] sm:$0xff]  ;;  %8009 = vmatpush2.bf16.msra.mxu0 %v12475_v20 }
  0x9e   :  { %v400_v18 = vld [vmem:[#allocation5 + $0x740] sm:$0xff]  ;;  %v12468_v22 = vcombine.high %v272_v16, %v276_v17  ;;  %8051 = vmatprep.subr.bf16.mxu1 %v12604_v15  ;;  %v12467_v28 = vcombine.low %v272_v16, %v276_v17 }
  0x9f   :  { %v404_v19 = vld [vmem:[#allocation5 + $0x760] sm:$0xff]  ;;  %8052 = vmatpush2.bf16.msra.mxu1 %v12603_v21 }
  0xa0   :  { %v12596_v23 = vcombine.high %v400_v18, %v404_v19  ;;  %v264_v24 = vld [vmem:[#allocation5 + $0x300] sm:$0xff]  ;;  %8010 = vmatprep.subr.bf16.mxu0 %v12468_v22  ;;  %v12595_v29 = vcombine.low %v400_v18, %v404_v19 }
  0xa1   :  { %v268_v25 = vld [vmem:[#allocation5 + $0x320] sm:$0xff]  ;;  %8011 = vmatpush2.bf16.msra.mxu0 %v12467_v28 }
  0xa2   :  { %v392_v26 = vld [vmem:[#allocation5 + $0x700] sm:$0xff]  ;;  %v12460_v30 = vcombine.high %v264_v24, %v268_v25  ;;  %8053 = vmatprep.subr.bf16.mxu1 %v12596_v23  ;;  %v12459_v36 = vcombine.low %v264_v24, %v268_v25  ;;  %v14039_v23 = vld [vmem:[#allocation2 + $0x1c] ss:$80 sps:$4 sm:$0xff]  }
  0xa3   :  { %v396_v27 = vld [vmem:[#allocation5 + $0x720] sm:$0xff]  ;;  %8054 = vmatpush2.bf16.msra.mxu1 %v12595_v29 }
  0xa4   :  { %v12588_v31 = vcombine.high %v392_v26, %v396_v27  ;;  %v256_v32 = vld [vmem:[#allocation5 + $0x2c0] sm:$0xff]  ;;  %8012 = vmatprep.subr.bf16.mxu0 %v12460_v30  ;;  %v12587_v37 = vcombine.low %v392_v26, %v396_v27 }
  0xa5   :  { %v260_v33 = vld [vmem:[#allocation5 + $0x2e0] sm:$0xff]  ;;  %8013 = vmatpush2.bf16.msra.mxu0 %v12459_v36 }
  0xa6   :  { %v384_v34 = vld [vmem:[#allocation5 + $0x6c0] sm:$0xff]  ;;  %v12452_v38 = vcombine.high %v256_v32, %v260_v33  ;;  %8055 = vmatprep.subr.bf16.mxu1 %v12588_v31  ;;  %v12451_v44 = vcombine.low %v256_v32, %v260_v33 }
  0xa7   :  { %v388_v35 = vld [vmem:[#allocation5 + $0x6e0] sm:$0xff]  ;;  %8056 = vmatpush2.bf16.msra.mxu1 %v12587_v37 }
  0xa8   :  { %v248_v39 = vld [vmem:[#allocation5 + $0x280] sm:$0xff]  ;;  %v12580_v40 = vcombine.high %v384_v34, %v388_v35  ;;  %8014 = vmatprep.subr.bf16.mxu0 %v12452_v38  ;;  %v12579_v45 = vcombine.low %v384_v34, %v388_v35 }
  0xa9   :  { %v252_v41 = vld [vmem:[#allocation5 + $0x2a0] sm:$0xff]  ;;  %8015 = vmatpush2.bf16.msra.mxu0 %v12451_v44 }
  0xaa   :  { %v376_v42 = vld [vmem:[#allocation5 + $0x680] sm:$0xff]  ;;  %v12444_v46 = vcombine.high %v248_v39, %v252_v41  ;;  %8057 = vmatprep.subr.bf16.mxu1 %v12580_v40  ;;  %v12443_v52 = vcombine.low %v248_v39, %v252_v41 }
  0xab   :  { %v380_v43 = vld [vmem:[#allocation5 + $0x6a0] sm:$0xff]  ;;  %8058 = vmatpush2.bf16.msra.mxu1 %v12579_v45 }
  0xac   :  { %v12572_v47 = vcombine.high %v376_v42, %v380_v43  ;;  %v240_v48 = vld [vmem:[#allocation5 + $0x240] sm:$0xff]  ;;  %8016 = vmatprep.subr.bf16.mxu0 %v12444_v46  ;;  %v12571_v53 = vcombine.low %v376_v42, %v380_v43 }
  0xad   :  { %v244_v49 = vld [vmem:[#allocation5 + $0x260] sm:$0xff]  ;;  %8017 = vmatpush2.bf16.msra.mxu0 %v12443_v52 }
  0xae   :  { %v368_v50 = vld [vmem:[#allocation5 + $0x640] sm:$0xff]  ;;  %v12436_v54 = vcombine.high %v240_v48, %v244_v49  ;;  %8059 = vmatprep.subr.bf16.mxu1 %v12572_v47  ;;  %v12435_v60 = vcombine.low %v240_v48, %v244_v49 }
  0xaf   :  { %v372_v51 = vld [vmem:[#allocation5 + $0x660] sm:$0xff]  ;;  %8060 = vmatpush2.bf16.msra.mxu1 %v12571_v53 }
  0xb0   :  { %v12564_v55 = vcombine.high %v368_v50, %v372_v51  ;;  %v232_v56 = vld [vmem:[#allocation5 + $0x200] sm:$0xff]  ;;  %8018 = vmatprep.subr.bf16.mxu0 %v12436_v54  ;;  %v12563_v61 = vcombine.low %v368_v50, %v372_v51 }
  0xb1   :  { %v236_v57 = vld [vmem:[#allocation5 + $0x220] sm:$0xff]  ;;  %8019 = vmatpush2.bf16.msra.mxu0 %v12435_v60 }
  0xb2   :  { %v360_v58 = vld [vmem:[#allocation5 + $0x600] sm:$0xff]  ;;  %v12428_v62 = vcombine.high %v232_v56, %v236_v57  ;;  %8061 = vmatprep.subr.bf16.mxu1 %v12564_v55  ;;  %v12427_v4 = vcombine.low %v232_v56, %v236_v57 }
  0xb3   :  { %v364_v59 = vld [vmem:[#allocation5 + $0x620] sm:$0xff]  ;;  %8062 = vmatpush2.bf16.msra.mxu1 %v12563_v61 }
  0xb4   :  { %v12556_v63 = vcombine.high %v360_v58, %v364_v59  ;;  %v480_v0 = vld [vmem:[#allocation5 + $0x9c0] sm:$0xff]  ;;  %8020 = vmatprep.subr.bf16.mxu0 %v12428_v62  ;;  %v12555_v5 = vcombine.low %v360_v58, %v364_v59 }
  0xb5   :  { %v484_v1 = vld [vmem:[#allocation5 + $0x9e0] sm:$0xff]  ;;  %8021 = vmatpush2.bf16.msra.mxu0 %v12427_v4 }
  0xb6   :  { %v608_v2 = vld [vmem:[#allocation5 + $0xdc0] sm:$0xff]  ;;  %v12676_v6 = vcombine.high %v480_v0, %v484_v1  ;;  %8063 = vmatprep.subr.bf16.mxu1 %v12556_v63  ;;  %v12675_v14 = vcombine.low %v480_v0, %v484_v1 }
  0xb7   :  { %v612_v3 = vld [vmem:[#allocation5 + $0xde0] sm:$0xff]  ;;  %8064 = vmatpush2.bf16.msra.mxu1 %v12555_v5 }
  0xb8   :  { %v12804_v7 = vcombine.high %v608_v2, %v612_v3  ;;  %v472_v8 = vld [vmem:[#allocation5 + $0x980] sm:$0xff]  ;;  %8076 = vmatprep.subr.bf16.mxu0 %v12676_v6  ;;  %v12803_v15 = vcombine.low %v608_v2, %v612_v3 }
  0xb9   :  { %v476_v9 = vld [vmem:[#allocation5 + $0x9a0] sm:$0xff] }
  0xba   :  { %v14035_v10 = vld [vmem:[#allocation2] ss:$80 sps:$4 sm:$0xff]   ;;  %v12668_v16 = vcombine.high %v472_v8, %v476_v9  ;;  %8119 = vmatprep.subr.bf16.mxu1 %v12804_v7  ;;  %v14037_v20 = vld [vmem:[#allocation2 + $0x14] ss:$80 sps:$4 sm:$0xff]   ;;  %8066 = vmatmul.mubr.bf16.vlgmr.msra.gmra.mxu1 %v14036_v13  ;;  %v12667_v24 = vcombine.low %v472_v8, %v476_v9 }
  0xbb   :  { %v600_v11 = vld [vmem:[#allocation5 + $0xd80] sm:$0xff]  ;;  %8023 = vmatmul.mubr.bf16.vlgmr.msra.gmra.mxu0 %v14035_v10  ;;  %8120 = vmatpush1.bf16.msra.mxu1 %v12803_v15 }
  0xbc   :  { %v604_v12 = vld [vmem:[#allocation5 + $0xda0] sm:$0xff]  ;;  %8077 = vmatpush1.bf16.msra.mxu0 %v12675_v14  ;;  %8108 = vmatprep.mubr.bf16.mxu0 %v14037_v20 }
  0xbd   :  { %v12796_v17 = vcombine.high %v600_v11, %v604_v12  ;;  %v464_v18 = vld [vmem:[#allocation5 + $0x940] sm:$0xff]  ;;  %8078 = vmatprep.subr.bf16.mxu0 %v12668_v16  ;;  %v12795_v25 = vcombine.low %v600_v11, %v604_v12  ;;  %8151 = vmatprep.mubr.bf16.mxu1 %v14039_v23 }
  0xbe   :  { %v468_v19 = vld [vmem:[#allocation5 + $0x960] sm:$0xff] }
  0xbf   :  { %v592_v21 = vld [vmem:[#allocation5 + $0xd40] sm:$0xff]  ;;  %v12660_v26 = vcombine.high %v464_v18, %v468_v19  ;;  %8121 = vmatprep.subr.bf16.mxu1 %v12796_v17  ;;  %v12659_v32 = vcombine.low %v464_v18, %v468_v19 }
  0xc0   :  { %v596_v22 = vld [vmem:[#allocation5 + $0xd60] sm:$0xff]  ;;  %8079 = vmatpush1.bf16.msra.mxu0 %v12667_v24  ;;  %8122 = vmatpush1.bf16.msra.mxu1 %v12795_v25 }
  0xc1   :  { %v456_v27 = vld [vmem:[#allocation5 + $0x900] sm:$0xff]  ;;  %v12788_v28 = vcombine.high %v592_v21, %v596_v22  ;;  %8080 = vmatprep.subr.bf16.mxu0 %v12660_v26  ;;  %v12787_v33 = vcombine.low %v592_v21, %v596_v22 }
  0xc2   :  { %v460_v29 = vld [vmem:[#allocation5 + $0x920] sm:$0xff] }
  0xc3   :  { %v584_v30 = vld [vmem:[#allocation5 + $0xd00] sm:$0xff]  ;;  %v12652_v34 = vcombine.high %v456_v27, %v460_v29  ;;  %8123 = vmatprep.subr.bf16.mxu1 %v12788_v28  ;;  %v12651_v40 = vcombine.low %v456_v27, %v460_v29 }
  0xc4   :  { %v588_v31 = vld [vmem:[#allocation5 + $0xd20] sm:$0xff]  ;;  %8081 = vmatpush1.bf16.msra.mxu0 %v12659_v32  ;;  %8124 = vmatpush1.bf16.msra.mxu1 %v12787_v33 }
  0xc5   :  { %v12780_v35 = vcombine.high %v584_v30, %v588_v31  ;;  %v448_v36 = vld [vmem:[#allocation5 + $0x8c0] sm:$0xff]  ;;  %8082 = vmatprep.subr.bf16.mxu0 %v12652_v34  ;;  %v12779_v41 = vcombine.low %v584_v30, %v588_v31 }
  0xc6   :  { %v452_v37 = vld [vmem:[#allocation5 + $0x8e0] sm:$0xff] }
  0xc7   :  { %v576_v38 = vld [vmem:[#allocation5 + $0xcc0] sm:$0xff]  ;;  %v12644_v42 = vcombine.high %v448_v36, %v452_v37  ;;  %8125 = vmatprep.subr.bf16.mxu1 %v12780_v35  ;;  %v12643_v48 = vcombine.low %v448_v36, %v452_v37 }
  0xc8   :  { %v580_v39 = vld [vmem:[#allocation5 + $0xce0] sm:$0xff]  ;;  %8083 = vmatpush1.bf16.msra.mxu0 %v12651_v40  ;;  %8126 = vmatpush1.bf16.msra.mxu1 %v12779_v41 }
  0xc9   :  { %v440_v43 = vld [vmem:[#allocation5 + $0x880] sm:$0xff]  ;;  %v12772_v46 = vcombine.high %v576_v38, %v580_v39  ;;  %8084 = vmatprep.subr.bf16.mxu0 %v12644_v42  ;;  %v12771_v49 = vcombine.low %v576_v38, %v580_v39 }
  0xca   :  { %v444_v44 = vld [vmem:[#allocation5 + $0x8a0] sm:$0xff] }
  0xcb   :  { %v568_v45 = vld [vmem:[#allocation5 + $0xc80] sm:$0xff]  ;;  %v12636_v50 = vcombine.high %v440_v43, %v444_v44  ;;  %8127 = vmatprep.subr.bf16.mxu1 %v12772_v46  ;;  %v12635_v56 = vcombine.low %v440_v43, %v444_v44 }
  0xcc   :  { %v572_v47 = vld [vmem:[#allocation5 + $0xca0] sm:$0xff]  ;;  %8085 = vmatpush1.bf16.msra.mxu0 %v12643_v48  ;;  %8128 = vmatpush1.bf16.msra.mxu1 %v12771_v49 }
  0xcd   :  { %v432_v51 = vld [vmem:[#allocation5 + $0x840] sm:$0xff]  ;;  %v12764_v54 = vcombine.high %v568_v45, %v572_v47  ;;  %8086 = vmatprep.subr.bf16.mxu0 %v12636_v50  ;;  %v12763_v57 = vcombine.low %v568_v45, %v572_v47 }
  0xce   :  { %v436_v52 = vld [vmem:[#allocation5 + $0x860] sm:$0xff] }
  0xcf   :  { %v560_v53 = vld [vmem:[#allocation5 + $0xc40] sm:$0xff]  ;;  %v12628_v58 = vcombine.high %v432_v51, %v436_v52  ;;  %8129 = vmatprep.subr.bf16.mxu1 %v12764_v54  ;;  %v12627_v0 = vcombine.low %v432_v51, %v436_v52 }
  0xd0   :  { %v564_v55 = vld [vmem:[#allocation5 + $0xc60] sm:$0xff]  ;;  %8087 = vmatpush1.bf16.msra.mxu0 %v12635_v56  ;;  %8130 = vmatpush1.bf16.msra.mxu1 %v12763_v57 }
  0xd1   :  { %v424_v59 = vld [vmem:[#allocation5 + $0x800] sm:$0xff]  ;;  %v12756_v62 = vcombine.high %v560_v53, %v564_v55  ;;  %8088 = vmatprep.subr.bf16.mxu0 %v12628_v58  ;;  %v12755_v1 = vcombine.low %v560_v53, %v564_v55 }
  0xd2   :  { %v428_v60 = vld [vmem:[#allocation5 + $0x820] sm:$0xff] }
  0xd3   :  { %v552_v61 = vld [vmem:[#allocation5 + $0xc00] sm:$0xff]  ;;  %v12620_v2 = vcombine.high %v424_v59, %v428_v60  ;;  %8131 = vmatprep.subr.bf16.mxu1 %v12756_v62  ;;  %v12619_v8 = vcombine.low %v424_v59, %v428_v60 }
  0xd4   :  { %v556_v63 = vld [vmem:[#allocation5 + $0xc20] sm:$0xff]  ;;  %8089 = vmatpush1.bf16.msra.mxu0 %v12627_v0  ;;  %8132 = vmatpush1.bf16.msra.mxu1 %v12755_v1 }
  0xd5   :  { %v544_v3 = vld [vmem:[#allocation5 + $0xbc0] sm:$0xff]  ;;  %v12748_v6 = vcombine.high %v552_v61, %v556_v63  ;;  %8090 = vmatprep.subr.bf16.mxu0 %v12620_v2  ;;  %v12747_v9 = vcombine.low %v552_v61, %v556_v63 }
  0xd6   :  { %v548_v4 = vld [vmem:[#allocation5 + $0xbe0] sm:$0xff] }
  0xd7   :  { %v672_v5 = vld [vmem:[#allocation5 + $0xfc0] sm:$0xff]  ;;  %v12740_v10 = vcombine.high %v544_v3, %v548_v4  ;;  %8133 = vmatprep.subr.bf16.mxu1 %v12748_v6  ;;  %v12739_v16 = vcombine.low %v544_v3, %v548_v4 }
  0xd8   :  { %v676_v7 = vld [vmem:[#allocation5 + $0xfe0] sm:$0xff]  ;;  %8091 = vmatpush1.bf16.msra.mxu0 %v12619_v8  ;;  %8134 = vmatpush1.bf16.msra.mxu1 %v12747_v9 }
  0xd9   :  { %v536_v11 = vld [vmem:[#allocation5 + $0xb80] sm:$0xff]  ;;  %v12868_v14 = vcombine.high %v672_v5, %v676_v7  ;;  %8092 = vmatprep.subr.bf16.mxu0 %v12740_v10  ;;  %v12867_v17 = vcombine.low %v672_v5, %v676_v7 }
  0xda   :  { %v540_v12 = vld [vmem:[#allocation5 + $0xba0] sm:$0xff] }
  0xdb   :  { %v664_v13 = vld [vmem:[#allocation5 + $0xf80] sm:$0xff]  ;;  %v12732_v18 = vcombine.high %v536_v11, %v540_v12  ;;  %8135 = vmatprep.subr.bf16.mxu1 %v12868_v14  ;;  %v12731_v24 = vcombine.low %v536_v11, %v540_v12 }
  0xdc   :  { %v668_v15 = vld [vmem:[#allocation5 + $0xfa0] sm:$0xff]  ;;  %8093 = vmatpush2.bf16.msra.mxu0 %v12739_v16  ;;  %8136 = vmatpush2.bf16.msra.mxu1 %v12867_v17 }
  0xdd   :  { %v528_v19 = vld [vmem:[#allocation5 + $0xb40] sm:$0xff]  ;;  %v12860_v22 = vcombine.high %v664_v13, %v668_v15  ;;  %8094 = vmatprep.subr.bf16.mxu0 %v12732_v18  ;;  %v12859_v25 = vcombine.low %v664_v13, %v668_v15  ;;  %v14042_v15 = vld [vmem:[#allocation2 + $0x18] ss:$80 sps:$4 sm:$0xff]  }
  0xde   :  { %v532_v20 = vld [vmem:[#allocation5 + $0xb60] sm:$0xff] }
  0xdf   :  { %v656_v21 = vld [vmem:[#allocation5 + $0xf40] sm:$0xff]  ;;  %v12724_v26 = vcombine.high %v528_v19, %v532_v20  ;;  %8137 = vmatprep.subr.bf16.mxu1 %v12860_v22  ;;  %v12723_v32 = vcombine.low %v528_v19, %v532_v20 }
  0xe0   :  { %v660_v23 = vld [vmem:[#allocation5 + $0xf60] sm:$0xff]  ;;  %8095 = vmatpush2.bf16.msra.mxu0 %v12731_v24  ;;  %8138 = vmatpush2.bf16.msra.mxu1 %v12859_v25 }
  0xe1   :  { %v520_v27 = vld [vmem:[#allocation5 + $0xb00] sm:$0xff]  ;;  %v12852_v30 = vcombine.high %v656_v21, %v660_v23  ;;  %8096 = vmatprep.subr.bf16.mxu0 %v12724_v26  ;;  %v12851_v33 = vcombine.low %v656_v21, %v660_v23 }
  0xe2   :  { %v524_v28 = vld [vmem:[#allocation5 + $0xb20] sm:$0xff] }
  0xe3   :  { %v648_v29 = vld [vmem:[#allocation5 + $0xf00] sm:$0xff]  ;;  %v12716_v34 = vcombine.high %v520_v27, %v524_v28  ;;  %8139 = vmatprep.subr.bf16.mxu1 %v12852_v30  ;;  %v12715_v40 = vcombine.low %v520_v27, %v524_v28  ;;  %v14045_v27 = vld [vmem:[#allocation2 + $0x2c] ss:$80 sps:$4 sm:$0xff]  }
  0xe4   :  { %v652_v31 = vld [vmem:[#allocation5 + $0xf20] sm:$0xff]  ;;  %8097 = vmatpush2.bf16.msra.mxu0 %v12723_v32  ;;  %8140 = vmatpush2.bf16.msra.mxu1 %v12851_v33 }
  0xe5   :  { %v512_v35 = vld [vmem:[#allocation5 + $0xac0] sm:$0xff]  ;;  %v12844_v38 = vcombine.high %v648_v29, %v652_v31  ;;  %8098 = vmatprep.subr.bf16.mxu0 %v12716_v34  ;;  %v12843_v41 = vcombine.low %v648_v29, %v652_v31 }
  0xe6   :  { %v516_v36 = vld [vmem:[#allocation5 + $0xae0] sm:$0xff] }
  0xe7   :  { %v640_v37 = vld [vmem:[#allocation5 + $0xec0] sm:$0xff]  ;;  %v12708_v42 = vcombine.high %v512_v35, %v516_v36  ;;  %8141 = vmatprep.subr.bf16.mxu1 %v12844_v38  ;;  %v12707_v48 = vcombine.low %v512_v35, %v516_v36 }
  0xe8   :  { %v644_v39 = vld [vmem:[#allocation5 + $0xee0] sm:$0xff]  ;;  %8099 = vmatpush2.bf16.msra.mxu0 %v12715_v40  ;;  %8142 = vmatpush2.bf16.msra.mxu1 %v12843_v41 }
  0xe9   :  { %v504_v43 = vld [vmem:[#allocation5 + $0xa80] sm:$0xff]  ;;  %v12836_v46 = vcombine.high %v640_v37, %v644_v39  ;;  %8100 = vmatprep.subr.bf16.mxu0 %v12708_v42  ;;  %v12835_v49 = vcombine.low %v640_v37, %v644_v39 }
  0xea   :  { %v508_v44 = vld [vmem:[#allocation5 + $0xaa0] sm:$0xff] }
  0xeb   :  { %v632_v45 = vld [vmem:[#allocation5 + $0xe80] sm:$0xff]  ;;  %v12700_v50 = vcombine.high %v504_v43, %v508_v44  ;;  %8143 = vmatprep.subr.bf16.mxu1 %v12836_v46  ;;  %v12699_v56 = vcombine.low %v504_v43, %v508_v44 }
  0xec   :  { %v636_v47 = vld [vmem:[#allocation5 + $0xea0] sm:$0xff]  ;;  %8101 = vmatpush2.bf16.msra.mxu0 %v12707_v48  ;;  %8144 = vmatpush2.bf16.msra.mxu1 %v12835_v49 }
  0xed   :  { %v496_v51 = vld [vmem:[#allocation5 + $0xa40] sm:$0xff]  ;;  %v12828_v54 = vcombine.high %v632_v45, %v636_v47  ;;  %8102 = vmatprep.subr.bf16.mxu0 %v12700_v50  ;;  %v12827_v57 = vcombine.low %v632_v45, %v636_v47 }
  0xee   :  { %v500_v52 = vld [vmem:[#allocation5 + $0xa60] sm:$0xff] }
  0xef   :  { %v624_v53 = vld [vmem:[#allocation5 + $0xe40] sm:$0xff]  ;;  %v12692_v58 = vcombine.high %v496_v51, %v500_v52  ;;  %8145 = vmatprep.subr.bf16.mxu1 %v12828_v54  ;;  %v12691_v0 = vcombine.low %v496_v51, %v500_v52 }
  0xf0   :  { %v628_v55 = vld [vmem:[#allocation5 + $0xe60] sm:$0xff]  ;;  %8103 = vmatpush2.bf16.msra.mxu0 %v12699_v56  ;;  %8146 = vmatpush2.bf16.msra.mxu1 %v12827_v57 }
  0xf1   :  { %v488_v59 = vld [vmem:[#allocation5 + $0xa00] sm:$0xff]  ;;  %v12820_v62 = vcombine.high %v624_v53, %v628_v55  ;;  %8104 = vmatprep.subr.bf16.mxu0 %v12692_v58  ;;  %v12819_v1 = vcombine.low %v624_v53, %v628_v55 }
  0xf2   :  { %v492_v60 = vld [vmem:[#allocation5 + $0xa20] sm:$0xff] }
  0xf3   :  { %v616_v61 = vld [vmem:[#allocation5 + $0xe00] sm:$0xff]  ;;  %v12684_v2 = vcombine.high %v488_v59, %v492_v60  ;;  %8147 = vmatprep.subr.bf16.mxu1 %v12820_v62  ;;  %v12683_v8 = vcombine.low %v488_v59, %v492_v60 }
  0xf4   :  { %v620_v63 = vld [vmem:[#allocation5 + $0xe20] sm:$0xff]  ;;  %8105 = vmatpush2.bf16.msra.mxu0 %v12691_v0  ;;  %8148 = vmatpush2.bf16.msra.mxu1 %v12819_v1 }
  0xf5   :  { %v736_v3 = vld [vmem:[#allocation5 + $0x11c0] sm:$0xff]  ;;  %v12812_v6 = vcombine.high %v616_v61, %v620_v63  ;;  %8106 = vmatprep.subr.bf16.mxu0 %v12684_v2  ;;  %v12811_v9 = vcombine.low %v616_v61, %v620_v63 }
  0xf6   :  { %v740_v4 = vld [vmem:[#allocation5 + $0x11e0] sm:$0xff] }
  0xf7   :  { %v864_v5 = vld [vmem:[#allocation5 + $0x15c0] sm:$0xff]  ;;  %v12932_v11 = vcombine.high %v736_v3, %v740_v4  ;;  %8149 = vmatprep.subr.bf16.mxu1 %v12812_v6  ;;  %v12931_v18 = vcombine.low %v736_v3, %v740_v4 }
  0xf8   :  { %v868_v7 = vld [vmem:[#allocation5 + $0x15e0] sm:$0xff]  ;;  %8107 = vmatpush2.bf16.msra.mxu0 %v12683_v8  ;;  %8150 = vmatpush2.bf16.msra.mxu1 %v12811_v9 }
  0xf9   :  { %v14041_v10 = vld [vmem:[#allocation2 + $0x10] ss:$80 sps:$4 sm:$0xff]   ;;  %v13060_v16 = vcombine.high %v864_v5, %v868_v7  ;;  %8162 = vmatprep.subr.bf16.mxu0 %v12932_v11  ;;  %v13059_v19 = vcombine.low %v864_v5, %v868_v7  ;;  %v14043_v24 = vld [vmem:[#allocation2 + $0x24] ss:$80 sps:$4 sm:$0xff]  }
  0xfa   :  { %v728_v12 = vld [vmem:[#allocation5 + $0x1180] sm:$0xff] }
  0xfb   :  { %v732_v13 = vld [vmem:[#allocation5 + $0x11a0] sm:$0xff]  ;;  %8205 = vmatprep.subr.bf16.mxu1 %v13060_v16  ;;  %8109 = vmatmul.mubr.bf16.vlgmr.msra.gmra.mxu0 %v14041_v10 }
  0xfc   :  { %v856_v14 = vld [vmem:[#allocation5 + $0x1580] sm:$0xff]  ;;  %v12924_v20 = vcombine.high %v728_v12, %v732_v13  ;;  %8152 = vmatmul.mubr.bf16.vlgmr.msra.gmra.mxu1 %v14042_v15  ;;  %8163 = vmatpush1.bf16.msra.mxu0 %v12931_v18  ;;  %v12923_v28 = vcombine.low %v728_v12, %v732_v13 }
  0xfd   :  { %v860_v17 = vld [vmem:[#allocation5 + $0x15a0] sm:$0xff]  ;;  %8206 = vmatpush1.bf16.msra.mxu1 %v13059_v19  ;;  %8194 = vmatprep.mubr.bf16.mxu0 %v14043_v24 }
  0xfe   :  { %v13052_v21 = vcombine.high %v856_v14, %v860_v17  ;;  %v720_v22 = vld [vmem:[#allocation5 + $0x1140] sm:$0xff]  ;;  %8164 = vmatprep.subr.bf16.mxu0 %v12924_v20  ;;  %v13051_v29 = vcombine.low %v856_v14, %v860_v17  ;;  %8237 = vmatprep.mubr.bf16.mxu1 %v14045_v27 }
  0xff   :  { %v724_v23 = vld [vmem:[#allocation5 + $0x1160] sm:$0xff] }
 0x100   :  { %v848_v25 = vld [vmem:[#allocation5 + $0x1540] sm:$0xff]  ;;  %v12916_v30 = vcombine.high %v720_v22, %v724_v23  ;;  %8207 = vmatprep.subr.bf16.mxu1 %v13052_v21  ;;  %8165 = vmatpush1.bf16.msra.mxu0 %v12923_v28  ;;  %v12915_v36 = vcombine.low %v720_v22, %v724_v23 }
 0x101   :  { %v852_v26 = vld [vmem:[#allocation5 + $0x1560] sm:$0xff]  ;;  %8208 = vmatpush1.bf16.msra.mxu1 %v13051_v29 }
 0x102   :  { %v712_v31 = vld [vmem:[#allocation5 + $0x1100] sm:$0xff]  ;;  %v13044_v34 = vcombine.high %v848_v25, %v852_v26  ;;  %8166 = vmatprep.subr.bf16.mxu0 %v12916_v30  ;;  %v13043_v37 = vcombine.low %v848_v25, %v852_v26 }
 0x103   :  { %v716_v32 = vld [vmem:[#allocation5 + $0x1120] sm:$0xff] }
 0x104   :  { %v840_v33 = vld [vmem:[#allocation5 + $0x1500] sm:$0xff]  ;;  %v12908_v38 = vcombine.high %v712_v31, %v716_v32  ;;  %8209 = vmatprep.subr.bf16.mxu1 %v13044_v34  ;;  %8167 = vmatpush1.bf16.msra.mxu0 %v12915_v36  ;;  %v12907_v44 = vcombine.low %v712_v31, %v716_v32 }
 0x105   :  { %v844_v35 = vld [vmem:[#allocation5 + $0x1520] sm:$0xff]  ;;  %8210 = vmatpush1.bf16.msra.mxu1 %v13043_v37 }
 0x106   :  { %v704_v39 = vld [vmem:[#allocation5 + $0x10c0] sm:$0xff]  ;;  %v13036_v42 = vcombine.high %v840_v33, %v844_v35  ;;  %8168 = vmatprep.subr.bf16.mxu0 %v12908_v38  ;;  %v13035_v45 = vcombine.low %v840_v33, %v844_v35 }
 0x107   :  { %v708_v40 = vld [vmem:[#allocation5 + $0x10e0] sm:$0xff] }
 0x108   :  { %v832_v41 = vld [vmem:[#allocation5 + $0x14c0] sm:$0xff]  ;;  %v12900_v46 = vcombine.high %v704_v39, %v708_v40  ;;  %8211 = vmatprep.subr.bf16.mxu1 %v13036_v42  ;;  %8169 = vmatpush1.bf16.msra.mxu0 %v12907_v44  ;;  %v12899_v52 = vcombine.low %v704_v39, %v708_v40 }
 0x109   :  { %v836_v43 = vld [vmem:[#allocation5 + $0x14e0] sm:$0xff]  ;;  %8212 = vmatpush1.bf16.msra.mxu1 %v13035_v45 }
 0x10a   :  { %v696_v47 = vld [vmem:[#allocation5 + $0x1080] sm:$0xff]  ;;  %v13028_v50 = vcombine.high %v832_v41, %v836_v43  ;;  %8170 = vmatprep.subr.bf16.mxu0 %v12900_v46  ;;  %v13027_v53 = vcombine.low %v832_v41, %v836_v43 }
 0x10b   :  { %v700_v48 = vld [vmem:[#allocation5 + $0x10a0] sm:$0xff] }
 0x10c   :  { %v824_v49 = vld [vmem:[#allocation5 + $0x1480] sm:$0xff]  ;;  %v12892_v54 = vcombine.high %v696_v47, %v700_v48  ;;  %8213 = vmatprep.subr.bf16.mxu1 %v13028_v50  ;;  %8171 = vmatpush1.bf16.msra.mxu0 %v12899_v52  ;;  %v12891_v60 = vcombine.low %v696_v47, %v700_v48 }
 0x10d   :  { %v828_v51 = vld [vmem:[#allocation5 + $0x14a0] sm:$0xff]  ;;  %8214 = vmatpush1.bf16.msra.mxu1 %v13027_v53 }
 0x10e   :  { %v688_v55 = vld [vmem:[#allocation5 + $0x1040] sm:$0xff]  ;;  %v13020_v58 = vcombine.high %v824_v49, %v828_v51  ;;  %8172 = vmatprep.subr.bf16.mxu0 %v12892_v54  ;;  %v13019_v61 = vcombine.low %v824_v49, %v828_v51 }
 0x10f   :  { %v692_v56 = vld [vmem:[#allocation5 + $0x1060] sm:$0xff] }
 0x110   :  { %v816_v57 = vld [vmem:[#allocation5 + $0x1440] sm:$0xff]  ;;  %v12884_v62 = vcombine.high %v688_v55, %v692_v56  ;;  %8215 = vmatprep.subr.bf16.mxu1 %v13020_v58  ;;  %8173 = vmatpush1.bf16.msra.mxu0 %v12891_v60  ;;  %v12883_v4 = vcombine.low %v688_v55, %v692_v56 }
 0x111   :  { %v820_v59 = vld [vmem:[#allocation5 + $0x1460] sm:$0xff]  ;;  %8216 = vmatpush1.bf16.msra.mxu1 %v13019_v61 }
 0x112   :  { %v680_v63 = vld [vmem:[#allocation5 + $0x1000] sm:$0xff]  ;;  %v13012_v2 = vcombine.high %v816_v57, %v820_v59  ;;  %8174 = vmatprep.subr.bf16.mxu0 %v12884_v62  ;;  %v13011_v5 = vcombine.low %v816_v57, %v820_v59 }
 0x113   :  { %v684_v0 = vld [vmem:[#allocation5 + $0x1020] sm:$0xff] }
 0x114   :  { %v808_v1 = vld [vmem:[#allocation5 + $0x1400] sm:$0xff]  ;;  %v12876_v6 = vcombine.high %v680_v63, %v684_v0  ;;  %8217 = vmatprep.subr.bf16.mxu1 %v13012_v2  ;;  %8175 = vmatpush1.bf16.msra.mxu0 %v12883_v4  ;;  %v12875_v12 = vcombine.low %v680_v63, %v684_v0 }
 0x115   :  { %v812_v3 = vld [vmem:[#allocation5 + $0x1420] sm:$0xff]  ;;  %8218 = vmatpush1.bf16.msra.mxu1 %v13011_v5 }
 0x116   :  { %v800_v7 = vld [vmem:[#allocation5 + $0x13c0] sm:$0xff]  ;;  %v13004_v10 = vcombine.high %v808_v1, %v812_v3  ;;  %8176 = vmatprep.subr.bf16.mxu0 %v12876_v6  ;;  %v13003_v13 = vcombine.low %v808_v1, %v812_v3 }
 0x117   :  { %v804_v8 = vld [vmem:[#allocation5 + $0x13e0] sm:$0xff] }
 0x118   :  { %v928_v9 = vld [vmem:[#allocation5 + $0x17c0] sm:$0xff]  ;;  %v12996_v14 = vcombine.high %v800_v7, %v804_v8  ;;  %8219 = vmatprep.subr.bf16.mxu1 %v13004_v10  ;;  %8177 = vmatpush1.bf16.msra.mxu0 %v12875_v12  ;;  %v12995_v20 = vcombine.low %v800_v7, %v804_v8 }
 0x119   :  { %v932_v11 = vld [vmem:[#allocation5 + $0x17e0] sm:$0xff]  ;;  %8220 = vmatpush1.bf16.msra.mxu1 %v13003_v13 }
 0x11a   :  { %v792_v15 = vld [vmem:[#allocation5 + $0x1380] sm:$0xff]  ;;  %v13124_v18 = vcombine.high %v928_v9, %v932_v11  ;;  %8178 = vmatprep.subr.bf16.mxu0 %v12996_v14  ;;  %v13123_v21 = vcombine.low %v928_v9, %v932_v11 }
 0x11b   :  { %v796_v16 = vld [vmem:[#allocation5 + $0x13a0] sm:$0xff] }
 0x11c   :  { %v920_v17 = vld [vmem:[#allocation5 + $0x1780] sm:$0xff]  ;;  %v12988_v22 = vcombine.high %v792_v15, %v796_v16  ;;  %8221 = vmatprep.subr.bf16.mxu1 %v13124_v18  ;;  %8179 = vmatpush2.bf16.msra.mxu0 %v12995_v20  ;;  %v12987_v28 = vcombine.low %v792_v15, %v796_v16 }
 0x11d   :  { %v924_v19 = vld [vmem:[#allocation5 + $0x17a0] sm:$0xff]  ;;  %8222 = vmatpush2.bf16.msra.mxu1 %v13123_v21 }
 0x11e   :  { %v784_v23 = vld [vmem:[#allocation5 + $0x1340] sm:$0xff]  ;;  %v13116_v26 = vcombine.high %v920_v17, %v924_v19  ;;  %8180 = vmatprep.subr.bf16.mxu0 %v12988_v22  ;;  %v13115_v29 = vcombine.low %v920_v17, %v924_v19  ;;  %v14048_v19 = vld [vmem:[#allocation2 + $0x28] ss:$80 sps:$4 sm:$0xff]  }
 0x11f   :  { %v788_v24 = vld [vmem:[#allocation5 + $0x1360] sm:$0xff] }
 0x120   :  { %v912_v25 = vld [vmem:[#allocation5 + $0x1740] sm:$0xff]  ;;  %v12980_v30 = vcombine.high %v784_v23, %v788_v24  ;;  %8223 = vmatprep.subr.bf16.mxu1 %v13116_v26  ;;  %8181 = vmatpush2.bf16.msra.mxu0 %v12987_v28  ;;  %v12979_v36 = vcombine.low %v784_v23, %v788_v24 }
 0x121   :  { %v916_v27 = vld [vmem:[#allocation5 + $0x1760] sm:$0xff]  ;;  %8224 = vmatpush2.bf16.msra.mxu1 %v13115_v29 }
 0x122   :  { %v776_v31 = vld [vmem:[#allocation5 + $0x1300] sm:$0xff]  ;;  %v13108_v34 = vcombine.high %v912_v25, %v916_v27  ;;  %8182 = vmatprep.subr.bf16.mxu0 %v12980_v30  ;;  %v13107_v37 = vcombine.low %v912_v25, %v916_v27 }
 0x123   :  { %v780_v32 = vld [vmem:[#allocation5 + $0x1320] sm:$0xff] }
 0x124   :  { %v904_v33 = vld [vmem:[#allocation5 + $0x1700] sm:$0xff]  ;;  %v12972_v38 = vcombine.high %v776_v31, %v780_v32  ;;  %8225 = vmatprep.subr.bf16.mxu1 %v13108_v34  ;;  %8183 = vmatpush2.bf16.msra.mxu0 %v12979_v36  ;;  %v12971_v44 = vcombine.low %v776_v31, %v780_v32  ;;  %v14051_v31 = vld [vmem:[#allocation2 + $0x3c] ss:$80 sps:$4 sm:$0xff]  }
 0x125   :  { %v908_v35 = vld [vmem:[#allocation5 + $0x1720] sm:$0xff]  ;;  %8226 = vmatpush2.bf16.msra.mxu1 %v13107_v37 }
 0x126   :  { %v768_v39 = vld [vmem:[#allocation5 + $0x12c0] sm:$0xff]  ;;  %v13100_v42 = vcombine.high %v904_v33, %v908_v35  ;;  %8184 = vmatprep.subr.bf16.mxu0 %v12972_v38  ;;  %v13099_v45 = vcombine.low %v904_v33, %v908_v35 }
 0x127   :  { %v772_v40 = vld [vmem:[#allocation5 + $0x12e0] sm:$0xff] }
 0x128   :  { %v896_v41 = vld [vmem:[#allocation5 + $0x16c0] sm:$0xff]  ;;  %v12964_v46 = vcombine.high %v768_v39, %v772_v40  ;;  %8227 = vmatprep.subr.bf16.mxu1 %v13100_v42  ;;  %8185 = vmatpush2.bf16.msra.mxu0 %v12971_v44  ;;  %v12963_v52 = vcombine.low %v768_v39, %v772_v40 }
 0x129   :  { %v900_v43 = vld [vmem:[#allocation5 + $0x16e0] sm:$0xff]  ;;  %8228 = vmatpush2.bf16.msra.mxu1 %v13099_v45 }
 0x12a   :  { %v760_v47 = vld [vmem:[#allocation5 + $0x1280] sm:$0xff]  ;;  %v13092_v50 = vcombine.high %v896_v41, %v900_v43  ;;  %8186 = vmatprep.subr.bf16.mxu0 %v12964_v46  ;;  %v13091_v53 = vcombine.low %v896_v41, %v900_v43 }
 0x12b   :  { %v764_v48 = vld [vmem:[#allocation5 + $0x12a0] sm:$0xff] }
 0x12c   :  { %v888_v49 = vld [vmem:[#allocation5 + $0x1680] sm:$0xff]  ;;  %v12956_v54 = vcombine.high %v760_v47, %v764_v48  ;;  %8229 = vmatprep.subr.bf16.mxu1 %v13092_v50  ;;  %8187 = vmatpush2.bf16.msra.mxu0 %v12963_v52  ;;  %v12955_v60 = vcombine.low %v760_v47, %v764_v48 }
 0x12d   :  { %v892_v51 = vld [vmem:[#allocation5 + $0x16a0] sm:$0xff]  ;;  %8230 = vmatpush2.bf16.msra.mxu1 %v13091_v53 }
 0x12e   :  { %v752_v55 = vld [vmem:[#allocation5 + $0x1240] sm:$0xff]  ;;  %v13084_v58 = vcombine.high %v888_v49, %v892_v51  ;;  %8188 = vmatprep.subr.bf16.mxu0 %v12956_v54  ;;  %v13083_v61 = vcombine.low %v888_v49, %v892_v51 }
 0x12f   :  { %v756_v56 = vld [vmem:[#allocation5 + $0x1260] sm:$0xff] }
 0x130   :  { %v880_v57 = vld [vmem:[#allocation5 + $0x1640] sm:$0xff]  ;;  %v12948_v62 = vcombine.high %v752_v55, %v756_v56  ;;  %8231 = vmatprep.subr.bf16.mxu1 %v13084_v58  ;;  %8189 = vmatpush2.bf16.msra.mxu0 %v12955_v60  ;;  %v12947_v4 = vcombine.low %v752_v55, %v756_v56 }
 0x131   :  { %v884_v59 = vld [vmem:[#allocation5 + $0x1660] sm:$0xff]  ;;  %8232 = vmatpush2.bf16.msra.mxu1 %v13083_v61 }
 0x132   :  { %v744_v63 = vld [vmem:[#allocation5 + $0x1200] sm:$0xff]  ;;  %v13076_v2 = vcombine.high %v880_v57, %v884_v59  ;;  %8190 = vmatprep.subr.bf16.mxu0 %v12948_v62  ;;  %v13075_v5 = vcombine.low %v880_v57, %v884_v59 }
 0x133   :  { %v748_v0 = vld [vmem:[#allocation5 + $0x1220] sm:$0xff] }
 0x134   :  { %v872_v1 = vld [vmem:[#allocation5 + $0x1600] sm:$0xff]  ;;  %v12940_v6 = vcombine.high %v744_v63, %v748_v0  ;;  %8233 = vmatprep.subr.bf16.mxu1 %v13076_v2  ;;  %8191 = vmatpush2.bf16.msra.mxu0 %v12947_v4  ;;  %v12939_v12 = vcombine.low %v744_v63, %v748_v0 }
 0x135   :  { %v876_v3 = vld [vmem:[#allocation5 + $0x1620] sm:$0xff]  ;;  %8234 = vmatpush2.bf16.msra.mxu1 %v13075_v5 }
 0x136   :  { %v992_v7 = vld [vmem:[#allocation5 + $0x19c0] sm:$0xff]  ;;  %v13068_v10 = vcombine.high %v872_v1, %v876_v3  ;;  %8192 = vmatprep.subr.bf16.mxu0 %v12940_v6  ;;  %v13067_v13 = vcombine.low %v872_v1, %v876_v3 }
 0x137   :  { %v996_v8 = vld [vmem:[#allocation5 + $0x19e0] sm:$0xff] }
 0x138   :  { %v1120_v9 = vld [vmem:[#allocation5 + $0x1dc0] sm:$0xff]  ;;  %v13188_v15 = vcombine.high %v992_v7, %v996_v8  ;;  %8235 = vmatprep.subr.bf16.mxu1 %v13068_v10  ;;  %8193 = vmatpush2.bf16.msra.mxu0 %v12939_v12  ;;  %v13187_v22 = vcombine.low %v992_v7, %v996_v8 }
 0x139   :  { %v1124_v11 = vld [vmem:[#allocation5 + $0x1de0] sm:$0xff]  ;;  %8236 = vmatpush2.bf16.msra.mxu1 %v13067_v13 }
 0x13a   :  { %v14047_v14 = vld [vmem:[#allocation2 + $0x20] ss:$80 sps:$4 sm:$0xff]   ;;  %v13316_v20 = vcombine.high %v1120_v9, %v1124_v11  ;;  %8248 = vmatprep.subr.bf16.mxu0 %v13188_v15  ;;  %v13315_v23 = vcombine.low %v1120_v9, %v1124_v11  ;;  %v14049_v29 = vld [vmem:[#allocation2 + $0x34] ss:$80 sps:$4 sm:$0xff]  }
 0x13b   :  { %v984_v16 = vld [vmem:[#allocation5 + $0x1980] sm:$0xff]  ;;  %8195 = vmatmul.mubr.bf16.vlgmr.msra.gmra.mxu0 %v14047_v14 }
 0x13c   :  { %v988_v17 = vld [vmem:[#allocation5 + $0x19a0] sm:$0xff]  ;;  %8291 = vmatprep.subr.bf16.mxu1 %v13316_v20  ;;  %8238 = vmatmul.mubr.bf16.vlgmr.msra.gmra.mxu1 %v14048_v19 }
 0x13d   :  { %v1112_v18 = vld [vmem:[#allocation5 + $0x1d80] sm:$0xff]  ;;  %v13180_v24 = vcombine.high %v984_v16, %v988_v17  ;;  %8249 = vmatpush1.bf16.msra.mxu0 %v13187_v22  ;;  %v13179_v32 = vcombine.low %v984_v16, %v988_v17  ;;  %8292 = vmatpush1.bf16.msra.mxu1 %v13315_v23 }
 0x13e   :  { %v1116_v21 = vld [vmem:[#allocation5 + $0x1da0] sm:$0xff]  ;;  %8280 = vmatprep.mubr.bf16.mxu0 %v14049_v29  ;;  %8323 = vmatprep.mubr.bf16.mxu1 %v14051_v31 }
 0x13f   :  { %v976_v25 = vld [vmem:[#allocation5 + $0x1940] sm:$0xff]  ;;  %v13308_v26 = vcombine.high %v1112_v18, %v1116_v21  ;;  %8250 = vmatprep.subr.bf16.mxu0 %v13180_v24  ;;  %v13307_v33 = vcombine.low %v1112_v18, %v1116_v21 }
 0x140   :  { %v980_v27 = vld [vmem:[#allocation5 + $0x1960] sm:$0xff] }
 0x141   :  { %v1104_v28 = vld [vmem:[#allocation5 + $0x1d40] sm:$0xff]  ;;  %v13172_v34 = vcombine.high %v976_v25, %v980_v27  ;;  %8293 = vmatprep.subr.bf16.mxu1 %v13308_v26  ;;  %8251 = vmatpush1.bf16.msra.mxu0 %v13179_v32  ;;  %v13171_v40 = vcombine.low %v976_v25, %v980_v27 }
 0x142   :  { %v1108_v30 = vld [vmem:[#allocation5 + $0x1d60] sm:$0xff]  ;;  %8294 = vmatpush1.bf16.msra.mxu1 %v13307_v33 }
 0x143   :  { %v968_v35 = vld [vmem:[#allocation5 + $0x1900] sm:$0xff]  ;;  %v13300_v38 = vcombine.high %v1104_v28, %v1108_v30  ;;  %8252 = vmatprep.subr.bf16.mxu0 %v13172_v34  ;;  %v13299_v41 = vcombine.low %v1104_v28, %v1108_v30 }
 0x144   :  { %v972_v36 = vld [vmem:[#allocation5 + $0x1920] sm:$0xff] }
 0x145   :  { %v1096_v37 = vld [vmem:[#allocation5 + $0x1d00] sm:$0xff]  ;;  %v13164_v42 = vcombine.high %v968_v35, %v972_v36  ;;  %8295 = vmatprep.subr.bf16.mxu1 %v13300_v38  ;;  %8253 = vmatpush1.bf16.msra.mxu0 %v13171_v40  ;;  %v13163_v48 = vcombine.low %v968_v35, %v972_v36 }
 0x146   :  { %v1100_v39 = vld [vmem:[#allocation5 + $0x1d20] sm:$0xff]  ;;  %8296 = vmatpush1.bf16.msra.mxu1 %v13299_v41 }
 0x147   :  { %v960_v43 = vld [vmem:[#allocation5 + $0x18c0] sm:$0xff]  ;;  %v13292_v46 = vcombine.high %v1096_v37, %v1100_v39  ;;  %8254 = vmatprep.subr.bf16.mxu0 %v13164_v42  ;;  %v13291_v49 = vcombine.low %v1096_v37, %v1100_v39 }
 0x148   :  { %v964_v44 = vld [vmem:[#allocation5 + $0x18e0] sm:$0xff] }
 0x149   :  { %v1088_v45 = vld [vmem:[#allocation5 + $0x1cc0] sm:$0xff]  ;;  %v13156_v50 = vcombine.high %v960_v43, %v964_v44  ;;  %8297 = vmatprep.subr.bf16.mxu1 %v13292_v46  ;;  %8255 = vmatpush1.bf16.msra.mxu0 %v13163_v48  ;;  %v13155_v56 = vcombine.low %v960_v43, %v964_v44 }
 0x14a   :  { %v1092_v47 = vld [vmem:[#allocation5 + $0x1ce0] sm:$0xff]  ;;  %8298 = vmatpush1.bf16.msra.mxu1 %v13291_v49 }
 0x14b   :  { %v952_v51 = vld [vmem:[#allocation5 + $0x1880] sm:$0xff]  ;;  %v13284_v54 = vcombine.high %v1088_v45, %v1092_v47  ;;  %8256 = vmatprep.subr.bf16.mxu0 %v13156_v50  ;;  %v13283_v57 = vcombine.low %v1088_v45, %v1092_v47 }
 0x14c   :  { %v956_v52 = vld [vmem:[#allocation5 + $0x18a0] sm:$0xff] }
 0x14d   :  { %v1080_v53 = vld [vmem:[#allocation5 + $0x1c80] sm:$0xff]  ;;  %v13148_v58 = vcombine.high %v952_v51, %v956_v52  ;;  %8299 = vmatprep.subr.bf16.mxu1 %v13284_v54  ;;  %8257 = vmatpush1.bf16.msra.mxu0 %v13155_v56  ;;  %v13147_v0 = vcombine.low %v952_v51, %v956_v52 }
 0x14e   :  { %v1084_v55 = vld [vmem:[#allocation5 + $0x1ca0] sm:$0xff]  ;;  %8300 = vmatpush1.bf16.msra.mxu1 %v13283_v57 }
 0x14f   :  { %v944_v59 = vld [vmem:[#allocation5 + $0x1840] sm:$0xff]  ;;  %v13276_v62 = vcombine.high %v1080_v53, %v1084_v55  ;;  %8258 = vmatprep.subr.bf16.mxu0 %v13148_v58  ;;  %v13275_v1 = vcombine.low %v1080_v53, %v1084_v55 }
 0x150   :  { %v948_v60 = vld [vmem:[#allocation5 + $0x1860] sm:$0xff] }
 0x151   :  { %v1072_v61 = vld [vmem:[#allocation5 + $0x1c40] sm:$0xff]  ;;  %v13140_v2 = vcombine.high %v944_v59, %v948_v60  ;;  %8301 = vmatprep.subr.bf16.mxu1 %v13276_v62  ;;  %8259 = vmatpush1.bf16.msra.mxu0 %v13147_v0  ;;  %v13139_v8 = vcombine.low %v944_v59, %v948_v60  ;;  %v1450_v0 = vlaneseq }
 0x152   :  { %v1076_v63 = vld [vmem:[#allocation5 + $0x1c60] sm:$0xff]  ;;  %8302 = vmatpush1.bf16.msra.mxu1 %v13275_v1 }
 0x153   :  { %v936_v3 = vld [vmem:[#allocation5 + $0x1800] sm:$0xff]  ;;  %v13268_v6 = vcombine.high %v1072_v61, %v1076_v63  ;;  %8260 = vmatprep.subr.bf16.mxu0 %v13140_v2  ;;  %v13267_v9 = vcombine.low %v1072_v61, %v1076_v63 }
 0x154   :  { %v940_v4 = vld [vmem:[#allocation5 + $0x1820] sm:$0xff] }
 0x155   :  { %v1064_v5 = vld [vmem:[#allocation5 + $0x1c00] sm:$0xff]  ;;  %v13132_v10 = vcombine.high %v936_v3, %v940_v4  ;;  %8303 = vmatprep.subr.bf16.mxu1 %v13268_v6  ;;  %8261 = vmatpush1.bf16.msra.mxu0 %v13139_v8  ;;  %v13131_v16 = vcombine.low %v936_v3, %v940_v4 }
 0x156   :  { %v1068_v7 = vld [vmem:[#allocation5 + $0x1c20] sm:$0xff]  ;;  %8304 = vmatpush1.bf16.msra.mxu1 %v13267_v9  ;;  %v14932_v9 = vshrl.u32 %v1450_v0, 7 }
 0x157   :  { %v1056_v11 = vld [vmem:[#allocation5 + $0x1bc0] sm:$0xff]  ;;  %v13260_v14 = vcombine.high %v1064_v5, %v1068_v7  ;;  %8262 = vmatprep.subr.bf16.mxu0 %v13132_v10  ;;  %v13259_v17 = vcombine.low %v1064_v5, %v1068_v7 }
 0x158   :  { %v1060_v12 = vld [vmem:[#allocation5 + $0x1be0] sm:$0xff] }
 0x159   :  { %v1184_v13 = vld [vmem:[#allocation5 + $0x1fc0] sm:$0xff]  ;;  %v13252_v18 = vcombine.high %v1056_v11, %v1060_v12  ;;  %8305 = vmatprep.subr.bf16.mxu1 %v13260_v14  ;;  %8263 = vmatpush1.bf16.msra.mxu0 %v13131_v16  ;;  %v13251_v24 = vcombine.low %v1056_v11, %v1060_v12 }
 0x15a   :  { %v1188_v15 = vld [vmem:[#allocation5 + $0x1fe0] sm:$0xff]  ;;  %8306 = vmatpush1.bf16.msra.mxu1 %v13259_v17  ;;  %v14935_v17 = vsub.s32 0, %v14932_v9 }
 0x15b   :  { %v1048_v19 = vld [vmem:[#allocation5 + $0x1b80] sm:$0xff]  ;;  %v13380_v22 = vcombine.high %v1184_v13, %v1188_v15  ;;  %8264 = vmatprep.subr.bf16.mxu0 %v13252_v18  ;;  %v13379_v25 = vcombine.low %v1184_v13, %v1188_v15 }
 0x15c   :  { %v1052_v20 = vld [vmem:[#allocation5 + $0x1ba0] sm:$0xff]  ;;  %15282 = vst [vmem:[#allocation24_spill] sm:$0xff] %v14935_v17 }
 0x15d   :  { %v1176_v21 = vld [vmem:[#allocation5 + $0x1f80] sm:$0xff]  ;;  %v13244_v26 = vcombine.high %v1048_v19, %v1052_v20  ;;  %8307 = vmatprep.subr.bf16.mxu1 %v13380_v22  ;;  %8265 = vmatpush2.bf16.msra.mxu0 %v13251_v24  ;;  %v13243_v32 = vcombine.low %v1048_v19, %v1052_v20 }
 0x15e   :  { %v1180_v23 = vld [vmem:[#allocation5 + $0x1fa0] sm:$0xff]  ;;  %8308 = vmatpush2.bf16.msra.mxu1 %v13379_v25 }
 0x15f   :  { %v1040_v27 = vld [vmem:[#allocation5 + $0x1b40] sm:$0xff]  ;;  %v13372_v30 = vcombine.high %v1176_v21, %v1180_v23  ;;  %8266 = vmatprep.subr.bf16.mxu0 %v13244_v26  ;;  %v13371_v33 = vcombine.low %v1176_v21, %v1180_v23 }
 0x160   :  { %v1044_v28 = vld [vmem:[#allocation5 + $0x1b60] sm:$0xff] }
 0x161   :  { %v1168_v29 = vld [vmem:[#allocation5 + $0x1f40] sm:$0xff]  ;;  %v13236_v34 = vcombine.high %v1040_v27, %v1044_v28  ;;  %8309 = vmatprep.subr.bf16.mxu1 %v13372_v30  ;;  %8267 = vmatpush2.bf16.msra.mxu0 %v13243_v32  ;;  %v13235_v40 = vcombine.low %v1040_v27, %v1044_v28  ;;  %v14054_v27 = vld [vmem:[#allocation2 + $0x38] ss:$80 sps:$4 sm:$0xff]  }
 0x162   :  { %v1172_v31 = vld [vmem:[#allocation5 + $0x1f60] sm:$0xff]  ;;  %8310 = vmatpush2.bf16.msra.mxu1 %v13371_v33 }
 0x163   :  { %v1032_v35 = vld [vmem:[#allocation5 + $0x1b00] sm:$0xff]  ;;  %v13364_v38 = vcombine.high %v1168_v29, %v1172_v31  ;;  %8268 = vmatprep.subr.bf16.mxu0 %v13236_v34  ;;  %v13363_v41 = vcombine.low %v1168_v29, %v1172_v31 }
 0x164   :  { %v1036_v36 = vld [vmem:[#allocation5 + $0x1b20] sm:$0xff] }
 0x165   :  { %v1160_v37 = vld [vmem:[#allocation5 + $0x1f00] sm:$0xff]  ;;  %v13228_v42 = vcombine.high %v1032_v35, %v1036_v36  ;;  %8311 = vmatprep.subr.bf16.mxu1 %v13364_v38  ;;  %8269 = vmatpush2.bf16.msra.mxu0 %v13235_v40  ;;  %v13227_v48 = vcombine.low %v1032_v35, %v1036_v36  ;;  %v14057_v40 = vld [vmem:[#allocation2 + $0x4c] ss:$80 sps:$4 sm:$0xff]  }
 0x166   :  { %v1164_v39 = vld [vmem:[#allocation5 + $0x1f20] sm:$0xff]  ;;  %8312 = vmatpush2.bf16.msra.mxu1 %v13363_v41 }
 0x167   :  { %v1024_v43 = vld [vmem:[#allocation5 + $0x1ac0] sm:$0xff]  ;;  %v13356_v46 = vcombine.high %v1160_v37, %v1164_v39  ;;  %8270 = vmatprep.subr.bf16.mxu0 %v13228_v42  ;;  %v13355_v49 = vcombine.low %v1160_v37, %v1164_v39 }
 0x168   :  { %v1028_v44 = vld [vmem:[#allocation5 + $0x1ae0] sm:$0xff] }
 0x169   :  { %v1152_v45 = vld [vmem:[#allocation5 + $0x1ec0] sm:$0xff]  ;;  %v13220_v50 = vcombine.high %v1024_v43, %v1028_v44  ;;  %8313 = vmatprep.subr.bf16.mxu1 %v13356_v46  ;;  %8271 = vmatpush2.bf16.msra.mxu0 %v13227_v48  ;;  %v13219_v56 = vcombine.low %v1024_v43, %v1028_v44 }
 0x16a   :  { %v1156_v47 = vld [vmem:[#allocation5 + $0x1ee0] sm:$0xff]  ;;  %8314 = vmatpush2.bf16.msra.mxu1 %v13355_v49 }
 0x16b   :  { %v1016_v51 = vld [vmem:[#allocation5 + $0x1a80] sm:$0xff]  ;;  %v13348_v54 = vcombine.high %v1152_v45, %v1156_v47  ;;  %8272 = vmatprep.subr.bf16.mxu0 %v13220_v50  ;;  %v13347_v57 = vcombine.low %v1152_v45, %v1156_v47 }
 0x16c   :  { %v1020_v52 = vld [vmem:[#allocation5 + $0x1aa0] sm:$0xff] }
 0x16d   :  { %v1144_v53 = vld [vmem:[#allocation5 + $0x1e80] sm:$0xff]  ;;  %v13212_v58 = vcombine.high %v1016_v51, %v1020_v52  ;;  %8315 = vmatprep.subr.bf16.mxu1 %v13348_v54  ;;  %8273 = vmatpush2.bf16.msra.mxu0 %v13219_v56  ;;  %v13211_v1 = vcombine.low %v1016_v51, %v1020_v52 }
 0x16e   :  { %v1148_v55 = vld [vmem:[#allocation5 + $0x1ea0] sm:$0xff]  ;;  %8316 = vmatpush2.bf16.msra.mxu1 %v13347_v57 }
 0x16f   :  { %v1008_v59 = vld [vmem:[#allocation5 + $0x1a40] sm:$0xff]  ;;  %v13340_v62 = vcombine.high %v1144_v53, %v1148_v55  ;;  %8274 = vmatprep.subr.bf16.mxu0 %v13212_v58  ;;  %v13339_v2 = vcombine.low %v1144_v53, %v1148_v55 }
 0x170   :  { %v1012_v60 = vld [vmem:[#allocation5 + $0x1a60] sm:$0xff] }
 0x171   :  { %v1136_v61 = vld [vmem:[#allocation5 + $0x1e40] sm:$0xff]  ;;  %v13204_v3 = vcombine.high %v1008_v59, %v1012_v60  ;;  %8317 = vmatprep.subr.bf16.mxu1 %v13340_v62  ;;  %8275 = vmatpush2.bf16.msra.mxu0 %v13211_v1  ;;  %v13203_v10 = vcombine.low %v1008_v59, %v1012_v60 }
 0x172   :  { %v1140_v63 = vld [vmem:[#allocation5 + $0x1e60] sm:$0xff]  ;;  %8318 = vmatpush2.bf16.msra.mxu1 %v13339_v2 }
 0x173   :  { %v1000_v4 = vld [vmem:[#allocation5 + $0x1a00] sm:$0xff]  ;;  %v13332_v7 = vcombine.high %v1136_v61, %v1140_v63  ;;  %8276 = vmatprep.subr.bf16.mxu0 %v13204_v3  ;;  %v13331_v11 = vcombine.low %v1136_v61, %v1140_v63 }
 0x174   :  { %v1004_v5 = vld [vmem:[#allocation5 + $0x1a20] sm:$0xff] }
 0x175   :  { %v1128_v6 = vld [vmem:[#allocation5 + $0x1e00] sm:$0xff]  ;;  %v13196_v12 = vcombine.high %v1000_v4, %v1004_v5  ;;  %8319 = vmatprep.subr.bf16.mxu1 %v13332_v7  ;;  %8277 = vmatpush2.bf16.msra.mxu0 %v13203_v10  ;;  %v13195_v20 = vcombine.low %v1000_v4, %v1004_v5 }
 0x176   :  { %v1132_v8 = vld [vmem:[#allocation5 + $0x1e20] sm:$0xff]  ;;  %8320 = vmatpush2.bf16.msra.mxu1 %v13331_v11 }
 0x177   :  { %v1248_v13 = vld [vmem:[#allocation5 + $0x21c0] sm:$0xff]  ;;  %v13324_v16 = vcombine.high %v1128_v6, %v1132_v8  ;;  %8278 = vmatprep.subr.bf16.mxu0 %v13196_v12  ;;  %v13323_v21 = vcombine.low %v1128_v6, %v1132_v8 }
 0x178   :  { %v1252_v14 = vld [vmem:[#allocation5 + $0x21e0] sm:$0xff] }
 0x179   :  { %v1376_v15 = vld [vmem:[#allocation5 + $0x25c0] sm:$0xff]  ;;  %v13444_v23 = vcombine.high %v1248_v13, %v1252_v14  ;;  %8321 = vmatprep.subr.bf16.mxu1 %v13324_v16  ;;  %8279 = vmatpush2.bf16.msra.mxu0 %v13195_v20  ;;  %v13443_v31 = vcombine.low %v1248_v13, %v1252_v14 }
 0x17a   :  { %v1380_v18 = vld [vmem:[#allocation5 + $0x25e0] sm:$0xff]  ;;  %8322 = vmatpush2.bf16.msra.mxu1 %v13323_v21  ;;  %v8067_v43 = vpop.f32.mrf.mxu1 }
 0x17b   :  { %v1448_v19 = vld [vmem:[#allocation7] sm:$0xff]  ;;  %v13572_v28 = vcombine.high %v1376_v15, %v1380_v18  ;;  %8334 = vmatprep.subr.bf16.mxu0 %v13444_v23  ;;  %v13571_v34 = vcombine.low %v1376_v15, %v1380_v18  ;;  %v8024_v41 = vpop.f32.mrf.mxu0 }
 0x17c   :  { %v14053_v22 = vld [vmem:[#allocation2 + $0x30] ss:$80 sps:$4 sm:$0xff]   ;;  %v1453_v30 = vrot.slane %v1448_v19, %v14935_v17  ;;  %v14055_v38 = vld [vmem:[#allocation2 + $0x44] ss:$80 sps:$4 sm:$0xff]   ;;  %v14942_v49 = vpop.f32.mrf.mxu1 }
 0x17d   :  { %v1240_v24 = vld [vmem:[#allocation5 + $0x2180] sm:$0xff]  ;;  %8377 = vmatprep.subr.bf16.mxu1 %v13572_v28  ;;  %8281 = vmatmul.mubr.bf16.vlgmr.msra.gmra.mxu0 %v14053_v22  ;;  %v14938_v45 = vpop.f32.mrf.mxu0 }
 0x17e   :  { %v1244_v25 = vld [vmem:[#allocation5 + $0x21a0] sm:$0xff]  ;;  %v8025_v42 = vadd.f32 %v8024_v41, %v1453_v30  ;;  %8324 = vmatmul.mubr.bf16.vlgmr.msra.gmra.mxu1 %v14054_v27  ;;  %8335 = vmatpush1.bf16.msra.mxu0 %v13443_v31  ;;  %v8071_v58 = vpop.f32.mrf.mxu1 }
 0x17f   :  { %v1368_v26 = vld [vmem:[#allocation5 + $0x2580] sm:$0xff]  ;;  %v13436_v35 = vcombine.high %v1240_v24, %v1244_v25  ;;  %v13435_v44 = vcombine.low %v1240_v24, %v1244_v25  ;;  %8378 = vmatpush1.bf16.msra.mxu1 %v13571_v34  ;;  %8366 = vmatprep.mubr.bf16.mxu0 %v14055_v38  ;;  %v8028_v53 = vpop.f32.mrf.mxu0 }
 0x180   :  { %v1372_v29 = vld [vmem:[#allocation5 + $0x25a0] sm:$0xff]  ;;  %v14940_v48 = vadd.f32 %v8067_v43, %v8025_v42  ;;  %8409 = vmatprep.mubr.bf16.mxu1 %v14057_v40  ;;  %v8029_v56 = vadd.f32 %v8028_v53, %v1453_v30 }
 0x181   :  { %v1232_v32 = vld [vmem:[#allocation5 + $0x2140] sm:$0xff]  ;;  %v13564_v39 = vcombine.high %v1368_v26, %v1372_v29  ;;  %8336 = vmatprep.subr.bf16.mxu0 %v13436_v35  ;;  %v13563_v46 = vcombine.low %v1368_v26, %v1372_v29 }
 0x182   :  { %v1236_v33 = vld [vmem:[#allocation5 + $0x2160] sm:$0xff]  ;;  %8337 = vmatpush1.bf16.msra.mxu0 %v13435_v44  ;;  %v14944_v61 = vadd.f32 %v8071_v58, %v8029_v56 }
 0x183   :  { %v1360_v36 = vld [vmem:[#allocation5 + $0x2540] sm:$0xff]  ;;  %v13428_v47 = vcombine.high %v1232_v32, %v1236_v33  ;;  %8379 = vmatprep.subr.bf16.mxu1 %v13564_v39  ;;  %v13427_v57 = vcombine.low %v1232_v32, %v1236_v33 }
 0x184   :  { %v1364_v37 = vld [vmem:[#allocation5 + $0x2560] sm:$0xff]  ;;  %8380 = vmatpush1.bf16.msra.mxu1 %v13563_v46 }
 0x185   :  { %v13556_v50 = vcombine.high %v1360_v36, %v1364_v37  ;;  %v1224_v51 = vld [vmem:[#allocation5 + $0x2100] sm:$0xff]  ;;  %8338 = vmatprep.subr.bf16.mxu0 %v13428_v47  ;;  %v13555_v59 = vcombine.low %v1360_v36, %v1364_v37 }
 0x186   :  { %v1228_v52 = vld [vmem:[#allocation5 + $0x2120] sm:$0xff]  ;;  %8339 = vmatpush1.bf16.msra.mxu0 %v13427_v57 }
 0x187   :  { %v1352_v54 = vld [vmem:[#allocation5 + $0x2500] sm:$0xff]  ;;  %v13420_v60 = vcombine.high %v1224_v51, %v1228_v52  ;;  %8381 = vmatprep.subr.bf16.mxu1 %v13556_v50  ;;  %v13419_v3 = vcombine.low %v1224_v51, %v1228_v52 }
 0x188   :  { %v1356_v55 = vld [vmem:[#allocation5 + $0x2520] sm:$0xff]  ;;  %8382 = vmatpush1.bf16.msra.mxu1 %v13555_v59 }
 0x189   :  { %v13548_v62 = vcombine.high %v1352_v54, %v1356_v55  ;;  %v1216_v63 = vld [vmem:[#allocation5 + $0x20c0] sm:$0xff]  ;;  %8340 = vmatprep.subr.bf16.mxu0 %v13420_v60  ;;  %v13547_v4 = vcombine.low %v1352_v54, %v1356_v55 }
 0x18a   :  { %v1220_v0 = vld [vmem:[#allocation5 + $0x20e0] sm:$0xff]  ;;  %8341 = vmatpush1.bf16.msra.mxu0 %v13419_v3 }
 0x18b   :  { %v1344_v1 = vld [vmem:[#allocation5 + $0x24c0] sm:$0xff]  ;;  %v13412_v5 = vcombine.high %v1216_v63, %v1220_v0  ;;  %8383 = vmatprep.subr.bf16.mxu1 %v13548_v62  ;;  %v13411_v12 = vcombine.low %v1216_v63, %v1220_v0 }
 0x18c   :  { %v1348_v2 = vld [vmem:[#allocation5 + $0x24e0] sm:$0xff]  ;;  %8384 = vmatpush1.bf16.msra.mxu1 %v13547_v4 }
 0x18d   :  { %v13540_v6 = vcombine.high %v1344_v1, %v1348_v2  ;;  %v1208_v7 = vld [vmem:[#allocation5 + $0x2080] sm:$0xff]  ;;  %8342 = vmatprep.subr.bf16.mxu0 %v13412_v5  ;;  %v13539_v13 = vcombine.low %v1344_v1, %v1348_v2 }
 0x18e   :  { %v1212_v8 = vld [vmem:[#allocation5 + $0x20a0] sm:$0xff]  ;;  %8343 = vmatpush1.bf16.msra.mxu0 %v13411_v12 }
 0x18f   :  { %v1336_v10 = vld [vmem:[#allocation5 + $0x2480] sm:$0xff]  ;;  %v13404_v14 = vcombine.high %v1208_v7, %v1212_v8  ;;  %8385 = vmatprep.subr.bf16.mxu1 %v13540_v6  ;;  %v13403_v21 = vcombine.low %v1208_v7, %v1212_v8 }
 0x190   :  { %v1340_v11 = vld [vmem:[#allocation5 + $0x24a0] sm:$0xff]  ;;  %8386 = vmatpush1.bf16.msra.mxu1 %v13539_v13 }
 0x191   :  { %v13532_v15 = vcombine.high %v1336_v10, %v1340_v11  ;;  %v1200_v16 = vld [vmem:[#allocation5 + $0x2040] sm:$0xff]  ;;  %8344 = vmatprep.subr.bf16.mxu0 %v13404_v14  ;;  %v13531_v22 = vcombine.low %v1336_v10, %v1340_v11 }
 0x192   :  { %v1204_v18 = vld [vmem:[#allocation5 + $0x2060] sm:$0xff]  ;;  %8345 = vmatpush1.bf16.msra.mxu0 %v13403_v21 }
 0x193   :  { %v1328_v19 = vld [vmem:[#allocation5 + $0x2440] sm:$0xff]  ;;  %v13396_v23 = vcombine.high %v1200_v16, %v1204_v18  ;;  %8387 = vmatprep.subr.bf16.mxu1 %v13532_v15  ;;  %v13395_v29 = vcombine.low %v1200_v16, %v1204_v18 }
 0x194   :  { %v1332_v20 = vld [vmem:[#allocation5 + $0x2460] sm:$0xff]  ;;  %8388 = vmatpush1.bf16.msra.mxu1 %v13531_v22 }
 0x195   :  { %v13524_v24 = vcombine.high %v1328_v19, %v1332_v20  ;;  %v1192_v25 = vld [vmem:[#allocation5 + $0x2000] sm:$0xff]  ;;  %8346 = vmatprep.subr.bf16.mxu0 %v13396_v23  ;;  %v13523_v30 = vcombine.low %v1328_v19, %v1332_v20 }
 0x196   :  { %v1196_v26 = vld [vmem:[#allocation5 + $0x2020] sm:$0xff]  ;;  %8347 = vmatpush1.bf16.msra.mxu0 %v13395_v29 }
 0x197   :  { %v1320_v27 = vld [vmem:[#allocation5 + $0x2400] sm:$0xff]  ;;  %v13388_v31 = vcombine.high %v1192_v25, %v1196_v26  ;;  %8389 = vmatprep.subr.bf16.mxu1 %v13524_v24  ;;  %v13387_v37 = vcombine.low %v1192_v25, %v1196_v26 }
 0x198   :  { %v1324_v28 = vld [vmem:[#allocation5 + $0x2420] sm:$0xff]  ;;  %8390 = vmatpush1.bf16.msra.mxu1 %v13523_v30 }
 0x199   :  { %v13516_v32 = vcombine.high %v1320_v27, %v1324_v28  ;;  %v1312_v33 = vld [vmem:[#allocation5 + $0x23c0] sm:$0xff]  ;;  %8348 = vmatprep.subr.bf16.mxu0 %v13388_v31  ;;  %v13515_v38 = vcombine.low %v1320_v27, %v1324_v28 }
 0x19a   :  { %v1316_v34 = vld [vmem:[#allocation5 + $0x23e0] sm:$0xff]  ;;  %8349 = vmatpush1.bf16.msra.mxu0 %v13387_v37 }
 0x19b   :  { %v1440_v35 = vld [vmem:[#allocation5 + $0x27c0] sm:$0xff]  ;;  %v13508_v39 = vcombine.high %v1312_v33, %v1316_v34  ;;  %8391 = vmatprep.subr.bf16.mxu1 %v13516_v32  ;;  %v13507_v46 = vcombine.low %v1312_v33, %v1316_v34 }
 0x19c   :  { %v1444_v36 = vld [vmem:[#allocation5 + $0x27e0] sm:$0xff]  ;;  %8392 = vmatpush1.bf16.msra.mxu1 %v13515_v38 }
 0x19d   :  { %v13636_v40 = vcombine.high %v1440_v35, %v1444_v36  ;;  %v1304_v41 = vld [vmem:[#allocation5 + $0x2380] sm:$0xff]  ;;  %8350 = vmatprep.subr.bf16.mxu0 %v13508_v39  ;;  %v13635_v47 = vcombine.low %v1440_v35, %v1444_v36  ;;  %v225_v39 = vld [vmem:[#allocation5 + $0x1c8] sm:$0xff] }
 0x19e   :  { %v1308_v42 = vld [vmem:[#allocation5 + $0x23a0] sm:$0xff]  ;;  %8351 = vmatpush2.bf16.msra.mxu0 %v13507_v46 }
 0x19f   :  { %v1432_v43 = vld [vmem:[#allocation5 + $0x2780] sm:$0xff]  ;;  %v13500_v50 = vcombine.high %v1304_v41, %v1308_v42  ;;  %8393 = vmatprep.subr.bf16.mxu1 %v13636_v40  ;;  %v13499_v56 = vcombine.low %v1304_v41, %v1308_v42  ;;  %v229_v40 = vld [vmem:[#allocation5 + $0x1e8] sm:$0xff] }
 0x1a0   :  { %v1436_v44 = vld [vmem:[#allocation5 + $0x27a0] sm:$0xff]  ;;  %8394 = vmatpush2.bf16.msra.mxu1 %v13635_v47  ;;  %v353_v41 = vld [vmem:[#allocation5 + $0x5c8] sm:$0xff]  ;;  %v12422_v46 = vcombine.high %v225_v39, %v229_v40 }
 0x1a1   :  { %v13628_v51 = vcombine.high %v1432_v43, %v1436_v44  ;;  %v1296_v52 = vld [vmem:[#allocation5 + $0x2340] sm:$0xff]  ;;  %8352 = vmatprep.subr.bf16.mxu0 %v13500_v50  ;;  %v13627_v57 = vcombine.low %v1432_v43, %v1436_v44  ;;  %v357_v42 = vld [vmem:[#allocation5 + $0x5e8] sm:$0xff] }
 0x1a2   :  { %v1300_v53 = vld [vmem:[#allocation5 + $0x2360] sm:$0xff]  ;;  %8353 = vmatpush2.bf16.msra.mxu0 %v13499_v56  ;;  %v12550_v47 = vcombine.high %v353_v41, %v357_v42  ;;  %v217_v50 = vld [vmem:[#allocation5 + $0x188] sm:$0xff]  ;;  %v12421_v56 = vcombine.low %v225_v39, %v229_v40 }
 0x1a3   :  { %v1424_v54 = vld [vmem:[#allocation5 + $0x2740] sm:$0xff]  ;;  %v13492_v58 = vcombine.high %v1296_v52, %v1300_v53  ;;  %8395 = vmatprep.subr.bf16.mxu1 %v13628_v51  ;;  %v13491_v1 = vcombine.low %v1296_v52, %v1300_v53  ;;  %v221_v51 = vld [vmem:[#allocation5 + $0x1a8] sm:$0xff] }
 0x1a4   :  { %v1428_v55 = vld [vmem:[#allocation5 + $0x2760] sm:$0xff]  ;;  %8396 = vmatpush2.bf16.msra.mxu1 %v13627_v57  ;;  %v345_v53 = vld [vmem:[#allocation5 + $0x588] sm:$0xff]  ;;  %v14946_v57 = vpop.f32.mrf.mxu0 }
 0x1a5   :  { %v13620_v59 = vcombine.high %v1424_v54, %v1428_v55  ;;  %v1288_v60 = vld [vmem:[#allocation5 + $0x2300] sm:$0xff]  ;;  %8354 = vmatprep.subr.bf16.mxu0 %v13492_v58  ;;  %v13619_v2 = vcombine.low %v1424_v54, %v1428_v55  ;;  %v349_v54 = vld [vmem:[#allocation5 + $0x5a8] sm:$0xff]  ;;  %v12549_v58 = vcombine.low %v353_v41, %v357_v42 }
 0x1a6   :  { %v1292_v62 = vld [vmem:[#allocation5 + $0x2320] sm:$0xff]  ;;  %8355 = vmatpush2.bf16.msra.mxu0 %v13491_v1  ;;  %v14060_v55 = vld [vmem:[#allocation2 + $0x48] ss:$80 sps:$4 sm:$0xff]  }
 0x1a7   :  { %v1416_v63 = vld [vmem:[#allocation5 + $0x2700] sm:$0xff]  ;;  %v13484_v3 = vcombine.high %v1288_v60, %v1292_v62  ;;  %8397 = vmatprep.subr.bf16.mxu1 %v13620_v59  ;;  %v13483_v10 = vcombine.low %v1288_v60, %v1292_v62  ;;  %v12414_v59 = vcombine.high %v217_v50, %v221_v51  ;;  %v14948_v60 = vpop.f32.mrf.mxu1  ;;  %v12542_v62 = vcombine.high %v345_v53, %v349_v54 }
 0x1a8   :  { %v1420_v0 = vld [vmem:[#allocation5 + $0x2720] sm:$0xff]  ;;  %8398 = vmatpush2.bf16.msra.mxu1 %v13619_v2  ;;  %v337_v2 = vld [vmem:[#allocation5 + $0x548] sm:$0xff] }
 0x1a9   :  { %v13612_v4 = vcombine.high %v1416_v63, %v1420_v0  ;;  %v1280_v5 = vld [vmem:[#allocation5 + $0x22c0] sm:$0xff]  ;;  %8356 = vmatprep.subr.bf16.mxu0 %v13484_v3  ;;  %v13611_v11 = vcombine.low %v1416_v63, %v1420_v0  ;;  %v209_v63 = vld [vmem:[#allocation5 + $0x148] sm:$0xff] }
 0x1aa   :  { %v1284_v6 = vld [vmem:[#allocation5 + $0x22e0] sm:$0xff]  ;;  %8357 = vmatpush2.bf16.msra.mxu0 %v13483_v10  ;;  %v213_v0 = vld [vmem:[#allocation5 + $0x168] sm:$0xff] }
 0x1ab   :  { %v1408_v7 = vld [vmem:[#allocation5 + $0x26c0] sm:$0xff]  ;;  %v13476_v12 = vcombine.high %v1280_v5, %v1284_v6  ;;  %8399 = vmatprep.subr.bf16.mxu1 %v13612_v4  ;;  %v13475_v19 = vcombine.low %v1280_v5, %v1284_v6  ;;  %v341_v3 = vld [vmem:[#allocation5 + $0x568] sm:$0xff]  ;;  %v12413_v6 = vcombine.low %v217_v50, %v221_v51  ;;  %v12406_v10 = vcombine.high %v209_v63, %v213_v0 }
 0x1ac   :  { %v1412_v8 = vld [vmem:[#allocation5 + $0x26e0] sm:$0xff]  ;;  %8400 = vmatpush2.bf16.msra.mxu1 %v13611_v11 }
 0x1ad   :  { %v13604_v13 = vcombine.high %v1408_v7, %v1412_v8  ;;  %v1272_v14 = vld [vmem:[#allocation5 + $0x2280] sm:$0xff]  ;;  %8358 = vmatprep.subr.bf16.mxu0 %v13476_v12  ;;  %v13603_v20 = vcombine.low %v1408_v7, %v1412_v8  ;;  %v12541_v8 = vcombine.low %v345_v53, %v349_v54  ;;  %v169_v54 = vld [vmem:[#allocation5 + $0x8] sm:$0xff] }
 0x1ae   :  { %v1276_v15 = vld [vmem:[#allocation5 + $0x22a0] sm:$0xff]  ;;  %8359 = vmatpush2.bf16.msra.mxu0 %v13475_v19  ;;  %v333_v19 = vld [vmem:[#allocation5 + $0x528] sm:$0xff] }
 0x1af   :  { %v1400_v16 = vld [vmem:[#allocation5 + $0x2680] sm:$0xff]  ;;  %v13468_v21 = vcombine.high %v1272_v14, %v1276_v15  ;;  %8401 = vmatprep.subr.bf16.mxu1 %v13604_v13  ;;  %v13467_v27 = vcombine.low %v1272_v14, %v1276_v15  ;;  %v12534_v13 = vcombine.high %v337_v2, %v341_v3  ;;  %v201_v14 = vld [vmem:[#allocation5 + $0x108] sm:$0xff] }
 0x1b0   :  { %v1404_v18 = vld [vmem:[#allocation5 + $0x26a0] sm:$0xff]  ;;  %8402 = vmatpush2.bf16.msra.mxu1 %v13603_v20  ;;  %v205_v15 = vld [vmem:[#allocation5 + $0x128] sm:$0xff] }
 0x1b1   :  { %v13596_v22 = vcombine.high %v1400_v16, %v1404_v18  ;;  %v1264_v23 = vld [vmem:[#allocation5 + $0x2240] sm:$0xff]  ;;  %8360 = vmatprep.subr.bf16.mxu0 %v13468_v21  ;;  %v13595_v28 = vcombine.low %v1400_v16, %v1404_v18  ;;  %v329_v18 = vld [vmem:[#allocation5 + $0x508] sm:$0xff] }
 0x1b2   :  { %v1268_v24 = vld [vmem:[#allocation5 + $0x2260] sm:$0xff]  ;;  %8361 = vmatpush2.bf16.msra.mxu0 %v13467_v27  ;;  %v14558_v20 = vld [vmem:[#allocation2 + $0xc] ss:$80 sps:$4 sm:$0xff]   ;;  %v12526_v27 = vcombine.high %v329_v18, %v333_v19 }
 0x1b3   :  { %v1392_v25 = vld [vmem:[#allocation5 + $0x2640] sm:$0xff]  ;;  %v13460_v29 = vcombine.high %v1264_v23, %v1268_v24  ;;  %8403 = vmatprep.subr.bf16.mxu1 %v13596_v22  ;;  %v13459_v35 = vcombine.low %v1264_v23, %v1268_v24  ;;  %v12405_v22 = vcombine.low %v209_v63, %v213_v0  ;;  %v12533_v24 = vcombine.low %v337_v2, %v341_v3  ;;  %v293_v2 = vld [vmem:[#allocation5 + $0x3e8] sm:$0xff] }
 0x1b4   :  { %v1396_v26 = vld [vmem:[#allocation5 + $0x2660] sm:$0xff]  ;;  %8404 = vmatpush2.bf16.msra.mxu1 %v13595_v28  ;;  %v193_v28 = vld [vmem:[#allocation5 + $0xc8] sm:$0xff] }
 0x1b5   :  { %v13588_v30 = vcombine.high %v1392_v25, %v1396_v26  ;;  %v1256_v31 = vld [vmem:[#allocation5 + $0x2200] sm:$0xff]  ;;  %8362 = vmatprep.subr.bf16.mxu0 %v13460_v29  ;;  %v13587_v36 = vcombine.low %v1392_v25, %v1396_v26  ;;  %v12398_v25 = vcombine.high %v201_v14, %v205_v15  ;;  %v197_v29 = vld [vmem:[#allocation5 + $0xe8] sm:$0xff] }
 0x1b6   :  { %v1260_v32 = vld [vmem:[#allocation5 + $0x2220] sm:$0xff]  ;;  %8363 = vmatpush2.bf16.msra.mxu0 %v13459_v35  ;;  %v185_v35 = vld [vmem:[#allocation5 + $0x88] sm:$0xff]  ;;  %v12389_v39 = vcombine.low %v193_v28, %v197_v29 }
 0x1b7   :  { %v1384_v33 = vld [vmem:[#allocation5 + $0x2600] sm:$0xff]  ;;  %v13452_v37 = vcombine.high %v1256_v31, %v1260_v32  ;;  %8405 = vmatprep.subr.bf16.mxu1 %v13588_v30  ;;  %v13451_v43 = vcombine.low %v1256_v31, %v1260_v32  ;;  %v321_v30 = vld [vmem:[#allocation5 + $0x4c8] sm:$0xff]  ;;  %v12397_v32 = vcombine.low %v201_v14, %v205_v15 }
 0x1b8   :  { %v1388_v34 = vld [vmem:[#allocation5 + $0x2620] sm:$0xff]  ;;  %8406 = vmatpush2.bf16.msra.mxu1 %v13587_v36  ;;  %v325_v31 = vld [vmem:[#allocation5 + $0x4e8] sm:$0xff] }
 0x1b9   :  { %v13580_v38 = vcombine.high %v1384_v33, %v1388_v34  ;;  %8364 = vmatprep.subr.bf16.mxu0 %v13452_v37  ;;  %v13579_v44 = vcombine.low %v1384_v33, %v1388_v34  ;;  %v14059_v52 = vld [vmem:[#allocation2 + $0x40] ss:$80 sps:$4 sm:$0xff]   ;;  %v14557_v16 = vld [vmem:[#allocation2 + $0x4] ss:$80 sps:$4 sm:$0xff]   ;;  %v12390_v33 = vcombine.high %v193_v28, %v197_v29  ;;  %v12518_v34 = vcombine.high %v321_v30, %v325_v31  ;;  %v189_v36 = vld [vmem:[#allocation5 + $0xa8] sm:$0xff] }
 0x1ba   :  { %8365 = vmatpush2.bf16.msra.mxu0 %v13451_v43  ;;  %v313_v37 = vld [vmem:[#allocation5 + $0x488] sm:$0xff]  ;;  %v12517_v40 = vcombine.low %v321_v30, %v325_v31  ;;  %v12382_v41 = vcombine.high %v185_v35, %v189_v36  ;;  %v12381_v50 = vcombine.low %v185_v35, %v189_v36 }
 0x1bb   :  { %8407 = vmatprep.subr.bf16.mxu1 %v13580_v38  ;;  %8420 = vmatprep.subr.bf16.mxu0 %v12422_v46  ;;  %v8110_v1 = vpop.f32.mrf.mxu0  ;;  %v317_v38 = vld [vmem:[#allocation5 + $0x4a8] sm:$0xff] }
 0x1bc   :  { %8408 = vmatpush2.bf16.msra.mxu1 %v13579_v44  ;;  %v8111_v4 = vadd.f32 %v8110_v1, %v14940_v48  ;;  %v8153_v5 = vpop.f32.mrf.mxu1  ;;  %v12510_v42 = vcombine.high %v313_v37, %v317_v38  ;;  %v177_v43 = vld [vmem:[#allocation5 + $0x48] sm:$0xff]  ;;  %v12509_v51 = vcombine.low %v313_v37, %v317_v38 }
 0x1bd   :  { %8463 = vmatprep.subr.bf16.mxu1 %v12550_v47  ;;  %8367 = vmatmul.mubr.bf16.vlgmr.msra.gmra.mxu0 %v14059_v52  ;;  %v14951_v7 = vpop.f32.mrf.mxu0  ;;  %v181_v44 = vld [vmem:[#allocation5 + $0x68] sm:$0xff] }
 0x1be   :  { %8421 = vmatpush1.bf16.msra.mxu0 %v12421_v56  ;;  %v14953_v11 = vadd.f32 %v8153_v5, %v8111_v4  ;;  %v14955_v12 = vpop.f32.mrf.mxu1  ;;  %8452 = vmatprep.mubr.bf16.mxu0 %v14557_v16  ;;  %v305_v46 = vld [vmem:[#allocation5 + $0x448] sm:$0xff]  ;;  %v12374_v52 = vcombine.high %v177_v43, %v181_v44 }
 0x1bf   :  { %8410 = vmatmul.mubr.bf16.vlgmr.msra.gmra.mxu1 %v14060_v55  ;;  %8422 = vmatprep.subr.bf16.mxu0 %v12414_v59  ;;  %v8114_v48 = vpop.f32.mrf.mxu0  ;;  %v309_v47 = vld [vmem:[#allocation5 + $0x468] sm:$0xff]  ;;  %v12373_v59 = vcombine.low %v177_v43, %v181_v44 }
 0x1c0   :  { %8464 = vmatpush1.bf16.msra.mxu1 %v12549_v58  ;;  %8495 = vmatprep.mubr.bf16.mxu1 %v14558_v20  ;;  %v8115_v21 = vadd.f32 %v8114_v48, %v14944_v61  ;;  %v8157_v23 = vpop.f32.mrf.mxu1  ;;  %v12525_v61 = vcombine.low %v329_v18, %v333_v19  ;;  %v12502_v53 = vcombine.high %v305_v46, %v309_v47  ;;  %v173_v55 = vld [vmem:[#allocation5 + $0x28] sm:$0xff] }
 0x1c1   :  { %8465 = vmatprep.subr.bf16.mxu1 %v12542_v62  ;;  %v297_v56 = vld [vmem:[#allocation5 + $0x408] sm:$0xff]  ;;  %v12501_v62 = vcombine.low %v305_v46, %v309_v47  ;;  %v12366_v63 = vcombine.high %v169_v54, %v173_v55  ;;  %v12365_v5 = vcombine.low %v169_v54, %v173_v55 }
 0x1c2   :  { %8423 = vmatpush1.bf16.msra.mxu0 %v12413_v6  ;;  %v14958_v26 = vadd.f32 %v8157_v23, %v8115_v21  ;;  %v301_v58 = vld [vmem:[#allocation5 + $0x428] sm:$0xff] }
 0x1c3   :  { %8424 = vmatprep.subr.bf16.mxu0 %v12406_v10  ;;  %v12494_v0 = vcombine.high %v297_v56, %v301_v58  ;;  %v289_v1 = vld [vmem:[#allocation5 + $0x3c8] sm:$0xff]  ;;  %v12493_v6 = vcombine.low %v297_v56, %v301_v58 }
 0x1c4   :  { %8466 = vmatpush1.bf16.msra.mxu1 %v12541_v8  ;;  %v417_v3 = vld [vmem:[#allocation5 + $0x7c8] sm:$0xff]  ;;  %v12486_v8 = vcombine.high %v289_v1, %v293_v2  ;;  %v12485_v48 = vcombine.low %v289_v1, %v293_v2 }
 0x1c5   :  { %8467 = vmatprep.subr.bf16.mxu1 %v12534_v13  ;;  %v421_v4 = vld [vmem:[#allocation5 + $0x7e8] sm:$0xff] }
 0x1c6   :  { %8425 = vmatpush1.bf16.msra.mxu0 %v12405_v22  ;;  %v12614_v10 = vcombine.high %v417_v3, %v421_v4  ;;  %v281_v13 = vld [vmem:[#allocation5 + $0x388] sm:$0xff]  ;;  %v12613_v18 = vcombine.low %v417_v3, %v421_v4 }
 0x1c7   :  { %8426 = vmatprep.subr.bf16.mxu0 %v12398_v25  ;;  %v285_v14 = vld [vmem:[#allocation5 + $0x3a8] sm:$0xff] }
 0x1c8   :  { %8468 = vmatpush1.bf16.msra.mxu1 %v12533_v24  ;;  %v409_v15 = vld [vmem:[#allocation5 + $0x788] sm:$0xff]  ;;  %v12478_v19 = vcombine.high %v281_v13, %v285_v14  ;;  %v12477_v25 = vcombine.low %v281_v13, %v285_v14 }
 0x1c9   :  { %8469 = vmatprep.subr.bf16.mxu1 %v12526_v27  ;;  %v413_v16 = vld [vmem:[#allocation5 + $0x7a8] sm:$0xff] }
 0x1ca   :  { %8427 = vmatpush1.bf16.msra.mxu0 %v12397_v32  ;;  %v12606_v20 = vcombine.high %v409_v15, %v413_v16  ;;  %v273_v21 = vld [vmem:[#allocation5 + $0x348] sm:$0xff]  ;;  %v12605_v27 = vcombine.low %v409_v15, %v413_v16 }
 0x1cb   :  { %8428 = vmatprep.subr.bf16.mxu0 %v12390_v33  ;;  %v277_v22 = vld [vmem:[#allocation5 + $0x368] sm:$0xff] }
 0x1cc   :  { %8470 = vmatpush1.bf16.msra.mxu1 %v12525_v61  ;;  %v401_v23 = vld [vmem:[#allocation5 + $0x748] sm:$0xff]  ;;  %v12470_v28 = vcombine.high %v273_v21, %v277_v22  ;;  %v12469_v33 = vcombine.low %v273_v21, %v277_v22 }
 0x1cd   :  { %8471 = vmatprep.subr.bf16.mxu1 %v12518_v34  ;;  %v405_v24 = vld [vmem:[#allocation5 + $0x768] sm:$0xff] }
 0x1ce   :  { %8429 = vmatpush1.bf16.msra.mxu0 %v12389_v39  ;;  %v12598_v29 = vcombine.high %v401_v23, %v405_v24  ;;  %v265_v30 = vld [vmem:[#allocation5 + $0x308] sm:$0xff]  ;;  %v12597_v34 = vcombine.low %v401_v23, %v405_v24 }
 0x1cf   :  { %8430 = vmatprep.subr.bf16.mxu0 %v12382_v41  ;;  %v269_v31 = vld [vmem:[#allocation5 + $0x328] sm:$0xff] }
 0x1d0   :  { %8472 = vmatpush1.bf16.msra.mxu1 %v12517_v40  ;;  %v393_v32 = vld [vmem:[#allocation5 + $0x708] sm:$0xff]  ;;  %v12462_v35 = vcombine.high %v265_v30, %v269_v31  ;;  %v12461_v41 = vcombine.low %v265_v30, %v269_v31 }
 0x1d1   :  { %8473 = vmatprep.subr.bf16.mxu1 %v12510_v42  ;;  %v397_v61 = vld [vmem:[#allocation5 + $0x728] sm:$0xff] }
 0x1d2   :  { %8431 = vmatpush1.bf16.msra.mxu0 %v12381_v50  ;;  %v12590_v36 = vcombine.high %v393_v32, %v397_v61  ;;  %v257_v37 = vld [vmem:[#allocation5 + $0x2c8] sm:$0xff]  ;;  %v12589_v42 = vcombine.low %v393_v32, %v397_v61  ;;  %v14962_v32 = vpop.f32.mrf.mxu1 }
 0x1d3   :  { %8432 = vmatprep.subr.bf16.mxu0 %v12374_v52  ;;  %v261_v38 = vld [vmem:[#allocation5 + $0x2e8] sm:$0xff] }
 0x1d4   :  { %8474 = vmatpush1.bf16.msra.mxu1 %v12509_v51  ;;  %v385_v39 = vld [vmem:[#allocation5 + $0x6c8] sm:$0xff]  ;;  %v12454_v43 = vcombine.high %v257_v37, %v261_v38  ;;  %v12453_v52 = vcombine.low %v257_v37, %v261_v38 }
 0x1d5   :  { %8475 = vmatprep.subr.bf16.mxu1 %v12502_v53  ;;  %v389_v40 = vld [vmem:[#allocation5 + $0x6e8] sm:$0xff] }
 0x1d6   :  { %8433 = vmatpush1.bf16.msra.mxu0 %v12373_v59  ;;  %v12582_v44 = vcombine.high %v385_v39, %v389_v40  ;;  %v249_v46 = vld [vmem:[#allocation5 + $0x288] sm:$0xff]  ;;  %v12581_v53 = vcombine.low %v385_v39, %v389_v40 }
 0x1d7   :  { %8434 = vmatprep.subr.bf16.mxu0 %v12366_v63  ;;  %v253_v47 = vld [vmem:[#allocation5 + $0x2a8] sm:$0xff] }
 0x1d8   :  { %8476 = vmatpush1.bf16.msra.mxu1 %v12501_v62  ;;  %v377_v50 = vld [vmem:[#allocation5 + $0x688] sm:$0xff]  ;;  %v12446_v54 = vcombine.high %v249_v46, %v253_v47  ;;  %v12445_v63 = vcombine.low %v249_v46, %v253_v47 }
 0x1d9   :  { %8477 = vmatprep.subr.bf16.mxu1 %v12494_v0  ;;  %v381_v51 = vld [vmem:[#allocation5 + $0x6a8] sm:$0xff] }
 0x1da   :  { %8435 = vmatpush1.bf16.msra.mxu0 %v12365_v5  ;;  %v12574_v55 = vcombine.high %v377_v50, %v381_v51  ;;  %v241_v56 = vld [vmem:[#allocation5 + $0x248] sm:$0xff]  ;;  %v12573_v0 = vcombine.low %v377_v50, %v381_v51 }
 0x1db   :  { %8436 = vmatprep.subr.bf16.mxu0 %v12486_v8  ;;  %v245_v58 = vld [vmem:[#allocation5 + $0x268] sm:$0xff] }
 0x1dc   :  { %8478 = vmatpush1.bf16.msra.mxu1 %v12493_v6  ;;  %v369_v59 = vld [vmem:[#allocation5 + $0x648] sm:$0xff]  ;;  %v12438_v1 = vcombine.high %v241_v56, %v245_v58  ;;  %v12437_v8 = vcombine.low %v241_v56, %v245_v58 }
 0x1dd   :  { %8479 = vmatprep.subr.bf16.mxu1 %v12614_v10  ;;  %v373_v62 = vld [vmem:[#allocation5 + $0x668] sm:$0xff] }
 0x1de   :  { %8437 = vmatpush2.bf16.msra.mxu0 %v12485_v48  ;;  %v12566_v2 = vcombine.high %v369_v59, %v373_v62  ;;  %v233_v3 = vld [vmem:[#allocation5 + $0x208] sm:$0xff]  ;;  %v12565_v10 = vcombine.low %v369_v59, %v373_v62 }
 0x1df   :  { %8438 = vmatprep.subr.bf16.mxu0 %v12478_v19  ;;  %v237_v4 = vld [vmem:[#allocation5 + $0x228] sm:$0xff] }
 0x1e0   :  { %8480 = vmatpush2.bf16.msra.mxu1 %v12613_v18  ;;  %v361_v5 = vld [vmem:[#allocation5 + $0x608] sm:$0xff]  ;;  %v12430_v13 = vcombine.high %v233_v3, %v237_v4  ;;  %v12429_v19 = vcombine.low %v233_v3, %v237_v4 }
 0x1e1   :  { %8481 = vmatprep.subr.bf16.mxu1 %v12606_v20  ;;  %v365_v6 = vld [vmem:[#allocation5 + $0x628] sm:$0xff] }
 0x1e2   :  { %8439 = vmatpush2.bf16.msra.mxu0 %v12477_v25  ;;  %v12558_v14 = vcombine.high %v361_v5, %v365_v6  ;;  %v481_v15 = vld [vmem:[#allocation5 + $0x9c8] sm:$0xff]  ;;  %v12557_v20 = vcombine.low %v361_v5, %v365_v6 }
 0x1e3   :  { %8440 = vmatprep.subr.bf16.mxu0 %v12470_v28  ;;  %v485_v16 = vld [vmem:[#allocation5 + $0x9e8] sm:$0xff] }
 0x1e4   :  { %8482 = vmatpush2.bf16.msra.mxu1 %v12605_v27  ;;  %v609_v48 = vld [vmem:[#allocation5 + $0xdc8] sm:$0xff]  ;;  %v12678_v21 = vcombine.high %v481_v15, %v485_v16  ;;  %v12677_v28 = vcombine.low %v481_v15, %v485_v16 }
 0x1e5   :  { %8483 = vmatprep.subr.bf16.mxu1 %v12598_v29  ;;  %v613_v18 = vld [vmem:[#allocation5 + $0xde8] sm:$0xff]  ;;  %v14960_v29 = vpop.f32.mrf.mxu0 }
 0x1e6   :  { %8441 = vmatpush2.bf16.msra.mxu0 %v12469_v33  ;;  %v12806_v22 = vcombine.high %v609_v48, %v613_v18  ;;  %v473_v23 = vld [vmem:[#allocation5 + $0x988] sm:$0xff]  ;;  %v12805_v30 = vcombine.low %v609_v48, %v613_v18 }
 0x1e7   :  { %8442 = vmatprep.subr.bf16.mxu0 %v12462_v35  ;;  %v477_v24 = vld [vmem:[#allocation5 + $0x9a8] sm:$0xff] }
 0x1e8   :  { %8484 = vmatpush2.bf16.msra.mxu1 %v12597_v34  ;;  %v601_v25 = vld [vmem:[#allocation5 + $0xd88] sm:$0xff]  ;;  %v12670_v31 = vcombine.high %v473_v23, %v477_v24 }
 0x1e9   :  { %8485 = vmatprep.subr.bf16.mxu1 %v12590_v36  ;;  %v605_v27 = vld [vmem:[#allocation5 + $0xda8] sm:$0xff]  ;;  %v14559_v36 = vld [vmem:[#allocation2] ss:$80 sps:$4 sm:$0xff]  }
 0x1ea   :  { %8443 = vmatpush2.bf16.msra.mxu0 %v12461_v41  ;;  %v12798_v61 = vcombine.high %v601_v25, %v605_v27  ;;  %v465_v33 = vld [vmem:[#allocation5 + $0x948] sm:$0xff] }
 0x1eb   :  { %8444 = vmatprep.subr.bf16.mxu0 %v12454_v43  ;;  %v469_v34 = vld [vmem:[#allocation5 + $0x968] sm:$0xff] }
 0x1ec   :  { %8486 = vmatpush2.bf16.msra.mxu1 %v12589_v42  ;;  %v593_v37 = vld [vmem:[#allocation5 + $0xd48] sm:$0xff]  ;;  %v12669_v42 = vcombine.low %v473_v23, %v477_v24  ;;  %v12662_v46 = vcombine.high %v465_v33, %v469_v34  ;;  %v12661_v62 = vcombine.low %v465_v33, %v469_v34 }
 0x1ed   :  { %8487 = vmatprep.subr.bf16.mxu1 %v12582_v44  ;;  %v597_v38 = vld [vmem:[#allocation5 + $0xd68] sm:$0xff]  ;;  %v12797_v44 = vcombine.low %v601_v25, %v605_v27 }
 0x1ee   :  { %8445 = vmatpush2.bf16.msra.mxu0 %v12453_v52  ;;  %v14560_v41 = vld [vmem:[#allocation2 + $0x8] ss:$80 sps:$4 sm:$0xff]   ;;  %v12790_v51 = vcombine.high %v593_v37, %v597_v38  ;;  %v14562_v58 = vld [vmem:[#allocation2 + $0x1c] ss:$80 sps:$4 sm:$0xff]  }
 0x1ef   :  { %8446 = vmatprep.subr.bf16.mxu0 %v12446_v54  ;;  %v457_v52 = vld [vmem:[#allocation5 + $0x908] sm:$0xff] }
 0x1f0   :  { %8488 = vmatpush2.bf16.msra.mxu1 %v12581_v53  ;;  %v461_v53 = vld [vmem:[#allocation5 + $0x928] sm:$0xff] }
 0x1f1   :  { %8489 = vmatprep.subr.bf16.mxu1 %v12574_v55  ;;  %v585_v55 = vld [vmem:[#allocation5 + $0xd08] sm:$0xff] }
 0x1f2   :  { %8447 = vmatpush2.bf16.msra.mxu0 %v12445_v63  ;;  %v589_v56 = vld [vmem:[#allocation5 + $0xd28] sm:$0xff] }
 0x1f3   :  { %8448 = vmatprep.subr.bf16.mxu0 %v12438_v1  ;;  %v12654_v1 = vcombine.high %v457_v52, %v461_v53  ;;  %v12782_v3 = vcombine.high %v585_v55, %v589_v56  ;;  %v449_v4 = vld [vmem:[#allocation5 + $0x8c8] sm:$0xff] }
 0x1f4   :  { %8490 = vmatpush2.bf16.msra.mxu1 %v12573_v0  ;;  %v12789_v0 = vcombine.low %v593_v37, %v597_v38  ;;  %v453_v5 = vld [vmem:[#allocation5 + $0x8e8] sm:$0xff] }
 0x1f5   :  { %8491 = vmatprep.subr.bf16.mxu1 %v12566_v2  ;;  %v577_v6 = vld [vmem:[#allocation5 + $0xcc8] sm:$0xff] }
 0x1f6   :  { %8449 = vmatpush2.bf16.msra.mxu0 %v12437_v8  ;;  %v581_v8 = vld [vmem:[#allocation5 + $0xce8] sm:$0xff] }
 0x1f7   :  { %8450 = vmatprep.subr.bf16.mxu0 %v12430_v13  ;;  %v12646_v13 = vcombine.high %v449_v4, %v453_v5  ;;  %v441_v15 = vld [vmem:[#allocation5 + $0x888] sm:$0xff] }
 0x1f8   :  { %8492 = vmatpush2.bf16.msra.mxu1 %v12565_v10  ;;  %v12653_v10 = vcombine.low %v457_v52, %v461_v53  ;;  %v445_v16 = vld [vmem:[#allocation5 + $0x8a8] sm:$0xff] }
 0x1f9   :  { %8493 = vmatprep.subr.bf16.mxu1 %v12558_v14  ;;  %v12774_v14 = vcombine.high %v577_v6, %v581_v8  ;;  %v569_v48 = vld [vmem:[#allocation5 + $0xc88] sm:$0xff] }
 0x1fa   :  { %8451 = vmatpush2.bf16.msra.mxu0 %v12429_v19  ;;  %v573_v18 = vld [vmem:[#allocation5 + $0xca8] sm:$0xff]  ;;  %v12645_v19 = vcombine.low %v449_v4, %v453_v5 }
 0x1fb   :  { %8506 = vmatprep.subr.bf16.mxu0 %v12678_v21  ;;  %v8196_v35 = vpop.f32.mrf.mxu0  ;;  %v12638_v21 = vcombine.high %v441_v15, %v445_v16  ;;  %v433_v23 = vld [vmem:[#allocation5 + $0x848] sm:$0xff] }
 0x1fc   :  { %8494 = vmatpush2.bf16.msra.mxu1 %v12557_v20  ;;  %v8197_v39 = vadd.f32 %v8196_v35, %v14953_v11  ;;  %v8239_v40 = vpop.f32.mrf.mxu1  ;;  %v14561_v11 = vld [vmem:[#allocation2 + $0x14] ss:$80 sps:$4 sm:$0xff]   ;;  %v12773_v20 = vcombine.low %v577_v6, %v581_v8  ;;  %v437_v24 = vld [vmem:[#allocation5 + $0x868] sm:$0xff] }
 0x1fd   :  { %8549 = vmatprep.subr.bf16.mxu1 %v12806_v22  ;;  %8453 = vmatmul.mubr.bf16.vlgmr.msra.gmra.mxu0 %v14559_v36  ;;  %v14965_v43 = vpop.f32.mrf.mxu0  ;;  %v12766_v22 = vcombine.high %v569_v48, %v573_v18  ;;  %v561_v25 = vld [vmem:[#allocation5 + $0xc48] sm:$0xff]  ;;  %v12629_v37 = vcombine.low %v433_v23, %v437_v24 }
 0x1fe   :  { %8507 = vmatpush1.bf16.msra.mxu0 %v12677_v28  ;;  %v14967_v47 = vadd.f32 %v8239_v40, %v8197_v39  ;;  %v14969_v50 = vpop.f32.mrf.mxu1  ;;  %8538 = vmatprep.mubr.bf16.mxu0 %v14561_v11  ;;  %v565_v27 = vld [vmem:[#allocation5 + $0xc68] sm:$0xff]  ;;  %v12637_v28 = vcombine.low %v441_v15, %v445_v16 }
 0x1ff   :  { %8496 = vmatmul.mubr.bf16.vlgmr.msra.gmra.mxu1 %v14560_v41  ;;  %8508 = vmatprep.subr.bf16.mxu0 %v12670_v31  ;;  %v8200_v54 = vpop.f32.mrf.mxu0  ;;  %v12630_v31 = vcombine.high %v433_v23, %v437_v24  ;;  %v425_v33 = vld [vmem:[#allocation5 + $0x808] sm:$0xff]  ;;  %v12757_v38 = vcombine.low %v561_v25, %v565_v27 }
 0x200   :  { %8550 = vmatpush1.bf16.msra.mxu1 %v12805_v30  ;;  %8581 = vmatprep.mubr.bf16.mxu1 %v14562_v58  ;;  %v8201_v59 = vadd.f32 %v8200_v54, %v14958_v26  ;;  %v8243_v63 = vpop.f32.mrf.mxu1  ;;  %v12781_v26 = vcombine.low %v585_v55, %v589_v56  ;;  %v12765_v30 = vcombine.low %v569_v48, %v573_v18  ;;  %v429_v34 = vld [vmem:[#allocation5 + $0x828] sm:$0xff] }
 0x201   :  { %8551 = vmatprep.subr.bf16.mxu1 %v12798_v61  ;;  %v12758_v61 = vcombine.high %v561_v25, %v565_v27  ;;  %v553_v35 = vld [vmem:[#allocation5 + $0xc08] sm:$0xff]  ;;  %v12622_v39 = vcombine.high %v425_v33, %v429_v34 }
 0x202   :  { %8509 = vmatpush1.bf16.msra.mxu0 %v12669_v42  ;;  %v14972_v2 = vadd.f32 %v8243_v63, %v8201_v59  ;;  %v557_v36 = vld [vmem:[#allocation5 + $0xc28] sm:$0xff] }
 0x203   :  { %8510 = vmatprep.subr.bf16.mxu0 %v12662_v46  ;;  %v12750_v40 = vcombine.high %v553_v35, %v557_v36  ;;  %v545_v41 = vld [vmem:[#allocation5 + $0xbc8] sm:$0xff]  ;;  %v12749_v52 = vcombine.low %v553_v35, %v557_v36 }
 0x204   :  { %8552 = vmatpush1.bf16.msra.mxu1 %v12797_v44  ;;  %v549_v42 = vld [vmem:[#allocation5 + $0xbe8] sm:$0xff] }
 0x205   :  { %8553 = vmatprep.subr.bf16.mxu1 %v12790_v51  ;;  %v673_v44 = vld [vmem:[#allocation5 + $0xfc8] sm:$0xff]  ;;  %v12621_v51 = vcombine.low %v425_v33, %v429_v34  ;;  %v12742_v53 = vcombine.high %v545_v41, %v549_v42  ;;  %v12741_v59 = vcombine.low %v545_v41, %v549_v42 }
 0x206   :  { %8511 = vmatpush1.bf16.msra.mxu0 %v12661_v62  ;;  %v677_v46 = vld [vmem:[#allocation5 + $0xfe8] sm:$0xff] }
 0x207   :  { %8512 = vmatprep.subr.bf16.mxu0 %v12654_v1  ;;  %v12870_v11 = vcombine.high %v673_v44, %v677_v46  ;;  %v537_v54 = vld [vmem:[#allocation5 + $0xb88] sm:$0xff]  ;;  %v12869_v62 = vcombine.low %v673_v44, %v677_v46 }
 0x208   :  { %8554 = vmatpush1.bf16.msra.mxu1 %v12789_v0  ;;  %v541_v55 = vld [vmem:[#allocation5 + $0xba8] sm:$0xff] }
 0x209   :  { %8555 = vmatprep.subr.bf16.mxu1 %v12782_v3  ;;  %v665_v56 = vld [vmem:[#allocation5 + $0xf88] sm:$0xff]  ;;  %v12734_v63 = vcombine.high %v537_v54, %v541_v55  ;;  %v12733_v6 = vcombine.low %v537_v54, %v541_v55 }
 0x20a   :  { %8513 = vmatpush1.bf16.msra.mxu0 %v12653_v10  ;;  %v669_v58 = vld [vmem:[#allocation5 + $0xfa8] sm:$0xff] }
 0x20b   :  { %8514 = vmatprep.subr.bf16.mxu0 %v12646_v13  ;;  %v12862_v0 = vcombine.high %v665_v56, %v669_v58  ;;  %v529_v1 = vld [vmem:[#allocation5 + $0xb48] sm:$0xff]  ;;  %v12861_v8 = vcombine.low %v665_v56, %v669_v58 }
 0x20c   :  { %8556 = vmatpush1.bf16.msra.mxu1 %v12781_v26  ;;  %v533_v3 = vld [vmem:[#allocation5 + $0xb68] sm:$0xff] }
 0x20d   :  { %8557 = vmatprep.subr.bf16.mxu1 %v12774_v14  ;;  %v657_v4 = vld [vmem:[#allocation5 + $0xf48] sm:$0xff]  ;;  %v12726_v10 = vcombine.high %v529_v1, %v533_v3  ;;  %v12725_v48 = vcombine.low %v529_v1, %v533_v3 }
 0x20e   :  { %8515 = vmatpush1.bf16.msra.mxu0 %v12645_v19  ;;  %v661_v5 = vld [vmem:[#allocation5 + $0xf68] sm:$0xff] }
 0x20f   :  { %8516 = vmatprep.subr.bf16.mxu0 %v12638_v21  ;;  %v12854_v26 = vcombine.high %v657_v4, %v661_v5  ;;  %v521_v13 = vld [vmem:[#allocation5 + $0xb08] sm:$0xff]  ;;  %v12853_v18 = vcombine.low %v657_v4, %v661_v5 }
 0x210   :  { %8558 = vmatpush1.bf16.msra.mxu1 %v12773_v20  ;;  %v525_v14 = vld [vmem:[#allocation5 + $0xb28] sm:$0xff] }
 0x211   :  { %8559 = vmatprep.subr.bf16.mxu1 %v12766_v22  ;;  %v649_v15 = vld [vmem:[#allocation5 + $0xf08] sm:$0xff]  ;;  %v12718_v19 = vcombine.high %v521_v13, %v525_v14  ;;  %v12717_v25 = vcombine.low %v521_v13, %v525_v14 }
 0x212   :  { %8517 = vmatpush1.bf16.msra.mxu0 %v12637_v28  ;;  %v653_v16 = vld [vmem:[#allocation5 + $0xf28] sm:$0xff] }
 0x213   :  { %8518 = vmatprep.subr.bf16.mxu0 %v12630_v31  ;;  %v12846_v20 = vcombine.high %v649_v15, %v653_v16  ;;  %v513_v21 = vld [vmem:[#allocation5 + $0xac8] sm:$0xff]  ;;  %v12845_v27 = vcombine.low %v649_v15, %v653_v16  ;;  %v14974_v16 = vpop.f32.mrf.mxu0 }
 0x214   :  { %8560 = vmatpush1.bf16.msra.mxu1 %v12765_v30  ;;  %v517_v22 = vld [vmem:[#allocation5 + $0xae8] sm:$0xff] }
 0x215   :  { %8561 = vmatprep.subr.bf16.mxu1 %v12758_v61  ;;  %v641_v23 = vld [vmem:[#allocation5 + $0xec8] sm:$0xff]  ;;  %v12710_v28 = vcombine.high %v513_v21, %v517_v22  ;;  %v12709_v35 = vcombine.low %v513_v21, %v517_v22 }
 0x216   :  { %8519 = vmatpush1.bf16.msra.mxu0 %v12629_v37  ;;  %v645_v24 = vld [vmem:[#allocation5 + $0xee8] sm:$0xff] }
 0x217   :  { %8520 = vmatprep.subr.bf16.mxu0 %v12622_v39  ;;  %v12838_v30 = vcombine.high %v641_v23, %v645_v24  ;;  %v505_v31 = vld [vmem:[#allocation5 + $0xa88] sm:$0xff]  ;;  %v12837_v36 = vcombine.low %v641_v23, %v645_v24  ;;  %v14563_v24 = vld [vmem:[#allocation2 + $0x10] ss:$80 sps:$4 sm:$0xff]  }
 0x218   :  { %8562 = vmatpush1.bf16.msra.mxu1 %v12757_v38  ;;  %v509_v61 = vld [vmem:[#allocation5 + $0xaa8] sm:$0xff] }
 0x219   :  { %8563 = vmatprep.subr.bf16.mxu1 %v12750_v40  ;;  %v633_v33 = vld [vmem:[#allocation5 + $0xe88] sm:$0xff]  ;;  %v12702_v37 = vcombine.high %v505_v31, %v509_v61  ;;  %v12701_v44 = vcombine.low %v505_v31, %v509_v61 }
 0x21a   :  { %8521 = vmatpush1.bf16.msra.mxu0 %v12621_v51  ;;  %v637_v34 = vld [vmem:[#allocation5 + $0xea8] sm:$0xff] }
 0x21b   :  { %8522 = vmatprep.subr.bf16.mxu0 %v12742_v53  ;;  %v12830_v38 = vcombine.high %v633_v33, %v637_v34  ;;  %v497_v39 = vld [vmem:[#allocation5 + $0xa48] sm:$0xff]  ;;  %v12829_v46 = vcombine.low %v633_v33, %v637_v34 }
 0x21c   :  { %8564 = vmatpush1.bf16.msra.mxu1 %v12749_v52  ;;  %v501_v40 = vld [vmem:[#allocation5 + $0xa68] sm:$0xff] }
 0x21d   :  { %8565 = vmatprep.subr.bf16.mxu1 %v12870_v11  ;;  %v625_v41 = vld [vmem:[#allocation5 + $0xe48] sm:$0xff]  ;;  %v12694_v51 = vcombine.high %v497_v39, %v501_v40  ;;  %v12693_v56 = vcombine.low %v497_v39, %v501_v40 }
 0x21e   :  { %8523 = vmatpush2.bf16.msra.mxu0 %v12741_v59  ;;  %v629_v42 = vld [vmem:[#allocation5 + $0xe68] sm:$0xff] }
 0x21f   :  { %8524 = vmatprep.subr.bf16.mxu0 %v12734_v63  ;;  %v12822_v52 = vcombine.high %v625_v41, %v629_v42  ;;  %v489_v53 = vld [vmem:[#allocation5 + $0xa08] sm:$0xff]  ;;  %v12821_v58 = vcombine.low %v625_v41, %v629_v42 }
 0x220   :  { %8566 = vmatpush2.bf16.msra.mxu1 %v12869_v62  ;;  %v493_v11 = vld [vmem:[#allocation5 + $0xa28] sm:$0xff] }
 0x221   :  { %8567 = vmatprep.subr.bf16.mxu1 %v12862_v0  ;;  %v617_v54 = vld [vmem:[#allocation5 + $0xe08] sm:$0xff]  ;;  %v12686_v59 = vcombine.high %v489_v53, %v493_v11  ;;  %v12685_v4 = vcombine.low %v489_v53, %v493_v11 }
 0x222   :  { %8525 = vmatpush2.bf16.msra.mxu0 %v12733_v6  ;;  %v621_v55 = vld [vmem:[#allocation5 + $0xe28] sm:$0xff] }
 0x223   :  { %8526 = vmatprep.subr.bf16.mxu0 %v12726_v10  ;;  %v12814_v62 = vcombine.high %v617_v54, %v621_v55  ;;  %v737_v63 = vld [vmem:[#allocation5 + $0x11c8] sm:$0xff]  ;;  %v12813_v5 = vcombine.low %v617_v54, %v621_v55 }
 0x224   :  { %8568 = vmatpush2.bf16.msra.mxu1 %v12861_v8  ;;  %v741_v0 = vld [vmem:[#allocation5 + $0x11e8] sm:$0xff] }
 0x225   :  { %8569 = vmatprep.subr.bf16.mxu1 %v12854_v26  ;;  %v865_v1 = vld [vmem:[#allocation5 + $0x15c8] sm:$0xff]  ;;  %v12934_v6 = vcombine.high %v737_v63, %v741_v0  ;;  %v12933_v15 = vcombine.low %v737_v63, %v741_v0 }
 0x226   :  { %8527 = vmatpush2.bf16.msra.mxu0 %v12725_v48  ;;  %v869_v3 = vld [vmem:[#allocation5 + $0x15e8] sm:$0xff] }
 0x227   :  { %8528 = vmatprep.subr.bf16.mxu0 %v12718_v19  ;;  %v13062_v8 = vcombine.high %v865_v1, %v869_v3  ;;  %v729_v10 = vld [vmem:[#allocation5 + $0x1188] sm:$0xff]  ;;  %v13061_v48 = vcombine.low %v865_v1, %v869_v3  ;;  %v14976_v19 = vpop.f32.mrf.mxu1 }
 0x228   :  { %8570 = vmatpush2.bf16.msra.mxu1 %v12853_v18  ;;  %v733_v26 = vld [vmem:[#allocation5 + $0x11a8] sm:$0xff] }
 0x229   :  { %8571 = vmatprep.subr.bf16.mxu1 %v12846_v20  ;;  %v857_v13 = vld [vmem:[#allocation5 + $0x1588] sm:$0xff]  ;;  %v12926_v18 = vcombine.high %v729_v10, %v733_v26  ;;  %v12925_v61 = vcombine.low %v729_v10, %v733_v26 }
 0x22a   :  { %8529 = vmatpush2.bf16.msra.mxu0 %v12717_v25  ;;  %v861_v14 = vld [vmem:[#allocation5 + $0x15a8] sm:$0xff] }
 0x22b   :  { %8530 = vmatprep.subr.bf16.mxu0 %v12710_v28  ;;  %v13054_v20 = vcombine.high %v857_v13, %v861_v14  ;;  %v721_v21 = vld [vmem:[#allocation5 + $0x1148] sm:$0xff]  ;;  %v13053_v34 = vcombine.low %v857_v13, %v861_v14 }
 0x22c   :  { %8572 = vmatpush2.bf16.msra.mxu1 %v12845_v27  ;;  %v725_v22 = vld [vmem:[#allocation5 + $0x1168] sm:$0xff] }
 0x22d   :  { %8573 = vmatprep.subr.bf16.mxu1 %v12838_v30  ;;  %v849_v25 = vld [vmem:[#allocation5 + $0x1548] sm:$0xff] }
 0x22e   :  { %8531 = vmatpush2.bf16.msra.mxu0 %v12709_v35  ;;  %v853_v27 = vld [vmem:[#allocation5 + $0x1568] sm:$0xff]  ;;  %v12918_v35 = vcombine.high %v721_v21, %v725_v22 }
 0x22f   :  { %8532 = vmatprep.subr.bf16.mxu0 %v12702_v37  ;;  %v14564_v31 = vld [vmem:[#allocation2 + $0x18] ss:$80 sps:$4 sm:$0xff]   ;;  %v13045_v11 = vcombine.low %v849_v25, %v853_v27 }
 0x230   :  { %8574 = vmatpush2.bf16.msra.mxu1 %v12837_v36  ;;  %v713_v39 = vld [vmem:[#allocation5 + $0x1108] sm:$0xff] }
 0x231   :  { %8575 = vmatprep.subr.bf16.mxu1 %v12830_v38  ;;  %v13046_v38 = vcombine.high %v849_v25, %v853_v27  ;;  %v717_v40 = vld [vmem:[#allocation5 + $0x1128] sm:$0xff] }
 0x232   :  { %8533 = vmatpush2.bf16.msra.mxu0 %v12701_v44  ;;  %v841_v42 = vld [vmem:[#allocation5 + $0x1508] sm:$0xff]  ;;  %v12910_v54 = vcombine.high %v713_v39, %v717_v40  ;;  %v12909_v0 = vcombine.low %v713_v39, %v717_v40 }
 0x233   :  { %8534 = vmatprep.subr.bf16.mxu0 %v12694_v51  ;;  %v845_v44 = vld [vmem:[#allocation5 + $0x1528] sm:$0xff] }
 0x234   :  { %8576 = vmatpush2.bf16.msra.mxu1 %v12829_v46  ;;  %v14566_v46 = vld [vmem:[#allocation2 + $0x2c] ss:$80 sps:$4 sm:$0xff]  }
 0x235   :  { %8577 = vmatprep.subr.bf16.mxu1 %v12822_v52  ;;  %v12917_v52 = vcombine.low %v721_v21, %v725_v22  ;;  %v837_v63 = vld [vmem:[#allocation5 + $0x14e8] sm:$0xff] }
 0x236   :  { %8535 = vmatpush2.bf16.msra.mxu0 %v12693_v56  ;;  %v13038_v56 = vcombine.high %v841_v42, %v845_v44  ;;  %v681_v25 = vld [vmem:[#allocation5 + $0x1008] sm:$0xff] }
 0x237   :  { %8536 = vmatprep.subr.bf16.mxu0 %v12686_v59  ;;  %v709_v59 = vld [vmem:[#allocation5 + $0x10e8] sm:$0xff] }
 0x238   :  { %8578 = vmatpush2.bf16.msra.mxu1 %v12821_v58  ;;  %v705_v58 = vld [vmem:[#allocation5 + $0x10c8] sm:$0xff] }
 0x239   :  { %8579 = vmatprep.subr.bf16.mxu1 %v12814_v62  ;;  %v833_v62 = vld [vmem:[#allocation5 + $0x14c8] sm:$0xff]  ;;  %v12902_v1 = vcombine.high %v705_v58, %v709_v59  ;;  %v12901_v10 = vcombine.low %v705_v58, %v709_v59 }
 0x23a   :  { %8537 = vmatpush2.bf16.msra.mxu0 %v12685_v4  ;;  %v13030_v3 = vcombine.high %v833_v62, %v837_v63  ;;  %v697_v4 = vld [vmem:[#allocation5 + $0x1088] sm:$0xff]  ;;  %v13029_v26 = vcombine.low %v833_v62, %v837_v63 }
 0x23b   :  { %8592 = vmatprep.subr.bf16.mxu0 %v12934_v6  ;;  %v825_v6 = vld [vmem:[#allocation5 + $0x1488] sm:$0xff] }
 0x23c   :  { %8580 = vmatpush2.bf16.msra.mxu1 %v12813_v5  ;;  %v701_v5 = vld [vmem:[#allocation5 + $0x10a8] sm:$0xff] }
 0x23d   :  { %8635 = vmatprep.subr.bf16.mxu1 %v13062_v8  ;;  %v8282_v23 = vpop.f32.mrf.mxu0  ;;  %8539 = vmatmul.mubr.bf16.vlgmr.msra.gmra.mxu0 %v14563_v24  ;;  %v829_v8 = vld [vmem:[#allocation5 + $0x14a8] sm:$0xff]  ;;  %v12894_v13 = vcombine.high %v697_v4, %v701_v5  ;;  %v12893_v21 = vcombine.low %v697_v4, %v701_v5 }
 0x23e   :  { %v8283_v28 = vadd.f32 %v8282_v23, %v14967_v47  ;;  %v8325_v30 = vpop.f32.mrf.mxu1  ;;  %8593 = vmatpush1.bf16.msra.mxu0 %v12933_v15  ;;  %v14565_v47 = vld [vmem:[#allocation2 + $0x24] ss:$80 sps:$4 sm:$0xff]   ;;  %v13022_v14 = vcombine.high %v825_v6, %v829_v8  ;;  %v689_v15 = vld [vmem:[#allocation5 + $0x1048] sm:$0xff]  ;;  %v13021_v22 = vcombine.low %v825_v6, %v829_v8 }
 0x23f   :  { %8582 = vmatmul.mubr.bf16.vlgmr.msra.gmra.mxu1 %v14564_v31  ;;  %v14979_v33 = vpop.f32.mrf.mxu0  ;;  %8594 = vmatprep.subr.bf16.mxu0 %v12926_v18  ;;  %v817_v18 = vld [vmem:[#allocation5 + $0x1448] sm:$0xff] }
 0x240   :  { %8636 = vmatpush1.bf16.msra.mxu1 %v13061_v48  ;;  %v14981_v36 = vadd.f32 %v8325_v30, %v8283_v28  ;;  %v14983_v37 = vpop.f32.mrf.mxu1  ;;  %8624 = vmatprep.mubr.bf16.mxu0 %v14565_v47  ;;  %v693_v48 = vld [vmem:[#allocation5 + $0x1068] sm:$0xff] }
 0x241   :  { %8637 = vmatprep.subr.bf16.mxu1 %v13054_v20  ;;  %v8286_v41 = vpop.f32.mrf.mxu0  ;;  %8667 = vmatprep.mubr.bf16.mxu1 %v14566_v46  ;;  %v821_v20 = vld [vmem:[#allocation5 + $0x1468] sm:$0xff]  ;;  %v12886_v23 = vcombine.high %v689_v15, %v693_v48  ;;  %v12885_v31 = vcombine.low %v689_v15, %v693_v48 }
 0x242   :  { %v8287_v51 = vadd.f32 %v8286_v41, %v14972_v2  ;;  %8595 = vmatpush1.bf16.msra.mxu0 %v12925_v61  ;;  %v8329_v53 = vpop.f32.mrf.mxu1  ;;  %v13037_v2 = vcombine.low %v841_v42, %v845_v44  ;;  %v13014_v24 = vcombine.high %v817_v18, %v821_v20  ;;  %v685_v27 = vld [vmem:[#allocation5 + $0x1028] sm:$0xff]  ;;  %v13013_v61 = vcombine.low %v817_v18, %v821_v20 }
 0x243   :  { %8596 = vmatprep.subr.bf16.mxu0 %v12918_v35  ;;  %v809_v28 = vld [vmem:[#allocation5 + $0x1408] sm:$0xff]  ;;  %v12877_v41 = vcombine.low %v681_v25, %v685_v27 }
 0x244   :  { %8638 = vmatpush1.bf16.msra.mxu1 %v13053_v34  ;;  %v14986_v55 = vadd.f32 %v8329_v53, %v8287_v51  ;;  %v813_v30 = vld [vmem:[#allocation5 + $0x1428] sm:$0xff]  ;;  %v12878_v34 = vcombine.high %v681_v25, %v685_v27 }
 0x245   :  { %8639 = vmatprep.subr.bf16.mxu1 %v13046_v38  ;;  %v13006_v35 = vcombine.high %v809_v28, %v813_v30  ;;  %v801_v38 = vld [vmem:[#allocation5 + $0x13c8] sm:$0xff]  ;;  %v13005_v42 = vcombine.low %v809_v28, %v813_v30 }
 0x246   :  { %8597 = vmatpush1.bf16.msra.mxu0 %v12917_v52  ;;  %v805_v39 = vld [vmem:[#allocation5 + $0x13e8] sm:$0xff] }
 0x247   :  { %8598 = vmatprep.subr.bf16.mxu0 %v12910_v54  ;;  %v929_v40 = vld [vmem:[#allocation5 + $0x17c8] sm:$0xff]  ;;  %v12998_v44 = vcombine.high %v801_v38, %v805_v39  ;;  %v12997_v54 = vcombine.low %v801_v38, %v805_v39 }
 0x248   :  { %8640 = vmatpush1.bf16.msra.mxu1 %v13045_v11  ;;  %v933_v47 = vld [vmem:[#allocation5 + $0x17e8] sm:$0xff] }
 0x249   :  { %8641 = vmatprep.subr.bf16.mxu1 %v13038_v56  ;;  %v13126_v46 = vcombine.high %v929_v40, %v933_v47  ;;  %v793_v51 = vld [vmem:[#allocation5 + $0x1388] sm:$0xff]  ;;  %v13125_v56 = vcombine.low %v929_v40, %v933_v47 }
 0x24a   :  { %8599 = vmatpush1.bf16.msra.mxu0 %v12909_v0  ;;  %v797_v52 = vld [vmem:[#allocation5 + $0x13a8] sm:$0xff] }
 0x24b   :  { %8600 = vmatprep.subr.bf16.mxu0 %v12902_v1  ;;  %v921_v53 = vld [vmem:[#allocation5 + $0x1788] sm:$0xff]  ;;  %v12990_v58 = vcombine.high %v793_v51, %v797_v52  ;;  %v12989_v1 = vcombine.low %v793_v51, %v797_v52 }
 0x24c   :  { %8642 = vmatpush1.bf16.msra.mxu1 %v13037_v2  ;;  %v925_v11 = vld [vmem:[#allocation5 + $0x17a8] sm:$0xff] }
 0x24d   :  { %8643 = vmatprep.subr.bf16.mxu1 %v13030_v3  ;;  %v13118_v59 = vcombine.high %v921_v53, %v925_v11  ;;  %v785_v62 = vld [vmem:[#allocation5 + $0x1348] sm:$0xff]  ;;  %v13117_v3 = vcombine.low %v921_v53, %v925_v11 }
 0x24e   :  { %8601 = vmatpush1.bf16.msra.mxu0 %v12901_v10  ;;  %v789_v63 = vld [vmem:[#allocation5 + $0x1368] sm:$0xff] }
 0x24f   :  { %8602 = vmatprep.subr.bf16.mxu0 %v12894_v13  ;;  %v913_v0 = vld [vmem:[#allocation5 + $0x1748] sm:$0xff]  ;;  %v12982_v4 = vcombine.high %v785_v62, %v789_v63  ;;  %v12981_v13 = vcombine.low %v785_v62, %v789_v63 }
 0x250   :  { %8644 = vmatpush1.bf16.msra.mxu1 %v13029_v26  ;;  %v917_v2 = vld [vmem:[#allocation5 + $0x1768] sm:$0xff] }
 0x251   :  { %8645 = vmatprep.subr.bf16.mxu1 %v13022_v14  ;;  %v13110_v5 = vcombine.high %v913_v0, %v917_v2  ;;  %v777_v6 = vld [vmem:[#allocation5 + $0x1308] sm:$0xff]  ;;  %v13109_v14 = vcombine.low %v913_v0, %v917_v2 }
 0x252   :  { %8603 = vmatpush1.bf16.msra.mxu0 %v12893_v21  ;;  %v781_v8 = vld [vmem:[#allocation5 + $0x1328] sm:$0xff] }
 0x253   :  { %8604 = vmatprep.subr.bf16.mxu0 %v12886_v23  ;;  %v905_v10 = vld [vmem:[#allocation5 + $0x1708] sm:$0xff]  ;;  %v12974_v15 = vcombine.high %v777_v6, %v781_v8  ;;  %v12973_v23 = vcombine.low %v777_v6, %v781_v8 }
 0x254   :  { %8646 = vmatpush1.bf16.msra.mxu1 %v13021_v22  ;;  %v909_v26 = vld [vmem:[#allocation5 + $0x1728] sm:$0xff] }
 0x255   :  { %8647 = vmatprep.subr.bf16.mxu1 %v13014_v24  ;;  %v13102_v48 = vcombine.high %v905_v10, %v909_v26  ;;  %v769_v18 = vld [vmem:[#allocation5 + $0x12c8] sm:$0xff]  ;;  %v13101_v24 = vcombine.low %v905_v10, %v909_v26 }
 0x256   :  { %8605 = vmatpush1.bf16.msra.mxu0 %v12885_v31  ;;  %v773_v20 = vld [vmem:[#allocation5 + $0x12e8] sm:$0xff] }
 0x257   :  { %8606 = vmatprep.subr.bf16.mxu0 %v12878_v34  ;;  %v897_v21 = vld [vmem:[#allocation5 + $0x16c8] sm:$0xff]  ;;  %v12966_v25 = vcombine.high %v769_v18, %v773_v20  ;;  %v12965_v34 = vcombine.low %v769_v18, %v773_v20 }
 0x258   :  { %8648 = vmatpush1.bf16.msra.mxu1 %v13013_v61  ;;  %v901_v22 = vld [vmem:[#allocation5 + $0x16e8] sm:$0xff] }
 0x259   :  { %8649 = vmatprep.subr.bf16.mxu1 %v13006_v35  ;;  %v13094_v27 = vcombine.high %v897_v21, %v901_v22  ;;  %v761_v28 = vld [vmem:[#allocation5 + $0x1288] sm:$0xff]  ;;  %v13093_v35 = vcombine.low %v897_v21, %v901_v22  ;;  %v14990_v21 = vpop.f32.mrf.mxu1 }
 0x25a   :  { %8607 = vmatpush1.bf16.msra.mxu0 %v12877_v41  ;;  %v765_v30 = vld [vmem:[#allocation5 + $0x12a8] sm:$0xff] }
 0x25b   :  { %8608 = vmatprep.subr.bf16.mxu0 %v12998_v44  ;;  %v889_v31 = vld [vmem:[#allocation5 + $0x1688] sm:$0xff]  ;;  %v12958_v38 = vcombine.high %v761_v28, %v765_v30  ;;  %v12957_v44 = vcombine.low %v761_v28, %v765_v30 }
 0x25c   :  { %8650 = vmatpush1.bf16.msra.mxu1 %v13005_v42  ;;  %v893_v61 = vld [vmem:[#allocation5 + $0x16a8] sm:$0xff] }
 0x25d   :  { %8651 = vmatprep.subr.bf16.mxu1 %v13126_v46  ;;  %v13086_v39 = vcombine.high %v889_v31, %v893_v61  ;;  %v753_v40 = vld [vmem:[#allocation5 + $0x1248] sm:$0xff]  ;;  %v13085_v46 = vcombine.low %v889_v31, %v893_v61 }
 0x25e   :  { %8609 = vmatpush2.bf16.msra.mxu0 %v12997_v54  ;;  %v757_v47 = vld [vmem:[#allocation5 + $0x1268] sm:$0xff] }
 0x25f   :  { %8610 = vmatprep.subr.bf16.mxu0 %v12990_v58  ;;  %v881_v41 = vld [vmem:[#allocation5 + $0x1648] sm:$0xff]  ;;  %v12950_v51 = vcombine.high %v753_v40, %v757_v47  ;;  %v12949_v58 = vcombine.low %v753_v40, %v757_v47 }
 0x260   :  { %8652 = vmatpush2.bf16.msra.mxu1 %v13125_v56  ;;  %v885_v42 = vld [vmem:[#allocation5 + $0x1668] sm:$0xff] }
 0x261   :  { %8653 = vmatprep.subr.bf16.mxu1 %v13118_v59  ;;  %v13078_v52 = vcombine.high %v881_v41, %v885_v42  ;;  %v745_v53 = vld [vmem:[#allocation5 + $0x1208] sm:$0xff]  ;;  %v13077_v59 = vcombine.low %v881_v41, %v885_v42 }
 0x262   :  { %8611 = vmatpush2.bf16.msra.mxu0 %v12989_v1  ;;  %v749_v11 = vld [vmem:[#allocation5 + $0x1228] sm:$0xff] }
 0x263   :  { %8612 = vmatprep.subr.bf16.mxu0 %v12982_v4  ;;  %v873_v54 = vld [vmem:[#allocation5 + $0x1608] sm:$0xff]  ;;  %v12942_v62 = vcombine.high %v745_v53, %v749_v11  ;;  %v12941_v4 = vcombine.low %v745_v53, %v749_v11 }
 0x264   :  { %8654 = vmatpush2.bf16.msra.mxu1 %v13117_v3  ;;  %v877_v56 = vld [vmem:[#allocation5 + $0x1628] sm:$0xff] }
 0x265   :  { %8655 = vmatprep.subr.bf16.mxu1 %v13110_v5  ;;  %v13070_v63 = vcombine.high %v873_v54, %v877_v56  ;;  %v993_v0 = vld [vmem:[#allocation5 + $0x19c8] sm:$0xff]  ;;  %v13069_v5 = vcombine.low %v873_v54, %v877_v56 }
 0x266   :  { %8613 = vmatpush2.bf16.msra.mxu0 %v12981_v13  ;;  %v997_v2 = vld [vmem:[#allocation5 + $0x19e8] sm:$0xff] }
 0x267   :  { %8614 = vmatprep.subr.bf16.mxu0 %v12974_v15  ;;  %v1121_v1 = vld [vmem:[#allocation5 + $0x1dc8] sm:$0xff]  ;;  %v13190_v6 = vcombine.high %v993_v0, %v997_v2  ;;  %v13189_v15 = vcombine.low %v993_v0, %v997_v2 }
 0x268   :  { %8656 = vmatpush2.bf16.msra.mxu1 %v13109_v14  ;;  %v1125_v3 = vld [vmem:[#allocation5 + $0x1de8] sm:$0xff] }
 0x269   :  { %8657 = vmatprep.subr.bf16.mxu1 %v13102_v48  ;;  %v13318_v8 = vcombine.high %v1121_v1, %v1125_v3  ;;  %v985_v10 = vld [vmem:[#allocation5 + $0x1988] sm:$0xff]  ;;  %v14988_v48 = vpop.f32.mrf.mxu0  ;;  %v13317_v18 = vcombine.low %v1121_v1, %v1125_v3 }
 0x26a   :  { %8615 = vmatpush2.bf16.msra.mxu0 %v12973_v23  ;;  %v989_v26 = vld [vmem:[#allocation5 + $0x19a8] sm:$0xff] }
 0x26b   :  { %8616 = vmatprep.subr.bf16.mxu0 %v12966_v25  ;;  %v1113_v13 = vld [vmem:[#allocation5 + $0x1d88] sm:$0xff]  ;;  %v13182_v20 = vcombine.high %v985_v10, %v989_v26 }
 0x26c   :  { %8658 = vmatpush2.bf16.msra.mxu1 %v13101_v24  ;;  %v1117_v14 = vld [vmem:[#allocation5 + $0x1da8] sm:$0xff] }
 0x26d   :  { %8659 = vmatprep.subr.bf16.mxu1 %v13094_v27  ;;  %v13310_v22 = vcombine.high %v1113_v13, %v1117_v14  ;;  %v977_v23 = vld [vmem:[#allocation5 + $0x1948] sm:$0xff]  ;;  %v14567_v27 = vld [vmem:[#allocation2 + $0x20] ss:$80 sps:$4 sm:$0xff]  }
 0x26e   :  { %8617 = vmatpush2.bf16.msra.mxu0 %v12965_v34  ;;  %v981_v24 = vld [vmem:[#allocation5 + $0x1968] sm:$0xff] }
 0x26f   :  { %8618 = vmatprep.subr.bf16.mxu0 %v12958_v38  ;;  %v1105_v28 = vld [vmem:[#allocation5 + $0x1d48] sm:$0xff]  ;;  %v13174_v40 = vcombine.high %v977_v23, %v981_v24  ;;  %v13173_v56 = vcombine.low %v977_v23, %v981_v24 }
 0x270   :  { %8660 = vmatpush2.bf16.msra.mxu1 %v13093_v35  ;;  %v1109_v30 = vld [vmem:[#allocation5 + $0x1d68] sm:$0xff]  ;;  %v13181_v35 = vcombine.low %v985_v10, %v989_v26 }
 0x271   :  { %8661 = vmatprep.subr.bf16.mxu1 %v13086_v39  ;;  %v14568_v34 = vld [vmem:[#allocation2 + $0x28] ss:$80 sps:$4 sm:$0xff]   ;;  %v13309_v39 = vcombine.low %v1113_v13, %v1117_v14  ;;  %v13302_v42 = vcombine.high %v1105_v28, %v1109_v30  ;;  %v14570_v11 = vld [vmem:[#allocation2 + $0x3c] ss:$80 sps:$4 sm:$0xff]  }
 0x272   :  { %8619 = vmatpush2.bf16.msra.mxu0 %v12957_v44  ;;  %v969_v44 = vld [vmem:[#allocation5 + $0x1908] sm:$0xff] }
 0x273   :  { %8620 = vmatprep.subr.bf16.mxu0 %v12950_v51  ;;  %v14569_v51 = vld [vmem:[#allocation2 + $0x34] ss:$80 sps:$4 sm:$0xff]   ;;  %v1101_v53 = vld [vmem:[#allocation5 + $0x1d28] sm:$0xff] }
 0x274   :  { %8662 = vmatpush2.bf16.msra.mxu1 %v13085_v46  ;;  %v973_v46 = vld [vmem:[#allocation5 + $0x1928] sm:$0xff] }
 0x275   :  { %8663 = vmatprep.subr.bf16.mxu1 %v13078_v52  ;;  %v1097_v52 = vld [vmem:[#allocation5 + $0x1d08] sm:$0xff] }
 0x276   :  { %8621 = vmatpush2.bf16.msra.mxu0 %v12949_v58  ;;  %v13294_v0 = vcombine.high %v1097_v52, %v1101_v53  ;;  %v961_v2 = vld [vmem:[#allocation5 + $0x18c8] sm:$0xff] }
 0x277   :  { %8622 = vmatprep.subr.bf16.mxu0 %v12942_v62  ;;  %v13166_v62 = vcombine.high %v969_v44, %v973_v46  ;;  %v965_v1 = vld [vmem:[#allocation5 + $0x18e8] sm:$0xff] }
 0x278   :  { %8664 = vmatpush2.bf16.msra.mxu1 %v13077_v59  ;;  %v13301_v59 = vcombine.low %v1105_v28, %v1109_v30  ;;  %v1089_v3 = vld [vmem:[#allocation5 + $0x1cc8] sm:$0xff]  ;;  %v13158_v10 = vcombine.high %v961_v2, %v965_v1 }
 0x279   :  { %8665 = vmatprep.subr.bf16.mxu1 %v13070_v63  ;;  %v953_v14 = vld [vmem:[#allocation5 + $0x1888] sm:$0xff] }
 0x27a   :  { %8623 = vmatpush2.bf16.msra.mxu0 %v12941_v4  ;;  %v1093_v4 = vld [vmem:[#allocation5 + $0x1ce8] sm:$0xff] }
 0x27b   :  { %8678 = vmatprep.subr.bf16.mxu0 %v13190_v6  ;;  %v13286_v13 = vcombine.high %v1089_v3, %v1093_v4  ;;  %v13285_v23 = vcombine.low %v1089_v3, %v1093_v4  ;;  %v949_v28 = vld [vmem:[#allocation5 + $0x1868] sm:$0xff] }
 0x27c   :  { %8666 = vmatpush2.bf16.msra.mxu1 %v13069_v5  ;;  %v1073_v30 = vld [vmem:[#allocation5 + $0x1c48] sm:$0xff] }
 0x27d   :  { %8721 = vmatprep.subr.bf16.mxu1 %v13318_v8  ;;  %v8368_v25 = vpop.f32.mrf.mxu0  ;;  %8625 = vmatmul.mubr.bf16.vlgmr.msra.gmra.mxu0 %v14567_v27  ;;  %v13165_v8 = vcombine.low %v969_v44, %v973_v46  ;;  %v945_v27 = vld [vmem:[#allocation5 + $0x1848] sm:$0xff] }
 0x27e   :  { %v8369_v31 = vadd.f32 %v8368_v25, %v14981_v36  ;;  %8679 = vmatpush1.bf16.msra.mxu0 %v13189_v15  ;;  %8710 = vmatprep.mubr.bf16.mxu0 %v14569_v51  ;;  %v957_v15 = vld [vmem:[#allocation5 + $0x18a8] sm:$0xff]  ;;  %v13141_v46 = vcombine.low %v945_v27, %v949_v28 }
 0x27f   :  { %v8411_v61 = vpop.f32.mrf.mxu1  ;;  %8668 = vmatmul.mubr.bf16.vlgmr.msra.gmra.mxu1 %v14568_v34  ;;  %v14993_v38 = vpop.f32.mrf.mxu0  ;;  %8680 = vmatprep.subr.bf16.mxu0 %v13182_v20  ;;  %v1085_v20 = vld [vmem:[#allocation5 + $0x1ca8] sm:$0xff]  ;;  %v13150_v24 = vcombine.high %v953_v14, %v957_v15 }
 0x280   :  { %8722 = vmatpush1.bf16.msra.mxu1 %v13317_v18  ;;  %15283 = vst [vmem:[#allocation25_spill] sm:$0xff] %v14993_v38  ;;  %v8412_v47 = vadd.f32 %v8411_v61, %v8369_v31  ;;  %8753 = vmatprep.mubr.bf16.mxu1 %v14570_v11  ;;  %v1081_v18 = vld [vmem:[#allocation5 + $0x1c88] sm:$0xff]  ;;  %v13149_v61 = vcombine.low %v953_v14, %v957_v15 }
 0x281   :  { %v14995_v41 = vpop.f32.mrf.mxu1  ;;  %8723 = vmatprep.subr.bf16.mxu1 %v13310_v22  ;;  %v8372_v36 = vpop.f32.mrf.mxu0  ;;  %v13157_v22 = vcombine.low %v961_v2, %v965_v1  ;;  %v13278_v25 = vcombine.high %v1081_v18, %v1085_v20  ;;  %v1077_v31 = vld [vmem:[#allocation5 + $0x1c68] sm:$0xff]  ;;  %v13277_v34 = vcombine.low %v1081_v18, %v1085_v20 }
 0x282   :  { %15284 = vst [vmem:[#allocation26_spill] sm:$0xff] %v14995_v41  ;;  %v8373_v54 = vadd.f32 %v8372_v36, %v14986_v55  ;;  %8681 = vmatpush1.bf16.msra.mxu0 %v13181_v35  ;;  %v9710_v5 = vmax.f32 %v8412_v47, 0.0  ;;  %v13293_v55 = vcombine.low %v1097_v52, %v1101_v53  ;;  %v13142_v35 = vcombine.high %v945_v27, %v949_v28  ;;  %v941_v47 = vld [vmem:[#allocation5 + $0x1828] sm:$0xff]  ;;  %v14590_v41 = vld [vmem:[#allocation2 + $0x34] ss:$80 sps:$4 sm:$0xff]  }
 0x283   :  { %v8415_v58 = vpop.f32.mrf.mxu1  ;;  %8682 = vmatprep.subr.bf16.mxu0 %v13174_v40  ;;  %v937_v40 = vld [vmem:[#allocation5 + $0x1808] sm:$0xff]  ;;  %v13269_v51 = vcombine.low %v1073_v30, %v1077_v31 }
 0x284   :  { %8724 = vmatpush1.bf16.msra.mxu1 %v13309_v39  ;;  %v8416_v63 = vadd.f32 %v8415_v58, %v8373_v54  ;;  %v13270_v39 = vcombine.high %v1073_v30, %v1077_v31  ;;  %v1069_v44 = vld [vmem:[#allocation5 + $0x1c28] sm:$0xff]  ;;  %v13134_v36 = vcombine.high %v937_v40, %v941_v47  ;;  %v13133_v58 = vcombine.low %v937_v40, %v941_v47 }
 0x285   :  { %8725 = vmatprep.subr.bf16.mxu1 %v13302_v42  ;;  %v1065_v42 = vld [vmem:[#allocation5 + $0x1c08] sm:$0xff] }
 0x286   :  { %v9718_v6 = vmax.f32 %v8416_v63, 0.0  ;;  %8683 = vmatpush1.bf16.msra.mxu0 %v13173_v56  ;;  %v13262_v52 = vcombine.high %v1065_v42, %v1069_v44  ;;  %v1057_v53 = vld [vmem:[#allocation5 + $0x1bc8] sm:$0xff] }
 0x287   :  { %8684 = vmatprep.subr.bf16.mxu0 %v13166_v62  ;;  %v1061_v11 = vld [vmem:[#allocation5 + $0x1be8] sm:$0xff] }
 0x288   :  { %8726 = vmatpush1.bf16.msra.mxu1 %v13301_v59  ;;  %v14998_v26 = vpack.c.bf16 %v9718_v6, %v9710_v5  ;;  %v1185_v54 = vld [vmem:[#allocation5 + $0x1fc8] sm:$0xff]  ;;  %v13261_v59 = vcombine.low %v1065_v42, %v1069_v44  ;;  %v13254_v62 = vcombine.high %v1057_v53, %v1061_v11  ;;  %v13253_v4 = vcombine.low %v1057_v53, %v1061_v11 }
 0x289   :  { %8727 = vmatprep.subr.bf16.mxu1 %v13294_v0  ;;  %v1189_v56 = vld [vmem:[#allocation5 + $0x1fe8] sm:$0xff] }
 0x28a   :  { %15285 = vst [vmem:[#allocation27_spill] sm:$0xff] %v14998_v26  ;;  %8685 = vmatpush1.bf16.msra.mxu0 %v13165_v8  ;;  %v13382_v63 = vcombine.high %v1185_v54, %v1189_v56  ;;  %v1049_v0 = vld [vmem:[#allocation5 + $0x1b88] sm:$0xff]  ;;  %v13381_v5 = vcombine.low %v1185_v54, %v1189_v56  ;;  %v974_v26 = vld [vmem:[#allocation5 + $0x1930] sm:$0xff] }
 0x28b   :  { %8686 = vmatprep.subr.bf16.mxu0 %v13158_v10  ;;  %v1053_v2 = vld [vmem:[#allocation5 + $0x1ba8] sm:$0xff] }
 0x28c   :  { %8728 = vmatpush1.bf16.msra.mxu1 %v13293_v55  ;;  %v1177_v1 = vld [vmem:[#allocation5 + $0x1f88] sm:$0xff]  ;;  %v13246_v6 = vcombine.high %v1049_v0, %v1053_v2  ;;  %v13245_v15 = vcombine.low %v1049_v0, %v1053_v2 }
 0x28d   :  { %8729 = vmatprep.subr.bf16.mxu1 %v13286_v13  ;;  %v1181_v3 = vld [vmem:[#allocation5 + $0x1fa8] sm:$0xff] }
 0x28e   :  { %8687 = vmatpush1.bf16.msra.mxu0 %v13157_v22  ;;  %v13374_v8 = vcombine.high %v1177_v1, %v1181_v3  ;;  %v1041_v55 = vld [vmem:[#allocation5 + $0x1b48] sm:$0xff]  ;;  %v13373_v18 = vcombine.low %v1177_v1, %v1181_v3 }
 0x28f   :  { %8688 = vmatprep.subr.bf16.mxu0 %v13150_v24  ;;  %v1045_v10 = vld [vmem:[#allocation5 + $0x1b68] sm:$0xff] }
 0x290   :  { %8730 = vmatpush1.bf16.msra.mxu1 %v13285_v23  ;;  %v1169_v13 = vld [vmem:[#allocation5 + $0x1f48] sm:$0xff]  ;;  %v13238_v20 = vcombine.high %v1041_v55, %v1045_v10  ;;  %v13237_v28 = vcombine.low %v1041_v55, %v1045_v10 }
 0x291   :  { %8731 = vmatprep.subr.bf16.mxu1 %v13278_v25  ;;  %v1173_v14 = vld [vmem:[#allocation5 + $0x1f68] sm:$0xff] }
 0x292   :  { %8689 = vmatpush1.bf16.msra.mxu0 %v13149_v61  ;;  %v13366_v22 = vcombine.high %v1169_v13, %v1173_v14  ;;  %v1033_v23 = vld [vmem:[#allocation5 + $0x1b08] sm:$0xff]  ;;  %v13365_v30 = vcombine.low %v1169_v13, %v1173_v14 }
 0x293   :  { %8690 = vmatprep.subr.bf16.mxu0 %v13142_v35  ;;  %v1037_v24 = vld [vmem:[#allocation5 + $0x1b28] sm:$0xff] }
 0x294   :  { %8732 = vmatpush1.bf16.msra.mxu1 %v13277_v34  ;;  %v1161_v25 = vld [vmem:[#allocation5 + $0x1f08] sm:$0xff]  ;;  %v13230_v31 = vcombine.high %v1033_v23, %v1037_v24  ;;  %v13229_v47 = vcombine.low %v1033_v23, %v1037_v24 }
 0x295   :  { %8733 = vmatprep.subr.bf16.mxu1 %v13270_v39  ;;  %v1165_v27 = vld [vmem:[#allocation5 + $0x1f28] sm:$0xff] }
 0x296   :  { %8691 = vmatpush1.bf16.msra.mxu0 %v13141_v46  ;;  %v13358_v61 = vcombine.high %v1161_v25, %v1165_v27  ;;  %v1025_v34 = vld [vmem:[#allocation5 + $0x1ac8] sm:$0xff]  ;;  %v13357_v42 = vcombine.low %v1161_v25, %v1165_v27  ;;  %v15276_v25 = vsub.s32 2, %v14932_v9 }
 0x297   :  { %8692 = vmatprep.subr.bf16.mxu0 %v13134_v36  ;;  %v1029_v35 = vld [vmem:[#allocation5 + $0x1ae8] sm:$0xff] }
 0x298   :  { %8734 = vmatpush1.bf16.msra.mxu1 %v13269_v51  ;;  %v1153_v39 = vld [vmem:[#allocation5 + $0x1ec8] sm:$0xff]  ;;  %v13222_v44 = vcombine.high %v1025_v34, %v1029_v35  ;;  %v13221_v11 = vcombine.low %v1025_v34, %v1029_v35 }
 0x299   :  { %8735 = vmatprep.subr.bf16.mxu1 %v13262_v52  ;;  %v1157_v40 = vld [vmem:[#allocation5 + $0x1ee8] sm:$0xff] }
 0x29a   :  { %8693 = vmatpush1.bf16.msra.mxu0 %v13133_v58  ;;  %v13350_v46 = vcombine.high %v1153_v39, %v1157_v40  ;;  %v1017_v51 = vld [vmem:[#allocation5 + $0x1a88] sm:$0xff]  ;;  %v13349_v54 = vcombine.low %v1153_v39, %v1157_v40  ;;  %v14571_v39 = vld [vmem:[#allocation7] sm:$0xff] }
 0x29b   :  { %8694 = vmatprep.subr.bf16.mxu0 %v13254_v62  ;;  %v1021_v36 = vld [vmem:[#allocation5 + $0x1aa8] sm:$0xff]  ;;  %v1461_v40 = vrot.slane %v14571_v39, %v15276_v25  ;;  %v838_v25 = vld [vmem:[#allocation5 + $0x14f0] sm:$0xff] }
 0x29c   :  { %8736 = vmatpush1.bf16.msra.mxu1 %v13261_v59  ;;  %v1145_v52 = vld [vmem:[#allocation5 + $0x1e88] sm:$0xff]  ;;  %v13214_v56 = vcombine.high %v1017_v51, %v1021_v36  ;;  %v13213_v2 = vcombine.low %v1017_v51, %v1021_v36  ;;  %v15005_v51 = vpop.f32.mrf.mxu1 }
 0x29d   :  { %8737 = vmatprep.subr.bf16.mxu1 %v13382_v63  ;;  %v1149_v53 = vld [vmem:[#allocation5 + $0x1ea8] sm:$0xff]  ;;  %15286 = vst [vmem:[#allocation28_spill] sm:$0xff] %v15005_v51 }
 0x29e   :  { %8695 = vmatpush2.bf16.msra.mxu0 %v13253_v4  ;;  %v13342_v58 = vcombine.high %v1145_v52, %v1149_v53  ;;  %v1009_v59 = vld [vmem:[#allocation5 + $0x1a48] sm:$0xff]  ;;  %v13341_v1 = vcombine.low %v1145_v52, %v1149_v53 }
 0x29f   :  { %8696 = vmatprep.subr.bf16.mxu0 %v13246_v6  ;;  %v1013_v62 = vld [vmem:[#allocation5 + $0x1a68] sm:$0xff] }
 0x2a0   :  { %8738 = vmatpush2.bf16.msra.mxu1 %v13381_v5  ;;  %v1137_v63 = vld [vmem:[#allocation5 + $0x1e48] sm:$0xff]  ;;  %v13206_v3 = vcombine.high %v1009_v59, %v1013_v62  ;;  %v13205_v10 = vcombine.low %v1009_v59, %v1013_v62 }
 0x2a1   :  { %8739 = vmatprep.subr.bf16.mxu1 %v13374_v8  ;;  %v1141_v0 = vld [vmem:[#allocation5 + $0x1e68] sm:$0xff] }
 0x2a2   :  { %8697 = vmatpush2.bf16.msra.mxu0 %v13245_v15  ;;  %v13334_v4 = vcombine.high %v1137_v63, %v1141_v0  ;;  %v1001_v5 = vld [vmem:[#allocation5 + $0x1a08] sm:$0xff]  ;;  %v13333_v13 = vcombine.low %v1137_v63, %v1141_v0 }
 0x2a3   :  { %8698 = vmatprep.subr.bf16.mxu0 %v13238_v20  ;;  %v1005_v6 = vld [vmem:[#allocation5 + $0x1a28] sm:$0xff] }
 0x2a4   :  { %8740 = vmatpush2.bf16.msra.mxu1 %v13373_v18  ;;  %v1129_v8 = vld [vmem:[#allocation5 + $0x1e08] sm:$0xff]  ;;  %v13198_v14 = vcombine.high %v1001_v5, %v1005_v6  ;;  %v13197_v24 = vcombine.low %v1001_v5, %v1005_v6 }
 0x2a5   :  { %8741 = vmatprep.subr.bf16.mxu1 %v13366_v22  ;;  %v1133_v55 = vld [vmem:[#allocation5 + $0x1e28] sm:$0xff] }
 0x2a6   :  { %8699 = vmatpush2.bf16.msra.mxu0 %v13237_v28  ;;  %v13326_v15 = vcombine.high %v1129_v8, %v1133_v55  ;;  %v1249_v18 = vld [vmem:[#allocation5 + $0x21c8] sm:$0xff]  ;;  %v13325_v27 = vcombine.low %v1129_v8, %v1133_v55 }
 0x2a7   :  { %8700 = vmatprep.subr.bf16.mxu0 %v13230_v31  ;;  %v1253_v20 = vld [vmem:[#allocation5 + $0x21e8] sm:$0xff] }
 0x2a8   :  { %8742 = vmatpush2.bf16.msra.mxu1 %v13365_v30  ;;  %v1377_v22 = vld [vmem:[#allocation5 + $0x25c8] sm:$0xff]  ;;  %v13446_v28 = vcombine.high %v1249_v18, %v1253_v20 }
 0x2a9   :  { %8743 = vmatprep.subr.bf16.mxu1 %v13358_v61  ;;  %v1381_v23 = vld [vmem:[#allocation5 + $0x25e8] sm:$0xff] }
 0x2aa   :  { %8701 = vmatpush2.bf16.msra.mxu0 %v13229_v47  ;;  %v13574_v30 = vcombine.high %v1377_v22, %v1381_v23  ;;  %v1241_v31 = vld [vmem:[#allocation5 + $0x2188] sm:$0xff]  ;;  %v13445_v47 = vcombine.low %v1249_v18, %v1253_v20 }
 0x2ab   :  { %8702 = vmatprep.subr.bf16.mxu0 %v13222_v44  ;;  %v1245_v61 = vld [vmem:[#allocation5 + $0x21a8] sm:$0xff]  ;;  %v13573_v44 = vcombine.low %v1377_v22, %v1381_v23 }
 0x2ac   :  { %8744 = vmatpush2.bf16.msra.mxu1 %v13357_v42  ;;  %v1369_v34 = vld [vmem:[#allocation5 + $0x2588] sm:$0xff]  ;;  %v15003_v42 = vpop.f32.mrf.mxu0  ;;  %v13437_v0 = vcombine.low %v1241_v31, %v1245_v61 }
 0x2ad   :  { %8745 = vmatprep.subr.bf16.mxu1 %v13350_v46  ;;  %v1373_v35 = vld [vmem:[#allocation5 + $0x25a8] sm:$0xff]  ;;  %v13438_v46 = vcombine.high %v1241_v31, %v1245_v61 }
 0x2ae   :  { %8703 = vmatpush2.bf16.msra.mxu0 %v13221_v11  ;;  %v13566_v36 = vcombine.high %v1369_v34, %v1373_v35  ;;  %v1233_v52 = vld [vmem:[#allocation5 + $0x2148] sm:$0xff] }
 0x2af   :  { %8704 = vmatprep.subr.bf16.mxu0 %v13214_v56  ;;  %v1237_v53 = vld [vmem:[#allocation5 + $0x2168] sm:$0xff] }
 0x2b0   :  { %8746 = vmatpush2.bf16.msra.mxu1 %v13349_v54  ;;  %v14572_v54 = vld [vmem:[#allocation2 + $0x30] ss:$80 sps:$4 sm:$0xff]   ;;  %v1361_v56 = vld [vmem:[#allocation5 + $0x2548] sm:$0xff]  ;;  %v13429_v22 = vcombine.low %v1233_v52, %v1237_v53 }
 0x2b1   :  { %8747 = vmatprep.subr.bf16.mxu1 %v13342_v58  ;;  %v1365_v58 = vld [vmem:[#allocation5 + $0x2568] sm:$0xff] }
 0x2b2   :  { %8705 = vmatpush2.bf16.msra.mxu0 %v13213_v2  ;;  %v14573_v63 = vld [vmem:[#allocation2 + $0x38] ss:$80 sps:$4 sm:$0xff]   ;;  %v13558_v6 = vcombine.high %v1361_v56, %v1365_v58  ;;  %v14575_v18 = vld [vmem:[#allocation2 + $0x4c] ss:$80 sps:$4 sm:$0xff]  }
 0x2b3   :  { %8706 = vmatprep.subr.bf16.mxu0 %v13206_v3  ;;  %v13430_v3 = vcombine.high %v1233_v52, %v1237_v53  ;;  %v1225_v8 = vld [vmem:[#allocation5 + $0x2108] sm:$0xff] }
 0x2b4   :  { %8748 = vmatpush2.bf16.msra.mxu1 %v13341_v1  ;;  %v13565_v1 = vcombine.low %v1369_v34, %v1373_v35  ;;  %v1229_v55 = vld [vmem:[#allocation5 + $0x2128] sm:$0xff] }
 0x2b5   :  { %8749 = vmatprep.subr.bf16.mxu1 %v13334_v4  ;;  %v1217_v31 = vld [vmem:[#allocation5 + $0x20c8] sm:$0xff]  ;;  %v13421_v39 = vcombine.low %v1225_v8, %v1229_v55 }
 0x2b6   :  { %8707 = vmatpush2.bf16.msra.mxu0 %v13205_v10  ;;  %v14574_v10 = vld [vmem:[#allocation2 + $0x44] ss:$80 sps:$4 sm:$0xff]   ;;  %v1221_v61 = vld [vmem:[#allocation5 + $0x20e8] sm:$0xff] }
 0x2b7   :  { %8708 = vmatprep.subr.bf16.mxu0 %v13198_v14  ;;  %v1353_v14 = vld [vmem:[#allocation5 + $0x2508] sm:$0xff] }
 0x2b8   :  { %8750 = vmatpush2.bf16.msra.mxu1 %v13333_v13  ;;  %v1345_v34 = vld [vmem:[#allocation5 + $0x24c8] sm:$0xff] }
 0x2b9   :  { %8751 = vmatprep.subr.bf16.mxu1 %v13326_v15  ;;  %v1357_v15 = vld [vmem:[#allocation5 + $0x2528] sm:$0xff] }
 0x2ba   :  { %8709 = vmatpush2.bf16.msra.mxu0 %v13197_v24  ;;  %v13557_v24 = vcombine.low %v1361_v56, %v1365_v58  ;;  %v1349_v35 = vld [vmem:[#allocation5 + $0x24e8] sm:$0xff] }
 0x2bb   :  { %8764 = vmatprep.subr.bf16.mxu0 %v13446_v28  ;;  %v1337_v52 = vld [vmem:[#allocation5 + $0x2488] sm:$0xff] }
 0x2bc   :  { %8752 = vmatpush2.bf16.msra.mxu1 %v13325_v27  ;;  %v13422_v27 = vcombine.high %v1225_v8, %v1229_v55  ;;  %v1341_v53 = vld [vmem:[#allocation5 + $0x24a8] sm:$0xff] }
 0x2bd   :  { %8807 = vmatprep.subr.bf16.mxu1 %v13574_v30  ;;  %v8454_v11 = vpop.f32.mrf.mxu0  ;;  %8711 = vmatmul.mubr.bf16.vlgmr.msra.gmra.mxu0 %v14572_v54  ;;  %v13550_v30 = vcombine.high %v1353_v14, %v1357_v15  ;;  %v13541_v54 = vcombine.low %v1345_v34, %v1349_v35  ;;  %v13534_v58 = vcombine.high %v1337_v52, %v1341_v53  ;;  %v1193_v55 = vld [vmem:[#allocation5 + $0x2008] sm:$0xff] }
 0x2be   :  { %v8455_v59 = vadd.f32 %v8454_v11, %v1461_v40  ;;  %8765 = vmatpush1.bf16.msra.mxu0 %v13445_v47  ;;  %8796 = vmatprep.mubr.bf16.mxu0 %v14574_v10  ;;  %v13414_v47 = vcombine.high %v1217_v31, %v1221_v61  ;;  %v13413_v11 = vcombine.low %v1217_v31, %v1221_v61  ;;  %v1197_v10 = vld [vmem:[#allocation5 + $0x2028] sm:$0xff] }
 0x2bf   :  { %v8497_v62 = vpop.f32.mrf.mxu1  ;;  %8754 = vmatmul.mubr.bf16.vlgmr.msra.gmra.mxu1 %v14573_v63  ;;  %v15007_v2 = vpop.f32.mrf.mxu0  ;;  %8766 = vmatprep.subr.bf16.mxu0 %v13438_v46  ;;  %v1209_v46 = vld [vmem:[#allocation5 + $0x2088] sm:$0xff]  ;;  %v13389_v31 = vcombine.low %v1193_v55, %v1197_v10 }
 0x2c0   :  { %8808 = vmatpush1.bf16.msra.mxu1 %v13573_v44  ;;  %v15009_v4 = vadd.f32 %v8497_v62, %v8455_v59  ;;  %8839 = vmatprep.mubr.bf16.mxu1 %v14575_v18  ;;  %v13542_v44 = vcombine.high %v1345_v34, %v1349_v35  ;;  %v1201_v59 = vld [vmem:[#allocation5 + $0x2048] sm:$0xff] }
 0x2c1   :  { %v15011_v5 = vpop.f32.mrf.mxu1  ;;  %8809 = vmatprep.subr.bf16.mxu1 %v13566_v36  ;;  %v8458_v13 = vpop.f32.mrf.mxu0  ;;  %v1213_v36 = vld [vmem:[#allocation5 + $0x20a8] sm:$0xff] }
 0x2c2   :  { %v8459_v20 = vadd.f32 %v8458_v13, %v1461_v40  ;;  %8767 = vmatpush1.bf16.msra.mxu0 %v13437_v0  ;;  %v13549_v40 = vcombine.low %v1353_v14, %v1357_v15  ;;  %v13406_v56 = vcombine.high %v1209_v46, %v1213_v36  ;;  %v1205_v62 = vld [vmem:[#allocation5 + $0x2068] sm:$0xff] }
 0x2c3   :  { %v8501_v23 = vpop.f32.mrf.mxu1  ;;  %8768 = vmatprep.subr.bf16.mxu0 %v13430_v3  ;;  %v1329_v63 = vld [vmem:[#allocation5 + $0x2448] sm:$0xff]  ;;  %v13533_v3 = vcombine.low %v1337_v52, %v1341_v53  ;;  %v13397_v15 = vcombine.low %v1201_v59, %v1205_v62 }
 0x2c4   :  { %8810 = vmatpush1.bf16.msra.mxu1 %v13565_v1  ;;  %v15013_v28 = vadd.f32 %v8501_v23, %v8459_v20  ;;  %v1333_v0 = vld [vmem:[#allocation5 + $0x2468] sm:$0xff]  ;;  %v13405_v1 = vcombine.low %v1209_v46, %v1213_v36  ;;  %v13390_v20 = vcombine.high %v1193_v55, %v1197_v10 }
 0x2c5   :  { %8811 = vmatprep.subr.bf16.mxu1 %v13558_v6  ;;  %v13398_v6 = vcombine.high %v1201_v59, %v1205_v62  ;;  %v13526_v8 = vcombine.high %v1329_v63, %v1333_v0  ;;  %v1321_v13 = vld [vmem:[#allocation5 + $0x2408] sm:$0xff]  ;;  %v13525_v18 = vcombine.low %v1329_v63, %v1333_v0 }
 0x2c6   :  { %8769 = vmatpush1.bf16.msra.mxu0 %v13429_v22  ;;  %v1325_v14 = vld [vmem:[#allocation5 + $0x2428] sm:$0xff] }
 0x2c7   :  { %8770 = vmatprep.subr.bf16.mxu0 %v13422_v27  ;;  %v13518_v22 = vcombine.high %v1321_v13, %v1325_v14  ;;  %v1313_v23 = vld [vmem:[#allocation5 + $0x23c8] sm:$0xff]  ;;  %v13517_v61 = vcombine.low %v1321_v13, %v1325_v14 }
 0x2c8   :  { %8812 = vmatpush1.bf16.msra.mxu1 %v13557_v24  ;;  %v1317_v24 = vld [vmem:[#allocation5 + $0x23e8] sm:$0xff] }
 0x2c9   :  { %8813 = vmatprep.subr.bf16.mxu1 %v13550_v30  ;;  %v1441_v27 = vld [vmem:[#allocation5 + $0x27c8] sm:$0xff]  ;;  %v13510_v34 = vcombine.high %v1313_v23, %v1317_v24  ;;  %v13509_v46 = vcombine.low %v1313_v23, %v1317_v24 }
 0x2ca   :  { %8771 = vmatpush1.bf16.msra.mxu0 %v13421_v39  ;;  %v1445_v30 = vld [vmem:[#allocation5 + $0x27e8] sm:$0xff] }
 0x2cb   :  { %8772 = vmatprep.subr.bf16.mxu0 %v13414_v47  ;;  %v13638_v35 = vcombine.high %v1441_v27, %v1445_v30  ;;  %v1305_v39 = vld [vmem:[#allocation5 + $0x2388] sm:$0xff]  ;;  %v13637_v36 = vcombine.low %v1441_v27, %v1445_v30 }
 0x2cc   :  { %8814 = vmatpush1.bf16.msra.mxu1 %v13549_v40  ;;  %v1309_v40 = vld [vmem:[#allocation5 + $0x23a8] sm:$0xff] }
 0x2cd   :  { %8815 = vmatprep.subr.bf16.mxu1 %v13542_v44  ;;  %v1433_v47 = vld [vmem:[#allocation5 + $0x2788] sm:$0xff]  ;;  %v13502_v52 = vcombine.high %v1305_v39, %v1309_v40  ;;  %v13501_v59 = vcombine.low %v1305_v39, %v1309_v40 }
 0x2ce   :  { %8773 = vmatpush1.bf16.msra.mxu0 %v13413_v11  ;;  %v1437_v44 = vld [vmem:[#allocation5 + $0x27a8] sm:$0xff] }
 0x2cf   :  { %8774 = vmatprep.subr.bf16.mxu0 %v13406_v56  ;;  %v13630_v53 = vcombine.high %v1433_v47, %v1437_v44  ;;  %v1297_v11 = vld [vmem:[#allocation5 + $0x2348] sm:$0xff]  ;;  %v13629_v62 = vcombine.low %v1433_v47, %v1437_v44 }
 0x2d0   :  { %8816 = vmatpush1.bf16.msra.mxu1 %v13541_v54  ;;  %v1301_v54 = vld [vmem:[#allocation5 + $0x2368] sm:$0xff] }
 0x2d1   :  { %8817 = vmatprep.subr.bf16.mxu1 %v13534_v58  ;;  %v1425_v56 = vld [vmem:[#allocation5 + $0x2748] sm:$0xff]  ;;  %v13494_v63 = vcombine.high %v1297_v11, %v1301_v54  ;;  %v13493_v55 = vcombine.low %v1297_v11, %v1301_v54 }
 0x2d2   :  { %8775 = vmatpush1.bf16.msra.mxu0 %v13405_v1  ;;  %v1429_v58 = vld [vmem:[#allocation5 + $0x2768] sm:$0xff] }
 0x2d3   :  { %8776 = vmatprep.subr.bf16.mxu0 %v13398_v6  ;;  %v13622_v0 = vcombine.high %v1425_v56, %v1429_v58  ;;  %v1289_v1 = vld [vmem:[#allocation5 + $0x2308] sm:$0xff]  ;;  %v13621_v10 = vcombine.low %v1425_v56, %v1429_v58 }
 0x2d4   :  { %8818 = vmatpush1.bf16.msra.mxu1 %v13533_v3  ;;  %v1293_v3 = vld [vmem:[#allocation5 + $0x2328] sm:$0xff] }
 0x2d5   :  { %8819 = vmatprep.subr.bf16.mxu1 %v13526_v8  ;;  %v1417_v6 = vld [vmem:[#allocation5 + $0x2708] sm:$0xff]  ;;  %v13486_v13 = vcombine.high %v1289_v1, %v1293_v3  ;;  %v13485_v23 = vcombine.low %v1289_v1, %v1293_v3 }
 0x2d6   :  { %8777 = vmatpush1.bf16.msra.mxu0 %v13397_v15  ;;  %v1421_v8 = vld [vmem:[#allocation5 + $0x2728] sm:$0xff] }
 0x2d7   :  { %8778 = vmatprep.subr.bf16.mxu0 %v13390_v20  ;;  %v13614_v14 = vcombine.high %v1417_v6, %v1421_v8  ;;  %v1281_v15 = vld [vmem:[#allocation5 + $0x22c8] sm:$0xff]  ;;  %v13613_v24 = vcombine.low %v1417_v6, %v1421_v8 }
 0x2d8   :  { %8820 = vmatpush1.bf16.msra.mxu1 %v13525_v18  ;;  %v1285_v18 = vld [vmem:[#allocation5 + $0x22e8] sm:$0xff] }
 0x2d9   :  { %8821 = vmatprep.subr.bf16.mxu1 %v13518_v22  ;;  %v1409_v20 = vld [vmem:[#allocation5 + $0x26c8] sm:$0xff]  ;;  %v13478_v27 = vcombine.high %v1281_v15, %v1285_v18  ;;  %v13477_v39 = vcombine.low %v1281_v15, %v1285_v18 }
 0x2da   :  { %8779 = vmatpush1.bf16.msra.mxu0 %v13389_v31  ;;  %v1413_v22 = vld [vmem:[#allocation5 + $0x26e8] sm:$0xff] }
 0x2db   :  { %8780 = vmatprep.subr.bf16.mxu0 %v13510_v34  ;;  %v13606_v30 = vcombine.high %v1409_v20, %v1413_v22  ;;  %v1273_v31 = vld [vmem:[#allocation5 + $0x2288] sm:$0xff]  ;;  %v13605_v40 = vcombine.low %v1409_v20, %v1413_v22 }
 0x2dc   :  { %8822 = vmatpush1.bf16.msra.mxu1 %v13517_v61  ;;  %v1277_v61 = vld [vmem:[#allocation5 + $0x22a8] sm:$0xff] }
 0x2dd   :  { %8823 = vmatprep.subr.bf16.mxu1 %v13638_v35  ;;  %v1401_v34 = vld [vmem:[#allocation5 + $0x2688] sm:$0xff]  ;;  %v13470_v47 = vcombine.high %v1273_v31, %v1277_v61  ;;  %v13469_v11 = vcombine.low %v1273_v31, %v1277_v61  ;;  %v15015_v61 = vpop.f32.mrf.mxu0 }
 0x2de   :  { %8781 = vmatpush2.bf16.msra.mxu0 %v13509_v46  ;;  %v1405_v35 = vld [vmem:[#allocation5 + $0x26a8] sm:$0xff] }
 0x2df   :  { %8782 = vmatprep.subr.bf16.mxu0 %v13502_v52  ;;  %v13598_v44 = vcombine.high %v1401_v34, %v1405_v35  ;;  %v1265_v46 = vld [vmem:[#allocation5 + $0x2248] sm:$0xff]  ;;  %v13597_v54 = vcombine.low %v1401_v34, %v1405_v35 }
 0x2e0   :  { %8824 = vmatpush2.bf16.msra.mxu1 %v13637_v36  ;;  %v1269_v36 = vld [vmem:[#allocation5 + $0x2268] sm:$0xff] }
 0x2e1   :  { %8825 = vmatprep.subr.bf16.mxu1 %v13630_v53  ;;  %v1393_v52 = vld [vmem:[#allocation5 + $0x2648] sm:$0xff]  ;;  %v13462_v56 = vcombine.high %v1265_v46, %v1269_v36  ;;  %v13461_v1 = vcombine.low %v1265_v46, %v1269_v36  ;;  %v14576_v36 = vld [vmem:[#allocation2 + $0x40] ss:$80 sps:$4 sm:$0xff]  }
 0x2e2   :  { %8783 = vmatpush2.bf16.msra.mxu0 %v13501_v59  ;;  %v1397_v53 = vld [vmem:[#allocation5 + $0x2668] sm:$0xff] }
 0x2e3   :  { %8784 = vmatprep.subr.bf16.mxu0 %v13494_v63  ;;  %v13590_v58 = vcombine.high %v1393_v52, %v1397_v53  ;;  %v1257_v59 = vld [vmem:[#allocation5 + $0x2208] sm:$0xff]  ;;  %v13589_v3 = vcombine.low %v1393_v52, %v1397_v53  ;;  %v338_v52 = vld [vmem:[#allocation5 + $0x550] sm:$0xff] }
 0x2e4   :  { %8826 = vmatpush2.bf16.msra.mxu1 %v13629_v62  ;;  %v1261_v62 = vld [vmem:[#allocation5 + $0x2228] sm:$0xff]  ;;  %v342_v53 = vld [vmem:[#allocation5 + $0x570] sm:$0xff] }
 0x2e5   :  { %8827 = vmatprep.subr.bf16.mxu1 %v13622_v0  ;;  %v1385_v63 = vld [vmem:[#allocation5 + $0x2608] sm:$0xff]  ;;  %v13454_v6 = vcombine.high %v1257_v59, %v1261_v62  ;;  %v13453_v15 = vcombine.low %v1257_v59, %v1261_v62 }
 0x2e6   :  { %8785 = vmatpush2.bf16.msra.mxu0 %v13493_v55  ;;  %v1389_v0 = vld [vmem:[#allocation5 + $0x2628] sm:$0xff]  ;;  %v226_v55 = vld [vmem:[#allocation5 + $0x1d0] sm:$0xff] }
 0x2e7   :  { %8786 = vmatprep.subr.bf16.mxu0 %v13486_v13  ;;  %v13582_v8 = vcombine.high %v1385_v63, %v1389_v0  ;;  %v354_v13 = vld [vmem:[#allocation5 + $0x5d0] sm:$0xff]  ;;  %v13581_v18 = vcombine.low %v1385_v63, %v1389_v0 }
 0x2e8   :  { %8828 = vmatpush2.bf16.msra.mxu1 %v13621_v10  ;;  %v230_v10 = vld [vmem:[#allocation5 + $0x1f0] sm:$0xff] }
 0x2e9   :  { %8829 = vmatprep.subr.bf16.mxu1 %v13614_v14  ;;  %v358_v14 = vld [vmem:[#allocation5 + $0x5f0] sm:$0xff]  ;;  %v12424_v20 = vcombine.high %v226_v55, %v230_v10  ;;  %v12423_v31 = vcombine.low %v226_v55, %v230_v10 }
 0x2ea   :  { %8787 = vmatpush2.bf16.msra.mxu0 %v13485_v23  ;;  %v12552_v22 = vcombine.high %v354_v13, %v358_v14  ;;  %v218_v23 = vld [vmem:[#allocation5 + $0x190] sm:$0xff]  ;;  %v12551_v34 = vcombine.low %v354_v13, %v358_v14  ;;  %v14579_v14 = vld [vmem:[#allocation2 + $0xc] ss:$80 sps:$4 sm:$0xff]  }
 0x2eb   :  { %8788 = vmatprep.subr.bf16.mxu0 %v13478_v27  ;;  %v346_v27 = vld [vmem:[#allocation5 + $0x590] sm:$0xff] }
 0x2ec   :  { %8830 = vmatpush2.bf16.msra.mxu1 %v13613_v24  ;;  %v222_v24 = vld [vmem:[#allocation5 + $0x1b0] sm:$0xff] }
 0x2ed   :  { %8831 = vmatprep.subr.bf16.mxu1 %v13606_v30  ;;  %v350_v30 = vld [vmem:[#allocation5 + $0x5b0] sm:$0xff]  ;;  %v12416_v35 = vcombine.high %v218_v23, %v222_v24 }
 0x2ee   :  { %8789 = vmatpush2.bf16.msra.mxu0 %v13477_v39  ;;  %v15017_v39 = vpop.f32.mrf.mxu1  ;;  %v12543_v62 = vcombine.low %v346_v27, %v350_v30  ;;  %v330_v10 = vld [vmem:[#allocation5 + $0x510] sm:$0xff] }
 0x2ef   :  { %8790 = vmatprep.subr.bf16.mxu0 %v13470_v47  ;;  %v210_v47 = vld [vmem:[#allocation5 + $0x150] sm:$0xff] }
 0x2f0   :  { %8832 = vmatpush2.bf16.msra.mxu1 %v13605_v40  ;;  %v12544_v40 = vcombine.high %v346_v27, %v350_v30  ;;  %v334_v13 = vld [vmem:[#allocation5 + $0x530] sm:$0xff] }
 0x2f1   :  { %8833 = vmatprep.subr.bf16.mxu1 %v13598_v44  ;;  %v214_v44 = vld [vmem:[#allocation5 + $0x170] sm:$0xff]  ;;  %v12528_v27 = vcombine.high %v330_v10, %v334_v13 }
 0x2f2   :  { %8791 = vmatpush2.bf16.msra.mxu0 %v13469_v11  ;;  %v12408_v63 = vcombine.high %v210_v47, %v214_v44  ;;  %v194_v30 = vld [vmem:[#allocation5 + $0xd0] sm:$0xff] }
 0x2f3   :  { %8792 = vmatprep.subr.bf16.mxu0 %v13462_v56  ;;  %v14577_v56 = vld [vmem:[#allocation2 + $0x48] ss:$80 sps:$4 sm:$0xff]  }
 0x2f4   :  { %8834 = vmatpush2.bf16.msra.mxu1 %v13597_v54 }
 0x2f5   :  { %8835 = vmatprep.subr.bf16.mxu1 %v13590_v58  ;;  %v12415_v58 = vcombine.low %v218_v23, %v222_v24 }
 0x2f6   :  { %8793 = vmatpush2.bf16.msra.mxu0 %v13461_v1 }
 0x2f7   :  { %8794 = vmatprep.subr.bf16.mxu0 %v13454_v6  ;;  %v202_v6 = vld [vmem:[#allocation5 + $0x110] sm:$0xff] }
 0x2f8   :  { %8836 = vmatpush2.bf16.msra.mxu1 %v13589_v3  ;;  %v12536_v3 = vcombine.high %v338_v52, %v342_v53 }
 0x2f9   :  { %8837 = vmatprep.subr.bf16.mxu1 %v13582_v8  ;;  %v206_v8 = vld [vmem:[#allocation5 + $0x130] sm:$0xff] }
 0x2fa   :  { %8795 = vmatpush2.bf16.msra.mxu0 %v13453_v15  ;;  %v12400_v23 = vcombine.high %v202_v6, %v206_v8 }
 0x2fb   :  { %8850 = vmatprep.subr.bf16.mxu0 %v12424_v20 }
 0x2fc   :  { %8838 = vmatpush2.bf16.msra.mxu1 %v13581_v18  ;;  %v12407_v18 = vcombine.low %v210_v47, %v214_v44  ;;  %v186_v44 = vld [vmem:[#allocation5 + $0x90] sm:$0xff] }
 0x2fd   :  { %8893 = vmatprep.subr.bf16.mxu1 %v12552_v22  ;;  %v8540_v46 = vpop.f32.mrf.mxu0  ;;  %8797 = vmatmul.mubr.bf16.vlgmr.msra.gmra.mxu0 %v14576_v36  ;;  %v12535_v22 = vcombine.low %v338_v52, %v342_v53  ;;  %v190_v36 = vld [vmem:[#allocation5 + $0xb0] sm:$0xff] }
 0x2fe   :  { %v8541_v11 = vadd.f32 %v8540_v46, %v15009_v4  ;;  %8851 = vmatpush1.bf16.msra.mxu0 %v12423_v31  ;;  %v14578_v4 = vld [vmem:[#allocation2 + $0x4] ss:$80 sps:$4 sm:$0xff]  }
 0x2ff   :  { %v8583_v54 = vpop.f32.mrf.mxu1  ;;  %8840 = vmatmul.mubr.bf16.vlgmr.msra.gmra.mxu1 %v14577_v56  ;;  %v15020_v59 = vpop.f32.mrf.mxu0  ;;  %8852 = vmatprep.subr.bf16.mxu0 %v12416_v35  ;;  %v198_v31 = vld [vmem:[#allocation5 + $0xf0] sm:$0xff]  ;;  %v12384_v56 = vcombine.high %v186_v44, %v190_v36 }
 0x300   :  { %8894 = vmatpush1.bf16.msra.mxu1 %v12551_v34  ;;  %v15022_v0 = vadd.f32 %v8583_v54, %v8541_v11  ;;  %8882 = vmatprep.mubr.bf16.mxu0 %v14578_v4  ;;  %v322_v34 = vld [vmem:[#allocation5 + $0x4d0] sm:$0xff]  ;;  %v12392_v46 = vcombine.high %v194_v30, %v198_v31  ;;  %v12391_v11 = vcombine.low %v194_v30, %v198_v31 }
 0x301   :  { %v15024_v1 = vpop.f32.mrf.mxu1  ;;  %8895 = vmatprep.subr.bf16.mxu1 %v12544_v40  ;;  %v8544_v55 = vpop.f32.mrf.mxu0  ;;  %8925 = vmatprep.mubr.bf16.mxu1 %v14579_v14  ;;  %v326_v35 = vld [vmem:[#allocation5 + $0x4f0] sm:$0xff]  ;;  %v12399_v40 = vcombine.low %v202_v6, %v206_v8  ;;  %v12383_v8 = vcombine.low %v186_v44, %v190_v36 }
 0x302   :  { %v8545_v15 = vadd.f32 %v8544_v55, %v15013_v28  ;;  %8853 = vmatpush1.bf16.msra.mxu0 %v12415_v58  ;;  %v12527_v28 = vcombine.low %v330_v10, %v334_v13  ;;  %v12520_v47 = vcombine.high %v322_v34, %v326_v35  ;;  %v314_v52 = vld [vmem:[#allocation5 + $0x490] sm:$0xff]  ;;  %v12519_v54 = vcombine.low %v322_v34, %v326_v35 }
 0x303   :  { %v8587_v20 = vpop.f32.mrf.mxu1  ;;  %8854 = vmatprep.subr.bf16.mxu0 %v12408_v63  ;;  %v318_v53 = vld [vmem:[#allocation5 + $0x4b0] sm:$0xff] }
 0x304   :  { %8896 = vmatpush1.bf16.msra.mxu1 %v12543_v62  ;;  %v15027_v24 = vadd.f32 %v8587_v20, %v8545_v15  ;;  %v12512_v58 = vcombine.high %v314_v52, %v318_v53  ;;  %v178_v62 = vld [vmem:[#allocation5 + $0x50] sm:$0xff]  ;;  %v12511_v4 = vcombine.low %v314_v52, %v318_v53 }
 0x305   :  { %8897 = vmatprep.subr.bf16.mxu1 %v12536_v3  ;;  %v182_v63 = vld [vmem:[#allocation5 + $0x70] sm:$0xff] }
 0x306   :  { %8855 = vmatpush1.bf16.msra.mxu0 %v12407_v18  ;;  %v306_v3 = vld [vmem:[#allocation5 + $0x450] sm:$0xff]  ;;  %v12376_v55 = vcombine.high %v178_v62, %v182_v63  ;;  %v12375_v20 = vcombine.low %v178_v62, %v182_v63 }
 0x307   :  { %8856 = vmatprep.subr.bf16.mxu0 %v12400_v23  ;;  %v310_v6 = vld [vmem:[#allocation5 + $0x470] sm:$0xff] }
 0x308   :  { %8898 = vmatpush1.bf16.msra.mxu1 %v12535_v22  ;;  %v12504_v10 = vcombine.high %v306_v3, %v310_v6  ;;  %v170_v13 = vld [vmem:[#allocation5 + $0x10] sm:$0xff]  ;;  %v12503_v22 = vcombine.low %v306_v3, %v310_v6 }
 0x309   :  { %8899 = vmatprep.subr.bf16.mxu1 %v12528_v27  ;;  %v174_v14 = vld [vmem:[#allocation5 + $0x30] sm:$0xff] }
 0x30a   :  { %8857 = vmatpush1.bf16.msra.mxu0 %v12399_v40  ;;  %v298_v15 = vld [vmem:[#allocation5 + $0x410] sm:$0xff]  ;;  %v12368_v23 = vcombine.high %v170_v13, %v174_v14  ;;  %v12367_v40 = vcombine.low %v170_v13, %v174_v14 }
 0x30b   :  { %8858 = vmatprep.subr.bf16.mxu0 %v12392_v46  ;;  %v302_v18 = vld [vmem:[#allocation5 + $0x430] sm:$0xff] }
 0x30c   :  { %8900 = vmatpush1.bf16.msra.mxu1 %v12527_v28  ;;  %v12496_v27 = vcombine.high %v298_v15, %v302_v18  ;;  %v290_v30 = vld [vmem:[#allocation5 + $0x3d0] sm:$0xff]  ;;  %v12495_v28 = vcombine.low %v298_v15, %v302_v18 }
 0x30d   :  { %8901 = vmatprep.subr.bf16.mxu1 %v12520_v47  ;;  %v294_v31 = vld [vmem:[#allocation5 + $0x3f0] sm:$0xff] }
 0x30e   :  { %8859 = vmatpush1.bf16.msra.mxu0 %v12391_v11  ;;  %v418_v34 = vld [vmem:[#allocation5 + $0x7d0] sm:$0xff]  ;;  %v12488_v46 = vcombine.high %v290_v30, %v294_v31  ;;  %v12487_v11 = vcombine.low %v290_v30, %v294_v31 }
 0x30f   :  { %8860 = vmatprep.subr.bf16.mxu0 %v12384_v56  ;;  %v422_v35 = vld [vmem:[#allocation5 + $0x7f0] sm:$0xff] }
 0x310   :  { %8902 = vmatpush1.bf16.msra.mxu1 %v12519_v54  ;;  %v12616_v47 = vcombine.high %v418_v34, %v422_v35  ;;  %v282_v44 = vld [vmem:[#allocation5 + $0x390] sm:$0xff]  ;;  %v12615_v54 = vcombine.low %v418_v34, %v422_v35 }
 0x311   :  { %8903 = vmatprep.subr.bf16.mxu1 %v12512_v58  ;;  %v286_v36 = vld [vmem:[#allocation5 + $0x3b0] sm:$0xff] }
 0x312   :  { %8861 = vmatpush1.bf16.msra.mxu0 %v12383_v8  ;;  %v410_v52 = vld [vmem:[#allocation5 + $0x790] sm:$0xff]  ;;  %v12480_v56 = vcombine.high %v282_v44, %v286_v36  ;;  %v12479_v8 = vcombine.low %v282_v44, %v286_v36 }
 0x313   :  { %8862 = vmatprep.subr.bf16.mxu0 %v12376_v55  ;;  %v414_v53 = vld [vmem:[#allocation5 + $0x7b0] sm:$0xff] }
 0x314   :  { %8904 = vmatpush1.bf16.msra.mxu1 %v12511_v4  ;;  %v12608_v58 = vcombine.high %v410_v52, %v414_v53  ;;  %v274_v62 = vld [vmem:[#allocation5 + $0x350] sm:$0xff]  ;;  %v12607_v4 = vcombine.low %v410_v52, %v414_v53 }
 0x315   :  { %8905 = vmatprep.subr.bf16.mxu1 %v12504_v10  ;;  %v278_v63 = vld [vmem:[#allocation5 + $0x370] sm:$0xff] }
 0x316   :  { %8863 = vmatpush1.bf16.msra.mxu0 %v12375_v20  ;;  %v402_v3 = vld [vmem:[#allocation5 + $0x750] sm:$0xff]  ;;  %v12472_v55 = vcombine.high %v274_v62, %v278_v63  ;;  %v12471_v20 = vcombine.low %v274_v62, %v278_v63 }
 0x317   :  { %8864 = vmatprep.subr.bf16.mxu0 %v12368_v23  ;;  %v406_v6 = vld [vmem:[#allocation5 + $0x770] sm:$0xff] }
 0x318   :  { %8906 = vmatpush1.bf16.msra.mxu1 %v12503_v22  ;;  %v12600_v10 = vcombine.high %v402_v3, %v406_v6  ;;  %v266_v13 = vld [vmem:[#allocation5 + $0x310] sm:$0xff]  ;;  %v12599_v22 = vcombine.low %v402_v3, %v406_v6 }
 0x319   :  { %8907 = vmatprep.subr.bf16.mxu1 %v12496_v27  ;;  %v270_v14 = vld [vmem:[#allocation5 + $0x330] sm:$0xff] }
 0x31a   :  { %8865 = vmatpush1.bf16.msra.mxu0 %v12367_v40  ;;  %v394_v15 = vld [vmem:[#allocation5 + $0x710] sm:$0xff]  ;;  %v12464_v23 = vcombine.high %v266_v13, %v270_v14  ;;  %v12463_v40 = vcombine.low %v266_v13, %v270_v14 }
 0x31b   :  { %8866 = vmatprep.subr.bf16.mxu0 %v12488_v46  ;;  %v398_v18 = vld [vmem:[#allocation5 + $0x730] sm:$0xff] }
 0x31c   :  { %8908 = vmatpush1.bf16.msra.mxu1 %v12495_v28  ;;  %v12592_v27 = vcombine.high %v394_v15, %v398_v18  ;;  %v258_v30 = vld [vmem:[#allocation5 + $0x2d0] sm:$0xff]  ;;  %v12591_v28 = vcombine.low %v394_v15, %v398_v18 }
 0x31d   :  { %8909 = vmatprep.subr.bf16.mxu1 %v12616_v47  ;;  %v262_v31 = vld [vmem:[#allocation5 + $0x2f0] sm:$0xff] }
 0x31e   :  { %8867 = vmatpush2.bf16.msra.mxu0 %v12487_v11  ;;  %v386_v34 = vld [vmem:[#allocation5 + $0x6d0] sm:$0xff]  ;;  %v12456_v46 = vcombine.high %v258_v30, %v262_v31  ;;  %v12455_v11 = vcombine.low %v258_v30, %v262_v31 }
 0x31f   :  { %8868 = vmatprep.subr.bf16.mxu0 %v12480_v56  ;;  %v390_v35 = vld [vmem:[#allocation5 + $0x6f0] sm:$0xff] }
 0x320   :  { %8910 = vmatpush2.bf16.msra.mxu1 %v12615_v54  ;;  %v12584_v47 = vcombine.high %v386_v34, %v390_v35  ;;  %v250_v44 = vld [vmem:[#allocation5 + $0x290] sm:$0xff]  ;;  %v12583_v54 = vcombine.low %v386_v34, %v390_v35 }
 0x321   :  { %8911 = vmatprep.subr.bf16.mxu1 %v12608_v58  ;;  %v254_v36 = vld [vmem:[#allocation5 + $0x2b0] sm:$0xff] }
 0x322   :  { %8869 = vmatpush2.bf16.msra.mxu0 %v12479_v8  ;;  %v378_v52 = vld [vmem:[#allocation5 + $0x690] sm:$0xff]  ;;  %v12448_v56 = vcombine.high %v250_v44, %v254_v36  ;;  %v12447_v8 = vcombine.low %v250_v44, %v254_v36 }
 0x323   :  { %8870 = vmatprep.subr.bf16.mxu0 %v12472_v55  ;;  %v382_v53 = vld [vmem:[#allocation5 + $0x6b0] sm:$0xff] }
 0x324   :  { %8912 = vmatpush2.bf16.msra.mxu1 %v12607_v4  ;;  %v12576_v58 = vcombine.high %v378_v52, %v382_v53  ;;  %v242_v62 = vld [vmem:[#allocation5 + $0x250] sm:$0xff]  ;;  %v12575_v4 = vcombine.low %v378_v52, %v382_v53 }
 0x325   :  { %8913 = vmatprep.subr.bf16.mxu1 %v12600_v10  ;;  %v246_v63 = vld [vmem:[#allocation5 + $0x270] sm:$0xff] }
 0x326   :  { %8871 = vmatpush2.bf16.msra.mxu0 %v12471_v20  ;;  %v370_v3 = vld [vmem:[#allocation5 + $0x650] sm:$0xff]  ;;  %v12440_v55 = vcombine.high %v242_v62, %v246_v63  ;;  %v12439_v20 = vcombine.low %v242_v62, %v246_v63  ;;  %v15031_v62 = vpop.f32.mrf.mxu1 }
 0x327   :  { %8872 = vmatprep.subr.bf16.mxu0 %v12464_v23  ;;  %v374_v6 = vld [vmem:[#allocation5 + $0x670] sm:$0xff] }
 0x328   :  { %8914 = vmatpush2.bf16.msra.mxu1 %v12599_v22  ;;  %v12568_v10 = vcombine.high %v370_v3, %v374_v6  ;;  %v234_v13 = vld [vmem:[#allocation5 + $0x210] sm:$0xff]  ;;  %v12567_v22 = vcombine.low %v370_v3, %v374_v6 }
 0x329   :  { %8915 = vmatprep.subr.bf16.mxu1 %v12592_v27  ;;  %v238_v14 = vld [vmem:[#allocation5 + $0x230] sm:$0xff] }
 0x32a   :  { %8873 = vmatpush2.bf16.msra.mxu0 %v12463_v40  ;;  %v362_v15 = vld [vmem:[#allocation5 + $0x610] sm:$0xff]  ;;  %v12432_v23 = vcombine.high %v234_v13, %v238_v14  ;;  %v12431_v40 = vcombine.low %v234_v13, %v238_v14 }
 0x32b   :  { %8874 = vmatprep.subr.bf16.mxu0 %v12456_v46  ;;  %v366_v18 = vld [vmem:[#allocation5 + $0x630] sm:$0xff] }
 0x32c   :  { %8916 = vmatpush2.bf16.msra.mxu1 %v12591_v28  ;;  %v12560_v27 = vcombine.high %v362_v15, %v366_v18  ;;  %v482_v30 = vld [vmem:[#allocation5 + $0x9d0] sm:$0xff]  ;;  %v12559_v28 = vcombine.low %v362_v15, %v366_v18  ;;  %v14581_v15 = vld [vmem:[#allocation2 + $0x8] ss:$80 sps:$4 sm:$0xff]  }
 0x32d   :  { %8917 = vmatprep.subr.bf16.mxu1 %v12584_v47  ;;  %v486_v31 = vld [vmem:[#allocation5 + $0x9f0] sm:$0xff] }
 0x32e   :  { %8875 = vmatpush2.bf16.msra.mxu0 %v12455_v11  ;;  %v610_v34 = vld [vmem:[#allocation5 + $0xdd0] sm:$0xff]  ;;  %v12680_v46 = vcombine.high %v482_v30, %v486_v31  ;;  %v12679_v11 = vcombine.low %v482_v30, %v486_v31 }
 0x32f   :  { %8876 = vmatprep.subr.bf16.mxu0 %v12448_v56  ;;  %v614_v35 = vld [vmem:[#allocation5 + $0xdf0] sm:$0xff] }
 0x330   :  { %8918 = vmatpush2.bf16.msra.mxu1 %v12583_v54  ;;  %v12808_v47 = vcombine.high %v610_v34, %v614_v35  ;;  %v474_v44 = vld [vmem:[#allocation5 + $0x990] sm:$0xff]  ;;  %v15029_v54 = vpop.f32.mrf.mxu0  ;;  %v12807_v56 = vcombine.low %v610_v34, %v614_v35 }
 0x331   :  { %8919 = vmatprep.subr.bf16.mxu1 %v12576_v58  ;;  %v478_v36 = vld [vmem:[#allocation5 + $0x9b0] sm:$0xff] }
 0x332   :  { %8877 = vmatpush2.bf16.msra.mxu0 %v12447_v8  ;;  %v602_v52 = vld [vmem:[#allocation5 + $0xd90] sm:$0xff]  ;;  %v12672_v58 = vcombine.high %v474_v44, %v478_v36  ;;  %v12671_v18 = vcombine.low %v474_v44, %v478_v36 }
 0x333   :  { %8878 = vmatprep.subr.bf16.mxu0 %v12440_v55  ;;  %v606_v53 = vld [vmem:[#allocation5 + $0xdb0] sm:$0xff] }
 0x334   :  { %8920 = vmatpush2.bf16.msra.mxu1 %v12575_v4  ;;  %v12800_v63 = vcombine.high %v602_v52, %v606_v53  ;;  %v466_v3 = vld [vmem:[#allocation5 + $0x950] sm:$0xff] }
 0x335   :  { %8921 = vmatprep.subr.bf16.mxu1 %v12568_v10  ;;  %v470_v6 = vld [vmem:[#allocation5 + $0x970] sm:$0xff] }
 0x336   :  { %8879 = vmatpush2.bf16.msra.mxu0 %v12439_v20  ;;  %v14580_v4 = vld [vmem:[#allocation2] ss:$80 sps:$4 sm:$0xff]   ;;  %v12663_v36 = vcombine.low %v466_v3, %v470_v6 }
 0x337   :  { %8880 = vmatprep.subr.bf16.mxu0 %v12432_v23  ;;  %v594_v55 = vld [vmem:[#allocation5 + $0xd50] sm:$0xff]  ;;  %v12664_v23 = vcombine.high %v466_v3, %v470_v6 }
 0x338   :  { %8922 = vmatpush2.bf16.msra.mxu1 %v12567_v22  ;;  %v598_v10 = vld [vmem:[#allocation5 + $0xd70] sm:$0xff]  ;;  %v12799_v22 = vcombine.low %v602_v52, %v606_v53 }
 0x339   :  { %8923 = vmatprep.subr.bf16.mxu1 %v12560_v27  ;;  %v12792_v31 = vcombine.high %v594_v55, %v598_v10  ;;  %v458_v34 = vld [vmem:[#allocation5 + $0x910] sm:$0xff]  ;;  %v12791_v53 = vcombine.low %v594_v55, %v598_v10 }
 0x33a   :  { %8881 = vmatpush2.bf16.msra.mxu0 %v12431_v40  ;;  %v462_v35 = vld [vmem:[#allocation5 + $0x930] sm:$0xff] }
 0x33b   :  { %8936 = vmatprep.subr.bf16.mxu0 %v12680_v46  ;;  %v590_v46 = vld [vmem:[#allocation5 + $0xd30] sm:$0xff] }
 0x33c   :  { %8924 = vmatpush2.bf16.msra.mxu1 %v12559_v28  ;;  %v586_v28 = vld [vmem:[#allocation5 + $0xd10] sm:$0xff] }
 0x33d   :  { %8979 = vmatprep.subr.bf16.mxu1 %v12808_v47  ;;  %v8626_v8 = vpop.f32.mrf.mxu0  ;;  %8883 = vmatmul.mubr.bf16.vlgmr.msra.gmra.mxu0 %v14580_v4  ;;  %v14583_v47 = vld [vmem:[#allocation2 + $0x1c] ss:$80 sps:$4 sm:$0xff]   ;;  %v578_v4 = vld [vmem:[#allocation5 + $0xcd0] sm:$0xff] }
 0x33e   :  { %v8627_v13 = vadd.f32 %v8626_v8, %v15022_v0  ;;  %8937 = vmatpush1.bf16.msra.mxu0 %v12679_v11  ;;  %v14582_v0 = vld [vmem:[#allocation2 + $0x14] ss:$80 sps:$4 sm:$0xff]   ;;  %v12656_v11 = vcombine.high %v458_v34, %v462_v35 }
 0x33f   :  { %v8669_v14 = vpop.f32.mrf.mxu1  ;;  %8926 = vmatmul.mubr.bf16.vlgmr.msra.gmra.mxu1 %v14581_v15  ;;  %v15034_v20 = vpop.f32.mrf.mxu0  ;;  %8938 = vmatprep.subr.bf16.mxu0 %v12672_v58  ;;  %v12784_v58 = vcombine.high %v586_v28, %v590_v46  ;;  %v454_v8 = vld [vmem:[#allocation5 + $0x8f0] sm:$0xff] }
 0x340   :  { %8980 = vmatpush1.bf16.msra.mxu1 %v12807_v56  ;;  %v15036_v27 = vadd.f32 %v8669_v14, %v8627_v13  ;;  %8968 = vmatprep.mubr.bf16.mxu0 %v14582_v0  ;;  %v582_v13 = vld [vmem:[#allocation5 + $0xcf0] sm:$0xff]  ;;  %v12655_v14 = vcombine.low %v458_v34, %v462_v35 }
 0x341   :  { %v15038_v30 = vpop.f32.mrf.mxu1  ;;  %8981 = vmatprep.subr.bf16.mxu1 %v12800_v63  ;;  %v8630_v40 = vpop.f32.mrf.mxu0  ;;  %9011 = vmatprep.mubr.bf16.mxu1 %v14583_v47  ;;  %v450_v63 = vld [vmem:[#allocation5 + $0x8d0] sm:$0xff]  ;;  %v12776_v3 = vcombine.high %v578_v4, %v582_v13 }
 0x342   :  { %v8631_v44 = vadd.f32 %v8630_v40, %v15027_v24  ;;  %8939 = vmatpush1.bf16.msra.mxu0 %v12671_v18  ;;  %v12783_v24 = vcombine.low %v586_v28, %v590_v46  ;;  %v12648_v15 = vcombine.high %v450_v63, %v454_v8  ;;  %v442_v6 = vld [vmem:[#allocation5 + $0x890] sm:$0xff] }
 0x343   :  { %v8673_v52 = vpop.f32.mrf.mxu1  ;;  %8940 = vmatprep.subr.bf16.mxu0 %v12664_v23  ;;  %v446_v18 = vld [vmem:[#allocation5 + $0x8b0] sm:$0xff]  ;;  %v12775_v23 = vcombine.low %v578_v4, %v582_v13 }
 0x344   :  { %8982 = vmatpush1.bf16.msra.mxu1 %v12799_v22  ;;  %v15041_v56 = vadd.f32 %v8673_v52, %v8631_v44  ;;  %v570_v55 = vld [vmem:[#allocation5 + $0xc90] sm:$0xff]  ;;  %v12647_v22 = vcombine.low %v450_v63, %v454_v8  ;;  %v12639_v28 = vcombine.low %v442_v6, %v446_v18 }
 0x345   :  { %8983 = vmatprep.subr.bf16.mxu1 %v12792_v31  ;;  %v574_v10 = vld [vmem:[#allocation5 + $0xcb0] sm:$0xff]  ;;  %v12640_v31 = vcombine.high %v442_v6, %v446_v18 }
 0x346   :  { %8941 = vmatpush1.bf16.msra.mxu0 %v12663_v36  ;;  %v12768_v0 = vcombine.high %v570_v55, %v574_v10  ;;  %v434_v40 = vld [vmem:[#allocation5 + $0x850] sm:$0xff]  ;;  %v12767_v46 = vcombine.low %v570_v55, %v574_v10 }
 0x347   :  { %8942 = vmatprep.subr.bf16.mxu0 %v12656_v11  ;;  %v438_v34 = vld [vmem:[#allocation5 + $0x870] sm:$0xff] }
 0x348   :  { %8984 = vmatpush1.bf16.msra.mxu1 %v12791_v53  ;;  %v562_v35 = vld [vmem:[#allocation5 + $0xc50] sm:$0xff]  ;;  %v12632_v44 = vcombine.high %v434_v40, %v438_v34  ;;  %v12631_v63 = vcombine.low %v434_v40, %v438_v34 }
 0x349   :  { %8985 = vmatprep.subr.bf16.mxu1 %v12784_v58  ;;  %v566_v47 = vld [vmem:[#allocation5 + $0xc70] sm:$0xff] }
 0x34a   :  { %8943 = vmatpush1.bf16.msra.mxu0 %v12655_v14  ;;  %v12760_v36 = vcombine.high %v562_v35, %v566_v47  ;;  %v426_v52 = vld [vmem:[#allocation5 + $0x810] sm:$0xff]  ;;  %v12759_v8 = vcombine.low %v562_v35, %v566_v47 }
 0x34b   :  { %8944 = vmatprep.subr.bf16.mxu0 %v12648_v15  ;;  %v430_v53 = vld [vmem:[#allocation5 + $0x830] sm:$0xff] }
 0x34c   :  { %8986 = vmatpush1.bf16.msra.mxu1 %v12783_v24  ;;  %v554_v11 = vld [vmem:[#allocation5 + $0xc10] sm:$0xff]  ;;  %v12624_v4 = vcombine.high %v426_v52, %v430_v53  ;;  %v12623_v6 = vcombine.low %v426_v52, %v430_v53 }
 0x34d   :  { %8987 = vmatprep.subr.bf16.mxu1 %v12776_v3  ;;  %v558_v58 = vld [vmem:[#allocation5 + $0xc30] sm:$0xff] }
 0x34e   :  { %8945 = vmatpush1.bf16.msra.mxu0 %v12647_v22  ;;  %v12752_v13 = vcombine.high %v554_v11, %v558_v58  ;;  %v546_v14 = vld [vmem:[#allocation5 + $0xbd0] sm:$0xff]  ;;  %v12751_v18 = vcombine.low %v554_v11, %v558_v58 }
 0x34f   :  { %8946 = vmatprep.subr.bf16.mxu0 %v12640_v31  ;;  %v550_v24 = vld [vmem:[#allocation5 + $0xbf0] sm:$0xff] }
 0x350   :  { %8988 = vmatpush1.bf16.msra.mxu1 %v12775_v23  ;;  %v674_v15 = vld [vmem:[#allocation5 + $0xfd0] sm:$0xff]  ;;  %v12744_v55 = vcombine.high %v546_v14, %v550_v24  ;;  %v12743_v40 = vcombine.low %v546_v14, %v550_v24 }
 0x351   :  { %8989 = vmatprep.subr.bf16.mxu1 %v12768_v0  ;;  %v678_v3 = vld [vmem:[#allocation5 + $0xff0] sm:$0xff] }
 0x352   :  { %8947 = vmatpush1.bf16.msra.mxu0 %v12639_v28  ;;  %v12872_v10 = vcombine.high %v674_v15, %v678_v3  ;;  %v538_v22 = vld [vmem:[#allocation5 + $0xb90] sm:$0xff]  ;;  %v12871_v34 = vcombine.low %v674_v15, %v678_v3 }
 0x353   :  { %8948 = vmatprep.subr.bf16.mxu0 %v12632_v44  ;;  %v542_v23 = vld [vmem:[#allocation5 + $0xbb0] sm:$0xff] }
 0x354   :  { %8990 = vmatpush1.bf16.msra.mxu1 %v12767_v46  ;;  %v666_v31 = vld [vmem:[#allocation5 + $0xf90] sm:$0xff]  ;;  %v12736_v35 = vcombine.high %v538_v22, %v542_v23  ;;  %v12735_v52 = vcombine.low %v538_v22, %v542_v23 }
 0x355   :  { %8991 = vmatprep.subr.bf16.mxu1 %v12760_v36  ;;  %v670_v0 = vld [vmem:[#allocation5 + $0xfb0] sm:$0xff] }
 0x356   :  { %8949 = vmatpush1.bf16.msra.mxu0 %v12631_v63  ;;  %v12864_v47 = vcombine.high %v666_v31, %v670_v0  ;;  %v530_v28 = vld [vmem:[#allocation5 + $0xb50] sm:$0xff]  ;;  %v12863_v53 = vcombine.low %v666_v31, %v670_v0 }
 0x357   :  { %8950 = vmatprep.subr.bf16.mxu0 %v12624_v4  ;;  %v534_v46 = vld [vmem:[#allocation5 + $0xb70] sm:$0xff] }
 0x358   :  { %8992 = vmatpush1.bf16.msra.mxu1 %v12759_v8  ;;  %v658_v44 = vld [vmem:[#allocation5 + $0xf50] sm:$0xff]  ;;  %v12728_v11 = vcombine.high %v530_v28, %v534_v46  ;;  %v12727_v14 = vcombine.low %v530_v28, %v534_v46 }
 0x359   :  { %8993 = vmatprep.subr.bf16.mxu1 %v12752_v13  ;;  %v662_v36 = vld [vmem:[#allocation5 + $0xf70] sm:$0xff] }
 0x35a   :  { %8951 = vmatpush1.bf16.msra.mxu0 %v12623_v6  ;;  %v12856_v58 = vcombine.high %v658_v44, %v662_v36  ;;  %v522_v63 = vld [vmem:[#allocation5 + $0xb10] sm:$0xff]  ;;  %v12855_v24 = vcombine.low %v658_v44, %v662_v36 }
 0x35b   :  { %8952 = vmatprep.subr.bf16.mxu0 %v12744_v55  ;;  %v526_v8 = vld [vmem:[#allocation5 + $0xb30] sm:$0xff] }
 0x35c   :  { %8994 = vmatpush1.bf16.msra.mxu1 %v12751_v18  ;;  %v650_v4 = vld [vmem:[#allocation5 + $0xf10] sm:$0xff]  ;;  %v12720_v15 = vcombine.high %v522_v63, %v526_v8  ;;  %v12719_v22 = vcombine.low %v522_v63, %v526_v8 }
 0x35d   :  { %8995 = vmatprep.subr.bf16.mxu1 %v12872_v10  ;;  %v654_v13 = vld [vmem:[#allocation5 + $0xf30] sm:$0xff] }
 0x35e   :  { %8953 = vmatpush2.bf16.msra.mxu0 %v12743_v40  ;;  %v12848_v3 = vcombine.high %v650_v4, %v654_v13  ;;  %v514_v6 = vld [vmem:[#allocation5 + $0xad0] sm:$0xff]  ;;  %v12847_v23 = vcombine.low %v650_v4, %v654_v13 }
 0x35f   :  { %8954 = vmatprep.subr.bf16.mxu0 %v12736_v35  ;;  %v518_v18 = vld [vmem:[#allocation5 + $0xaf0] sm:$0xff] }
 0x360   :  { %8996 = vmatpush2.bf16.msra.mxu1 %v12871_v34  ;;  %v642_v55 = vld [vmem:[#allocation5 + $0xed0] sm:$0xff]  ;;  %v12712_v31 = vcombine.high %v514_v6, %v518_v18  ;;  %v12711_v28 = vcombine.low %v514_v6, %v518_v18 }
 0x361   :  { %8997 = vmatprep.subr.bf16.mxu1 %v12864_v47  ;;  %v646_v10 = vld [vmem:[#allocation5 + $0xef0] sm:$0xff] }
 0x362   :  { %8955 = vmatpush2.bf16.msra.mxu0 %v12735_v52  ;;  %v12840_v0 = vcombine.high %v642_v55, %v646_v10  ;;  %v506_v40 = vld [vmem:[#allocation5 + $0xa90] sm:$0xff]  ;;  %v12839_v46 = vcombine.low %v642_v55, %v646_v10 }
 0x363   :  { %8956 = vmatprep.subr.bf16.mxu0 %v12728_v11  ;;  %v510_v34 = vld [vmem:[#allocation5 + $0xab0] sm:$0xff] }
 0x364   :  { %8998 = vmatpush2.bf16.msra.mxu1 %v12863_v53  ;;  %v634_v35 = vld [vmem:[#allocation5 + $0xe90] sm:$0xff]  ;;  %v12704_v44 = vcombine.high %v506_v40, %v510_v34  ;;  %v12703_v63 = vcombine.low %v506_v40, %v510_v34 }
 0x365   :  { %8999 = vmatprep.subr.bf16.mxu1 %v12856_v58  ;;  %v638_v47 = vld [vmem:[#allocation5 + $0xeb0] sm:$0xff] }
 0x366   :  { %8957 = vmatpush2.bf16.msra.mxu0 %v12727_v14  ;;  %v12832_v36 = vcombine.high %v634_v35, %v638_v47  ;;  %v498_v52 = vld [vmem:[#allocation5 + $0xa50] sm:$0xff]  ;;  %v12831_v8 = vcombine.low %v634_v35, %v638_v47 }
 0x367   :  { %8958 = vmatprep.subr.bf16.mxu0 %v12720_v15  ;;  %v502_v53 = vld [vmem:[#allocation5 + $0xa70] sm:$0xff] }
 0x368   :  { %9000 = vmatpush2.bf16.msra.mxu1 %v12855_v24  ;;  %v626_v11 = vld [vmem:[#allocation5 + $0xe50] sm:$0xff]  ;;  %v12696_v4 = vcombine.high %v498_v52, %v502_v53  ;;  %v12695_v6 = vcombine.low %v498_v52, %v502_v53  ;;  %v15043_v53 = vpop.f32.mrf.mxu0 }
 0x369   :  { %9001 = vmatprep.subr.bf16.mxu1 %v12848_v3  ;;  %v630_v58 = vld [vmem:[#allocation5 + $0xe70] sm:$0xff] }
 0x36a   :  { %8959 = vmatpush2.bf16.msra.mxu0 %v12719_v22  ;;  %v12824_v13 = vcombine.high %v626_v11, %v630_v58  ;;  %v490_v14 = vld [vmem:[#allocation5 + $0xa10] sm:$0xff]  ;;  %v12823_v18 = vcombine.low %v626_v11, %v630_v58 }
 0x36b   :  { %8960 = vmatprep.subr.bf16.mxu0 %v12712_v31  ;;  %v494_v24 = vld [vmem:[#allocation5 + $0xa30] sm:$0xff] }
 0x36c   :  { %9002 = vmatpush2.bf16.msra.mxu1 %v12847_v23  ;;  %v618_v15 = vld [vmem:[#allocation5 + $0xe10] sm:$0xff]  ;;  %v12688_v55 = vcombine.high %v490_v14, %v494_v24  ;;  %v12687_v40 = vcombine.low %v490_v14, %v494_v24 }
 0x36d   :  { %9003 = vmatprep.subr.bf16.mxu1 %v12840_v0  ;;  %v622_v3 = vld [vmem:[#allocation5 + $0xe30] sm:$0xff] }
 0x36e   :  { %8961 = vmatpush2.bf16.msra.mxu0 %v12711_v28  ;;  %v12816_v10 = vcombine.high %v618_v15, %v622_v3  ;;  %v738_v22 = vld [vmem:[#allocation5 + $0x11d0] sm:$0xff]  ;;  %v12815_v34 = vcombine.low %v618_v15, %v622_v3 }
 0x36f   :  { %8962 = vmatprep.subr.bf16.mxu0 %v12704_v44  ;;  %v742_v23 = vld [vmem:[#allocation5 + $0x11f0] sm:$0xff] }
 0x370   :  { %9004 = vmatpush2.bf16.msra.mxu1 %v12839_v46  ;;  %v866_v31 = vld [vmem:[#allocation5 + $0x15d0] sm:$0xff]  ;;  %v12936_v35 = vcombine.high %v738_v22, %v742_v23  ;;  %v12935_v52 = vcombine.low %v738_v22, %v742_v23 }
 0x371   :  { %9005 = vmatprep.subr.bf16.mxu1 %v12832_v36  ;;  %v870_v0 = vld [vmem:[#allocation5 + $0x15f0] sm:$0xff] }
 0x372   :  { %8963 = vmatpush2.bf16.msra.mxu0 %v12703_v63  ;;  %v13064_v47 = vcombine.high %v866_v31, %v870_v0  ;;  %v730_v28 = vld [vmem:[#allocation5 + $0x1190] sm:$0xff]  ;;  %v13063_v11 = vcombine.low %v866_v31, %v870_v0  ;;  %v15045_v63 = vpop.f32.mrf.mxu1 }
 0x373   :  { %8964 = vmatprep.subr.bf16.mxu0 %v12696_v4  ;;  %v734_v46 = vld [vmem:[#allocation5 + $0x11b0] sm:$0xff] }
 0x374   :  { %9006 = vmatpush2.bf16.msra.mxu1 %v12831_v8  ;;  %v858_v44 = vld [vmem:[#allocation5 + $0x1590] sm:$0xff]  ;;  %v12928_v58 = vcombine.high %v730_v28, %v734_v46 }
 0x375   :  { %9007 = vmatprep.subr.bf16.mxu1 %v12824_v13  ;;  %v862_v36 = vld [vmem:[#allocation5 + $0x15b0] sm:$0xff] }
 0x376   :  { %8965 = vmatpush2.bf16.msra.mxu0 %v12695_v6  ;;  %v13056_v8 = vcombine.high %v858_v44, %v862_v36  ;;  %v722_v4 = vld [vmem:[#allocation5 + $0x1150] sm:$0xff]  ;;  %v13055_v23 = vcombine.low %v858_v44, %v862_v36 }
 0x377   :  { %8966 = vmatprep.subr.bf16.mxu0 %v12688_v55  ;;  %v726_v13 = vld [vmem:[#allocation5 + $0x1170] sm:$0xff]  ;;  %v14585_v55 = vld [vmem:[#allocation2 + $0x18] ss:$80 sps:$4 sm:$0xff]  }
 0x378   :  { %9008 = vmatpush2.bf16.msra.mxu1 %v12823_v18  ;;  %v14584_v24 = vld [vmem:[#allocation2 + $0x10] ss:$80 sps:$4 sm:$0xff]   ;;  %v12920_v31 = vcombine.high %v722_v4, %v726_v13  ;;  %v12919_v44 = vcombine.low %v722_v4, %v726_v13 }
 0x379   :  { %9009 = vmatprep.subr.bf16.mxu1 %v12816_v10  ;;  %v850_v15 = vld [vmem:[#allocation5 + $0x1550] sm:$0xff]  ;;  %v12927_v10 = vcombine.low %v730_v28, %v734_v46  ;;  %v14587_v28 = vld [vmem:[#allocation2 + $0x2c] ss:$80 sps:$4 sm:$0xff]  }
 0x37a   :  { %8967 = vmatpush2.bf16.msra.mxu0 %v12687_v40  ;;  %v854_v3 = vld [vmem:[#allocation5 + $0x1570] sm:$0xff] }
 0x37b   :  { %9022 = vmatprep.subr.bf16.mxu0 %v12936_v35  ;;  %v714_v35 = vld [vmem:[#allocation5 + $0x1110] sm:$0xff] }
 0x37c   :  { %9010 = vmatpush2.bf16.msra.mxu1 %v12815_v34  ;;  %v13048_v34 = vcombine.high %v850_v15, %v854_v3  ;;  %v698_v13 = vld [vmem:[#allocation5 + $0x1090] sm:$0xff] }
 0x37d   :  { %9065 = vmatprep.subr.bf16.mxu1 %v13064_v47  ;;  %v8712_v14 = vpop.f32.mrf.mxu0  ;;  %8969 = vmatmul.mubr.bf16.vlgmr.msra.gmra.mxu0 %v14584_v24  ;;  %v718_v47 = vld [vmem:[#allocation5 + $0x1130] sm:$0xff] }
 0x37e   :  { %v8713_v6 = vadd.f32 %v8712_v14, %v15036_v27  ;;  %9023 = vmatpush1.bf16.msra.mxu0 %v12935_v52  ;;  %v14586_v27 = vld [vmem:[#allocation2 + $0x24] ss:$80 sps:$4 sm:$0xff]   ;;  %v12911_v17 = vcombine.low %v714_v35, %v718_v47 }
 0x37f   :  { %v8755_v18 = vpop.f32.mrf.mxu1  ;;  %9012 = vmatmul.mubr.bf16.vlgmr.msra.gmra.mxu1 %v14585_v55  ;;  %v15048_v22 = vpop.f32.mrf.mxu0  ;;  %9024 = vmatprep.subr.bf16.mxu0 %v12928_v58  ;;  %v842_v24 = vld [vmem:[#allocation5 + $0x1510] sm:$0xff]  ;;  %v12912_v58 = vcombine.high %v714_v35, %v718_v47 }
 0x380   :  { %9066 = vmatpush1.bf16.msra.mxu1 %v13063_v11  ;;  %v15050_v0 = vadd.f32 %v8755_v18, %v8713_v6  ;;  %9054 = vmatprep.mubr.bf16.mxu0 %v14586_v27  ;;  %v846_v52 = vld [vmem:[#allocation5 + $0x1530] sm:$0xff]  ;;  %v13047_v11 = vcombine.low %v850_v15, %v854_v3 }
 0x381   :  { %v15052_v40 = vpop.f32.mrf.mxu1  ;;  %9067 = vmatprep.subr.bf16.mxu1 %v13056_v8  ;;  %v8716_v14 = vpop.f32.mrf.mxu0  ;;  %9097 = vmatprep.mubr.bf16.mxu1 %v14587_v28  ;;  %v13040_v6 = vcombine.high %v842_v24, %v846_v52  ;;  %v706_v18 = vld [vmem:[#allocation5 + $0x10d0] sm:$0xff] }
 0x382   :  { %v8717_v46 = vadd.f32 %v8716_v14, %v15041_v56  ;;  %9025 = vmatpush1.bf16.msra.mxu0 %v12927_v10  ;;  %v710_v55 = vld [vmem:[#allocation5 + $0x10f0] sm:$0xff]  ;;  %v13039_v56 = vcombine.low %v842_v24, %v846_v52 }
 0x383   :  { %v8759_v36 = vpop.f32.mrf.mxu1  ;;  %9026 = vmatprep.subr.bf16.mxu0 %v12920_v31  ;;  %v834_v27 = vld [vmem:[#allocation5 + $0x14d0] sm:$0xff]  ;;  %v12904_v10 = vcombine.high %v706_v18, %v710_v55  ;;  %v12903_v31 = vcombine.low %v706_v18, %v710_v55 }
 0x384   :  { %9068 = vmatpush1.bf16.msra.mxu1 %v13055_v23  ;;  %v15055_v8 = vadd.f32 %v8759_v36, %v8717_v46  ;;  %v13032_v4 = vcombine.high %v834_v27, %v838_v25  ;;  %v702_v23 = vld [vmem:[#allocation5 + $0x10b0] sm:$0xff] }
 0x385   :  { %9069 = vmatprep.subr.bf16.mxu1 %v13048_v34  ;;  %v826_v15 = vld [vmem:[#allocation5 + $0x1490] sm:$0xff]  ;;  %v13031_v34 = vcombine.low %v834_v27, %v838_v25  ;;  %v12896_v14 = vcombine.high %v698_v13, %v702_v23  ;;  %v12895_v24 = vcombine.low %v698_v13, %v702_v23 }
 0x386   :  { %9027 = vmatpush1.bf16.msra.mxu0 %v12919_v44  ;;  %v830_v3 = vld [vmem:[#allocation5 + $0x14b0] sm:$0xff] }
 0x387   :  { %9028 = vmatprep.subr.bf16.mxu0 %v12912_v58  ;;  %v13024_v28 = vcombine.high %v826_v15, %v830_v3  ;;  %v690_v46 = vld [vmem:[#allocation5 + $0x1050] sm:$0xff]  ;;  %v13023_v52 = vcombine.low %v826_v15, %v830_v3 }
 0x388   :  { %9070 = vmatpush1.bf16.msra.mxu1 %v13047_v11  ;;  %v694_v35 = vld [vmem:[#allocation5 + $0x1070] sm:$0xff] }
 0x389   :  { %9071 = vmatprep.subr.bf16.mxu1 %v13040_v6  ;;  %v818_v47 = vld [vmem:[#allocation5 + $0x1450] sm:$0xff]  ;;  %v12888_v36 = vcombine.high %v690_v46, %v694_v35  ;;  %v12887_v25 = vcombine.low %v690_v46, %v694_v35 }
 0x38a   :  { %9029 = vmatpush1.bf16.msra.mxu0 %v12911_v17  ;;  %v822_v44 = vld [vmem:[#allocation5 + $0x1470] sm:$0xff] }
 0x38b   :  { %9030 = vmatprep.subr.bf16.mxu0 %v12904_v10  ;;  %v13016_v11 = vcombine.high %v818_v47, %v822_v44  ;;  %v682_v17 = vld [vmem:[#allocation5 + $0x1010] sm:$0xff]  ;;  %v13015_v55 = vcombine.low %v818_v47, %v822_v44 }
 0x38c   :  { %9072 = vmatpush1.bf16.msra.mxu1 %v13039_v56  ;;  %v686_v58 = vld [vmem:[#allocation5 + $0x1030] sm:$0xff] }
 0x38d   :  { %9073 = vmatprep.subr.bf16.mxu1 %v13032_v4  ;;  %v810_v6 = vld [vmem:[#allocation5 + $0x1410] sm:$0xff]  ;;  %v12880_v27 = vcombine.high %v682_v17, %v686_v58  ;;  %v12879_v15 = vcombine.low %v682_v17, %v686_v58 }
 0x38e   :  { %9031 = vmatpush1.bf16.msra.mxu0 %v12903_v31  ;;  %v814_v18 = vld [vmem:[#allocation5 + $0x1430] sm:$0xff] }
 0x38f   :  { %9032 = vmatprep.subr.bf16.mxu0 %v12896_v14  ;;  %v13008_v56 = vcombine.high %v810_v6, %v814_v18  ;;  %v802_v10 = vld [vmem:[#allocation5 + $0x13d0] sm:$0xff]  ;;  %v13007_v3 = vcombine.low %v810_v6, %v814_v18 }
 0x390   :  { %9074 = vmatpush1.bf16.msra.mxu1 %v13031_v34  ;;  %v806_v4 = vld [vmem:[#allocation5 + $0x13f0] sm:$0xff] }
 0x391   :  { %9075 = vmatprep.subr.bf16.mxu1 %v13024_v28  ;;  %v930_v13 = vld [vmem:[#allocation5 + $0x17d0] sm:$0xff]  ;;  %v13000_v31 = vcombine.high %v802_v10, %v806_v4  ;;  %v12999_v47 = vcombine.low %v802_v10, %v806_v4 }
 0x392   :  { %9033 = vmatpush1.bf16.msra.mxu0 %v12895_v24  ;;  %v934_v23 = vld [vmem:[#allocation5 + $0x17f0] sm:$0xff] }
 0x393   :  { %9034 = vmatprep.subr.bf16.mxu0 %v12888_v36  ;;  %v13128_v34 = vcombine.high %v930_v13, %v934_v23  ;;  %v794_v14 = vld [vmem:[#allocation5 + $0x1390] sm:$0xff]  ;;  %v13127_v44 = vcombine.low %v930_v13, %v934_v23 }
 0x394   :  { %9076 = vmatpush1.bf16.msra.mxu1 %v13023_v52  ;;  %v798_v28 = vld [vmem:[#allocation5 + $0x13b0] sm:$0xff] }
 0x395   :  { %9077 = vmatprep.subr.bf16.mxu1 %v13016_v11  ;;  %v922_v46 = vld [vmem:[#allocation5 + $0x1790] sm:$0xff]  ;;  %v12992_v24 = vcombine.high %v794_v14, %v798_v28  ;;  %v12991_v6 = vcombine.low %v794_v14, %v798_v28 }
 0x396   :  { %9035 = vmatpush1.bf16.msra.mxu0 %v12887_v25  ;;  %v926_v35 = vld [vmem:[#allocation5 + $0x17b0] sm:$0xff] }
 0x397   :  { %9036 = vmatprep.subr.bf16.mxu0 %v12880_v27  ;;  %v13120_v52 = vcombine.high %v922_v46, %v926_v35  ;;  %v786_v36 = vld [vmem:[#allocation5 + $0x1350] sm:$0xff]  ;;  %v13119_v18 = vcombine.low %v922_v46, %v926_v35 }
 0x398   :  { %9078 = vmatpush1.bf16.msra.mxu1 %v13015_v55  ;;  %v790_v11 = vld [vmem:[#allocation5 + $0x1370] sm:$0xff] }
 0x399   :  { %9079 = vmatprep.subr.bf16.mxu1 %v13008_v56  ;;  %v914_v17 = vld [vmem:[#allocation5 + $0x1750] sm:$0xff]  ;;  %v12984_v25 = vcombine.high %v786_v36, %v790_v11  ;;  %v12983_v13 = vcombine.low %v786_v36, %v790_v11 }
 0x39a   :  { %9037 = vmatpush1.bf16.msra.mxu0 %v12879_v15  ;;  %v918_v58 = vld [vmem:[#allocation5 + $0x1770] sm:$0xff] }
 0x39b   :  { %9038 = vmatprep.subr.bf16.mxu0 %v13000_v31  ;;  %v13112_v55 = vcombine.high %v914_v17, %v918_v58  ;;  %v778_v27 = vld [vmem:[#allocation5 + $0x1310] sm:$0xff]  ;;  %v13111_v23 = vcombine.low %v914_v17, %v918_v58 }
 0x39c   :  { %9080 = vmatpush1.bf16.msra.mxu1 %v13007_v3  ;;  %v782_v56 = vld [vmem:[#allocation5 + $0x1330] sm:$0xff] }
 0x39d   :  { %9081 = vmatprep.subr.bf16.mxu1 %v13128_v34  ;;  %v906_v10 = vld [vmem:[#allocation5 + $0x1710] sm:$0xff]  ;;  %v12976_v15 = vcombine.high %v778_v27, %v782_v56  ;;  %v12975_v46 = vcombine.low %v778_v27, %v782_v56 }
 0x39e   :  { %9039 = vmatpush2.bf16.msra.mxu0 %v12999_v47  ;;  %v910_v4 = vld [vmem:[#allocation5 + $0x1730] sm:$0xff] }
 0x39f   :  { %9040 = vmatprep.subr.bf16.mxu0 %v12992_v24  ;;  %v13104_v3 = vcombine.high %v906_v10, %v910_v4  ;;  %v770_v31 = vld [vmem:[#allocation5 + $0x12d0] sm:$0xff]  ;;  %v13103_v35 = vcombine.low %v906_v10, %v910_v4 }
 0x3a0   :  { %9082 = vmatpush2.bf16.msra.mxu1 %v13127_v44  ;;  %v774_v34 = vld [vmem:[#allocation5 + $0x12f0] sm:$0xff] }
 0x3a1   :  { %9083 = vmatprep.subr.bf16.mxu1 %v13120_v52  ;;  %v898_v14 = vld [vmem:[#allocation5 + $0x16d0] sm:$0xff]  ;;  %v12968_v47 = vcombine.high %v770_v31, %v774_v34  ;;  %v12967_v17 = vcombine.low %v770_v31, %v774_v34 }
 0x3a2   :  { %9041 = vmatpush2.bf16.msra.mxu0 %v12991_v6  ;;  %v902_v28 = vld [vmem:[#allocation5 + $0x16f0] sm:$0xff] }
 0x3a3   :  { %9042 = vmatprep.subr.bf16.mxu0 %v12984_v25  ;;  %v13096_v44 = vcombine.high %v898_v14, %v902_v28  ;;  %v762_v24 = vld [vmem:[#allocation5 + $0x1290] sm:$0xff]  ;;  %v13095_v58 = vcombine.low %v898_v14, %v902_v28 }
 0x3a4   :  { %9084 = vmatpush2.bf16.msra.mxu1 %v13119_v18  ;;  %v766_v52 = vld [vmem:[#allocation5 + $0x12b0] sm:$0xff] }
 0x3a5   :  { %9085 = vmatprep.subr.bf16.mxu1 %v13112_v55  ;;  %v890_v36 = vld [vmem:[#allocation5 + $0x1690] sm:$0xff]  ;;  %v12960_v6 = vcombine.high %v762_v24, %v766_v52  ;;  %v12959_v10 = vcombine.low %v762_v24, %v766_v52 }
 0x3a6   :  { %9043 = vmatpush2.bf16.msra.mxu0 %v12983_v13  ;;  %v894_v11 = vld [vmem:[#allocation5 + $0x16b0] sm:$0xff] }
 0x3a7   :  { %9044 = vmatprep.subr.bf16.mxu0 %v12976_v15  ;;  %v13088_v18 = vcombine.high %v890_v36, %v894_v11  ;;  %v754_v25 = vld [vmem:[#allocation5 + $0x1250] sm:$0xff]  ;;  %v13087_v4 = vcombine.low %v890_v36, %v894_v11 }
 0x3a8   :  { %9086 = vmatpush2.bf16.msra.mxu1 %v13111_v23  ;;  %v758_v55 = vld [vmem:[#allocation5 + $0x1270] sm:$0xff] }
 0x3a9   :  { %9087 = vmatprep.subr.bf16.mxu1 %v13104_v3  ;;  %v882_v27 = vld [vmem:[#allocation5 + $0x1650] sm:$0xff]  ;;  %v12952_v13 = vcombine.high %v754_v25, %v758_v55  ;;  %v12951_v14 = vcombine.low %v754_v25, %v758_v55 }
 0x3aa   :  { %9045 = vmatpush2.bf16.msra.mxu0 %v12975_v46  ;;  %v886_v56 = vld [vmem:[#allocation5 + $0x1670] sm:$0xff] }
 0x3ab   :  { %9046 = vmatprep.subr.bf16.mxu0 %v12968_v47  ;;  %v13080_v23 = vcombine.high %v882_v27, %v886_v56  ;;  %v746_v15 = vld [vmem:[#allocation5 + $0x1210] sm:$0xff]  ;;  %v13079_v28 = vcombine.low %v882_v27, %v886_v56  ;;  %v15057_v56 = vpop.f32.mrf.mxu0 }
 0x3ac   :  { %9088 = vmatpush2.bf16.msra.mxu1 %v13103_v35  ;;  %v750_v3 = vld [vmem:[#allocation5 + $0x1230] sm:$0xff] }
 0x3ad   :  { %9089 = vmatprep.subr.bf16.mxu1 %v13096_v44  ;;  %v874_v31 = vld [vmem:[#allocation5 + $0x1610] sm:$0xff]  ;;  %v12944_v46 = vcombine.high %v746_v15, %v750_v3  ;;  %v12943_v36 = vcombine.low %v746_v15, %v750_v3 }
 0x3ae   :  { %9047 = vmatpush2.bf16.msra.mxu0 %v12967_v17  ;;  %v878_v34 = vld [vmem:[#allocation5 + $0x1630] sm:$0xff] }
 0x3af   :  { %9048 = vmatprep.subr.bf16.mxu0 %v12960_v6  ;;  %v13072_v35 = vcombine.high %v874_v31, %v878_v34  ;;  %v994_v47 = vld [vmem:[#allocation5 + $0x19d0] sm:$0xff]  ;;  %v13071_v11 = vcombine.low %v874_v31, %v878_v34 }
 0x3b0   :  { %9090 = vmatpush2.bf16.msra.mxu1 %v13095_v58  ;;  %v998_v44 = vld [vmem:[#allocation5 + $0x19f0] sm:$0xff] }
 0x3b1   :  { %9091 = vmatprep.subr.bf16.mxu1 %v13088_v18  ;;  %v1122_v24 = vld [vmem:[#allocation5 + $0x1dd0] sm:$0xff]  ;;  %v13192_v17 = vcombine.high %v994_v47, %v998_v44  ;;  %v13191_v27 = vcombine.low %v994_v47, %v998_v44  ;;  %v14589_v47 = vld [vmem:[#allocation2 + $0x28] ss:$80 sps:$4 sm:$0xff]  }
 0x3b2   :  { %9049 = vmatpush2.bf16.msra.mxu0 %v12959_v10  ;;  %v1126_v52 = vld [vmem:[#allocation5 + $0x1df0] sm:$0xff] }
 0x3b3   :  { %9050 = vmatprep.subr.bf16.mxu0 %v12952_v13  ;;  %v13320_v58 = vcombine.high %v1122_v24, %v1126_v52  ;;  %v986_v6 = vld [vmem:[#allocation5 + $0x1990] sm:$0xff]  ;;  %v13319_v10 = vcombine.low %v1122_v24, %v1126_v52  ;;  %v15059_v13 = vpop.f32.mrf.mxu1 }
 0x3b4   :  { %9092 = vmatpush2.bf16.msra.mxu1 %v13087_v4  ;;  %v990_v18 = vld [vmem:[#allocation5 + $0x19b0] sm:$0xff] }
 0x3b5   :  { %9093 = vmatprep.subr.bf16.mxu1 %v13080_v23  ;;  %v1114_v25 = vld [vmem:[#allocation5 + $0x1d90] sm:$0xff]  ;;  %v13184_v4 = vcombine.high %v986_v6, %v990_v18  ;;  %v13183_v44 = vcombine.low %v986_v6, %v990_v18 }
 0x3b6   :  { %9051 = vmatpush2.bf16.msra.mxu0 %v12951_v14  ;;  %v1118_v55 = vld [vmem:[#allocation5 + $0x1db0] sm:$0xff] }
 0x3b7   :  { %9052 = vmatprep.subr.bf16.mxu0 %v12944_v46  ;;  %v13312_v23 = vcombine.high %v1114_v25, %v1118_v55  ;;  %v978_v15 = vld [vmem:[#allocation5 + $0x1950] sm:$0xff]  ;;  %v13311_v52 = vcombine.low %v1114_v25, %v1118_v55 }
 0x3b8   :  { %9094 = vmatpush2.bf16.msra.mxu1 %v13079_v28  ;;  %v982_v3 = vld [vmem:[#allocation5 + $0x1970] sm:$0xff] }
 0x3b9   :  { %9095 = vmatprep.subr.bf16.mxu1 %v13072_v35  ;;  %v14588_v34 = vld [vmem:[#allocation2 + $0x20] ss:$80 sps:$4 sm:$0xff]   ;;  %v13175_v18 = vcombine.low %v978_v15, %v982_v3 }
 0x3ba   :  { %9053 = vmatpush2.bf16.msra.mxu0 %v12943_v36  ;;  %v1106_v14 = vld [vmem:[#allocation5 + $0x1d50] sm:$0xff]  ;;  %v13176_v36 = vcombine.high %v978_v15, %v982_v3 }
 0x3bb   :  { %9108 = vmatprep.subr.bf16.mxu0 %v13192_v17  ;;  %v1110_v28 = vld [vmem:[#allocation5 + $0x1d70] sm:$0xff] }
 0x3bc   :  { %9096 = vmatpush2.bf16.msra.mxu1 %v13071_v11  ;;  %v13303_v55 = vcombine.low %v1106_v14, %v1110_v28 }
 0x3bd   :  { %9151 = vmatprep.subr.bf16.mxu1 %v13320_v58  ;;  %v8798_v31 = vpop.f32.mrf.mxu0  ;;  %9055 = vmatmul.mubr.bf16.vlgmr.msra.gmra.mxu0 %v14588_v34  ;;  %v13304_v58 = vcombine.high %v1106_v14, %v1110_v28  ;;  %v970_v34 = vld [vmem:[#allocation5 + $0x1910] sm:$0xff] }
 0x3be   :  { %v8799_v46 = vadd.f32 %v8798_v31, %v15050_v0  ;;  %9109 = vmatpush1.bf16.msra.mxu0 %v13191_v27  ;;  %9140 = vmatprep.mubr.bf16.mxu0 %v14590_v41  ;;  %v1098_v31 = vld [vmem:[#allocation5 + $0x1d10] sm:$0xff]  ;;  %v14591_v27 = vld [vmem:[#allocation2 + $0x3c] ss:$80 sps:$4 sm:$0xff]  }
 0x3bf   :  { %v8841_v35 = vpop.f32.mrf.mxu1  ;;  %9098 = vmatmul.mubr.bf16.vlgmr.msra.gmra.mxu1 %v14589_v47  ;;  %v15062_v24 = vpop.f32.mrf.mxu0  ;;  %9110 = vmatprep.subr.bf16.mxu0 %v13184_v4  ;;  %v1102_v47 = vld [vmem:[#allocation5 + $0x1d30] sm:$0xff] }
 0x3c0   :  { %9152 = vmatpush1.bf16.msra.mxu1 %v13319_v10  ;;  %15287 = vst [vmem:[#allocation29_spill] sm:$0xff] %v15062_v24  ;;  %v8842_v11 = vadd.f32 %v8841_v35, %v8799_v46  ;;  %9183 = vmatprep.mubr.bf16.mxu1 %v14591_v27  ;;  %v13168_v10 = vcombine.high %v970_v34, %v974_v26  ;;  %v962_v46 = vld [vmem:[#allocation5 + $0x18d0] sm:$0xff] }
 0x3c1   :  { %v15064_v17 = vpop.f32.mrf.mxu1  ;;  %9153 = vmatprep.subr.bf16.mxu1 %v13312_v23  ;;  %v8802_v0 = vpop.f32.mrf.mxu0  ;;  %v13296_v23 = vcombine.high %v1098_v31, %v1102_v47  ;;  %v966_v35 = vld [vmem:[#allocation5 + $0x18f0] sm:$0xff]  ;;  %v13167_v27 = vcombine.low %v970_v34, %v974_v26 }
 0x3c2   :  { %15288 = vst [vmem:[#allocation30_spill] sm:$0xff] %v15064_v17  ;;  %v8803_v6 = vadd.f32 %v8802_v0, %v15055_v8  ;;  %9111 = vmatpush1.bf16.msra.mxu0 %v13183_v44  ;;  %v1090_v41 = vld [vmem:[#allocation5 + $0x1cd0] sm:$0xff]  ;;  %v9712_v51 = vmax.f32 %v8842_v11, 0.0  ;;  %v13295_v8 = vcombine.low %v1098_v31, %v1102_v47  ;;  %v13160_v15 = vcombine.high %v962_v46, %v966_v35 }
 0x3c3   :  { %v8845_v25 = vpop.f32.mrf.mxu1  ;;  %9112 = vmatprep.subr.bf16.mxu0 %v13176_v36  ;;  %v1094_v17 = vld [vmem:[#allocation5 + $0x1cf0] sm:$0xff] }
 0x3c4   :  { %9154 = vmatpush1.bf16.msra.mxu1 %v13311_v52  ;;  %v8846_v4 = vadd.f32 %v8845_v25, %v8803_v6  ;;  %v13288_v14 = vcombine.high %v1090_v41, %v1094_v17  ;;  %v954_v28 = vld [vmem:[#allocation5 + $0x1890] sm:$0xff]  ;;  %v13287_v11 = vcombine.low %v1090_v41, %v1094_v17 }
 0x3c5   :  { %9155 = vmatprep.subr.bf16.mxu1 %v13304_v58  ;;  %v958_v44 = vld [vmem:[#allocation5 + $0x18b0] sm:$0xff]  ;;  %v13159_v58 = vcombine.low %v962_v46, %v966_v35 }
 0x3c6   :  { %v9720_v24 = vmax.f32 %v8846_v4, 0.0  ;;  %9113 = vmatpush1.bf16.msra.mxu0 %v13175_v18  ;;  %v1082_v52 = vld [vmem:[#allocation5 + $0x1c90] sm:$0xff]  ;;  %v13152_v0 = vcombine.high %v954_v28, %v958_v44 }
 0x3c7   :  { %9114 = vmatprep.subr.bf16.mxu0 %v13168_v10  ;;  %v1086_v36 = vld [vmem:[#allocation5 + $0x1cb0] sm:$0xff] }
 0x3c8   :  { %9156 = vmatpush1.bf16.msra.mxu1 %v13303_v55  ;;  %v15067_v3 = vpack.c.bf16 %v9720_v24, %v9712_v51  ;;  %v13280_v26 = vcombine.high %v1082_v52, %v1086_v36  ;;  %v946_v34 = vld [vmem:[#allocation5 + $0x1850] sm:$0xff]  ;;  %v13151_v51 = vcombine.low %v954_v28, %v958_v44  ;;  %v13279_v24 = vcombine.low %v1082_v52, %v1086_v36 }
 0x3c9   :  { %9157 = vmatprep.subr.bf16.mxu1 %v13296_v23  ;;  %v950_v6 = vld [vmem:[#allocation5 + $0x1870] sm:$0xff] }
 0x3ca   :  { %15289 = vst [vmem:[#allocation31_spill] sm:$0xff] %v15067_v3  ;;  %9115 = vmatpush1.bf16.msra.mxu0 %v13167_v27  ;;  %v1074_v31 = vld [vmem:[#allocation5 + $0x1c50] sm:$0xff]  ;;  %v13144_v18 = vcombine.high %v946_v34, %v950_v6  ;;  %v13143_v17 = vcombine.low %v946_v34, %v950_v6 }
 0x3cb   :  { %9116 = vmatprep.subr.bf16.mxu0 %v13160_v15  ;;  %v1078_v47 = vld [vmem:[#allocation5 + $0x1c70] sm:$0xff] }
 0x3cc   :  { %9158 = vmatpush1.bf16.msra.mxu1 %v13295_v8  ;;  %v13272_v25 = vcombine.high %v1074_v31, %v1078_v47  ;;  %v938_v55 = vld [vmem:[#allocation5 + $0x1810] sm:$0xff]  ;;  %v13271_v46 = vcombine.low %v1074_v31, %v1078_v47 }
 0x3cd   :  { %9159 = vmatprep.subr.bf16.mxu1 %v13288_v14  ;;  %v942_v10 = vld [vmem:[#allocation5 + $0x1830] sm:$0xff] }
 0x3ce   :  { %9117 = vmatpush1.bf16.msra.mxu0 %v13159_v58  ;;  %v1066_v4 = vld [vmem:[#allocation5 + $0x1c10] sm:$0xff]  ;;  %v13136_v35 = vcombine.high %v938_v55, %v942_v10  ;;  %v13135_v28 = vcombine.low %v938_v55, %v942_v10 }
 0x3cf   :  { %9118 = vmatprep.subr.bf16.mxu0 %v13152_v0  ;;  %v1070_v23 = vld [vmem:[#allocation5 + $0x1c30] sm:$0xff] }
 0x3d0   :  { %9160 = vmatpush1.bf16.msra.mxu1 %v13287_v11  ;;  %v13264_v41 = vcombine.high %v1066_v4, %v1070_v23  ;;  %v1058_v27 = vld [vmem:[#allocation5 + $0x1bd0] sm:$0xff]  ;;  %v13263_v44 = vcombine.low %v1066_v4, %v1070_v23 }
 0x3d1   :  { %9161 = vmatprep.subr.bf16.mxu1 %v13280_v26  ;;  %v1062_v8 = vld [vmem:[#allocation5 + $0x1bf0] sm:$0xff] }
 0x3d2   :  { %9119 = vmatpush1.bf16.msra.mxu0 %v13151_v51  ;;  %v1186_v15 = vld [vmem:[#allocation5 + $0x1fd0] sm:$0xff]  ;;  %v13256_v52 = vcombine.high %v1058_v27, %v1062_v8  ;;  %v13255_v34 = vcombine.low %v1058_v27, %v1062_v8 }
 0x3d3   :  { %9120 = vmatprep.subr.bf16.mxu0 %v13144_v18  ;;  %v1190_v14 = vld [vmem:[#allocation5 + $0x1ff0] sm:$0xff] }
 0x3d4   :  { %9162 = vmatpush1.bf16.msra.mxu1 %v13279_v24  ;;  %v13384_v36 = vcombine.high %v1186_v15, %v1190_v14  ;;  %v1050_v58 = vld [vmem:[#allocation5 + $0x1b90] sm:$0xff]  ;;  %v13383_v6 = vcombine.low %v1186_v15, %v1190_v14 }
 0x3d5   :  { %9163 = vmatprep.subr.bf16.mxu1 %v13272_v25  ;;  %v1054_v11 = vld [vmem:[#allocation5 + $0x1bb0] sm:$0xff] }
 0x3d6   :  { %9121 = vmatpush1.bf16.msra.mxu0 %v13143_v17  ;;  %v1178_v0 = vld [vmem:[#allocation5 + $0x1f90] sm:$0xff]  ;;  %v13248_v31 = vcombine.high %v1050_v58, %v1054_v11  ;;  %v13247_v55 = vcombine.low %v1050_v58, %v1054_v11 }
 0x3d7   :  { %9122 = vmatprep.subr.bf16.mxu0 %v13136_v35  ;;  %v1182_v26 = vld [vmem:[#allocation5 + $0x1fb0] sm:$0xff] }
 0x3d8   :  { %9164 = vmatpush1.bf16.msra.mxu1 %v13271_v46  ;;  %v13376_v47 = vcombine.high %v1178_v0, %v1182_v26  ;;  %v1042_v51 = vld [vmem:[#allocation5 + $0x1b50] sm:$0xff]  ;;  %v13375_v10 = vcombine.low %v1178_v0, %v1182_v26 }
 0x3d9   :  { %9165 = vmatprep.subr.bf16.mxu1 %v13264_v41  ;;  %v1046_v24 = vld [vmem:[#allocation5 + $0x1b70] sm:$0xff] }
 0x3da   :  { %9123 = vmatpush1.bf16.msra.mxu0 %v13135_v28  ;;  %v1170_v18 = vld [vmem:[#allocation5 + $0x1f50] sm:$0xff]  ;;  %v13240_v4 = vcombine.high %v1042_v51, %v1046_v24  ;;  %v13239_v27 = vcombine.low %v1042_v51, %v1046_v24 }
 0x3db   :  { %9124 = vmatprep.subr.bf16.mxu0 %v13256_v52  ;;  %v1174_v25 = vld [vmem:[#allocation5 + $0x1f70] sm:$0xff] }
 0x3dc   :  { %9166 = vmatpush1.bf16.msra.mxu1 %v13263_v44  ;;  %v13368_v23 = vcombine.high %v1170_v18, %v1174_v25  ;;  %v1034_v17 = vld [vmem:[#allocation5 + $0x1b10] sm:$0xff]  ;;  %v13367_v8 = vcombine.low %v1170_v18, %v1174_v25 }
 0x3dd   :  { %9167 = vmatprep.subr.bf16.mxu1 %v13384_v36  ;;  %v1038_v46 = vld [vmem:[#allocation5 + $0x1b30] sm:$0xff] }
 0x3de   :  { %9125 = vmatpush2.bf16.msra.mxu0 %v13255_v34  ;;  %v1162_v35 = vld [vmem:[#allocation5 + $0x1f10] sm:$0xff]  ;;  %v13232_v15 = vcombine.high %v1034_v17, %v1038_v46  ;;  %v13231_v58 = vcombine.low %v1034_v17, %v1038_v46 }
 0x3df   :  { %9126 = vmatprep.subr.bf16.mxu0 %v13248_v31  ;;  %v1166_v41 = vld [vmem:[#allocation5 + $0x1f30] sm:$0xff] }
 0x3e0   :  { %9168 = vmatpush2.bf16.msra.mxu1 %v13383_v6  ;;  %v13360_v14 = vcombine.high %v1162_v35, %v1166_v41  ;;  %v1026_v28 = vld [vmem:[#allocation5 + $0x1ad0] sm:$0xff]  ;;  %v13359_v11 = vcombine.low %v1162_v35, %v1166_v41 }
 0x3e1   :  { %9169 = vmatprep.subr.bf16.mxu1 %v13376_v47  ;;  %v1030_v44 = vld [vmem:[#allocation5 + $0x1af0] sm:$0xff] }
 0x3e2   :  { %9127 = vmatpush2.bf16.msra.mxu0 %v13247_v55  ;;  %v1154_v52 = vld [vmem:[#allocation5 + $0x1ed0] sm:$0xff]  ;;  %v13224_v0 = vcombine.high %v1026_v28, %v1030_v44  ;;  %v13223_v51 = vcombine.low %v1026_v28, %v1030_v44 }
 0x3e3   :  { %9128 = vmatprep.subr.bf16.mxu0 %v13240_v4  ;;  %v1158_v36 = vld [vmem:[#allocation5 + $0x1ef0] sm:$0xff] }
 0x3e4   :  { %9170 = vmatpush2.bf16.msra.mxu1 %v13375_v10  ;;  %v13352_v26 = vcombine.high %v1154_v52, %v1158_v36  ;;  %v1018_v34 = vld [vmem:[#allocation5 + $0x1a90] sm:$0xff]  ;;  %v13351_v24 = vcombine.low %v1154_v52, %v1158_v36 }
 0x3e5   :  { %9171 = vmatprep.subr.bf16.mxu1 %v13368_v23  ;;  %v1022_v6 = vld [vmem:[#allocation5 + $0x1ab0] sm:$0xff] }
 0x3e6   :  { %9129 = vmatpush2.bf16.msra.mxu0 %v13239_v27  ;;  %v1146_v31 = vld [vmem:[#allocation5 + $0x1e90] sm:$0xff]  ;;  %v13216_v18 = vcombine.high %v1018_v34, %v1022_v6  ;;  %v13215_v17 = vcombine.low %v1018_v34, %v1022_v6  ;;  %v1468_v6 = vsub.s32 4, %v14932_v9 }
 0x3e7   :  { %9130 = vmatprep.subr.bf16.mxu0 %v13232_v15  ;;  %v1150_v47 = vld [vmem:[#allocation5 + $0x1eb0] sm:$0xff] }
 0x3e8   :  { %9172 = vmatpush2.bf16.msra.mxu1 %v13367_v8  ;;  %v13344_v25 = vcombine.high %v1146_v31, %v1150_v47  ;;  %v1010_v55 = vld [vmem:[#allocation5 + $0x1a50] sm:$0xff]  ;;  %v13343_v46 = vcombine.low %v1146_v31, %v1150_v47 }
 0x3e9   :  { %9173 = vmatprep.subr.bf16.mxu1 %v13360_v14  ;;  %v1014_v10 = vld [vmem:[#allocation5 + $0x1a70] sm:$0xff] }
 0x3ea   :  { %9131 = vmatpush2.bf16.msra.mxu0 %v13231_v58  ;;  %v1138_v4 = vld [vmem:[#allocation5 + $0x1e50] sm:$0xff]  ;;  %v13208_v35 = vcombine.high %v1010_v55, %v1014_v10  ;;  %v13207_v28 = vcombine.low %v1010_v55, %v1014_v10  ;;  %v14592_v10 = vld [vmem:[#allocation7] sm:$0xff] }
 0x3eb   :  { %9132 = vmatprep.subr.bf16.mxu0 %v13224_v0  ;;  %v1142_v23 = vld [vmem:[#allocation5 + $0x1e70] sm:$0xff] }
 0x3ec   :  { %9174 = vmatpush2.bf16.msra.mxu1 %v13359_v11  ;;  %v13336_v41 = vcombine.high %v1138_v4, %v1142_v23  ;;  %v1002_v27 = vld [vmem:[#allocation5 + $0x1a10] sm:$0xff]  ;;  %v13335_v44 = vcombine.low %v1138_v4, %v1142_v23  ;;  %v1469_v4 = vrot.slane %v14592_v10, %v1468_v6 }
 0x3ed   :  { %9175 = vmatprep.subr.bf16.mxu1 %v13352_v26  ;;  %v1006_v8 = vld [vmem:[#allocation5 + $0x1a30] sm:$0xff] }
 0x3ee   :  { %9133 = vmatpush2.bf16.msra.mxu0 %v13223_v51  ;;  %v1130_v15 = vld [vmem:[#allocation5 + $0x1e10] sm:$0xff]  ;;  %v13200_v52 = vcombine.high %v1002_v27, %v1006_v8  ;;  %v13199_v34 = vcombine.low %v1002_v27, %v1006_v8 }
 0x3ef   :  { %9134 = vmatprep.subr.bf16.mxu0 %v13216_v18  ;;  %v1134_v14 = vld [vmem:[#allocation5 + $0x1e30] sm:$0xff] }
 0x3f0   :  { %9176 = vmatpush2.bf16.msra.mxu1 %v13351_v24  ;;  %v13328_v36 = vcombine.high %v1130_v15, %v1134_v14  ;;  %v1250_v58 = vld [vmem:[#allocation5 + $0x21d0] sm:$0xff]  ;;  %v13327_v31 = vcombine.low %v1130_v15, %v1134_v14 }
 0x3f1   :  { %9177 = vmatprep.subr.bf16.mxu1 %v13344_v25  ;;  %v1254_v11 = vld [vmem:[#allocation5 + $0x21f0] sm:$0xff] }
 0x3f2   :  { %9135 = vmatpush2.bf16.msra.mxu0 %v13215_v17  ;;  %v1378_v0 = vld [vmem:[#allocation5 + $0x25d0] sm:$0xff]  ;;  %v13448_v47 = vcombine.high %v1250_v58, %v1254_v11  ;;  %v13447_v23 = vcombine.low %v1250_v58, %v1254_v11  ;;  %v15070_v17 = vpop.f32.mrf.mxu0  ;;  %v14594_v58 = vld [vmem:[#allocation2 + $0x38] ss:$80 sps:$4 sm:$0xff]  }
 0x3f3   :  { %9136 = vmatprep.subr.bf16.mxu0 %v13208_v35  ;;  %v1382_v26 = vld [vmem:[#allocation5 + $0x25f0] sm:$0xff] }
 0x3f4   :  { %9178 = vmatpush2.bf16.msra.mxu1 %v13343_v46  ;;  %v13576_v51 = vcombine.high %v1378_v0, %v1382_v26  ;;  %v1242_v24 = vld [vmem:[#allocation5 + $0x2190] sm:$0xff]  ;;  %v13575_v46 = vcombine.low %v1378_v0, %v1382_v26 }
 0x3f5   :  { %9179 = vmatprep.subr.bf16.mxu1 %v13336_v41  ;;  %v1246_v18 = vld [vmem:[#allocation5 + $0x21b0] sm:$0xff]  ;;  %v15072_v41 = vpop.f32.mrf.mxu1 }
 0x3f6   :  { %9137 = vmatpush2.bf16.msra.mxu0 %v13207_v28  ;;  %v1370_v25 = vld [vmem:[#allocation5 + $0x2590] sm:$0xff]  ;;  %v13440_v35 = vcombine.high %v1242_v24, %v1246_v18  ;;  %15290 = vst [vmem:[#allocation32_spill] sm:$0xff] %v15072_v41  ;;  %v13439_v11 = vcombine.low %v1242_v24, %v1246_v18  ;;  %v14596_v24 = vld [vmem:[#allocation2 + $0x4c] ss:$80 sps:$4 sm:$0xff]  }
 0x3f7   :  { %9138 = vmatprep.subr.bf16.mxu0 %v13200_v52  ;;  %v1374_v55 = vld [vmem:[#allocation5 + $0x25b0] sm:$0xff] }
 0x3f8   :  { %9180 = vmatpush2.bf16.msra.mxu1 %v13335_v44  ;;  %v13568_v27 = vcombine.high %v1370_v25, %v1374_v55  ;;  %v1234_v8 = vld [vmem:[#allocation5 + $0x2150] sm:$0xff]  ;;  %v13567_v26 = vcombine.low %v1370_v25, %v1374_v55 }
 0x3f9   :  { %9181 = vmatprep.subr.bf16.mxu1 %v13328_v36  ;;  %v1238_v15 = vld [vmem:[#allocation5 + $0x2170] sm:$0xff] }
 0x3fa   :  { %9139 = vmatpush2.bf16.msra.mxu0 %v13199_v34  ;;  %v14593_v28 = vld [vmem:[#allocation2 + $0x30] ss:$80 sps:$4 sm:$0xff]   ;;  %v13432_v6 = vcombine.high %v1234_v8, %v1238_v15 }
 0x3fb   :  { %9194 = vmatprep.subr.bf16.mxu0 %v13448_v47  ;;  %v1362_v44 = vld [vmem:[#allocation5 + $0x2550] sm:$0xff] }
 0x3fc   :  { %9182 = vmatpush2.bf16.msra.mxu1 %v13327_v31  ;;  %v1366_v52 = vld [vmem:[#allocation5 + $0x2570] sm:$0xff] }
 0x3fd   :  { %9237 = vmatprep.subr.bf16.mxu1 %v13576_v51  ;;  %v8884_v14 = vpop.f32.mrf.mxu0  ;;  %9141 = vmatmul.mubr.bf16.vlgmr.msra.gmra.mxu0 %v14593_v28  ;;  %v13560_v51 = vcombine.high %v1362_v44, %v1366_v52  ;;  %v1226_v10 = vld [vmem:[#allocation5 + $0x2110] sm:$0xff]  ;;  %v13559_v55 = vcombine.low %v1362_v44, %v1366_v52 }
 0x3fe   :  { %v8885_v36 = vadd.f32 %v8884_v14, %v1469_v4  ;;  %9195 = vmatpush1.bf16.msra.mxu0 %v13447_v23  ;;  %v1230_v28 = vld [vmem:[#allocation5 + $0x2130] sm:$0xff] }
 0x3ff   :  { %v8927_v34 = vpop.f32.mrf.mxu1  ;;  %9184 = vmatmul.mubr.bf16.vlgmr.msra.gmra.mxu1 %v14594_v58  ;;  %v15074_v0 = vpop.f32.mrf.mxu0  ;;  %9196 = vmatprep.subr.bf16.mxu0 %v13440_v35  ;;  %v14595_v14 = vld [vmem:[#allocation2 + $0x44] ss:$80 sps:$4 sm:$0xff]   ;;  %v13424_v35 = vcombine.high %v1226_v10, %v1230_v28  ;;  %v13423_v41 = vcombine.low %v1226_v10, %v1230_v28 }
 0x400   :  { %9238 = vmatpush1.bf16.msra.mxu1 %v13575_v46  ;;  %15291 = vst [vmem:[#allocation33_spill] sm:$0xff] %v15074_v0  ;;  %v15076_v31 = vadd.f32 %v8927_v34, %v8885_v36  ;;  %9226 = vmatprep.mubr.bf16.mxu0 %v14595_v14  ;;  %v1354_v58 = vld [vmem:[#allocation5 + $0x2510] sm:$0xff]  ;;  %v13431_v46 = vcombine.low %v1234_v8, %v1238_v15 }
 0x401   :  { %v15078_v47 = vpop.f32.mrf.mxu1  ;;  %9239 = vmatprep.subr.bf16.mxu1 %v13568_v27  ;;  %v8888_v3 = vpop.f32.mrf.mxu0  ;;  %v1358_v23 = vld [vmem:[#allocation5 + $0x2530] sm:$0xff]  ;;  %9269 = vmatprep.mubr.bf16.mxu1 %v14596_v24 }
 0x402   :  { %15292 = vst [vmem:[#allocation34_spill] sm:$0xff] %v15078_v47  ;;  %v8889_v18 = vadd.f32 %v8888_v3, %v1469_v4  ;;  %9197 = vmatpush1.bf16.msra.mxu0 %v13439_v11  ;;  %v13552_v27 = vcombine.high %v1354_v58, %v1358_v23  ;;  %v1218_v34 = vld [vmem:[#allocation5 + $0x20d0] sm:$0xff]  ;;  %v13551_v3 = vcombine.low %v1354_v58, %v1358_v23 }
 0x403   :  { %v8931_v25 = vpop.f32.mrf.mxu1  ;;  %9198 = vmatprep.subr.bf16.mxu0 %v13432_v6  ;;  %v1222_v47 = vld [vmem:[#allocation5 + $0x20f0] sm:$0xff] }
 0x404   :  { %9240 = vmatpush1.bf16.msra.mxu1 %v13567_v26  ;;  %v15080_v36 = vadd.f32 %v8931_v25, %v8889_v18  ;;  %v1346_v14 = vld [vmem:[#allocation5 + $0x24d0] sm:$0xff]  ;;  %v13416_v4 = vcombine.high %v1218_v34, %v1222_v47  ;;  %v13415_v26 = vcombine.low %v1218_v34, %v1222_v47 }
 0x405   :  { %9241 = vmatprep.subr.bf16.mxu1 %v13560_v51  ;;  %v1350_v0 = vld [vmem:[#allocation5 + $0x24f0] sm:$0xff] }
 0x406   :  { %9199 = vmatpush1.bf16.msra.mxu0 %v13431_v46  ;;  %v13544_v8 = vcombine.high %v1346_v14, %v1350_v0  ;;  %v1210_v15 = vld [vmem:[#allocation5 + $0x2090] sm:$0xff]  ;;  %v13543_v6 = vcombine.low %v1346_v14, %v1350_v0 }
 0x407   :  { %9200 = vmatprep.subr.bf16.mxu0 %v13424_v35  ;;  %v1214_v11 = vld [vmem:[#allocation5 + $0x20b0] sm:$0xff] }
 0x408   :  { %9242 = vmatpush1.bf16.msra.mxu1 %v13559_v55  ;;  %v1338_v44 = vld [vmem:[#allocation5 + $0x2490] sm:$0xff]  ;;  %v13408_v51 = vcombine.high %v1210_v15, %v1214_v11  ;;  %v13407_v58 = vcombine.low %v1210_v15, %v1214_v11 }
 0x409   :  { %9243 = vmatprep.subr.bf16.mxu1 %v13552_v27  ;;  %v1342_v52 = vld [vmem:[#allocation5 + $0x24b0] sm:$0xff] }
 0x40a   :  { %9201 = vmatpush1.bf16.msra.mxu0 %v13423_v41  ;;  %v13536_v24 = vcombine.high %v1338_v44, %v1342_v52  ;;  %v1202_v18 = vld [vmem:[#allocation5 + $0x2050] sm:$0xff]  ;;  %v13535_v23 = vcombine.low %v1338_v44, %v1342_v52 }
 0x40b   :  { %9202 = vmatprep.subr.bf16.mxu0 %v13416_v4  ;;  %v1206_v10 = vld [vmem:[#allocation5 + $0x2070] sm:$0xff] }
 0x40c   :  { %9244 = vmatpush1.bf16.msra.mxu1 %v13551_v3  ;;  %v1330_v28 = vld [vmem:[#allocation5 + $0x2450] sm:$0xff]  ;;  %v13400_v25 = vcombine.high %v1202_v18, %v1206_v10  ;;  %v13399_v0 = vcombine.low %v1202_v18, %v1206_v10 }
 0x40d   :  { %9245 = vmatprep.subr.bf16.mxu1 %v13544_v8  ;;  %v1334_v46 = vld [vmem:[#allocation5 + $0x2470] sm:$0xff] }
 0x40e   :  { %9203 = vmatpush1.bf16.msra.mxu0 %v13415_v26  ;;  %v13528_v55 = vcombine.high %v1330_v28, %v1334_v46  ;;  %v1194_v41 = vld [vmem:[#allocation5 + $0x2010] sm:$0xff]  ;;  %v13527_v34 = vcombine.low %v1330_v28, %v1334_v46 }
 0x40f   :  { %9204 = vmatprep.subr.bf16.mxu0 %v13408_v51  ;;  %v1198_v47 = vld [vmem:[#allocation5 + $0x2030] sm:$0xff] }
 0x410   :  { %9246 = vmatpush1.bf16.msra.mxu1 %v13543_v6  ;;  %v1322_v35 = vld [vmem:[#allocation5 + $0x2410] sm:$0xff]  ;;  %v13392_v14 = vcombine.high %v1194_v41, %v1198_v47  ;;  %v13391_v44 = vcombine.low %v1194_v41, %v1198_v47 }
 0x411   :  { %9247 = vmatprep.subr.bf16.mxu1 %v13536_v24  ;;  %v1326_v27 = vld [vmem:[#allocation5 + $0x2430] sm:$0xff] }
 0x412   :  { %9205 = vmatpush1.bf16.msra.mxu0 %v13407_v58  ;;  %v13520_v3 = vcombine.high %v1322_v35, %v1326_v27  ;;  %v1314_v4 = vld [vmem:[#allocation5 + $0x23d0] sm:$0xff]  ;;  %v13519_v52 = vcombine.low %v1322_v35, %v1326_v27 }
 0x413   :  { %9206 = vmatprep.subr.bf16.mxu0 %v13400_v25  ;;  %v1318_v8 = vld [vmem:[#allocation5 + $0x23f0] sm:$0xff] }
 0x414   :  { %9248 = vmatpush1.bf16.msra.mxu1 %v13535_v23  ;;  %v1442_v15 = vld [vmem:[#allocation5 + $0x27d0] sm:$0xff]  ;;  %v13512_v26 = vcombine.high %v1314_v4, %v1318_v8  ;;  %v13511_v28 = vcombine.low %v1314_v4, %v1318_v8 }
 0x415   :  { %9249 = vmatprep.subr.bf16.mxu1 %v13528_v55  ;;  %v1446_v11 = vld [vmem:[#allocation5 + $0x27f0] sm:$0xff] }
 0x416   :  { %9207 = vmatpush1.bf16.msra.mxu0 %v13399_v0  ;;  %v13640_v6 = vcombine.high %v1442_v15, %v1446_v11  ;;  %v1306_v51 = vld [vmem:[#allocation5 + $0x2390] sm:$0xff]  ;;  %v13639_v46 = vcombine.low %v1442_v15, %v1446_v11 }
 0x417   :  { %9208 = vmatprep.subr.bf16.mxu0 %v13392_v14  ;;  %v1310_v24 = vld [vmem:[#allocation5 + $0x23b0] sm:$0xff] }
 0x418   :  { %9250 = vmatpush1.bf16.msra.mxu1 %v13527_v34  ;;  %v1434_v18 = vld [vmem:[#allocation5 + $0x2790] sm:$0xff]  ;;  %v13504_v58 = vcombine.high %v1306_v51, %v1310_v24  ;;  %v13503_v35 = vcombine.low %v1306_v51, %v1310_v24 }
 0x419   :  { %9251 = vmatprep.subr.bf16.mxu1 %v13520_v3  ;;  %v1438_v10 = vld [vmem:[#allocation5 + $0x27b0] sm:$0xff] }
 0x41a   :  { %9209 = vmatpush1.bf16.msra.mxu0 %v13391_v44  ;;  %v13632_v23 = vcombine.high %v1434_v18, %v1438_v10  ;;  %v1298_v25 = vld [vmem:[#allocation5 + $0x2350] sm:$0xff]  ;;  %v13631_v27 = vcombine.low %v1434_v18, %v1438_v10 }
 0x41b   :  { %9210 = vmatprep.subr.bf16.mxu0 %v13512_v26  ;;  %v1302_v55 = vld [vmem:[#allocation5 + $0x2370] sm:$0xff] }
 0x41c   :  { %9252 = vmatpush1.bf16.msra.mxu1 %v13519_v52  ;;  %v1426_v41 = vld [vmem:[#allocation5 + $0x2750] sm:$0xff]  ;;  %v13496_v0 = vcombine.high %v1298_v25, %v1302_v55  ;;  %v13495_v15 = vcombine.low %v1298_v25, %v1302_v55 }
 0x41d   :  { %9253 = vmatprep.subr.bf16.mxu1 %v13640_v6  ;;  %v1430_v47 = vld [vmem:[#allocation5 + $0x2770] sm:$0xff] }
 0x41e   :  { %9211 = vmatpush2.bf16.msra.mxu0 %v13511_v28  ;;  %v13624_v34 = vcombine.high %v1426_v41, %v1430_v47  ;;  %v1290_v14 = vld [vmem:[#allocation5 + $0x2310] sm:$0xff]  ;;  %v13623_v11 = vcombine.low %v1426_v41, %v1430_v47 }
 0x41f   :  { %9212 = vmatprep.subr.bf16.mxu0 %v13504_v58  ;;  %v1294_v3 = vld [vmem:[#allocation5 + $0x2330] sm:$0xff] }
 0x420   :  { %9254 = vmatpush2.bf16.msra.mxu1 %v13639_v46  ;;  %v1418_v4 = vld [vmem:[#allocation5 + $0x2710] sm:$0xff]  ;;  %v13488_v44 = vcombine.high %v1290_v14, %v1294_v3  ;;  %v13487_v18 = vcombine.low %v1290_v14, %v1294_v3 }
 0x421   :  { %9255 = vmatprep.subr.bf16.mxu1 %v13632_v23  ;;  %v1422_v8 = vld [vmem:[#allocation5 + $0x2730] sm:$0xff] }
 0x422   :  { %9213 = vmatpush2.bf16.msra.mxu0 %v13503_v35  ;;  %v13616_v52 = vcombine.high %v1418_v4, %v1422_v8  ;;  %v1282_v26 = vld [vmem:[#allocation5 + $0x22d0] sm:$0xff]  ;;  %v13615_v10 = vcombine.low %v1418_v4, %v1422_v8 }
 0x423   :  { %9214 = vmatprep.subr.bf16.mxu0 %v13496_v0  ;;  %v1286_v6 = vld [vmem:[#allocation5 + $0x22f0] sm:$0xff] }
 0x424   :  { %9256 = vmatpush2.bf16.msra.mxu1 %v13631_v27  ;;  %v1410_v51 = vld [vmem:[#allocation5 + $0x26d0] sm:$0xff]  ;;  %v13480_v28 = vcombine.high %v1282_v26, %v1286_v6  ;;  %v13479_v41 = vcombine.low %v1282_v26, %v1286_v6 }
 0x425   :  { %9257 = vmatprep.subr.bf16.mxu1 %v13624_v34  ;;  %v1414_v24 = vld [vmem:[#allocation5 + $0x26f0] sm:$0xff] }
 0x426   :  { %9215 = vmatpush2.bf16.msra.mxu0 %v13495_v15  ;;  %v13608_v46 = vcombine.high %v1410_v51, %v1414_v24  ;;  %v1274_v58 = vld [vmem:[#allocation5 + $0x2290] sm:$0xff]  ;;  %v13607_v47 = vcombine.low %v1410_v51, %v1414_v24 }
 0x427   :  { %9216 = vmatprep.subr.bf16.mxu0 %v13488_v44  ;;  %v1278_v23 = vld [vmem:[#allocation5 + $0x22b0] sm:$0xff] }
 0x428   :  { %9258 = vmatpush2.bf16.msra.mxu1 %v13623_v11  ;;  %v1402_v25 = vld [vmem:[#allocation5 + $0x2690] sm:$0xff]  ;;  %v13472_v35 = vcombine.high %v1274_v58, %v1278_v23  ;;  %v13471_v4 = vcombine.low %v1274_v58, %v1278_v23  ;;  %v355_v58 = vld [vmem:[#allocation5 + $0x5d8] sm:$0xff] }
 0x429   :  { %9259 = vmatprep.subr.bf16.mxu1 %v13616_v52  ;;  %v1406_v55 = vld [vmem:[#allocation5 + $0x26b0] sm:$0xff]  ;;  %v359_v23 = vld [vmem:[#allocation5 + $0x5f8] sm:$0xff] }
 0x42a   :  { %9217 = vmatpush2.bf16.msra.mxu0 %v13487_v18  ;;  %v13600_v27 = vcombine.high %v1402_v25, %v1406_v55  ;;  %v1266_v0 = vld [vmem:[#allocation5 + $0x2250] sm:$0xff]  ;;  %v13599_v8 = vcombine.low %v1402_v25, %v1406_v55 }
 0x42b   :  { %9218 = vmatprep.subr.bf16.mxu0 %v13480_v28  ;;  %v1270_v34 = vld [vmem:[#allocation5 + $0x2270] sm:$0xff]  ;;  %v227_v28 = vld [vmem:[#allocation5 + $0x1d8] sm:$0xff] }
 0x42c   :  { %9260 = vmatpush2.bf16.msra.mxu1 %v13615_v10  ;;  %v1394_v14 = vld [vmem:[#allocation5 + $0x2650] sm:$0xff]  ;;  %v13464_v15 = vcombine.high %v1266_v0, %v1270_v34  ;;  %v13463_v51 = vcombine.low %v1266_v0, %v1270_v34  ;;  %v347_v0 = vld [vmem:[#allocation5 + $0x598] sm:$0xff] }
 0x42d   :  { %9261 = vmatprep.subr.bf16.mxu1 %v13608_v46  ;;  %v1398_v3 = vld [vmem:[#allocation5 + $0x2670] sm:$0xff]  ;;  %v231_v46 = vld [vmem:[#allocation5 + $0x1f8] sm:$0xff] }
 0x42e   :  { %9219 = vmatpush2.bf16.msra.mxu0 %v13479_v41  ;;  %v13592_v11 = vcombine.high %v1394_v14, %v1398_v3  ;;  %v1258_v44 = vld [vmem:[#allocation5 + $0x2210] sm:$0xff]  ;;  %v13591_v24 = vcombine.low %v1394_v14, %v1398_v3  ;;  %v12426_v41 = vcombine.high %v227_v28, %v231_v46  ;;  %v351_v34 = vld [vmem:[#allocation5 + $0x5b8] sm:$0xff]  ;;  %v12425_v14 = vcombine.low %v227_v28, %v231_v46  ;;  %v15082_v3 = vpop.f32.mrf.mxu0 }
 0x42f   :  { %9220 = vmatprep.subr.bf16.mxu0 %v13472_v35  ;;  %v1262_v52 = vld [vmem:[#allocation5 + $0x2230] sm:$0xff]  ;;  %v219_v35 = vld [vmem:[#allocation5 + $0x198] sm:$0xff]  ;;  %15293 = vst [vmem:[#allocation35_spill] sm:$0xff] %v15082_v3 }
 0x430   :  { %9262 = vmatpush2.bf16.msra.mxu1 %v13607_v47  ;;  %v1386_v26 = vld [vmem:[#allocation5 + $0x2610] sm:$0xff]  ;;  %v13456_v18 = vcombine.high %v1258_v44, %v1262_v52  ;;  %v13455_v25 = vcombine.low %v1258_v44, %v1262_v52  ;;  %v12554_v47 = vcombine.high %v355_v58, %v359_v23  ;;  %v211_v44 = vld [vmem:[#allocation5 + $0x158] sm:$0xff] }
 0x431   :  { %9263 = vmatprep.subr.bf16.mxu1 %v13600_v27  ;;  %v1390_v6 = vld [vmem:[#allocation5 + $0x2630] sm:$0xff]  ;;  %v223_v27 = vld [vmem:[#allocation5 + $0x1b8] sm:$0xff] }
 0x432   :  { %9221 = vmatpush2.bf16.msra.mxu0 %v13471_v4  ;;  %v13584_v10 = vcombine.high %v1386_v26, %v1390_v6  ;;  %v13583_v55 = vcombine.low %v1386_v26, %v1390_v6  ;;  %v12553_v4 = vcombine.low %v355_v58, %v359_v23  ;;  %v215_v52 = vld [vmem:[#allocation5 + $0x178] sm:$0xff]  ;;  %v14597_v6 = vld [vmem:[#allocation2 + $0x40] ss:$80 sps:$4 sm:$0xff]   ;;  %v12417_v46 = vcombine.low %v219_v35, %v223_v27 }
 0x433   :  { %9222 = vmatprep.subr.bf16.mxu0 %v13464_v15  ;;  %v15084_v15 = vpop.f32.mrf.mxu1  ;;  %v14598_v28 = vld [vmem:[#allocation2 + $0x48] ss:$80 sps:$4 sm:$0xff]   ;;  %v12545_v23 = vcombine.low %v347_v0, %v351_v34 }
 0x434   :  { %9264 = vmatpush2.bf16.msra.mxu1 %v13599_v8  ;;  %v12418_v8 = vcombine.high %v219_v35, %v223_v27  ;;  %15294 = vst [vmem:[#allocation36_spill] sm:$0xff] %v15084_v15  ;;  %v207_v15 = vld [vmem:[#allocation5 + $0x138] sm:$0xff] }
 0x435   :  { %9265 = vmatprep.subr.bf16.mxu1 %v13592_v11  ;;  %v12546_v11 = vcombine.high %v347_v0, %v351_v34  ;;  %v14600_v35 = vld [vmem:[#allocation2 + $0xc] ss:$80 sps:$4 sm:$0xff]   ;;  %v12409_v0 = vcombine.low %v211_v44, %v215_v52 }
 0x436   :  { %9223 = vmatpush2.bf16.msra.mxu0 %v13463_v51  ;;  %v339_v51 = vld [vmem:[#allocation5 + $0x558] sm:$0xff] }
 0x437   :  { %9224 = vmatprep.subr.bf16.mxu0 %v13456_v18 }
 0x438   :  { %9266 = vmatpush2.bf16.msra.mxu1 %v13591_v24  ;;  %v343_v24 = vld [vmem:[#allocation5 + $0x578] sm:$0xff] }
 0x439   :  { %9267 = vmatprep.subr.bf16.mxu1 %v13584_v10 }
 0x43a   :  { %9225 = vmatpush2.bf16.msra.mxu0 %v13455_v25  ;;  %v12410_v25 = vcombine.high %v211_v44, %v215_v52  ;;  %v187_v52 = vld [vmem:[#allocation5 + $0x98] sm:$0xff] }
 0x43b   :  { %9280 = vmatprep.subr.bf16.mxu0 %v12426_v41 }
 0x43c   :  { %9268 = vmatpush2.bf16.msra.mxu1 %v13583_v55 }
 0x43d   :  { %9323 = vmatprep.subr.bf16.mxu1 %v12554_v47  ;;  %v8970_v26 = vpop.f32.mrf.mxu0  ;;  %9227 = vmatmul.mubr.bf16.vlgmr.msra.gmra.mxu0 %v14597_v6  ;;  %v12538_v47 = vcombine.high %v339_v51, %v343_v24  ;;  %v203_v6 = vld [vmem:[#allocation5 + $0x118] sm:$0xff] }
 0x43e   :  { %v8971_v18 = vadd.f32 %v8970_v26, %v15076_v31  ;;  %9281 = vmatpush1.bf16.msra.mxu0 %v12425_v14  ;;  %v14599_v31 = vld [vmem:[#allocation2 + $0x4] ss:$80 sps:$4 sm:$0xff]   ;;  %v335_v14 = vld [vmem:[#allocation5 + $0x538] sm:$0xff]  ;;  %v12401_v3 = vcombine.low %v203_v6, %v207_v15 }
 0x43f   :  { %v9013_v10 = vpop.f32.mrf.mxu1  ;;  %9270 = vmatmul.mubr.bf16.vlgmr.msra.gmra.mxu1 %v14598_v28  ;;  %v15087_v58 = vpop.f32.mrf.mxu0  ;;  %9282 = vmatprep.subr.bf16.mxu0 %v12418_v8  ;;  %v331_v28 = vld [vmem:[#allocation5 + $0x518] sm:$0xff]  ;;  %v12402_v8 = vcombine.high %v203_v6, %v207_v15 }
 0x440   :  { %9324 = vmatpush1.bf16.msra.mxu1 %v12553_v4  ;;  %15295 = vst [vmem:[#allocation37_spill] sm:$0xff] %v15087_v58  ;;  %v15089_v55 = vadd.f32 %v9013_v10, %v8971_v18  ;;  %9312 = vmatprep.mubr.bf16.mxu0 %v14599_v31  ;;  %v12537_v4 = vcombine.low %v339_v51, %v343_v24  ;;  %v195_v10 = vld [vmem:[#allocation5 + $0xd8] sm:$0xff] }
 0x441   :  { %v15091_v41 = vpop.f32.mrf.mxu1  ;;  %9325 = vmatprep.subr.bf16.mxu1 %v12546_v11  ;;  %v8974_v26 = vpop.f32.mrf.mxu0  ;;  %9355 = vmatprep.mubr.bf16.mxu1 %v14600_v35  ;;  %v12530_v18 = vcombine.high %v331_v28, %v335_v14  ;;  %v199_v31 = vld [vmem:[#allocation5 + $0xf8] sm:$0xff] }
 0x442   :  { %15296 = vst [vmem:[#allocation38_spill] sm:$0xff] %v15091_v41  ;;  %v8975_v27 = vadd.f32 %v8974_v26, %v15080_v36  ;;  %9283 = vmatpush1.bf16.msra.mxu0 %v12417_v46  ;;  %v323_v41 = vld [vmem:[#allocation5 + $0x4d8] sm:$0xff]  ;;  %v12529_v36 = vcombine.low %v331_v28, %v335_v14  ;;  %v12394_v46 = vcombine.high %v195_v10, %v199_v31 }
 0x443   :  { %v9017_v34 = vpop.f32.mrf.mxu1  ;;  %9284 = vmatprep.subr.bf16.mxu0 %v12410_v25  ;;  %v327_v58 = vld [vmem:[#allocation5 + $0x4f8] sm:$0xff]  ;;  %v12393_v25 = vcombine.low %v195_v10, %v199_v31 }
 0x444   :  { %9326 = vmatpush1.bf16.msra.mxu1 %v12545_v23  ;;  %v15094_v11 = vadd.f32 %v9017_v34, %v8975_v27  ;;  %v12522_v44 = vcombine.high %v323_v41, %v327_v58  ;;  %v191_v23 = vld [vmem:[#allocation5 + $0xb8] sm:$0xff] }
 0x445   :  { %9327 = vmatprep.subr.bf16.mxu1 %v12538_v47  ;;  %v315_v51 = vld [vmem:[#allocation5 + $0x498] sm:$0xff]  ;;  %v12521_v47 = vcombine.low %v323_v41, %v327_v58  ;;  %v12386_v26 = vcombine.high %v187_v52, %v191_v23  ;;  %v12385_v28 = vcombine.low %v187_v52, %v191_v23 }
 0x446   :  { %9285 = vmatpush1.bf16.msra.mxu0 %v12409_v0  ;;  %v319_v24 = vld [vmem:[#allocation5 + $0x4b8] sm:$0xff] }
 0x447   :  { %9286 = vmatprep.subr.bf16.mxu0 %v12402_v8  ;;  %v12514_v35 = vcombine.high %v315_v51, %v319_v24  ;;  %v179_v27 = vld [vmem:[#allocation5 + $0x58] sm:$0xff]  ;;  %v12513_v14 = vcombine.low %v315_v51, %v319_v24 }
 0x448   :  { %9328 = vmatpush1.bf16.msra.mxu1 %v12537_v4  ;;  %v183_v15 = vld [vmem:[#allocation5 + $0x78] sm:$0xff] }
 0x449   :  { %9329 = vmatprep.subr.bf16.mxu1 %v12530_v18  ;;  %v307_v6 = vld [vmem:[#allocation5 + $0x458] sm:$0xff]  ;;  %v12378_v34 = vcombine.high %v179_v27, %v183_v15  ;;  %v12377_v58 = vcombine.low %v179_v27, %v183_v15 }
 0x44a   :  { %9287 = vmatpush1.bf16.msra.mxu0 %v12401_v3  ;;  %v311_v0 = vld [vmem:[#allocation5 + $0x478] sm:$0xff] }
 0x44b   :  { %9288 = vmatprep.subr.bf16.mxu0 %v12394_v46  ;;  %v12506_v4 = vcombine.high %v307_v6, %v311_v0  ;;  %v171_v3 = vld [vmem:[#allocation5 + $0x18] sm:$0xff]  ;;  %v12505_v41 = vcombine.low %v307_v6, %v311_v0 }
 0x44c   :  { %9330 = vmatpush1.bf16.msra.mxu1 %v12529_v36  ;;  %v175_v8 = vld [vmem:[#allocation5 + $0x38] sm:$0xff] }
 0x44d   :  { %9331 = vmatprep.subr.bf16.mxu1 %v12522_v44  ;;  %v299_v18 = vld [vmem:[#allocation5 + $0x418] sm:$0xff]  ;;  %v12370_v31 = vcombine.high %v171_v3, %v175_v8  ;;  %v12369_v51 = vcombine.low %v171_v3, %v175_v8 }
 0x44e   :  { %9289 = vmatpush1.bf16.msra.mxu0 %v12393_v25  ;;  %v303_v10 = vld [vmem:[#allocation5 + $0x438] sm:$0xff] }
 0x44f   :  { %9290 = vmatprep.subr.bf16.mxu0 %v12386_v26  ;;  %v12498_v36 = vcombine.high %v299_v18, %v303_v10  ;;  %v291_v46 = vld [vmem:[#allocation5 + $0x3d8] sm:$0xff]  ;;  %v12497_v24 = vcombine.low %v299_v18, %v303_v10 }
 0x450   :  { %9332 = vmatpush1.bf16.msra.mxu1 %v12521_v47  ;;  %v295_v44 = vld [vmem:[#allocation5 + $0x3f8] sm:$0xff] }
 0x451   :  { %9333 = vmatprep.subr.bf16.mxu1 %v12514_v35  ;;  %v419_v52 = vld [vmem:[#allocation5 + $0x7d8] sm:$0xff]  ;;  %v12490_v25 = vcombine.high %v291_v46, %v295_v44  ;;  %v12489_v6 = vcombine.low %v291_v46, %v295_v44 }
 0x452   :  { %9291 = vmatpush1.bf16.msra.mxu0 %v12385_v28  ;;  %v423_v23 = vld [vmem:[#allocation5 + $0x7f8] sm:$0xff] }
 0x453   :  { %9292 = vmatprep.subr.bf16.mxu0 %v12378_v34  ;;  %v12618_v47 = vcombine.high %v419_v52, %v423_v23  ;;  %v283_v26 = vld [vmem:[#allocation5 + $0x398] sm:$0xff]  ;;  %v12617_v0 = vcombine.low %v419_v52, %v423_v23 }
 0x454   :  { %9334 = vmatpush1.bf16.msra.mxu1 %v12513_v14  ;;  %v287_v35 = vld [vmem:[#allocation5 + $0x3b8] sm:$0xff] }
 0x455   :  { %9335 = vmatprep.subr.bf16.mxu1 %v12506_v4  ;;  %v411_v27 = vld [vmem:[#allocation5 + $0x798] sm:$0xff]  ;;  %v12482_v28 = vcombine.high %v283_v26, %v287_v35  ;;  %v12481_v18 = vcombine.low %v283_v26, %v287_v35 }
 0x456   :  { %9293 = vmatpush1.bf16.msra.mxu0 %v12377_v58  ;;  %v415_v15 = vld [vmem:[#allocation5 + $0x7b8] sm:$0xff] }
 0x457   :  { %9294 = vmatprep.subr.bf16.mxu0 %v12370_v31  ;;  %v12610_v14 = vcombine.high %v411_v27, %v415_v15  ;;  %v275_v34 = vld [vmem:[#allocation5 + $0x358] sm:$0xff]  ;;  %v12609_v10 = vcombine.low %v411_v27, %v415_v15 }
 0x458   :  { %9336 = vmatpush1.bf16.msra.mxu1 %v12505_v41  ;;  %v279_v4 = vld [vmem:[#allocation5 + $0x378] sm:$0xff] }
 0x459   :  { %9337 = vmatprep.subr.bf16.mxu1 %v12498_v36  ;;  %v403_v3 = vld [vmem:[#allocation5 + $0x758] sm:$0xff]  ;;  %v12474_v58 = vcombine.high %v275_v34, %v279_v4  ;;  %v12473_v52 = vcombine.low %v275_v34, %v279_v4 }
 0x45a   :  { %9295 = vmatpush1.bf16.msra.mxu0 %v12369_v51  ;;  %v407_v8 = vld [vmem:[#allocation5 + $0x778] sm:$0xff] }
 0x45b   :  { %9296 = vmatprep.subr.bf16.mxu0 %v12490_v25  ;;  %v12602_v41 = vcombine.high %v403_v3, %v407_v8  ;;  %v267_v31 = vld [vmem:[#allocation5 + $0x318] sm:$0xff]  ;;  %v12601_v23 = vcombine.low %v403_v3, %v407_v8 }
 0x45c   :  { %9338 = vmatpush1.bf16.msra.mxu1 %v12497_v24  ;;  %v271_v36 = vld [vmem:[#allocation5 + $0x338] sm:$0xff] }
 0x45d   :  { %9339 = vmatprep.subr.bf16.mxu1 %v12618_v47  ;;  %v395_v46 = vld [vmem:[#allocation5 + $0x718] sm:$0xff]  ;;  %v12466_v51 = vcombine.high %v267_v31, %v271_v36  ;;  %v12465_v27 = vcombine.low %v267_v31, %v271_v36 }
 0x45e   :  { %9297 = vmatpush2.bf16.msra.mxu0 %v12489_v6  ;;  %v399_v44 = vld [vmem:[#allocation5 + $0x738] sm:$0xff] }
 0x45f   :  { %9298 = vmatprep.subr.bf16.mxu0 %v12482_v28  ;;  %v12594_v24 = vcombine.high %v395_v46, %v399_v44  ;;  %v259_v25 = vld [vmem:[#allocation5 + $0x2d8] sm:$0xff]  ;;  %v12593_v15 = vcombine.low %v395_v46, %v399_v44 }
 0x460   :  { %9340 = vmatpush2.bf16.msra.mxu1 %v12617_v0  ;;  %v263_v47 = vld [vmem:[#allocation5 + $0x2f8] sm:$0xff] }
 0x461   :  { %9341 = vmatprep.subr.bf16.mxu1 %v12610_v14  ;;  %v387_v26 = vld [vmem:[#allocation5 + $0x6d8] sm:$0xff]  ;;  %v12458_v6 = vcombine.high %v259_v25, %v263_v47  ;;  %v12457_v3 = vcombine.low %v259_v25, %v263_v47 }
 0x462   :  { %9299 = vmatpush2.bf16.msra.mxu0 %v12481_v18  ;;  %v391_v35 = vld [vmem:[#allocation5 + $0x6f8] sm:$0xff] }
 0x463   :  { %9300 = vmatprep.subr.bf16.mxu0 %v12474_v58  ;;  %v12586_v0 = vcombine.high %v387_v26, %v391_v35  ;;  %v251_v28 = vld [vmem:[#allocation5 + $0x298] sm:$0xff]  ;;  %v12585_v8 = vcombine.low %v387_v26, %v391_v35 }
 0x464   :  { %9342 = vmatpush2.bf16.msra.mxu1 %v12609_v10  ;;  %v255_v14 = vld [vmem:[#allocation5 + $0x2b8] sm:$0xff] }
 0x465   :  { %9343 = vmatprep.subr.bf16.mxu1 %v12602_v41  ;;  %v379_v34 = vld [vmem:[#allocation5 + $0x698] sm:$0xff]  ;;  %v12450_v18 = vcombine.high %v251_v28, %v255_v14  ;;  %v12449_v46 = vcombine.low %v251_v28, %v255_v14 }
 0x466   :  { %9301 = vmatpush2.bf16.msra.mxu0 %v12473_v52  ;;  %v383_v4 = vld [vmem:[#allocation5 + $0x6b8] sm:$0xff] }
 0x467   :  { %9302 = vmatprep.subr.bf16.mxu0 %v12466_v51  ;;  %v12578_v10 = vcombine.high %v379_v34, %v383_v4  ;;  %v243_v58 = vld [vmem:[#allocation5 + $0x258] sm:$0xff]  ;;  %v12577_v44 = vcombine.low %v379_v34, %v383_v4 }
 0x468   :  { %9344 = vmatpush2.bf16.msra.mxu1 %v12601_v23  ;;  %v247_v41 = vld [vmem:[#allocation5 + $0x278] sm:$0xff] }
 0x469   :  { %9345 = vmatprep.subr.bf16.mxu1 %v12594_v24  ;;  %v371_v31 = vld [vmem:[#allocation5 + $0x658] sm:$0xff]  ;;  %v12442_v52 = vcombine.high %v243_v58, %v247_v41  ;;  %v12441_v26 = vcombine.low %v243_v58, %v247_v41 }
 0x46a   :  { %9303 = vmatpush2.bf16.msra.mxu0 %v12465_v27  ;;  %v375_v36 = vld [vmem:[#allocation5 + $0x678] sm:$0xff] }
 0x46b   :  { %9304 = vmatprep.subr.bf16.mxu0 %v12458_v6  ;;  %v12570_v23 = vcombine.high %v371_v31, %v375_v36  ;;  %v235_v51 = vld [vmem:[#allocation5 + $0x218] sm:$0xff]  ;;  %v12569_v35 = vcombine.low %v371_v31, %v375_v36  ;;  %v15096_v36 = vpop.f32.mrf.mxu0 }
 0x46c   :  { %9346 = vmatpush2.bf16.msra.mxu1 %v12593_v15  ;;  %v239_v24 = vld [vmem:[#allocation5 + $0x238] sm:$0xff]  ;;  %15297 = vst [vmem:[#allocation39_spill] sm:$0xff] %v15096_v36 }
 0x46d   :  { %9347 = vmatprep.subr.bf16.mxu1 %v12586_v0  ;;  %v363_v25 = vld [vmem:[#allocation5 + $0x618] sm:$0xff]  ;;  %v12434_v27 = vcombine.high %v235_v51, %v239_v24  ;;  %v12433_v34 = vcombine.low %v235_v51, %v239_v24 }
 0x46e   :  { %9305 = vmatpush2.bf16.msra.mxu0 %v12457_v3  ;;  %v367_v47 = vld [vmem:[#allocation5 + $0x638] sm:$0xff] }
 0x46f   :  { %9306 = vmatprep.subr.bf16.mxu0 %v12450_v18  ;;  %v12562_v15 = vcombine.high %v363_v25, %v367_v47  ;;  %v483_v6 = vld [vmem:[#allocation5 + $0x9d8] sm:$0xff]  ;;  %v12561_v4 = vcombine.low %v363_v25, %v367_v47  ;;  %v14601_v47 = vld [vmem:[#allocation2] ss:$80 sps:$4 sm:$0xff]  }
 0x470   :  { %9348 = vmatpush2.bf16.msra.mxu1 %v12585_v8  ;;  %v487_v0 = vld [vmem:[#allocation5 + $0x9f8] sm:$0xff] }
 0x471   :  { %9349 = vmatprep.subr.bf16.mxu1 %v12578_v10  ;;  %v611_v28 = vld [vmem:[#allocation5 + $0xdd8] sm:$0xff]  ;;  %v12682_v3 = vcombine.high %v483_v6, %v487_v0  ;;  %v12681_v31 = vcombine.low %v483_v6, %v487_v0 }
 0x472   :  { %9307 = vmatpush2.bf16.msra.mxu0 %v12449_v46  ;;  %v615_v14 = vld [vmem:[#allocation5 + $0xdf8] sm:$0xff] }
 0x473   :  { %9308 = vmatprep.subr.bf16.mxu0 %v12442_v52  ;;  %v12810_v8 = vcombine.high %v611_v28, %v615_v14  ;;  %v475_v18 = vld [vmem:[#allocation5 + $0x998] sm:$0xff]  ;;  %v12809_v46 = vcombine.low %v611_v28, %v615_v14  ;;  %v15098_v52 = vpop.f32.mrf.mxu1 }
 0x474   :  { %9350 = vmatpush2.bf16.msra.mxu1 %v12577_v44  ;;  %v479_v10 = vld [vmem:[#allocation5 + $0x9b8] sm:$0xff]  ;;  %15298 = vst [vmem:[#allocation40_spill] sm:$0xff] %v15098_v52 }
 0x475   :  { %9351 = vmatprep.subr.bf16.mxu1 %v12570_v23  ;;  %v603_v58 = vld [vmem:[#allocation5 + $0xd98] sm:$0xff]  ;;  %v12674_v44 = vcombine.high %v475_v18, %v479_v10  ;;  %v12673_v0 = vcombine.low %v475_v18, %v479_v10 }
 0x476   :  { %9309 = vmatpush2.bf16.msra.mxu0 %v12441_v26  ;;  %v607_v41 = vld [vmem:[#allocation5 + $0xdb8] sm:$0xff] }
 0x477   :  { %9310 = vmatprep.subr.bf16.mxu0 %v12434_v27  ;;  %v12802_v23 = vcombine.high %v603_v58, %v607_v41  ;;  %v467_v51 = vld [vmem:[#allocation5 + $0x958] sm:$0xff]  ;;  %v12801_v14 = vcombine.low %v603_v58, %v607_v41 }
 0x478   :  { %9352 = vmatpush2.bf16.msra.mxu1 %v12569_v35  ;;  %v471_v24 = vld [vmem:[#allocation5 + $0x978] sm:$0xff] }
 0x479   :  { %9353 = vmatprep.subr.bf16.mxu1 %v12562_v15  ;;  %v595_v26 = vld [vmem:[#allocation5 + $0xd58] sm:$0xff]  ;;  %v12665_v58 = vcombine.low %v467_v51, %v471_v24 }
 0x47a   :  { %9311 = vmatpush2.bf16.msra.mxu0 %v12433_v34  ;;  %v599_v35 = vld [vmem:[#allocation5 + $0xd78] sm:$0xff]  ;;  %v12666_v34 = vcombine.high %v467_v51, %v471_v24 }
 0x47b   :  { %9366 = vmatprep.subr.bf16.mxu0 %v12682_v3  ;;  %v14602_v6 = vld [vmem:[#allocation2 + $0x8] ss:$80 sps:$4 sm:$0xff]   ;;  %v14604_v18 = vld [vmem:[#allocation2 + $0x1c] ss:$80 sps:$4 sm:$0xff]  }
 0x47c   :  { %9354 = vmatpush2.bf16.msra.mxu1 %v12561_v4  ;;  %v463_v52 = vld [vmem:[#allocation5 + $0x938] sm:$0xff] }
 0x47d   :  { %9409 = vmatprep.subr.bf16.mxu1 %v12810_v8  ;;  %v9056_v25 = vpop.f32.mrf.mxu0  ;;  %9313 = vmatmul.mubr.bf16.vlgmr.msra.gmra.mxu0 %v14601_v47  ;;  %v12794_v8 = vcombine.high %v595_v26, %v599_v35  ;;  %v459_v47 = vld [vmem:[#allocation5 + $0x918] sm:$0xff] }
 0x47e   :  { %v9057_v27 = vadd.f32 %v9056_v25, %v15089_v55  ;;  %9367 = vmatpush1.bf16.msra.mxu0 %v12681_v31  ;;  %v14603_v55 = vld [vmem:[#allocation2 + $0x14] ss:$80 sps:$4 sm:$0xff]   ;;  %v591_v31 = vld [vmem:[#allocation5 + $0xd38] sm:$0xff]  ;;  %v12657_v36 = vcombine.low %v459_v47, %v463_v52 }
 0x47f   :  { %v9099_v15 = vpop.f32.mrf.mxu1  ;;  %9356 = vmatmul.mubr.bf16.vlgmr.msra.gmra.mxu1 %v14602_v6  ;;  %v15101_v28 = vpop.f32.mrf.mxu0  ;;  %9368 = vmatprep.subr.bf16.mxu0 %v12674_v44  ;;  %v587_v6 = vld [vmem:[#allocation5 + $0xd18] sm:$0xff]  ;;  %v12658_v44 = vcombine.high %v459_v47, %v463_v52 }
 0x480   :  { %9410 = vmatpush1.bf16.msra.mxu1 %v12809_v46  ;;  %15299 = vst [vmem:[#allocation41_spill] sm:$0xff] %v15101_v28  ;;  %v15103_v4 = vadd.f32 %v9099_v15, %v9057_v27  ;;  %9398 = vmatprep.mubr.bf16.mxu0 %v14603_v55  ;;  %v12793_v46 = vcombine.low %v595_v26, %v599_v35  ;;  %v451_v15 = vld [vmem:[#allocation5 + $0x8d8] sm:$0xff] }
 0x481   :  { %v15105_v3 = vpop.f32.mrf.mxu1  ;;  %9411 = vmatprep.subr.bf16.mxu1 %v12802_v23  ;;  %v9060_v25 = vpop.f32.mrf.mxu0  ;;  %9441 = vmatprep.mubr.bf16.mxu1 %v14604_v18  ;;  %v12786_v27 = vcombine.high %v587_v6, %v591_v31  ;;  %v455_v55 = vld [vmem:[#allocation5 + $0x8f8] sm:$0xff] }
 0x482   :  { %15300 = vst [vmem:[#allocation42_spill] sm:$0xff] %v15105_v3  ;;  %v9061_v10 = vadd.f32 %v9060_v25, %v15094_v11  ;;  %9369 = vmatpush1.bf16.msra.mxu0 %v12673_v0  ;;  %v579_v3 = vld [vmem:[#allocation5 + $0xcd8] sm:$0xff]  ;;  %v12785_v11 = vcombine.low %v587_v6, %v591_v31  ;;  %v12650_v0 = vcombine.high %v451_v15, %v455_v55 }
 0x483   :  { %v9103_v41 = vpop.f32.mrf.mxu1  ;;  %9370 = vmatprep.subr.bf16.mxu0 %v12666_v34  ;;  %v583_v28 = vld [vmem:[#allocation5 + $0xcf8] sm:$0xff]  ;;  %v12649_v34 = vcombine.low %v451_v15, %v455_v55 }
 0x484   :  { %9412 = vmatpush1.bf16.msra.mxu1 %v12801_v14  ;;  %v15108_v23 = vadd.f32 %v9103_v41, %v9061_v10  ;;  %v12778_v51 = vcombine.high %v579_v3, %v583_v28  ;;  %v443_v24 = vld [vmem:[#allocation5 + $0x898] sm:$0xff] }
 0x485   :  { %9413 = vmatprep.subr.bf16.mxu1 %v12794_v8  ;;  %v447_v14 = vld [vmem:[#allocation5 + $0x8b8] sm:$0xff]  ;;  %v12777_v8 = vcombine.low %v579_v3, %v583_v28 }
 0x486   :  { %9371 = vmatpush1.bf16.msra.mxu0 %v12665_v58  ;;  %v571_v26 = vld [vmem:[#allocation5 + $0xc98] sm:$0xff]  ;;  %v12642_v25 = vcombine.high %v443_v24, %v447_v14  ;;  %v12641_v6 = vcombine.low %v443_v24, %v447_v14 }
 0x487   :  { %9372 = vmatprep.subr.bf16.mxu0 %v12658_v44  ;;  %v575_v35 = vld [vmem:[#allocation5 + $0xcb8] sm:$0xff] }
 0x488   :  { %9414 = vmatpush1.bf16.msra.mxu1 %v12793_v46  ;;  %v12770_v18 = vcombine.high %v571_v26, %v575_v35  ;;  %v435_v10 = vld [vmem:[#allocation5 + $0x858] sm:$0xff]  ;;  %v12769_v31 = vcombine.low %v571_v26, %v575_v35 }
 0x489   :  { %9415 = vmatprep.subr.bf16.mxu1 %v12786_v27  ;;  %v439_v52 = vld [vmem:[#allocation5 + $0x878] sm:$0xff] }
 0x48a   :  { %9373 = vmatpush1.bf16.msra.mxu0 %v12657_v36  ;;  %v563_v47 = vld [vmem:[#allocation5 + $0xc58] sm:$0xff]  ;;  %v12634_v41 = vcombine.high %v435_v10, %v439_v52  ;;  %v12633_v28 = vcombine.low %v435_v10, %v439_v52 }
 0x48b   :  { %9374 = vmatprep.subr.bf16.mxu0 %v12650_v0  ;;  %v567_v58 = vld [vmem:[#allocation5 + $0xc78] sm:$0xff] }
 0x48c   :  { %9416 = vmatpush1.bf16.msra.mxu1 %v12785_v11  ;;  %v12762_v46 = vcombine.high %v563_v47, %v567_v58  ;;  %v427_v36 = vld [vmem:[#allocation5 + $0x818] sm:$0xff]  ;;  %v12761_v3 = vcombine.low %v563_v47, %v567_v58 }
 0x48d   :  { %9417 = vmatprep.subr.bf16.mxu1 %v12778_v51  ;;  %v431_v44 = vld [vmem:[#allocation5 + $0x838] sm:$0xff] }
 0x48e   :  { %9375 = vmatpush1.bf16.msra.mxu0 %v12649_v34  ;;  %v555_v27 = vld [vmem:[#allocation5 + $0xc18] sm:$0xff]  ;;  %v12626_v55 = vcombine.high %v427_v36, %v431_v44  ;;  %v12625_v26 = vcombine.low %v427_v36, %v431_v44 }
 0x48f   :  { %9376 = vmatprep.subr.bf16.mxu0 %v12642_v25  ;;  %v559_v15 = vld [vmem:[#allocation5 + $0xc38] sm:$0xff] }
 0x490   :  { %9418 = vmatpush1.bf16.msra.mxu1 %v12777_v8  ;;  %v12754_v11 = vcombine.high %v555_v27, %v559_v15  ;;  %v547_v0 = vld [vmem:[#allocation5 + $0xbd8] sm:$0xff]  ;;  %v12753_v35 = vcombine.low %v555_v27, %v559_v15 }
 0x491   :  { %9419 = vmatprep.subr.bf16.mxu1 %v12770_v18  ;;  %v551_v51 = vld [vmem:[#allocation5 + $0xbf8] sm:$0xff] }
 0x492   :  { %9377 = vmatpush1.bf16.msra.mxu0 %v12641_v6  ;;  %v675_v24 = vld [vmem:[#allocation5 + $0xfd8] sm:$0xff]  ;;  %v12746_v34 = vcombine.high %v547_v0, %v551_v51  ;;  %v12745_v47 = vcombine.low %v547_v0, %v551_v51 }
 0x493   :  { %9378 = vmatprep.subr.bf16.mxu0 %v12634_v41  ;;  %v679_v14 = vld [vmem:[#allocation5 + $0xff8] sm:$0xff] }
 0x494   :  { %9420 = vmatpush1.bf16.msra.mxu1 %v12769_v31  ;;  %v12874_v8 = vcombine.high %v675_v24, %v679_v14  ;;  %v539_v25 = vld [vmem:[#allocation5 + $0xb98] sm:$0xff]  ;;  %v12873_v58 = vcombine.low %v675_v24, %v679_v14 }
 0x495   :  { %9421 = vmatprep.subr.bf16.mxu1 %v12762_v46  ;;  %v543_v18 = vld [vmem:[#allocation5 + $0xbb8] sm:$0xff] }
 0x496   :  { %9379 = vmatpush1.bf16.msra.mxu0 %v12633_v28  ;;  %v667_v10 = vld [vmem:[#allocation5 + $0xf98] sm:$0xff]  ;;  %v12738_v6 = vcombine.high %v539_v25, %v543_v18  ;;  %v12737_v27 = vcombine.low %v539_v25, %v543_v18 }
 0x497   :  { %9380 = vmatprep.subr.bf16.mxu0 %v12626_v55  ;;  %v671_v52 = vld [vmem:[#allocation5 + $0xfb8] sm:$0xff] }
 0x498   :  { %9422 = vmatpush1.bf16.msra.mxu1 %v12761_v3  ;;  %v12866_v31 = vcombine.high %v667_v10, %v671_v52  ;;  %v531_v41 = vld [vmem:[#allocation5 + $0xb58] sm:$0xff]  ;;  %v12865_v15 = vcombine.low %v667_v10, %v671_v52 }
 0x499   :  { %9423 = vmatprep.subr.bf16.mxu1 %v12754_v11  ;;  %v535_v46 = vld [vmem:[#allocation5 + $0xb78] sm:$0xff] }
 0x49a   :  { %9381 = vmatpush1.bf16.msra.mxu0 %v12625_v26  ;;  %v659_v36 = vld [vmem:[#allocation5 + $0xf58] sm:$0xff]  ;;  %v12730_v28 = vcombine.high %v531_v41, %v535_v46  ;;  %v12729_v24 = vcombine.low %v531_v41, %v535_v46 }
 0x49b   :  { %9382 = vmatprep.subr.bf16.mxu0 %v12746_v34  ;;  %v663_v44 = vld [vmem:[#allocation5 + $0xf78] sm:$0xff] }
 0x49c   :  { %9424 = vmatpush1.bf16.msra.mxu1 %v12753_v35  ;;  %v12858_v3 = vcombine.high %v659_v36, %v663_v44  ;;  %v523_v55 = vld [vmem:[#allocation5 + $0xb18] sm:$0xff]  ;;  %v12857_v14 = vcombine.low %v659_v36, %v663_v44 }
 0x49d   :  { %9425 = vmatprep.subr.bf16.mxu1 %v12874_v8  ;;  %v527_v11 = vld [vmem:[#allocation5 + $0xb38] sm:$0xff] }
 0x49e   :  { %9383 = vmatpush2.bf16.msra.mxu0 %v12745_v47  ;;  %v651_v0 = vld [vmem:[#allocation5 + $0xf18] sm:$0xff]  ;;  %v12722_v26 = vcombine.high %v523_v55, %v527_v11  ;;  %v12721_v10 = vcombine.low %v523_v55, %v527_v11 }
 0x49f   :  { %9384 = vmatprep.subr.bf16.mxu0 %v12738_v6  ;;  %v655_v51 = vld [vmem:[#allocation5 + $0xf38] sm:$0xff] }
 0x4a0   :  { %9426 = vmatpush2.bf16.msra.mxu1 %v12873_v58  ;;  %v12850_v35 = vcombine.high %v651_v0, %v655_v51  ;;  %v515_v34 = vld [vmem:[#allocation5 + $0xad8] sm:$0xff]  ;;  %v12849_v52 = vcombine.low %v651_v0, %v655_v51 }
 0x4a1   :  { %9427 = vmatprep.subr.bf16.mxu1 %v12866_v31  ;;  %v519_v8 = vld [vmem:[#allocation5 + $0xaf8] sm:$0xff] }
 0x4a2   :  { %9385 = vmatpush2.bf16.msra.mxu0 %v12737_v27  ;;  %v643_v25 = vld [vmem:[#allocation5 + $0xed8] sm:$0xff]  ;;  %v12714_v47 = vcombine.high %v515_v34, %v519_v8  ;;  %v12713_v36 = vcombine.low %v515_v34, %v519_v8 }
 0x4a3   :  { %9386 = vmatprep.subr.bf16.mxu0 %v12730_v28  ;;  %v647_v18 = vld [vmem:[#allocation5 + $0xef8] sm:$0xff] }
 0x4a4   :  { %9428 = vmatpush2.bf16.msra.mxu1 %v12865_v15  ;;  %v12842_v58 = vcombine.high %v643_v25, %v647_v18  ;;  %v507_v6 = vld [vmem:[#allocation5 + $0xa98] sm:$0xff]  ;;  %v12841_v44 = vcombine.low %v643_v25, %v647_v18 }
 0x4a5   :  { %9429 = vmatprep.subr.bf16.mxu1 %v12858_v3  ;;  %v511_v31 = vld [vmem:[#allocation5 + $0xab8] sm:$0xff] }
 0x4a6   :  { %9387 = vmatpush2.bf16.msra.mxu0 %v12729_v24  ;;  %v635_v41 = vld [vmem:[#allocation5 + $0xe98] sm:$0xff]  ;;  %v12706_v27 = vcombine.high %v507_v6, %v511_v31  ;;  %v12705_v0 = vcombine.low %v507_v6, %v511_v31 }
 0x4a7   :  { %9388 = vmatprep.subr.bf16.mxu0 %v12722_v26  ;;  %v639_v46 = vld [vmem:[#allocation5 + $0xeb8] sm:$0xff] }
 0x4a8   :  { %9430 = vmatpush2.bf16.msra.mxu1 %v12857_v14  ;;  %v12834_v15 = vcombine.high %v635_v41, %v639_v46  ;;  %v499_v28 = vld [vmem:[#allocation5 + $0xa58] sm:$0xff]  ;;  %v12833_v51 = vcombine.low %v635_v41, %v639_v46 }
 0x4a9   :  { %9431 = vmatprep.subr.bf16.mxu1 %v12850_v35  ;;  %v503_v3 = vld [vmem:[#allocation5 + $0xa78] sm:$0xff] }
 0x4aa   :  { %9389 = vmatpush2.bf16.msra.mxu0 %v12721_v10  ;;  %v627_v55 = vld [vmem:[#allocation5 + $0xe58] sm:$0xff]  ;;  %v12698_v24 = vcombine.high %v499_v28, %v503_v3  ;;  %v12697_v25 = vcombine.low %v499_v28, %v503_v3 }
 0x4ab   :  { %9390 = vmatprep.subr.bf16.mxu0 %v12714_v47  ;;  %v631_v11 = vld [vmem:[#allocation5 + $0xe78] sm:$0xff] }
 0x4ac   :  { %9432 = vmatpush2.bf16.msra.mxu1 %v12849_v52  ;;  %v12826_v14 = vcombine.high %v627_v55, %v631_v11  ;;  %v491_v26 = vld [vmem:[#allocation5 + $0xa18] sm:$0xff]  ;;  %v12825_v18 = vcombine.low %v627_v55, %v631_v11  ;;  %v15110_v11 = vpop.f32.mrf.mxu0 }
 0x4ad   :  { %9433 = vmatprep.subr.bf16.mxu1 %v12842_v58  ;;  %v495_v35 = vld [vmem:[#allocation5 + $0xa38] sm:$0xff]  ;;  %15301 = vst [vmem:[#allocation43_spill] sm:$0xff] %v15110_v11 }
 0x4ae   :  { %9391 = vmatpush2.bf16.msra.mxu0 %v12713_v36  ;;  %v619_v34 = vld [vmem:[#allocation5 + $0xe18] sm:$0xff]  ;;  %v12690_v10 = vcombine.high %v491_v26, %v495_v35  ;;  %v12689_v41 = vcombine.low %v491_v26, %v495_v35 }
 0x4af   :  { %9392 = vmatprep.subr.bf16.mxu0 %v12706_v27  ;;  %v623_v8 = vld [vmem:[#allocation5 + $0xe38] sm:$0xff] }
 0x4b0   :  { %9434 = vmatpush2.bf16.msra.mxu1 %v12841_v44  ;;  %v12818_v52 = vcombine.high %v619_v34, %v623_v8  ;;  %v739_v47 = vld [vmem:[#allocation5 + $0x11d8] sm:$0xff]  ;;  %v12817_v46 = vcombine.low %v619_v34, %v623_v8  ;;  %v14605_v8 = vld [vmem:[#allocation2 + $0x10] ss:$80 sps:$4 sm:$0xff]  }
 0x4b1   :  { %9435 = vmatprep.subr.bf16.mxu1 %v12834_v15  ;;  %v743_v58 = vld [vmem:[#allocation5 + $0x11f8] sm:$0xff] }
 0x4b2   :  { %9393 = vmatpush2.bf16.msra.mxu0 %v12705_v0  ;;  %v867_v6 = vld [vmem:[#allocation5 + $0x15d8] sm:$0xff]  ;;  %v12938_v36 = vcombine.high %v739_v47, %v743_v58  ;;  %v12937_v55 = vcombine.low %v739_v47, %v743_v58 }
 0x4b3   :  { %9394 = vmatprep.subr.bf16.mxu0 %v12698_v24  ;;  %v871_v31 = vld [vmem:[#allocation5 + $0x15f8] sm:$0xff]  ;;  %v15112_v24 = vpop.f32.mrf.mxu1 }
 0x4b4   :  { %9436 = vmatpush2.bf16.msra.mxu1 %v12833_v51  ;;  %v13066_v44 = vcombine.high %v867_v6, %v871_v31  ;;  %v731_v27 = vld [vmem:[#allocation5 + $0x1198] sm:$0xff]  ;;  %v13065_v0 = vcombine.low %v867_v6, %v871_v31  ;;  %15302 = vst [vmem:[#allocation44_spill] sm:$0xff] %v15112_v24 }
 0x4b5   :  { %9437 = vmatprep.subr.bf16.mxu1 %v12826_v14  ;;  %v735_v15 = vld [vmem:[#allocation5 + $0x11b8] sm:$0xff] }
 0x4b6   :  { %9395 = vmatpush2.bf16.msra.mxu0 %v12697_v25  ;;  %v859_v28 = vld [vmem:[#allocation5 + $0x1598] sm:$0xff]  ;;  %v12930_v51 = vcombine.high %v731_v27, %v735_v15  ;;  %v12929_v58 = vcombine.low %v731_v27, %v735_v15 }
 0x4b7   :  { %9396 = vmatprep.subr.bf16.mxu0 %v12690_v10  ;;  %v863_v3 = vld [vmem:[#allocation5 + $0x15b8] sm:$0xff] }
 0x4b8   :  { %9438 = vmatpush2.bf16.msra.mxu1 %v12825_v18  ;;  %v13058_v14 = vcombine.high %v859_v28, %v863_v3  ;;  %v723_v26 = vld [vmem:[#allocation5 + $0x1158] sm:$0xff]  ;;  %v13057_v31 = vcombine.low %v859_v28, %v863_v3 }
 0x4b9   :  { %9439 = vmatprep.subr.bf16.mxu1 %v12818_v52  ;;  %v727_v35 = vld [vmem:[#allocation5 + $0x1178] sm:$0xff] }
 0x4ba   :  { %9397 = vmatpush2.bf16.msra.mxu0 %v12689_v41  ;;  %v851_v25 = vld [vmem:[#allocation5 + $0x1558] sm:$0xff]  ;;  %v12922_v41 = vcombine.high %v723_v26, %v727_v35  ;;  %v12921_v28 = vcombine.low %v723_v26, %v727_v35 }
 0x4bb   :  { %9452 = vmatprep.subr.bf16.mxu0 %v12938_v36  ;;  %v855_v18 = vld [vmem:[#allocation5 + $0x1578] sm:$0xff] }
 0x4bc   :  { %9440 = vmatpush2.bf16.msra.mxu1 %v12817_v46  ;;  %v14606_v47 = vld [vmem:[#allocation2 + $0x18] ss:$80 sps:$4 sm:$0xff]   ;;  %v14608_v27 = vld [vmem:[#allocation2 + $0x2c] ss:$80 sps:$4 sm:$0xff]  }
 0x4bd   :  { %9495 = vmatprep.subr.bf16.mxu1 %v13066_v44  ;;  %v9142_v34 = vpop.f32.mrf.mxu0  ;;  %9399 = vmatmul.mubr.bf16.vlgmr.msra.gmra.mxu0 %v14605_v8  ;;  %v13050_v44 = vcombine.high %v851_v25, %v855_v18  ;;  %v715_v8 = vld [vmem:[#allocation5 + $0x1118] sm:$0xff] }
 0x4be   :  { %v9143_v10 = vadd.f32 %v9142_v34, %v15103_v4  ;;  %9453 = vmatpush1.bf16.msra.mxu0 %v12937_v55  ;;  %v719_v24 = vld [vmem:[#allocation5 + $0x1138] sm:$0xff]  ;;  %v14607_v4 = vld [vmem:[#allocation2 + $0x24] ss:$80 sps:$4 sm:$0xff]  }
 0x4bf   :  { %v9185_v52 = vpop.f32.mrf.mxu1  ;;  %9442 = vmatmul.mubr.bf16.vlgmr.msra.gmra.mxu1 %v14606_v47  ;;  %v15115_v6 = vpop.f32.mrf.mxu0  ;;  %9454 = vmatprep.subr.bf16.mxu0 %v12930_v51  ;;  %v843_v47 = vld [vmem:[#allocation5 + $0x1518] sm:$0xff]  ;;  %v12914_v51 = vcombine.high %v715_v8, %v719_v24  ;;  %v12913_v11 = vcombine.low %v715_v8, %v719_v24 }
 0x4c0   :  { %9496 = vmatpush1.bf16.msra.mxu1 %v13065_v0  ;;  %15303 = vst [vmem:[#allocation45_spill] sm:$0xff] %v15115_v6  ;;  %v15117_v46 = vadd.f32 %v9185_v52, %v9143_v10  ;;  %9484 = vmatprep.mubr.bf16.mxu0 %v14607_v4  ;;  %v847_v55 = vld [vmem:[#allocation5 + $0x1538] sm:$0xff]  ;;  %v13049_v0 = vcombine.low %v851_v25, %v855_v18 }
 0x4c1   :  { %v15119_v36 = vpop.f32.mrf.mxu1  ;;  %9497 = vmatprep.subr.bf16.mxu1 %v13058_v14  ;;  %v9146_v34 = vpop.f32.mrf.mxu0  ;;  %9527 = vmatprep.mubr.bf16.mxu1 %v14608_v27  ;;  %v13042_v10 = vcombine.high %v843_v47, %v847_v55  ;;  %v707_v52 = vld [vmem:[#allocation5 + $0x10d8] sm:$0xff] }
 0x4c2   :  { %15304 = vst [vmem:[#allocation46_spill] sm:$0xff] %v15119_v36  ;;  %v9147_v15 = vadd.f32 %v9146_v34, %v15108_v23  ;;  %9455 = vmatpush1.bf16.msra.mxu0 %v12929_v58  ;;  %v711_v4 = vld [vmem:[#allocation5 + $0x10f8] sm:$0xff]  ;;  %v13041_v23 = vcombine.low %v843_v47, %v847_v55 }
 0x4c3   :  { %v9189_v3 = vpop.f32.mrf.mxu1  ;;  %9456 = vmatprep.subr.bf16.mxu0 %v12922_v41  ;;  %v835_v36 = vld [vmem:[#allocation5 + $0x14d8] sm:$0xff]  ;;  %v12906_v58 = vcombine.high %v707_v52, %v711_v4  ;;  %v12905_v41 = vcombine.low %v707_v52, %v711_v4 }
 0x4c4   :  { %9498 = vmatpush1.bf16.msra.mxu1 %v13057_v31  ;;  %v15122_v14 = vadd.f32 %v9189_v3, %v9147_v15  ;;  %v839_v6 = vld [vmem:[#allocation5 + $0x14f8] sm:$0xff] }
 0x4c5   :  { %9499 = vmatprep.subr.bf16.mxu1 %v13050_v44  ;;  %v13034_v26 = vcombine.high %v835_v36, %v839_v6  ;;  %v699_v35 = vld [vmem:[#allocation5 + $0x1098] sm:$0xff]  ;;  %v13033_v44 = vcombine.low %v835_v36, %v839_v6 }
 0x4c6   :  { %9457 = vmatpush1.bf16.msra.mxu0 %v12921_v28  ;;  %v703_v31 = vld [vmem:[#allocation5 + $0x10b8] sm:$0xff] }
 0x4c7   :  { %9458 = vmatprep.subr.bf16.mxu0 %v12914_v51  ;;  %v827_v25 = vld [vmem:[#allocation5 + $0x1498] sm:$0xff]  ;;  %v12898_v34 = vcombine.high %v699_v35, %v703_v31  ;;  %v12897_v47 = vcombine.low %v699_v35, %v703_v31 }
 0x4c8   :  { %9500 = vmatpush1.bf16.msra.mxu1 %v13049_v0  ;;  %v831_v18 = vld [vmem:[#allocation5 + $0x14b8] sm:$0xff] }
 0x4c9   :  { %9501 = vmatprep.subr.bf16.mxu1 %v13042_v10  ;;  %v13026_v27 = vcombine.high %v827_v25, %v831_v18  ;;  %v691_v15 = vld [vmem:[#allocation5 + $0x1058] sm:$0xff]  ;;  %v13025_v55 = vcombine.low %v827_v25, %v831_v18 }
 0x4ca   :  { %9459 = vmatpush1.bf16.msra.mxu0 %v12913_v11  ;;  %v695_v24 = vld [vmem:[#allocation5 + $0x1078] sm:$0xff] }
 0x4cb   :  { %9460 = vmatprep.subr.bf16.mxu0 %v12906_v58  ;;  %v819_v8 = vld [vmem:[#allocation5 + $0x1458] sm:$0xff]  ;;  %v12890_v3 = vcombine.high %v691_v15, %v695_v24  ;;  %v12889_v6 = vcombine.low %v691_v15, %v695_v24 }
 0x4cc   :  { %9502 = vmatpush1.bf16.msra.mxu1 %v13041_v23  ;;  %v823_v28 = vld [vmem:[#allocation5 + $0x1478] sm:$0xff] }
 0x4cd   :  { %9503 = vmatprep.subr.bf16.mxu1 %v13034_v26  ;;  %v13018_v0 = vcombine.high %v819_v8, %v823_v28  ;;  %v683_v11 = vld [vmem:[#allocation5 + $0x1018] sm:$0xff]  ;;  %v13017_v36 = vcombine.low %v819_v8, %v823_v28 }
 0x4ce   :  { %9461 = vmatpush1.bf16.msra.mxu0 %v12905_v41  ;;  %v687_v51 = vld [vmem:[#allocation5 + $0x1038] sm:$0xff] }
 0x4cf   :  { %9462 = vmatprep.subr.bf16.mxu0 %v12898_v34  ;;  %v811_v10 = vld [vmem:[#allocation5 + $0x1418] sm:$0xff]  ;;  %v12882_v4 = vcombine.high %v683_v11, %v687_v51  ;;  %v12881_v25 = vcombine.low %v683_v11, %v687_v51 }
 0x4d0   :  { %9504 = vmatpush1.bf16.msra.mxu1 %v13033_v44  ;;  %v815_v52 = vld [vmem:[#allocation5 + $0x1438] sm:$0xff] }
 0x4d1   :  { %9505 = vmatprep.subr.bf16.mxu1 %v13026_v27  ;;  %v13010_v23 = vcombine.high %v811_v10, %v815_v52  ;;  %v803_v58 = vld [vmem:[#allocation5 + $0x13d8] sm:$0xff]  ;;  %v13009_v18 = vcombine.low %v811_v10, %v815_v52 }
 0x4d2   :  { %9463 = vmatpush1.bf16.msra.mxu0 %v12897_v47  ;;  %v807_v26 = vld [vmem:[#allocation5 + $0x13f8] sm:$0xff] }
 0x4d3   :  { %9464 = vmatprep.subr.bf16.mxu0 %v12890_v3  ;;  %v931_v35 = vld [vmem:[#allocation5 + $0x17d8] sm:$0xff]  ;;  %v13002_v41 = vcombine.high %v803_v58, %v807_v26  ;;  %v13001_v8 = vcombine.low %v803_v58, %v807_v26 }
 0x4d4   :  { %9506 = vmatpush1.bf16.msra.mxu1 %v13025_v55  ;;  %v935_v31 = vld [vmem:[#allocation5 + $0x17f8] sm:$0xff] }
 0x4d5   :  { %9507 = vmatprep.subr.bf16.mxu1 %v13018_v0  ;;  %v13130_v44 = vcombine.high %v931_v35, %v935_v31  ;;  %v795_v34 = vld [vmem:[#allocation5 + $0x1398] sm:$0xff]  ;;  %v13129_v28 = vcombine.low %v931_v35, %v935_v31 }
 0x4d6   :  { %9465 = vmatpush1.bf16.msra.mxu0 %v12889_v6  ;;  %v799_v27 = vld [vmem:[#allocation5 + $0x13b8] sm:$0xff] }
 0x4d7   :  { %9466 = vmatprep.subr.bf16.mxu0 %v12882_v4  ;;  %v923_v15 = vld [vmem:[#allocation5 + $0x1798] sm:$0xff]  ;;  %v12994_v47 = vcombine.high %v795_v34, %v799_v27  ;;  %v12993_v10 = vcombine.low %v795_v34, %v799_v27 }
 0x4d8   :  { %9508 = vmatpush1.bf16.msra.mxu1 %v13017_v36  ;;  %v927_v24 = vld [vmem:[#allocation5 + $0x17b8] sm:$0xff] }
 0x4d9   :  { %9509 = vmatprep.subr.bf16.mxu1 %v13010_v23  ;;  %v13122_v55 = vcombine.high %v923_v15, %v927_v24  ;;  %v787_v3 = vld [vmem:[#allocation5 + $0x1358] sm:$0xff]  ;;  %v13121_v52 = vcombine.low %v923_v15, %v927_v24 }
 0x4da   :  { %9467 = vmatpush1.bf16.msra.mxu0 %v12881_v25  ;;  %v791_v0 = vld [vmem:[#allocation5 + $0x1378] sm:$0xff] }
 0x4db   :  { %9468 = vmatprep.subr.bf16.mxu0 %v13002_v41  ;;  %v915_v11 = vld [vmem:[#allocation5 + $0x1758] sm:$0xff]  ;;  %v12986_v6 = vcombine.high %v787_v3, %v791_v0  ;;  %v12985_v35 = vcombine.low %v787_v3, %v791_v0 }
 0x4dc   :  { %9510 = vmatpush1.bf16.msra.mxu1 %v13009_v18  ;;  %v919_v51 = vld [vmem:[#allocation5 + $0x1778] sm:$0xff] }
 0x4dd   :  { %9511 = vmatprep.subr.bf16.mxu1 %v13130_v44  ;;  %v13114_v36 = vcombine.high %v915_v11, %v919_v51  ;;  %v779_v4 = vld [vmem:[#allocation5 + $0x1318] sm:$0xff]  ;;  %v13113_v31 = vcombine.low %v915_v11, %v919_v51 }
 0x4de   :  { %9469 = vmatpush2.bf16.msra.mxu0 %v13001_v8  ;;  %v783_v23 = vld [vmem:[#allocation5 + $0x1338] sm:$0xff] }
 0x4df   :  { %9470 = vmatprep.subr.bf16.mxu0 %v12994_v47  ;;  %v907_v58 = vld [vmem:[#allocation5 + $0x1718] sm:$0xff]  ;;  %v12978_v25 = vcombine.high %v779_v4, %v783_v23  ;;  %v12977_v15 = vcombine.low %v779_v4, %v783_v23 }
 0x4e0   :  { %9512 = vmatpush2.bf16.msra.mxu1 %v13129_v28  ;;  %v911_v26 = vld [vmem:[#allocation5 + $0x1738] sm:$0xff] }
 0x4e1   :  { %9513 = vmatprep.subr.bf16.mxu1 %v13122_v55  ;;  %v13106_v18 = vcombine.high %v907_v58, %v911_v26  ;;  %v771_v41 = vld [vmem:[#allocation5 + $0x12d8] sm:$0xff]  ;;  %v13105_v24 = vcombine.low %v907_v58, %v911_v26 }
 0x4e2   :  { %9471 = vmatpush2.bf16.msra.mxu0 %v12993_v10  ;;  %v775_v44 = vld [vmem:[#allocation5 + $0x12f8] sm:$0xff] }
 0x4e3   :  { %9472 = vmatprep.subr.bf16.mxu0 %v12986_v6  ;;  %v899_v34 = vld [vmem:[#allocation5 + $0x16d8] sm:$0xff]  ;;  %v12970_v8 = vcombine.high %v771_v41, %v775_v44  ;;  %v12969_v11 = vcombine.low %v771_v41, %v775_v44 }
 0x4e4   :  { %9514 = vmatpush2.bf16.msra.mxu1 %v13121_v52  ;;  %v903_v27 = vld [vmem:[#allocation5 + $0x16f8] sm:$0xff] }
 0x4e5   :  { %9515 = vmatprep.subr.bf16.mxu1 %v13114_v36  ;;  %v13098_v28 = vcombine.high %v899_v34, %v903_v27  ;;  %v763_v47 = vld [vmem:[#allocation5 + $0x1298] sm:$0xff]  ;;  %v13097_v51 = vcombine.low %v899_v34, %v903_v27 }
 0x4e6   :  { %9473 = vmatpush2.bf16.msra.mxu0 %v12985_v35  ;;  %v767_v55 = vld [vmem:[#allocation5 + $0x12b8] sm:$0xff] }
 0x4e7   :  { %9474 = vmatprep.subr.bf16.mxu0 %v12978_v25  ;;  %v891_v3 = vld [vmem:[#allocation5 + $0x1698] sm:$0xff]  ;;  %v12962_v10 = vcombine.high %v763_v47, %v767_v55  ;;  %v12961_v58 = vcombine.low %v763_v47, %v767_v55 }
 0x4e8   :  { %9516 = vmatpush2.bf16.msra.mxu1 %v13113_v31  ;;  %v895_v0 = vld [vmem:[#allocation5 + $0x16b8] sm:$0xff] }
 0x4e9   :  { %9517 = vmatprep.subr.bf16.mxu1 %v13106_v18  ;;  %v13090_v52 = vcombine.high %v891_v3, %v895_v0  ;;  %v755_v6 = vld [vmem:[#allocation5 + $0x1258] sm:$0xff]  ;;  %v13089_v26 = vcombine.low %v891_v3, %v895_v0 }
 0x4ea   :  { %9475 = vmatpush2.bf16.msra.mxu0 %v12977_v15  ;;  %v759_v36 = vld [vmem:[#allocation5 + $0x1278] sm:$0xff] }
 0x4eb   :  { %9476 = vmatprep.subr.bf16.mxu0 %v12970_v8  ;;  %v883_v4 = vld [vmem:[#allocation5 + $0x1658] sm:$0xff]  ;;  %v12954_v35 = vcombine.high %v755_v6, %v759_v36  ;;  %v12953_v34 = vcombine.low %v755_v6, %v759_v36 }
 0x4ec   :  { %9518 = vmatpush2.bf16.msra.mxu1 %v13105_v24  ;;  %v887_v23 = vld [vmem:[#allocation5 + $0x1678] sm:$0xff] }
 0x4ed   :  { %9519 = vmatprep.subr.bf16.mxu1 %v13098_v28  ;;  %v13082_v31 = vcombine.high %v883_v4, %v887_v23  ;;  %v747_v25 = vld [vmem:[#allocation5 + $0x1218] sm:$0xff]  ;;  %v13081_v27 = vcombine.low %v883_v4, %v887_v23  ;;  %v15124_v23 = vpop.f32.mrf.mxu0 }
 0x4ee   :  { %9477 = vmatpush2.bf16.msra.mxu0 %v12969_v11  ;;  %v751_v18 = vld [vmem:[#allocation5 + $0x1238] sm:$0xff]  ;;  %15305 = vst [vmem:[#allocation47_spill] sm:$0xff] %v15124_v23  ;;  %v14611_v23 = vld [vmem:[#allocation2 + $0x34] ss:$80 sps:$4 sm:$0xff]  }
 0x4ef   :  { %9478 = vmatprep.subr.bf16.mxu0 %v12962_v10  ;;  %v875_v41 = vld [vmem:[#allocation5 + $0x1618] sm:$0xff]  ;;  %v12946_v15 = vcombine.high %v747_v25, %v751_v18  ;;  %v12945_v3 = vcombine.low %v747_v25, %v751_v18 }
 0x4f0   :  { %9520 = vmatpush2.bf16.msra.mxu1 %v13097_v51  ;;  %v879_v44 = vld [vmem:[#allocation5 + $0x1638] sm:$0xff] }
 0x4f1   :  { %9521 = vmatprep.subr.bf16.mxu1 %v13090_v52  ;;  %v13074_v24 = vcombine.high %v875_v41, %v879_v44  ;;  %v995_v8 = vld [vmem:[#allocation5 + $0x19d8] sm:$0xff]  ;;  %v13073_v0 = vcombine.low %v875_v41, %v879_v44  ;;  %v14609_v44 = vld [vmem:[#allocation2 + $0x20] ss:$80 sps:$4 sm:$0xff]  }
 0x4f2   :  { %9479 = vmatpush2.bf16.msra.mxu0 %v12961_v58  ;;  %v999_v28 = vld [vmem:[#allocation5 + $0x19f8] sm:$0xff] }
 0x4f3   :  { %9480 = vmatprep.subr.bf16.mxu0 %v12954_v35  ;;  %v1123_v47 = vld [vmem:[#allocation5 + $0x1dd8] sm:$0xff]  ;;  %v13194_v11 = vcombine.high %v995_v8, %v999_v28  ;;  %v13193_v4 = vcombine.low %v995_v8, %v999_v28  ;;  %v15126_v35 = vpop.f32.mrf.mxu1 }
 0x4f4   :  { %9522 = vmatpush2.bf16.msra.mxu1 %v13089_v26  ;;  %v1127_v55 = vld [vmem:[#allocation5 + $0x1df8] sm:$0xff]  ;;  %15306 = vst [vmem:[#allocation48_spill] sm:$0xff] %v15126_v35 }
 0x4f5   :  { %9523 = vmatprep.subr.bf16.mxu1 %v13082_v31  ;;  %v13322_v51 = vcombine.high %v1123_v47, %v1127_v55  ;;  %v987_v10 = vld [vmem:[#allocation5 + $0x1998] sm:$0xff]  ;;  %v13321_v58 = vcombine.low %v1123_v47, %v1127_v55 }
 0x4f6   :  { %9481 = vmatpush2.bf16.msra.mxu0 %v12953_v34  ;;  %v991_v52 = vld [vmem:[#allocation5 + $0x19b8] sm:$0xff] }
 0x4f7   :  { %9482 = vmatprep.subr.bf16.mxu0 %v12946_v15  ;;  %v1115_v6 = vld [vmem:[#allocation5 + $0x1d98] sm:$0xff]  ;;  %v13186_v26 = vcombine.high %v987_v10, %v991_v52  ;;  %v13185_v28 = vcombine.low %v987_v10, %v991_v52 }
 0x4f8   :  { %9524 = vmatpush2.bf16.msra.mxu1 %v13081_v27  ;;  %v1119_v36 = vld [vmem:[#allocation5 + $0x1db8] sm:$0xff] }
 0x4f9   :  { %9525 = vmatprep.subr.bf16.mxu1 %v13074_v24  ;;  %v13314_v31 = vcombine.high %v1115_v6, %v1119_v36  ;;  %v979_v25 = vld [vmem:[#allocation5 + $0x1958] sm:$0xff]  ;;  %v13313_v55 = vcombine.low %v1115_v6, %v1119_v36 }
 0x4fa   :  { %9483 = vmatpush2.bf16.msra.mxu0 %v12945_v3  ;;  %v983_v18 = vld [vmem:[#allocation5 + $0x1978] sm:$0xff] }
 0x4fb   :  { %9538 = vmatprep.subr.bf16.mxu0 %v13194_v11  ;;  %v1107_v34 = vld [vmem:[#allocation5 + $0x1d58] sm:$0xff]  ;;  %v13178_v3 = vcombine.high %v979_v25, %v983_v18  ;;  %v13177_v52 = vcombine.low %v979_v25, %v983_v18 }
 0x4fc   :  { %9526 = vmatpush2.bf16.msra.mxu1 %v13073_v0  ;;  %v1111_v27 = vld [vmem:[#allocation5 + $0x1d78] sm:$0xff] }
 0x4fd   :  { %9581 = vmatprep.subr.bf16.mxu1 %v13322_v51  ;;  %v9228_v41 = vpop.f32.mrf.mxu0  ;;  %9485 = vmatmul.mubr.bf16.vlgmr.msra.gmra.mxu0 %v14609_v44  ;;  %v14610_v8 = vld [vmem:[#allocation2 + $0x28] ss:$80 sps:$4 sm:$0xff]   ;;  %v13306_v51 = vcombine.high %v1107_v34, %v1111_v27  ;;  %v13305_v36 = vcombine.low %v1107_v34, %v1111_v27 }
 0x4fe   :  { %v9229_v15 = vadd.f32 %v9228_v41, %v15117_v46  ;;  %9539 = vmatpush1.bf16.msra.mxu0 %v13193_v4  ;;  %v971_v44 = vld [vmem:[#allocation5 + $0x1918] sm:$0xff]  ;;  %9570 = vmatprep.mubr.bf16.mxu0 %v14611_v23 }
 0x4ff   :  { %v9271_v24 = vpop.f32.mrf.mxu1  ;;  %9528 = vmatmul.mubr.bf16.vlgmr.msra.gmra.mxu1 %v14610_v8  ;;  %v15129_v47 = vpop.f32.mrf.mxu0  ;;  %9540 = vmatprep.subr.bf16.mxu0 %v13186_v26  ;;  %v975_v35 = vld [vmem:[#allocation5 + $0x1938] sm:$0xff] }
 0x500   :  { %9582 = vmatpush1.bf16.msra.mxu1 %v13321_v58  ;;  %15307 = vst [vmem:[#allocation49_spill] sm:$0xff] %v15129_v47  ;;  %v9272_v0 = vadd.f32 %v9271_v24, %v9229_v15  ;;  %v1099_v41 = vld [vmem:[#allocation5 + $0x1d18] sm:$0xff]  ;;  %v13170_v58 = vcombine.high %v971_v44, %v975_v35 }
 0x501   :  { %v15131_v11 = vpop.f32.mrf.mxu1  ;;  %9583 = vmatprep.subr.bf16.mxu1 %v13314_v31  ;;  %v9232_v46 = vpop.f32.mrf.mxu0  ;;  %v1103_v8 = vld [vmem:[#allocation5 + $0x1d38] sm:$0xff] }
 0x502   :  { %15308 = vst [vmem:[#allocation50_spill] sm:$0xff] %v15131_v11  ;;  %v14612_v4 = vld [vmem:[#allocation2 + $0x3c] ss:$80 sps:$4 sm:$0xff]   ;;  %v9233_v10 = vadd.f32 %v9232_v46, %v15122_v14  ;;  %9541 = vmatpush1.bf16.msra.mxu0 %v13185_v28  ;;  %v13298_v31 = vcombine.high %v1099_v41, %v1103_v8  ;;  %v9714_v47 = vmax.f32 %v9272_v0, 0.0  ;;  %v13297_v14 = vcombine.low %v1099_v41, %v1103_v8 }
 0x503   :  { %9613 = vmatprep.mubr.bf16.mxu1 %v14612_v4  ;;  %v9275_v6 = vpop.f32.mrf.mxu1  ;;  %9542 = vmatprep.subr.bf16.mxu0 %v13178_v3  ;;  %v963_v15 = vld [vmem:[#allocation5 + $0x18d8] sm:$0xff]  ;;  %v13169_v4 = vcombine.low %v971_v44, %v975_v35 }
 0x504   :  { %9584 = vmatpush1.bf16.msra.mxu1 %v13313_v55  ;;  %v9276_v26 = vadd.f32 %v9275_v6, %v9233_v10  ;;  %v967_v24 = vld [vmem:[#allocation5 + $0x18f8] sm:$0xff] }
 0x505   :  { %9585 = vmatprep.subr.bf16.mxu1 %v13306_v51  ;;  %v1091_v23 = vld [vmem:[#allocation5 + $0x1cd8] sm:$0xff]  ;;  %v13162_v25 = vcombine.high %v963_v15, %v967_v24  ;;  %v13161_v51 = vcombine.low %v963_v15, %v967_v24 }
 0x506   :  { %v1095_v11 = vld [vmem:[#allocation5 + $0x1cf8] sm:$0xff]  ;;  %v9722_v38 = vmax.f32 %v9276_v26, 0.0  ;;  %9543 = vmatpush1.bf16.msra.mxu0 %v13177_v52 }
 0x507   :  { %9544 = vmatprep.subr.bf16.mxu0 %v13170_v58  ;;  %v13290_v34 = vcombine.high %v1091_v23, %v1095_v11  ;;  %v955_v27 = vld [vmem:[#allocation5 + $0x1898] sm:$0xff]  ;;  %v13289_v0 = vcombine.low %v1091_v23, %v1095_v11 }
 0x508   :  { %9586 = vmatpush1.bf16.msra.mxu1 %v13305_v36  ;;  %v15134_v18 = vpack.c.bf16 %v9722_v38, %v9714_v47  ;;  %v959_v28 = vld [vmem:[#allocation5 + $0x18b8] sm:$0xff] }
 0x509   :  { %9587 = vmatprep.subr.bf16.mxu1 %v13298_v31  ;;  %v1083_v55 = vld [vmem:[#allocation5 + $0x1c98] sm:$0xff]  ;;  %v13154_v46 = vcombine.high %v955_v27, %v959_v28  ;;  %v13153_v38 = vcombine.low %v955_v27, %v959_v28 }
 0x50a   :  { %v1087_v3 = vld [vmem:[#allocation5 + $0x1cb8] sm:$0xff]  ;;  %9545 = vmatpush1.bf16.msra.mxu0 %v13169_v4 }
 0x50b   :  { %9546 = vmatprep.subr.bf16.mxu0 %v13162_v25  ;;  %v13282_v35 = vcombine.high %v1083_v55, %v1087_v3  ;;  %v947_v44 = vld [vmem:[#allocation5 + $0x1858] sm:$0xff]  ;;  %v13281_v47 = vcombine.low %v1083_v55, %v1087_v3 }
 0x50c   :  { %9588 = vmatpush1.bf16.msra.mxu1 %v13297_v14  ;;  %v951_v10 = vld [vmem:[#allocation5 + $0x1878] sm:$0xff] }
 0x50d   :  { %9589 = vmatprep.subr.bf16.mxu1 %v13290_v34  ;;  %v1075_v41 = vld [vmem:[#allocation5 + $0x1c58] sm:$0xff]  ;;  %v13146_v52 = vcombine.high %v947_v44, %v951_v10  ;;  %v13145_v11 = vcombine.low %v947_v44, %v951_v10 }
 0x50e   :  { %v1079_v8 = vld [vmem:[#allocation5 + $0x1c78] sm:$0xff]  ;;  %9547 = vmatpush1.bf16.msra.mxu0 %v13161_v51 }
 0x50f   :  { %9548 = vmatprep.subr.bf16.mxu0 %v13154_v46  ;;  %v13274_v6 = vcombine.high %v1075_v41, %v1079_v8  ;;  %v939_v36 = vld [vmem:[#allocation5 + $0x1818] sm:$0xff]  ;;  %v13273_v15 = vcombine.low %v1075_v41, %v1079_v8 }
 0x510   :  { %9590 = vmatpush1.bf16.msra.mxu1 %v13289_v0  ;;  %v943_v58 = vld [vmem:[#allocation5 + $0x1838] sm:$0xff] }
 0x511   :  { %9591 = vmatprep.subr.bf16.mxu1 %v13282_v35  ;;  %v1067_v26 = vld [vmem:[#allocation5 + $0x1c18] sm:$0xff]  ;;  %v13138_v24 = vcombine.high %v939_v36, %v943_v58  ;;  %v13137_v27 = vcombine.low %v939_v36, %v943_v58 }
 0x512   :  { %v1071_v31 = vld [vmem:[#allocation5 + $0x1c38] sm:$0xff]  ;;  %9549 = vmatpush1.bf16.msra.mxu0 %v13153_v38 }
 0x513   :  { %9550 = vmatprep.subr.bf16.mxu0 %v13146_v52  ;;  %v13266_v23 = vcombine.high %v1067_v26, %v1071_v31  ;;  %v1059_v4 = vld [vmem:[#allocation5 + $0x1bd8] sm:$0xff]  ;;  %v13265_v28 = vcombine.low %v1067_v26, %v1071_v31 }
 0x514   :  { %9592 = vmatpush1.bf16.msra.mxu1 %v13281_v47  ;;  %v1063_v14 = vld [vmem:[#allocation5 + $0x1bf8] sm:$0xff] }
 0x515   :  { %9593 = vmatprep.subr.bf16.mxu1 %v13274_v6  ;;  %v1187_v25 = vld [vmem:[#allocation5 + $0x1fd8] sm:$0xff]  ;;  %v13258_v55 = vcombine.high %v1059_v4, %v1063_v14  ;;  %v13257_v44 = vcombine.low %v1059_v4, %v1063_v14 }
 0x516   :  { %v1191_v34 = vld [vmem:[#allocation5 + $0x1ff8] sm:$0xff]  ;;  %9551 = vmatpush1.bf16.msra.mxu0 %v13145_v11 }
 0x517   :  { %9552 = vmatprep.subr.bf16.mxu0 %v13138_v24  ;;  %v13386_v3 = vcombine.high %v1187_v25, %v1191_v34  ;;  %v1051_v51 = vld [vmem:[#allocation5 + $0x1b98] sm:$0xff]  ;;  %v13385_v10 = vcombine.low %v1187_v25, %v1191_v34 }
 0x518   :  { %9594 = vmatpush1.bf16.msra.mxu1 %v13273_v15  ;;  %v1055_v0 = vld [vmem:[#allocation5 + $0x1bb8] sm:$0xff] }
 0x519   :  { %9595 = vmatprep.subr.bf16.mxu1 %v13266_v23  ;;  %v1179_v46 = vld [vmem:[#allocation5 + $0x1f98] sm:$0xff]  ;;  %v13250_v41 = vcombine.high %v1051_v51, %v1055_v0  ;;  %v13249_v36 = vcombine.low %v1051_v51, %v1055_v0 }
 0x51a   :  { %v1183_v35 = vld [vmem:[#allocation5 + $0x1fb8] sm:$0xff]  ;;  %9553 = vmatpush1.bf16.msra.mxu0 %v13137_v27 }
 0x51b   :  { %9554 = vmatprep.subr.bf16.mxu0 %v13258_v55  ;;  %v13378_v8 = vcombine.high %v1179_v46, %v1183_v35  ;;  %v1043_v38 = vld [vmem:[#allocation5 + $0x1b58] sm:$0xff]  ;;  %v13377_v58 = vcombine.low %v1179_v46, %v1183_v35 }
 0x51c   :  { %9596 = vmatpush1.bf16.msra.mxu1 %v13265_v28  ;;  %v1047_v47 = vld [vmem:[#allocation5 + $0x1b78] sm:$0xff] }
 0x51d   :  { %9597 = vmatprep.subr.bf16.mxu1 %v13386_v3  ;;  %v1171_v52 = vld [vmem:[#allocation5 + $0x1f58] sm:$0xff]  ;;  %v13242_v26 = vcombine.high %v1043_v38, %v1047_v47  ;;  %v13241_v4 = vcombine.low %v1043_v38, %v1047_v47 }
 0x51e   :  { %v1175_v6 = vld [vmem:[#allocation5 + $0x1f78] sm:$0xff]  ;;  %9555 = vmatpush2.bf16.msra.mxu0 %v13257_v44 }
 0x51f   :  { %9556 = vmatprep.subr.bf16.mxu0 %v13250_v41  ;;  %v13370_v31 = vcombine.high %v1171_v52, %v1175_v6  ;;  %v1035_v11 = vld [vmem:[#allocation5 + $0x1b18] sm:$0xff]  ;;  %v13369_v14 = vcombine.low %v1171_v52, %v1175_v6 }
 0x520   :  { %9598 = vmatpush2.bf16.msra.mxu1 %v13385_v10  ;;  %v1039_v15 = vld [vmem:[#allocation5 + $0x1b38] sm:$0xff] }
 0x521   :  { %9599 = vmatprep.subr.bf16.mxu1 %v13378_v8  ;;  %v1163_v24 = vld [vmem:[#allocation5 + $0x1f18] sm:$0xff]  ;;  %v13234_v25 = vcombine.high %v1035_v11, %v1039_v15  ;;  %v13233_v51 = vcombine.low %v1035_v11, %v1039_v15 }
 0x522   :  { %v1167_v23 = vld [vmem:[#allocation5 + $0x1f38] sm:$0xff]  ;;  %9557 = vmatpush2.bf16.msra.mxu0 %v13249_v36 }
 0x523   :  { %9558 = vmatprep.subr.bf16.mxu0 %v13242_v26  ;;  %v13362_v34 = vcombine.high %v1163_v24, %v1167_v23  ;;  %v1027_v27 = vld [vmem:[#allocation5 + $0x1ad8] sm:$0xff]  ;;  %v13361_v0 = vcombine.low %v1163_v24, %v1167_v23 }
 0x524   :  { %9600 = vmatpush2.bf16.msra.mxu1 %v13377_v58  ;;  %v1031_v28 = vld [vmem:[#allocation5 + $0x1af8] sm:$0xff] }
 0x525   :  { %9601 = vmatprep.subr.bf16.mxu1 %v13370_v31  ;;  %v1155_v55 = vld [vmem:[#allocation5 + $0x1ed8] sm:$0xff]  ;;  %v13226_v46 = vcombine.high %v1027_v27, %v1031_v28  ;;  %v13225_v38 = vcombine.low %v1027_v27, %v1031_v28 }
 0x526   :  { %v1159_v3 = vld [vmem:[#allocation5 + $0x1ef8] sm:$0xff]  ;;  %9559 = vmatpush2.bf16.msra.mxu0 %v13241_v4 }
 0x527   :  { %9560 = vmatprep.subr.bf16.mxu0 %v13234_v25  ;;  %v13354_v35 = vcombine.high %v1155_v55, %v1159_v3  ;;  %v1019_v44 = vld [vmem:[#allocation5 + $0x1a98] sm:$0xff]  ;;  %v13353_v47 = vcombine.low %v1155_v55, %v1159_v3 }
 0x528   :  { %9602 = vmatpush2.bf16.msra.mxu1 %v13369_v14  ;;  %v1023_v10 = vld [vmem:[#allocation5 + $0x1ab8] sm:$0xff] }
 0x529   :  { %9603 = vmatprep.subr.bf16.mxu1 %v13362_v34  ;;  %v1147_v41 = vld [vmem:[#allocation5 + $0x1e98] sm:$0xff]  ;;  %v13218_v52 = vcombine.high %v1019_v44, %v1023_v10  ;;  %v13217_v11 = vcombine.low %v1019_v44, %v1023_v10 }
 0x52a   :  { %v1151_v8 = vld [vmem:[#allocation5 + $0x1eb8] sm:$0xff]  ;;  %9561 = vmatpush2.bf16.msra.mxu0 %v13233_v51 }
 0x52b   :  { %9562 = vmatprep.subr.bf16.mxu0 %v13226_v46  ;;  %v13346_v6 = vcombine.high %v1147_v41, %v1151_v8  ;;  %v1011_v36 = vld [vmem:[#allocation5 + $0x1a58] sm:$0xff]  ;;  %v13345_v15 = vcombine.low %v1147_v41, %v1151_v8 }
 0x52c   :  { %9604 = vmatpush2.bf16.msra.mxu1 %v13361_v0  ;;  %v1015_v58 = vld [vmem:[#allocation5 + $0x1a78] sm:$0xff] }
 0x52d   :  { %9605 = vmatprep.subr.bf16.mxu1 %v13354_v35  ;;  %v1139_v26 = vld [vmem:[#allocation5 + $0x1e58] sm:$0xff]  ;;  %v13210_v24 = vcombine.high %v1011_v36, %v1015_v58  ;;  %v13209_v27 = vcombine.low %v1011_v36, %v1015_v58 }
 0x52e   :  { %v1143_v31 = vld [vmem:[#allocation5 + $0x1e78] sm:$0xff]  ;;  %9563 = vmatpush2.bf16.msra.mxu0 %v13225_v38 }
 0x52f   :  { %9564 = vmatprep.subr.bf16.mxu0 %v13218_v52  ;;  %v13338_v23 = vcombine.high %v1139_v26, %v1143_v31  ;;  %v1003_v4 = vld [vmem:[#allocation5 + $0x1a18] sm:$0xff]  ;;  %v13337_v28 = vcombine.low %v1139_v26, %v1143_v31 }
 0x530   :  { %9606 = vmatpush2.bf16.msra.mxu1 %v13353_v47  ;;  %v1007_v14 = vld [vmem:[#allocation5 + $0x1a38] sm:$0xff] }
 0x531   :  { %9607 = vmatprep.subr.bf16.mxu1 %v13346_v6  ;;  %v1131_v25 = vld [vmem:[#allocation5 + $0x1e18] sm:$0xff]  ;;  %v13202_v55 = vcombine.high %v1003_v4, %v1007_v14  ;;  %v13201_v44 = vcombine.low %v1003_v4, %v1007_v14 }
 0x532   :  { %v1135_v34 = vld [vmem:[#allocation5 + $0x1e38] sm:$0xff]  ;;  %9565 = vmatpush2.bf16.msra.mxu0 %v13217_v11 }
 0x533   :  { %9566 = vmatprep.subr.bf16.mxu0 %v13210_v24  ;;  %v13330_v3 = vcombine.high %v1131_v25, %v1135_v34  ;;  %v1251_v51 = vld [vmem:[#allocation5 + $0x21d8] sm:$0xff]  ;;  %v13329_v10 = vcombine.low %v1131_v25, %v1135_v34  ;;  %v14613_v24 = vld [vmem:[#allocation2 + $0x30] ss:$80 sps:$4 sm:$0xff]  }
 0x534   :  { %9608 = vmatpush2.bf16.msra.mxu1 %v13345_v15  ;;  %v1255_v0 = vld [vmem:[#allocation5 + $0x21f8] sm:$0xff] }
 0x535   :  { %9609 = vmatprep.subr.bf16.mxu1 %v13338_v23  ;;  %v1379_v46 = vld [vmem:[#allocation5 + $0x25d8] sm:$0xff]  ;;  %v13450_v41 = vcombine.high %v1251_v51, %v1255_v0  ;;  %v13449_v36 = vcombine.low %v1251_v51, %v1255_v0  ;;  %v14615_v51 = vld [vmem:[#allocation2 + $0x44] ss:$80 sps:$4 sm:$0xff]  }
 0x536   :  { %v1383_v35 = vld [vmem:[#allocation5 + $0x25f8] sm:$0xff]  ;;  %9567 = vmatpush2.bf16.msra.mxu0 %v13209_v27 }
 0x537   :  { %9568 = vmatprep.subr.bf16.mxu0 %v13202_v55  ;;  %v13578_v8 = vcombine.high %v1379_v46, %v1383_v35  ;;  %v1243_v38 = vld [vmem:[#allocation5 + $0x2198] sm:$0xff]  ;;  %v13577_v58 = vcombine.low %v1379_v46, %v1383_v35 }
 0x538   :  { %9610 = vmatpush2.bf16.msra.mxu1 %v13337_v28  ;;  %v1247_v47 = vld [vmem:[#allocation5 + $0x21b8] sm:$0xff] }
 0x539   :  { %9611 = vmatprep.subr.bf16.mxu1 %v13330_v3  ;;  %v1371_v52 = vld [vmem:[#allocation5 + $0x2598] sm:$0xff]  ;;  %v13442_v26 = vcombine.high %v1243_v38, %v1247_v47  ;;  %v13441_v25 = vcombine.low %v1243_v38, %v1247_v47 }
 0x53a   :  { %v1375_v6 = vld [vmem:[#allocation5 + $0x25b8] sm:$0xff]  ;;  %9569 = vmatpush2.bf16.msra.mxu0 %v13201_v44 }
 0x53b   :  { %9624 = vmatprep.subr.bf16.mxu0 %v13450_v41  ;;  %v13570_v31 = vcombine.high %v1371_v52, %v1375_v6  ;;  %v1235_v11 = vld [vmem:[#allocation5 + $0x2158] sm:$0xff]  ;;  %v13569_v34 = vcombine.low %v1371_v52, %v1375_v6 }
 0x53c   :  { %9612 = vmatpush2.bf16.msra.mxu1 %v13329_v10  ;;  %v1239_v15 = vld [vmem:[#allocation5 + $0x2178] sm:$0xff] }
 0x53d   :  { %9667 = vmatprep.subr.bf16.mxu1 %v13578_v8  ;;  %9571 = vmatmul.mubr.bf16.vlgmr.msra.gmra.mxu0 %v14613_v24  ;;  %v1363_v23 = vld [vmem:[#allocation5 + $0x2558] sm:$0xff]  ;;  %v13434_v27 = vcombine.high %v1235_v11, %v1239_v15  ;;  %v13433_v44 = vcombine.low %v1235_v11, %v1239_v15 }
 0x53e   :  { %v1367_v4 = vld [vmem:[#allocation5 + $0x2578] sm:$0xff]  ;;  %9625 = vmatpush1.bf16.msra.mxu0 %v13449_v36  ;;  %9656 = vmatprep.mubr.bf16.mxu0 %v14615_v51 }
 0x53f   :  { %v14614_v14 = vld [vmem:[#allocation2 + $0x38] ss:$80 sps:$4 sm:$0xff]   ;;  %9626 = vmatprep.subr.bf16.mxu0 %v13442_v26  ;;  %v13562_v28 = vcombine.high %v1363_v23, %v1367_v4  ;;  %v14616_v35 = vld [vmem:[#allocation2 + $0x4c] ss:$80 sps:$4 sm:$0xff]   ;;  %v13561_v10 = vcombine.low %v1363_v23, %v1367_v4 }
 0x540   :  { %9614 = vmatmul.mubr.bf16.vlgmr.msra.gmra.mxu1 %v14614_v14  ;;  %v1227_v55 = vld [vmem:[#allocation5 + $0x2118] sm:$0xff] }
 0x541   :  { %9668 = vmatpush1.bf16.msra.mxu1 %v13577_v58  ;;  %v1231_v3 = vld [vmem:[#allocation5 + $0x2138] sm:$0xff]  ;;  %9699 = vmatprep.mubr.bf16.mxu1 %v14616_v35 }
 0x542   :  { %9669 = vmatprep.subr.bf16.mxu1 %v13570_v31  ;;  %v1355_v0 = vld [vmem:[#allocation5 + $0x2518] sm:$0xff]  ;;  %9627 = vmatpush1.bf16.msra.mxu0 %v13441_v25  ;;  %v13426_v41 = vcombine.high %v1227_v55, %v1231_v3  ;;  %v13425_v36 = vcombine.low %v1227_v55, %v1231_v3 }
 0x543   :  { %v1359_v46 = vld [vmem:[#allocation5 + $0x2538] sm:$0xff]  ;;  %9628 = vmatprep.subr.bf16.mxu0 %v13434_v27 }
 0x544   :  { %v13554_v8 = vcombine.high %v1355_v0, %v1359_v46  ;;  %v1219_v38 = vld [vmem:[#allocation5 + $0x20d8] sm:$0xff]  ;;  %v13553_v58 = vcombine.low %v1355_v0, %v1359_v46 }
 0x545   :  { %9670 = vmatpush1.bf16.msra.mxu1 %v13569_v34  ;;  %v1223_v47 = vld [vmem:[#allocation5 + $0x20f8] sm:$0xff] }
 0x546   :  { %9671 = vmatprep.subr.bf16.mxu1 %v13562_v28  ;;  %v1347_v52 = vld [vmem:[#allocation5 + $0x24d8] sm:$0xff]  ;;  %9629 = vmatpush1.bf16.msra.mxu0 %v13433_v44  ;;  %v13418_v26 = vcombine.high %v1219_v38, %v1223_v47  ;;  %v13417_v23 = vcombine.low %v1219_v38, %v1223_v47  ;;  %v15137_v38 = vsub.s32 1, %v14932_v9 }
 0x547   :  { %v1351_v6 = vld [vmem:[#allocation5 + $0x24f8] sm:$0xff]  ;;  %9630 = vmatprep.subr.bf16.mxu0 %v13426_v41 }
 0x548   :  { %v13546_v31 = vcombine.high %v1347_v52, %v1351_v6  ;;  %v1211_v24 = vld [vmem:[#allocation5 + $0x2098] sm:$0xff]  ;;  %v13545_v4 = vcombine.low %v1347_v52, %v1351_v6 }
 0x549   :  { %9672 = vmatpush1.bf16.msra.mxu1 %v13561_v10  ;;  %v1215_v11 = vld [vmem:[#allocation5 + $0x20b8] sm:$0xff] }
 0x54a   :  { %9673 = vmatprep.subr.bf16.mxu1 %v13554_v8  ;;  %v1339_v15 = vld [vmem:[#allocation5 + $0x2498] sm:$0xff]  ;;  %9631 = vmatpush1.bf16.msra.mxu0 %v13425_v36  ;;  %v13410_v25 = vcombine.high %v1211_v24, %v1215_v11  ;;  %v13409_v51 = vcombine.low %v1211_v24, %v1215_v11  ;;  %v15281_v36 = vsub.s32 3, %v14932_v9 }
 0x54b   :  { %v1343_v14 = vld [vmem:[#allocation5 + $0x24b8] sm:$0xff]  ;;  %9632 = vmatprep.subr.bf16.mxu0 %v13418_v26 }
 0x54c   :  { %v13538_v34 = vcombine.high %v1339_v15, %v1343_v14  ;;  %v1203_v27 = vld [vmem:[#allocation5 + $0x2058] sm:$0xff]  ;;  %v13537_v0 = vcombine.low %v1339_v15, %v1343_v14  ;;  %v15140_v15 = vld [vmem:[#allocation7] sm:$0xff] }
 0x54d   :  { %9674 = vmatpush1.bf16.msra.mxu1 %v13553_v58  ;;  %v1207_v28 = vld [vmem:[#allocation5 + $0x2078] sm:$0xff]  ;;  %v1457_v14 = vrot.slane %v15140_v15, %v15137_v38 }
 0x54e   :  { %9675 = vmatprep.subr.bf16.mxu1 %v13546_v31  ;;  %v1331_v55 = vld [vmem:[#allocation5 + $0x2458] sm:$0xff]  ;;  %9633 = vmatpush1.bf16.msra.mxu0 %v13417_v23  ;;  %v13402_v46 = vcombine.high %v1203_v27, %v1207_v28  ;;  %v13401_v47 = vcombine.low %v1203_v27, %v1207_v28 }
 0x54f   :  { %v1335_v3 = vld [vmem:[#allocation5 + $0x2478] sm:$0xff]  ;;  %9634 = vmatprep.subr.bf16.mxu0 %v13410_v25 }
 0x550   :  { %v13530_v35 = vcombine.high %v1331_v55, %v1335_v3  ;;  %v1195_v44 = vld [vmem:[#allocation5 + $0x2018] sm:$0xff]  ;;  %v13529_v52 = vcombine.low %v1331_v55, %v1335_v3  ;;  %v8031_v3 = vadd.f32 %v14946_v57, %v1457_v14 }
 0x551   :  { %9676 = vmatpush1.bf16.msra.mxu1 %v13545_v4  ;;  %v1199_v10 = vld [vmem:[#allocation5 + $0x2038] sm:$0xff] }
 0x552   :  { %9677 = vmatprep.subr.bf16.mxu1 %v13538_v34  ;;  %v1323_v41 = vld [vmem:[#allocation5 + $0x2418] sm:$0xff]  ;;  %9635 = vmatpush1.bf16.msra.mxu0 %v13409_v51  ;;  %v13394_v6 = vcombine.high %v1195_v44, %v1199_v10  ;;  %v13393_v23 = vcombine.low %v1195_v44, %v1199_v10  ;;  %v1465_v34 = vrot.slane %v15140_v15, %v15281_v36 }
 0x553   :  { %v1327_v8 = vld [vmem:[#allocation5 + $0x2438] sm:$0xff]  ;;  %9636 = vmatprep.subr.bf16.mxu0 %v13402_v46  ;;  %v8027_v46 = vadd.f32 %v14938_v45, %v1457_v14  ;;  %v8074_v57 = vadd.f32 %v14948_v60, %v8031_v3 }
 0x554   :  { %v13522_v58 = vcombine.high %v1323_v41, %v1327_v8  ;;  %v1315_v26 = vld [vmem:[#allocation5 + $0x23d8] sm:$0xff]  ;;  %v13521_v4 = vcombine.low %v1323_v41, %v1327_v8  ;;  %v8457_v8 = vadd.f32 %v15007_v2, %v1465_v34 }
 0x555   :  { %9678 = vmatpush1.bf16.msra.mxu1 %v13537_v0  ;;  %v1319_v31 = vld [vmem:[#allocation5 + $0x23f8] sm:$0xff]  ;;  %v8070_v45 = vadd.f32 %v14942_v49, %v8027_v46 }
 0x556   :  { %9679 = vmatprep.subr.bf16.mxu1 %v13530_v35  ;;  %v1443_v24 = vld [vmem:[#allocation5 + $0x27d8] sm:$0xff]  ;;  %9637 = vmatpush1.bf16.msra.mxu0 %v13401_v47  ;;  %v13514_v25 = vcombine.high %v1315_v26, %v1319_v31  ;;  %v8461_v35 = vadd.f32 %v15015_v61, %v1465_v34  ;;  %v13513_v44 = vcombine.low %v1315_v26, %v1319_v31 }
 0x557   :  { %v1447_v11 = vld [vmem:[#allocation5 + $0x27f8] sm:$0xff]  ;;  %9638 = vmatprep.subr.bf16.mxu0 %v13394_v6  ;;  %v8117_v31 = vadd.f32 %v14960_v29, %v8074_v57  ;;  %v8500_v14 = vadd.f32 %v15011_v5, %v8457_v8 }
 0x558   :  { %v13642_v27 = vcombine.high %v1443_v24, %v1447_v11  ;;  %v1307_v28 = vld [vmem:[#allocation5 + $0x2398] sm:$0xff]  ;;  %v13641_v10 = vcombine.low %v1443_v24, %v1447_v11  ;;  %v8504_v61 = vadd.f32 %v15017_v39, %v8461_v35  ;;  %v8113_v11 = vadd.f32 %v14951_v7, %v8070_v45 }
 0x559   :  { %9680 = vmatpush1.bf16.msra.mxu1 %v13529_v52  ;;  %v1311_v55 = vld [vmem:[#allocation5 + $0x23b8] sm:$0xff]  ;;  %v8543_v34 = vadd.f32 %v15020_v59, %v8500_v14 }
 0x55a   :  { %9681 = vmatprep.subr.bf16.mxu1 %v13522_v58  ;;  %v1435_v51 = vld [vmem:[#allocation5 + $0x2798] sm:$0xff]  ;;  %9639 = vmatpush1.bf16.msra.mxu0 %v13393_v23  ;;  %v13506_v41 = vcombine.high %v1307_v28, %v1311_v55  ;;  %v13505_v26 = vcombine.low %v1307_v28, %v1311_v55  ;;  %v8547_v60 = vadd.f32 %v15029_v54, %v8504_v61 }
 0x55b   :  { %v1439_v0 = vld [vmem:[#allocation5 + $0x27b8] sm:$0xff]  ;;  %9640 = vmatprep.subr.bf16.mxu0 %v13514_v25  ;;  %v8156_v5 = vadd.f32 %v14955_v12, %v8113_v11 }
 0x55c   :  { %v13634_v47 = vcombine.high %v1435_v51, %v1439_v0  ;;  %v1299_v52 = vld [vmem:[#allocation5 + $0x2358] sm:$0xff]  ;;  %v13633_v24 = vcombine.low %v1435_v51, %v1439_v0  ;;  %v8590_v54 = vadd.f32 %v15031_v62, %v8547_v60 }
 0x55d   :  { %9682 = vmatpush1.bf16.msra.mxu1 %v13521_v4  ;;  %v1303_v6 = vld [vmem:[#allocation5 + $0x2378] sm:$0xff]  ;;  %v8199_v35 = vadd.f32 %v14965_v43, %v8156_v5 }
 0x55e   :  { %9683 = vmatprep.subr.bf16.mxu1 %v13642_v27  ;;  %v1427_v58 = vld [vmem:[#allocation5 + $0x2758] sm:$0xff]  ;;  %9641 = vmatpush2.bf16.msra.mxu0 %v13513_v44  ;;  %v13498_v2 = vcombine.high %v1299_v52, %v1303_v6  ;;  %v13497_v29 = vcombine.low %v1299_v52, %v1303_v6  ;;  %v8160_v27 = vadd.f32 %v14962_v32, %v8117_v31 }
 0x55f   :  { %v1431_v36 = vld [vmem:[#allocation5 + $0x2778] sm:$0xff]  ;;  %9642 = vmatprep.subr.bf16.mxu0 %v13506_v41  ;;  %v8586_v32 = vadd.f32 %v15024_v1, %v8543_v34  ;;  %v8633_v44 = vadd.f32 %v15043_v53, %v8590_v54  ;;  %v8242_v1 = vadd.f32 %v14969_v50, %v8199_v35 }
 0x560   :  { %v13626_v23 = vcombine.high %v1427_v58, %v1431_v36  ;;  %v1291_v4 = vld [vmem:[#allocation5 + $0x2318] sm:$0xff]  ;;  %v13625_v28 = vcombine.low %v1427_v58, %v1431_v36  ;;  %v8203_v0 = vadd.f32 %v14974_v16, %v8160_v27 }
 0x561   :  { %9684 = vmatpush2.bf16.msra.mxu1 %v13641_v10  ;;  %v1295_v49 = vld [vmem:[#allocation5 + $0x2338] sm:$0xff]  ;;  %v8629_v10 = vadd.f32 %v15034_v20, %v8586_v32  ;;  %v8676_v53 = vadd.f32 %v15045_v63, %v8633_v44  ;;  %v8285_v50 = vadd.f32 %v14979_v33, %v8242_v1 }
 0x562   :  { %9685 = vmatprep.subr.bf16.mxu1 %v13634_v47  ;;  %v1419_v25 = vld [vmem:[#allocation5 + $0x2718] sm:$0xff]  ;;  %9643 = vmatpush2.bf16.msra.mxu0 %v13505_v26  ;;  %v13490_v7 = vcombine.high %v1291_v4, %v1295_v49  ;;  %v13489_v36 = vcombine.low %v1291_v4, %v1295_v49  ;;  %v8246_v47 = vadd.f32 %v14976_v19, %v8203_v0 }
 0x563   :  { %v1423_v39 = vld [vmem:[#allocation5 + $0x2738] sm:$0xff]  ;;  %9644 = vmatprep.subr.bf16.mxu0 %v13498_v2  ;;  %v8672_v45 = vadd.f32 %v15038_v30, %v8629_v10  ;;  %v8719_v61 = vadd.f32 %v15057_v56, %v8676_v53  ;;  %v8328_v33 = vadd.f32 %v14983_v37, %v8285_v50 }
 0x564   :  { %v13618_v55 = vcombine.high %v1419_v25, %v1423_v39  ;;  %v1283_v3 = vld [vmem:[#allocation5 + $0x22d8] sm:$0xff]  ;;  %v13617_v12 = vcombine.low %v1419_v25, %v1423_v39  ;;  %v8289_v57 = vadd.f32 %v14988_v48, %v8246_v47  ;;  %v14618_v47 = vld [vmem:[#allocation2 + $0x40] ss:$80 sps:$4 sm:$0xff]  }
 0x565   :  { %9686 = vmatpush2.bf16.msra.mxu1 %v13633_v24  ;;  %v1287_v51 = vld [vmem:[#allocation5 + $0x22f8] sm:$0xff]  ;;  %v8715_v2 = vadd.f32 %v15048_v22, %v8672_v45  ;;  %v8762_v56 = vadd.f32 %v15059_v13, %v8719_v61 }
 0x566   :  { %9687 = vmatprep.subr.bf16.mxu1 %v13626_v23  ;;  %v1411_v46 = vld [vmem:[#allocation5 + $0x26d8] sm:$0xff]  ;;  %9645 = vmatpush2.bf16.msra.mxu0 %v13497_v29  ;;  %v13482_v62 = vcombine.high %v1283_v3, %v1287_v51  ;;  %v13481_v6 = vcombine.low %v1283_v3, %v1287_v51  ;;  %v8332_v11 = vadd.f32 %v14990_v21, %v8289_v57  ;;  %v15309_v29 = vld [vmem:[#allocation25_spill] sm:$0xff]  ;;  %v15313_v51 = vld [vmem:[#allocation26_spill] sm:$0xff] }
 0x567   :  { %v1415_v59 = vld [vmem:[#allocation5 + $0x26f8] sm:$0xff]  ;;  %9646 = vmatprep.subr.bf16.mxu0 %v13490_v7  ;;  %v8758_v39 = vadd.f32 %v15052_v40, %v8715_v2  ;;  %v8805_v21 = vadd.f32 %v15070_v17, %v8762_v56  ;;  %v8371_v27 = vadd.f32 %v15309_v29, %v8328_v33  ;;  %v15310_v7 = vld [vmem:[#allocation29_spill] sm:$0xff] }
 0x568   :  { %v13610_v41 = vcombine.high %v1411_v46, %v1415_v59  ;;  %v1275_v8 = vld [vmem:[#allocation5 + $0x2298] sm:$0xff]  ;;  %v13609_v58 = vcombine.low %v1411_v46, %v1415_v59  ;;  %v8375_v49 = vadd.f32 %v15003_v42, %v8332_v11  ;;  %v15314_v59 = vld [vmem:[#allocation30_spill] sm:$0xff] }
 0x569   :  { %9688 = vmatpush2.bf16.msra.mxu1 %v13625_v28  ;;  %v1279_v16 = vld [vmem:[#allocation5 + $0x22b8] sm:$0xff]  ;;  %v8801_v5 = vadd.f32 %v15310_v7, %v8758_v39  ;;  %v8414_v17 = vadd.f32 %v15313_v51, %v8371_v27  ;;  %v15315_v27 = vld [vmem:[#allocation35_spill] sm:$0xff]  ;;  %v15316_v7 = vld [vmem:[#allocation33_spill] sm:$0xff] }
 0x56a   :  { %9689 = vmatprep.subr.bf16.mxu1 %v13618_v55  ;;  %v1403_v52 = vld [vmem:[#allocation5 + $0x2698] sm:$0xff]  ;;  %9647 = vmatpush2.bf16.msra.mxu0 %v13489_v36  ;;  %v13474_v20 = vcombine.high %v1275_v8, %v1279_v16  ;;  %v13473_v48 = vcombine.low %v1275_v8, %v1279_v16  ;;  %v15318_v51 = vld [vmem:[#allocation34_spill] sm:$0xff] }
 0x56b   :  { %v1407_v43 = vld [vmem:[#allocation5 + $0x26b8] sm:$0xff]  ;;  %9648 = vmatprep.subr.bf16.mxu0 %v13482_v62  ;;  %v8844_v35 = vadd.f32 %v15314_v59, %v8801_v5  ;;  %v9711_v62 = vmax.f32 %v8414_v17, 0.0 }
 0x56c   :  { %v13602_v19 = vcombine.high %v1403_v52, %v1407_v43  ;;  %v1267_v26 = vld [vmem:[#allocation5 + $0x2258] sm:$0xff]  ;;  %v13601_v14 = vcombine.low %v1403_v52, %v1407_v43 }
 0x56d   :  { %9690 = vmatpush2.bf16.msra.mxu1 %v13617_v12  ;;  %v1271_v31 = vld [vmem:[#allocation5 + $0x2278] sm:$0xff] }
 0x56e   :  { %9691 = vmatprep.subr.bf16.mxu1 %v13610_v41  ;;  %v1395_v24 = vld [vmem:[#allocation5 + $0x2658] sm:$0xff]  ;;  %9649 = vmatpush2.bf16.msra.mxu0 %v13481_v6  ;;  %v13466_v30 = vcombine.high %v1267_v26, %v1271_v31  ;;  %v13465_v34 = vcombine.low %v1267_v26, %v1271_v31  ;;  %v9713_v41 = vmax.f32 %v8844_v35, 0.0 }
 0x56f   :  { %v1399_v63 = vld [vmem:[#allocation5 + $0x2678] sm:$0xff]  ;;  %9650 = vmatprep.subr.bf16.mxu0 %v13474_v20 }
 0x570   :  { %v13594_v60 = vcombine.high %v1395_v24, %v1399_v63  ;;  %v1259_v23 = vld [vmem:[#allocation5 + $0x2218] sm:$0xff]  ;;  %v13593_v13 = vcombine.low %v1395_v24, %v1399_v63 }
 0x571   :  { %9692 = vmatpush2.bf16.msra.mxu1 %v13609_v58  ;;  %v1263_v4 = vld [vmem:[#allocation5 + $0x2238] sm:$0xff] }
 0x572   :  { %9693 = vmatprep.subr.bf16.mxu1 %v13602_v19  ;;  %v1387_v25 = vld [vmem:[#allocation5 + $0x2618] sm:$0xff]  ;;  %9651 = vmatpush2.bf16.msra.mxu0 %v13473_v48  ;;  %v13458_v28 = vcombine.high %v1259_v23, %v1263_v4  ;;  %v13457_v40 = vcombine.low %v1259_v23, %v1263_v4  ;;  %v1472_v4 = vsub.s32 5, %v14932_v9 }
 0x573   :  { %v1391_v22 = vld [vmem:[#allocation5 + $0x2638] sm:$0xff]  ;;  %9652 = vmatprep.subr.bf16.mxu0 %v13466_v30 }
 0x574   :  { %v13586_v37 = vcombine.high %v1387_v25, %v1391_v22  ;;  %v15311_v54 = vld [vmem:[#allocation28_spill] sm:$0xff]  ;;  %v13585_v0 = vcombine.low %v1387_v25, %v1391_v22  ;;  %v1473_v39 = vrot.slane %v15140_v15, %v1472_v4 }
 0x575   :  { %9694 = vmatpush2.bf16.msra.mxu1 %v13601_v14  ;;  %v8418_v42 = vadd.f32 %v15311_v54, %v8375_v49  ;;  %v15312_v55 = vld [vmem:[#allocation32_spill] sm:$0xff] }
 0x576   :  { %9695 = vmatprep.subr.bf16.mxu1 %v13594_v60  ;;  %v8848_v3 = vadd.f32 %v15312_v55, %v8805_v21  ;;  %9653 = vmatpush2.bf16.msra.mxu0 %v13465_v34  ;;  %v14063_v46 = vld [vmem:[#allocation8 + $0xe4] ss:$16 sps:$4 sm:$0xff]   ;;  %v14061_v12 = vld [vmem:[#allocation8 + $0xe0] ss:$16 sps:$4 sm:$0xff]   ;;  %v8887_v5 = vadd.f32 %v15316_v7, %v1473_v39 }
 0x577   :  { %9654 = vmatprep.subr.bf16.mxu0 %v13458_v28  ;;  %v14066_v32 = vld [vmem:[#allocation8 + $0x2e4] ss:$16 sps:$4 sm:$0xff]   ;;  %v9719_v44 = vmax.f32 %v8418_v42, 0.0  ;;  %v14064_v10 = vld [vmem:[#allocation8 + $0x2e0] ss:$16 sps:$4 sm:$0xff]  }
 0x578   :  { %v9721_v36 = vmax.f32 %v8848_v3, 0.0  ;;  %v14069_v8 = vld [vmem:[#allocation8 + $0xc4] ss:$16 sps:$4 sm:$0xff]   ;;  %v14619_v1 = vld [vmem:[#allocation2 + $0x48] ss:$80 sps:$4 sm:$0xff]   ;;  %v8930_v17 = vadd.f32 %v15318_v51, %v8887_v5 }
 0x579   :  { %9696 = vmatpush2.bf16.msra.mxu1 %v13593_v13  ;;  %v15187_v16 = vpack.c.bf16 %v9719_v44, %v9711_v62  ;;  %v14072_v52 = vld [vmem:[#allocation8 + $0x2c4] ss:$16 sps:$4 sm:$0xff]   ;;  %v14067_v53 = vld [vmem:[#allocation8 + $0xc0] ss:$16 sps:$4 sm:$0xff]   ;;  %v8891_v13 = vadd.f32 %v15315_v27, %v1473_v39  ;;  %v15320_v44 = vld [vmem:[#allocation37_spill] sm:$0xff] }
 0x57a   :  { %9697 = vmatprep.subr.bf16.mxu1 %v13586_v37  ;;  %9655 = vmatpush2.bf16.msra.mxu0 %v13457_v40  ;;  %v15189_v43 = vpack.c.bf16 %v9721_v36, %v9713_v41  ;;  %v14070_v6 = vld [vmem:[#allocation8 + $0x2c0] ss:$16 sps:$4 sm:$0xff]   ;;  %v14075_v57 = vld [vmem:[#allocation8 + $0xa4] ss:$16 sps:$4 sm:$0xff]   ;;  %v8973_v36 = vadd.f32 %v15320_v44, %v8930_v17 }
 0x57b   :  { %11292 = vmatprep.subr.bf16.mxu0 %v14063_v46  ;;  %v14078_v58 = vld [vmem:[#allocation8 + $0x2a4] ss:$16 sps:$4 sm:$0xff]   ;;  %v14073_v20 = vld [vmem:[#allocation8 + $0xa0] ss:$16 sps:$4 sm:$0xff]  }
 0x57c   :  { %v14076_v45 = vld [vmem:[#allocation8 + $0x2a0] ss:$16 sps:$4 sm:$0xff]   ;;  %v14081_v61 = vld [vmem:[#allocation8 + $0x84] ss:$16 sps:$4 sm:$0xff]  }
 0x57d   :  { %9698 = vmatpush2.bf16.msra.mxu1 %v13585_v0  ;;  %9657 = vmatmul.mubr.bf16.vlgmr.msra.gmra.mxu0 %v14618_v47  ;;  %v14084_v19 = vld [vmem:[#allocation8 + $0x284] ss:$16 sps:$4 sm:$0xff]   ;;  %v14079_v26 = vld [vmem:[#allocation8 + $0x80] ss:$16 sps:$4 sm:$0xff]   ;;  %v15319_v0 = vld [vmem:[#allocation39_spill] sm:$0xff] }
 0x57e   :  { %11335 = vmatprep.subr.bf16.mxu1 %v14066_v32  ;;  %11293 = vmatpush1.bf16.msra.mxu0 %v14061_v12  ;;  %v14082_v31 = vld [vmem:[#allocation8 + $0x280] ss:$16 sps:$4 sm:$0xff]   ;;  %v14087_v50 = vld [vmem:[#allocation8 + $0x64] ss:$16 sps:$4 sm:$0xff]  }
 0x57f   :  { %11324 = vmatprep.mubr.bf16.mxu0 %v15187_v16  ;;  %11294 = vmatprep.subr.bf16.mxu0 %v14069_v8  ;;  %v14090_v24 = vld [vmem:[#allocation8 + $0x264] ss:$16 sps:$4 sm:$0xff]   ;;  %v14085_v63 = vld [vmem:[#allocation8 + $0x60] ss:$16 sps:$4 sm:$0xff]  }
 0x580   :  { %9700 = vmatmul.mubr.bf16.vlgmr.msra.gmra.mxu1 %v14619_v1  ;;  %v14088_v2 = vld [vmem:[#allocation8 + $0x260] ss:$16 sps:$4 sm:$0xff]   ;;  %v14093_v48 = vld [vmem:[#allocation8 + $0x44] ss:$16 sps:$4 sm:$0xff]  }
 0x581   :  { %11336 = vmatpush1.bf16.msra.mxu1 %v14064_v10  ;;  %11367 = vmatprep.mubr.bf16.mxu1 %v15189_v43  ;;  %v14096_v11 = vld [vmem:[#allocation8 + $0x244] ss:$16 sps:$4 sm:$0xff]   ;;  %v14091_v14 = vld [vmem:[#allocation8 + $0x40] ss:$16 sps:$4 sm:$0xff]  }
 0x582   :  { %11337 = vmatprep.subr.bf16.mxu1 %v14072_v52  ;;  %11295 = vmatpush1.bf16.msra.mxu0 %v14067_v53  ;;  %v14094_v30 = vld [vmem:[#allocation8 + $0x240] ss:$16 sps:$4 sm:$0xff]   ;;  %v14099_v56 = vld [vmem:[#allocation8 + $0x24] ss:$16 sps:$4 sm:$0xff]   ;;  %v15323_v53 = vld [vmem:[#allocation43_spill] sm:$0xff] }
 0x583   :  { %11296 = vmatprep.subr.bf16.mxu0 %v14075_v57  ;;  %v14102_v60 = vld [vmem:[#allocation8 + $0x224] ss:$16 sps:$4 sm:$0xff]   ;;  %v14097_v23 = vld [vmem:[#allocation8 + $0x20] ss:$16 sps:$4 sm:$0xff]  }
 0x584   :  { %v14100_v33 = vld [vmem:[#allocation8 + $0x220] ss:$16 sps:$4 sm:$0xff]   ;;  %v14105_v49 = vld [vmem:[#allocation8 + $0x4] ss:$16 sps:$4 sm:$0xff]  }
 0x585   :  { %11338 = vmatpush1.bf16.msra.mxu1 %v14070_v6  ;;  %v14108_v25 = vld [vmem:[#allocation8 + $0x204] ss:$16 sps:$4 sm:$0xff]   ;;  %v14103_v22 = vld [vmem:[#allocation8] ss:$16 sps:$4 sm:$0xff]  }
 0x586   :  { %11339 = vmatprep.subr.bf16.mxu1 %v14078_v58  ;;  %11297 = vmatpush1.bf16.msra.mxu0 %v14073_v20  ;;  %v14106_v21 = vld [vmem:[#allocation8 + $0x200] ss:$16 sps:$4 sm:$0xff]   ;;  %v14111_v34 = vld [vmem:[#allocation8 + $0x1e4] ss:$16 sps:$4 sm:$0xff]   ;;  %v15324_v58 = vld [vmem:[#allocation41_spill] sm:$0xff] }
 0x587   :  { %11298 = vmatprep.subr.bf16.mxu0 %v14081_v61  ;;  %v14114_v29 = vld [vmem:[#allocation8 + $0x3e4] ss:$16 sps:$4 sm:$0xff]   ;;  %v14109_v28 = vld [vmem:[#allocation8 + $0x1e0] ss:$16 sps:$4 sm:$0xff]  }
 0x588   :  { %v14112_v37 = vld [vmem:[#allocation8 + $0x3e0] ss:$16 sps:$4 sm:$0xff]   ;;  %v14117_v54 = vld [vmem:[#allocation8 + $0x1c4] ss:$16 sps:$4 sm:$0xff]  }
 0x589   :  { %11340 = vmatpush1.bf16.msra.mxu1 %v14076_v45  ;;  %v14120_v42 = vld [vmem:[#allocation8 + $0x3c4] ss:$16 sps:$4 sm:$0xff]   ;;  %v14115_v40 = vld [vmem:[#allocation8 + $0x1c0] ss:$16 sps:$4 sm:$0xff]  }
 0x58a   :  { %11341 = vmatprep.subr.bf16.mxu1 %v14084_v19  ;;  %11299 = vmatpush1.bf16.msra.mxu0 %v14079_v26  ;;  %v15317_v55 = vld [vmem:[#allocation36_spill] sm:$0xff]  ;;  %v15322_v52 = vld [vmem:[#allocation38_spill] sm:$0xff] }
 0x58b   :  { %11300 = vmatprep.subr.bf16.mxu0 %v14087_v50  ;;  %v8934_v3 = vadd.f32 %v15317_v55, %v8891_v13  ;;  %v14118_v59 = vld [vmem:[#allocation8 + $0x3c0] ss:$16 sps:$4 sm:$0xff]   ;;  %v14123_v35 = vld [vmem:[#allocation8 + $0x1a4] ss:$16 sps:$4 sm:$0xff]   ;;  %v9016_v1 = vadd.f32 %v15322_v52, %v8973_v36  ;;  %v15331_v13 = vld [vmem:[#allocation49_spill] sm:$0xff] }
 0x58c   :  { %v14126_v32 = vld [vmem:[#allocation8 + $0x3a4] ss:$16 sps:$4 sm:$0xff]   ;;  %v14121_v12 = vld [vmem:[#allocation8 + $0x1a0] ss:$16 sps:$4 sm:$0xff]  }
 0x58d   :  { %11342 = vmatpush1.bf16.msra.mxu1 %v14082_v31  ;;  %v8977_v46 = vadd.f32 %v15319_v0, %v8934_v3  ;;  %v15321_v62 = vld [vmem:[#allocation40_spill] sm:$0xff]  ;;  %v9059_v20 = vadd.f32 %v15324_v58, %v9016_v1  ;;  %v15332_v3 = vld [vmem:[#allocation50_spill] sm:$0xff] }
 0x58e   :  { %11343 = vmatprep.subr.bf16.mxu1 %v14090_v24  ;;  %11301 = vmatpush1.bf16.msra.mxu0 %v14085_v63  ;;  %v14124_v41 = vld [vmem:[#allocation8 + $0x3a0] ss:$16 sps:$4 sm:$0xff]   ;;  %v14129_v8 = vld [vmem:[#allocation8 + $0x184] ss:$16 sps:$4 sm:$0xff]  }
 0x58f   :  { %11302 = vmatprep.subr.bf16.mxu0 %v14093_v48  ;;  %v9020_v10 = vadd.f32 %v15321_v62, %v8977_v46  ;;  %v14132_v47 = vld [vmem:[#allocation8 + $0x384] ss:$16 sps:$4 sm:$0xff]   ;;  %v14127_v57 = vld [vmem:[#allocation8 + $0x180] ss:$16 sps:$4 sm:$0xff]  }
 0x590   :  { %v14130_v45 = vld [vmem:[#allocation8 + $0x380] ss:$16 sps:$4 sm:$0xff]   ;;  %v14135_v61 = vld [vmem:[#allocation8 + $0x164] ss:$16 sps:$4 sm:$0xff]  }
 0x591   :  { %11344 = vmatpush1.bf16.msra.mxu1 %v14088_v2  ;;  %v9063_v6 = vadd.f32 %v15323_v53, %v9020_v10  ;;  %v14138_v19 = vld [vmem:[#allocation8 + $0x364] ss:$16 sps:$4 sm:$0xff]   ;;  %v14133_v50 = vld [vmem:[#allocation8 + $0x160] ss:$16 sps:$4 sm:$0xff]   ;;  %v15327_v2 = vld [vmem:[#allocation47_spill] sm:$0xff] }
 0x592   :  { %11345 = vmatprep.subr.bf16.mxu1 %v14096_v11  ;;  %11303 = vmatpush1.bf16.msra.mxu0 %v14091_v14  ;;  %v15325_v26 = vld [vmem:[#allocation44_spill] sm:$0xff]  ;;  %v15326_v24 = vld [vmem:[#allocation42_spill] sm:$0xff]  ;;  %v15334_v10 = vld [vmem:[#allocation31_spill] sm:$0xff] }
 0x593   :  { %11304 = vmatprep.subr.bf16.mxu0 %v14099_v56  ;;  %v9106_v31 = vadd.f32 %v15325_v26, %v9063_v6  ;;  %v9102_v63 = vadd.f32 %v15326_v24, %v9059_v20  ;;  %v14136_v11 = vld [vmem:[#allocation8 + $0x360] ss:$16 sps:$4 sm:$0xff]   ;;  %v14141_v14 = vld [vmem:[#allocation8 + $0x144] ss:$16 sps:$4 sm:$0xff]   ;;  %v15328_v56 = vld [vmem:[#allocation45_spill] sm:$0xff] }
 0x594   :  { %v14139_v4 = vld [vmem:[#allocation8 + $0x140] ss:$16 sps:$4 sm:$0xff]   ;;  %v14150_v39 = vld [vmem:[#allocation8 + $0x324] ss:$16 sps:$4 sm:$0xff]  }
 0x595   :  { %11346 = vmatpush1.bf16.msra.mxu1 %v14094_v30  ;;  %v9149_v48 = vadd.f32 %v15327_v2, %v9106_v31  ;;  %v14144_v30 = vld [vmem:[#allocation8 + $0x344] ss:$16 sps:$4 sm:$0xff]   ;;  %v14145_v27 = vld [vmem:[#allocation8 + $0x120] ss:$16 sps:$4 sm:$0xff]  }
 0x596   :  { %11347 = vmatprep.subr.bf16.mxu1 %v14102_v60  ;;  %11305 = vmatpush1.bf16.msra.mxu0 %v14097_v23  ;;  %v9145_v60 = vadd.f32 %v15328_v56, %v9102_v63  ;;  %v9234_v23 = vpop.f32.mrf.mxu0  ;;  %v14148_v7 = vld [vmem:[#allocation8 + $0x320] ss:$16 sps:$4 sm:$0xff]   ;;  %v14153_v5 = vld [vmem:[#allocation8 + $0x104] ss:$16 sps:$4 sm:$0xff]  }
 0x597   :  { %11306 = vmatprep.subr.bf16.mxu0 %v14105_v49  ;;  %v14151_v55 = vld [vmem:[#allocation8 + $0x100] ss:$16 sps:$4 sm:$0xff]   ;;  %v14159_v17 = vld [vmem:[#allocation8 + $0x4e4] ss:$16 sps:$4 sm:$0xff]  }
 0x598   :  { %v14154_v51 = vld [vmem:[#allocation8 + $0x300] ss:$16 sps:$4 sm:$0xff]   ;;  %v14219_v0 = vld [vmem:[#allocation8 + $0x6e4] ss:$16 sps:$4 sm:$0xff]  }
 0x599   :  { %11348 = vmatpush1.bf16.msra.mxu1 %v14100_v33  ;;  %v15329_v33 = vld [vmem:[#allocation48_spill] sm:$0xff] }
 0x59a   :  { %11349 = vmatprep.subr.bf16.mxu1 %v14108_v25  ;;  %11307 = vmatpush1.bf16.msra.mxu0 %v14103_v22  ;;  %v9192_v49 = vadd.f32 %v15329_v33, %v9149_v48  ;;  %v14142_v25 = vld [vmem:[#allocation8 + $0x340] ss:$16 sps:$4 sm:$0xff]   ;;  %v14147_v22 = vld [vmem:[#allocation8 + $0x124] ss:$16 sps:$4 sm:$0xff]  }
 0x59b   :  { %11308 = vmatprep.subr.bf16.mxu0 %v14111_v34  ;;  %v14217_v44 = vld [vmem:[#allocation8 + $0x6e0] ss:$16 sps:$4 sm:$0xff]   ;;  %v14225_v62 = vld [vmem:[#allocation8 + $0x6c4] ss:$16 sps:$4 sm:$0xff]  }
 0x59c   :  { %v14231_v52 = vld [vmem:[#allocation8 + $0x6a4] ss:$16 sps:$4 sm:$0xff]   ;;  %v14163_v1 = vld [vmem:[#allocation8 + $0x4a0] ss:$16 sps:$4 sm:$0xff]  }
 0x59d   :  { %11350 = vmatpush1.bf16.msra.mxu1 %v14106_v21  ;;  %v15330_v21 = vld [vmem:[#allocation46_spill] sm:$0xff] }
 0x59e   :  { %11351 = vmatprep.subr.bf16.mxu1 %v14114_v29  ;;  %11309 = vmatpush2.bf16.msra.mxu0 %v14109_v28  ;;  %v9188_v34 = vadd.f32 %v15330_v21, %v9145_v60  ;;  %v9235_v29 = vadd.f32 %v9234_v23, %v9192_v49  ;;  %v14168_v53 = vld [vmem:[#allocation8 + $0x484] ss:$16 sps:$4 sm:$0xff]   ;;  %v14229_v6 = vld [vmem:[#allocation8 + $0x6a0] ss:$16 sps:$4 sm:$0xff]  }
 0x59f   :  { %11310 = vmatprep.subr.bf16.mxu0 %v14117_v54  ;;  %v14156_v54 = vld [vmem:[#allocation8 + $0x304] ss:$16 sps:$4 sm:$0xff]   ;;  %v14166_v58 = vld [vmem:[#allocation8 + $0x480] ss:$16 sps:$4 sm:$0xff]  }
 0x5a0   :  { %v9231_v28 = vadd.f32 %v15331_v13, %v9188_v34  ;;  %v14171_v20 = vld [vmem:[#allocation8 + $0x464] ss:$16 sps:$4 sm:$0xff]   ;;  %v14241_v31 = vld [vmem:[#allocation8 + $0x660] ss:$16 sps:$4 sm:$0xff]  }
 0x5a1   :  { %11352 = vmatpush2.bf16.msra.mxu1 %v14112_v37  ;;  %v9277_v37 = vpop.f32.mrf.mxu1  ;;  %v14174_v26 = vld [vmem:[#allocation8 + $0x444] ss:$16 sps:$4 sm:$0xff]   ;;  %v14172_v24 = vld [vmem:[#allocation8 + $0x440] ss:$16 sps:$4 sm:$0xff]  }
 0x5a2   :  { %11353 = vmatprep.subr.bf16.mxu1 %v14120_v42  ;;  %11311 = vmatpush2.bf16.msra.mxu0 %v14115_v40  ;;  %v9278_v42 = vadd.f32 %v9277_v37, %v9235_v29  ;;  %v9274_v40 = vadd.f32 %v15332_v3, %v9231_v28  ;;  %v14177_v63 = vld [vmem:[#allocation8 + $0x424] ss:$16 sps:$4 sm:$0xff]   ;;  %v14247_v2 = vld [vmem:[#allocation8 + $0x640] ss:$16 sps:$4 sm:$0xff]  }
 0x5a3   :  { %11312 = vmatprep.subr.bf16.mxu0 %v14123_v35  ;;  %v14255_v48 = vld [vmem:[#allocation8 + $0x624] ss:$16 sps:$4 sm:$0xff]   ;;  %v14178_v60 = vld [vmem:[#allocation8 + $0x400] ss:$16 sps:$4 sm:$0xff]  }
 0x5a4   :  { %v9723_v46 = vmax.f32 %v9278_v42, 0.0  ;;  %v9715_v35 = vmax.f32 %v9274_v40, 0.0  ;;  %v14261_v56 = vld [vmem:[#allocation8 + $0x604] ss:$16 sps:$4 sm:$0xff]   ;;  %v14181_v49 = vld [vmem:[#allocation8 + $0x5e0] ss:$16 sps:$4 sm:$0xff]  }
 0x5a5   :  { %11354 = vmatpush2.bf16.msra.mxu1 %v14118_v59  ;;  %v14157_v59 = vld [vmem:[#allocation8 + $0x4e0] ss:$16 sps:$4 sm:$0xff]   ;;  %v14183_v23 = vld [vmem:[#allocation8 + $0x5e4] ss:$16 sps:$4 sm:$0xff]  }
 0x5a6   :  { %11355 = vmatprep.subr.bf16.mxu1 %v14126_v32  ;;  %11313 = vmatpush2.bf16.msra.mxu0 %v14121_v12  ;;  %v14162_v32 = vld [vmem:[#allocation8 + $0x4c4] ss:$16 sps:$4 sm:$0xff]   ;;  %v15213_v36 = vpack.c.bf16 %v9723_v46, %v9715_v35  ;;  %v15333_v12 = vld [vmem:[#allocation27_spill] sm:$0xff]  ;;  %v14184_v21 = vld [vmem:[#allocation8 + $0x5c0] ss:$16 sps:$4 sm:$0xff]  }
 0x5a7   :  { %11314 = vmatprep.subr.bf16.mxu0 %v14129_v8  ;;  %v14165_v8 = vld [vmem:[#allocation8 + $0x4a4] ss:$16 sps:$4 sm:$0xff]   ;;  %v14271_v29 = vld [vmem:[#allocation8 + $0x7c0] ss:$16 sps:$4 sm:$0xff]  }
 0x5a8   :  { %v14267_v33 = vld [vmem:[#allocation8 + $0x7e4] ss:$16 sps:$4 sm:$0xff]   ;;  %v14187_v13 = vld [vmem:[#allocation8 + $0x5a0] ss:$16 sps:$4 sm:$0xff]  }
 0x5a9   :  { %11356 = vmatpush2.bf16.msra.mxu1 %v14124_v41  ;;  %v14160_v41 = vld [vmem:[#allocation8 + $0x4c0] ss:$16 sps:$4 sm:$0xff]   ;;  %v14189_v34 = vld [vmem:[#allocation8 + $0x5a4] ss:$16 sps:$4 sm:$0xff]  }
 0x5aa   :  { %11357 = vmatprep.subr.bf16.mxu1 %v14132_v47  ;;  %11315 = vmatpush2.bf16.msra.mxu0 %v14127_v57  ;;  %v14223_v47 = vld [vmem:[#allocation8 + $0x6c0] ss:$16 sps:$4 sm:$0xff]   ;;  %v14237_v57 = vld [vmem:[#allocation8 + $0x684] ss:$16 sps:$4 sm:$0xff]  }
 0x5ab   :  { %11316 = vmatprep.subr.bf16.mxu0 %v14135_v61  ;;  %v14243_v61 = vld [vmem:[#allocation8 + $0x664] ss:$16 sps:$4 sm:$0xff]   ;;  %v14190_v37 = vld [vmem:[#allocation8 + $0x580] ss:$16 sps:$4 sm:$0xff]  }
 0x5ac   :  { %v14192_v28 = vld [vmem:[#allocation8 + $0x584] ss:$16 sps:$4 sm:$0xff]   ;;  %v14283_v42 = vld [vmem:[#allocation8 + $0x780] ss:$16 sps:$4 sm:$0xff]  }
 0x5ad   :  { %11358 = vmatpush2.bf16.msra.mxu1 %v14130_v45  ;;  %v14235_v45 = vld [vmem:[#allocation8 + $0x680] ss:$16 sps:$4 sm:$0xff]   ;;  %v14198_v40 = vld [vmem:[#allocation8 + $0x544] ss:$16 sps:$4 sm:$0xff]  }
 0x5ae   :  { %11359 = vmatprep.subr.bf16.mxu1 %v14138_v19  ;;  %11317 = vmatpush2.bf16.msra.mxu0 %v14133_v50  ;;  %v14169_v19 = vld [vmem:[#allocation8 + $0x460] ss:$16 sps:$4 sm:$0xff]   ;;  %v14249_v50 = vld [vmem:[#allocation8 + $0x644] ss:$16 sps:$4 sm:$0xff]  }
 0x5af   :  { %11318 = vmatprep.subr.bf16.mxu0 %v14141_v14  ;;  %v14180_v14 = vld [vmem:[#allocation8 + $0x404] ss:$16 sps:$4 sm:$0xff]   ;;  %v14193_v3 = vld [vmem:[#allocation8 + $0x560] ss:$16 sps:$4 sm:$0xff]  }
 0x5b0   :  { %v14201_v46 = vld [vmem:[#allocation8 + $0x524] ss:$16 sps:$4 sm:$0xff]  }
 0x5b1   :  { %11360 = vmatpush2.bf16.msra.mxu1 %v14136_v11  ;;  %v14175_v11 = vld [vmem:[#allocation8 + $0x420] ss:$16 sps:$4 sm:$0xff]   ;;  %v14303_v35 = vld [vmem:[#allocation8 + $0x724] ss:$16 sps:$4 sm:$0xff]  }
 0x5b2   :  { %11361 = vmatprep.subr.bf16.mxu1 %v14144_v30  ;;  %11319 = vmatpush2.bf16.msra.mxu0 %v14139_v4  ;;  %v14253_v30 = vld [vmem:[#allocation8 + $0x620] ss:$16 sps:$4 sm:$0xff]  }
 0x5b3   :  { %11320 = vmatprep.subr.bf16.mxu0 %v14147_v22  ;;  %v14259_v4 = vld [vmem:[#allocation8 + $0x600] ss:$16 sps:$4 sm:$0xff]  }
 0x5b4   :  { %v14265_v22 = vld [vmem:[#allocation8 + $0x7e0] ss:$16 sps:$4 sm:$0xff]  }
 0x5b5   :  { %11362 = vmatpush2.bf16.msra.mxu1 %v14142_v25  ;;  %v14186_v25 = vld [vmem:[#allocation8 + $0x5c4] ss:$16 sps:$4 sm:$0xff]  }
 0x5b6   :  { %11363 = vmatprep.subr.bf16.mxu1 %v14150_v39  ;;  %11321 = vmatpush2.bf16.msra.mxu0 %v14145_v27  ;;  %v14273_v39 = vld [vmem:[#allocation8 + $0x7c4] ss:$16 sps:$4 sm:$0xff]  }
 0x5b7   :  { %11322 = vmatprep.subr.bf16.mxu0 %v14153_v5  ;;  %v14279_v27 = vld [vmem:[#allocation8 + $0x7a4] ss:$16 sps:$4 sm:$0xff]  }
 0x5b8   :  { %v14285_v5 = vld [vmem:[#allocation8 + $0x784] ss:$16 sps:$4 sm:$0xff]  }
 0x5b9   :  { %11364 = vmatpush2.bf16.msra.mxu1 %v14148_v7  ;;  %v14277_v7 = vld [vmem:[#allocation8 + $0x7a0] ss:$16 sps:$4 sm:$0xff]  }
 0x5ba   :  { %11365 = vmatprep.subr.bf16.mxu1 %v14156_v54  ;;  %11323 = vmatpush2.bf16.msra.mxu0 %v14151_v55  ;;  %v14195_v54 = vld [vmem:[#allocation8 + $0x564] ss:$16 sps:$4 sm:$0xff]  }
 0x5bb   :  { %11378 = vmatprep.subr.bf16.mxu0 %v14159_v17  ;;  %v14291_v55 = vld [vmem:[#allocation8 + $0x764] ss:$16 sps:$4 sm:$0xff]  }
 0x5bc   :  { %v14297_v17 = vld [vmem:[#allocation8 + $0x744] ss:$16 sps:$4 sm:$0xff]  }
 0x5bd   :  { %11366 = vmatpush2.bf16.msra.mxu1 %v14154_v51  ;;  %11325 = vmatmul.mubr.bf16.vlgmr.msra.gmra.mxu0 %v15333_v12  ;;  %v14289_v51 = vld [vmem:[#allocation8 + $0x760] ss:$16 sps:$4 sm:$0xff]  }
 0x5be   :  { %11421 = vmatprep.subr.bf16.mxu1 %v14219_v0  ;;  %11379 = vmatpush1.bf16.msra.mxu0 %v14157_v59  ;;  %v14196_v0 = vld [vmem:[#allocation8 + $0x540] ss:$16 sps:$4 sm:$0xff]  }
 0x5bf   :  { %11410 = vmatprep.mubr.bf16.mxu0 %v15213_v36  ;;  %11380 = vmatprep.subr.bf16.mxu0 %v14162_v32  ;;  %v14295_v59 = vld [vmem:[#allocation8 + $0x740] ss:$16 sps:$4 sm:$0xff]  }
 0x5c0   :  { %11368 = vmatmul.mubr.bf16.vlgmr.msra.gmra.mxu1 %v15334_v10  ;;  %v14199_v32 = vld [vmem:[#allocation8 + $0x520] ss:$16 sps:$4 sm:$0xff]  }
 0x5c1   :  { %11422 = vmatpush1.bf16.msra.mxu1 %v14217_v44  ;;  %v14204_v44 = vld [vmem:[#allocation8 + $0x504] ss:$16 sps:$4 sm:$0xff]  }
 0x5c2   :  { %11423 = vmatprep.subr.bf16.mxu1 %v14225_v62  ;;  %11381 = vmatpush1.bf16.msra.mxu0 %v14160_v41  ;;  %v14301_v62 = vld [vmem:[#allocation8 + $0x720] ss:$16 sps:$4 sm:$0xff]   ;;  %v14309_v41 = vld [vmem:[#allocation8 + $0x704] ss:$16 sps:$4 sm:$0xff]  }
 0x5c3   :  { %11382 = vmatprep.subr.bf16.mxu0 %v14165_v8  ;;  %v14202_v8 = vld [vmem:[#allocation8 + $0x500] ss:$16 sps:$4 sm:$0xff]  }
 0x5c5   :  { %11424 = vmatpush1.bf16.msra.mxu1 %v14223_v47  ;;  %v14207_v47 = vld [vmem:[#allocation8 + $0xec] ss:$16 sps:$4 sm:$0xff]  }
 0x5c6   :  { %11425 = vmatprep.subr.bf16.mxu1 %v14231_v52  ;;  %11383 = vmatpush1.bf16.msra.mxu0 %v14163_v1  ;;  %v14307_v52 = vld [vmem:[#allocation8 + $0x700] ss:$16 sps:$4 sm:$0xff]   ;;  %v14315_v1 = vld [vmem:[#allocation8 + $0x2ec] ss:$16 sps:$4 sm:$0xff]  }
 0x5c7   :  { %11384 = vmatprep.subr.bf16.mxu0 %v14168_v53  ;;  %v14205_v53 = vld [vmem:[#allocation8 + $0xe8] ss:$16 sps:$4 sm:$0xff]  }
 0x5c9   :  { %11426 = vmatpush1.bf16.msra.mxu1 %v14229_v6  ;;  %v14210_v6 = vld [vmem:[#allocation8 + $0xcc] ss:$16 sps:$4 sm:$0xff]  }
 0x5ca   :  { %11427 = vmatprep.subr.bf16.mxu1 %v14237_v57  ;;  %11385 = vmatpush1.bf16.msra.mxu0 %v14166_v58  ;;  %v14208_v57 = vld [vmem:[#allocation8 + $0xc8] ss:$16 sps:$4 sm:$0xff]   ;;  %v14213_v58 = vld [vmem:[#allocation8 + $0xac] ss:$16 sps:$4 sm:$0xff]  }
 0x5cb   :  { %11386 = vmatprep.subr.bf16.mxu0 %v14171_v20  ;;  %v14211_v20 = vld [vmem:[#allocation8 + $0xa8] ss:$16 sps:$4 sm:$0xff]  }
 0x5cd   :  { %11428 = vmatpush1.bf16.msra.mxu1 %v14235_v45  ;;  %v14216_v45 = vld [vmem:[#allocation8 + $0x8c] ss:$16 sps:$4 sm:$0xff]  }
 0x5ce   :  { %11429 = vmatprep.subr.bf16.mxu1 %v14243_v61  ;;  %11387 = vmatpush1.bf16.msra.mxu0 %v14169_v19  ;;  %v9314_v61 = vpop.f32.mrf.mxu0  ;;  %v15220_v19 = vpop.f32.mrf.mxu1 }
 0x5cf   :  { %11388 = vmatprep.subr.bf16.mxu0 %v14174_v26  ;;  %v14214_v26 = vld [vmem:[#allocation8 + $0x88] ss:$16 sps:$4 sm:$0xff]  }
 0x5d1   :  { %11430 = vmatpush1.bf16.msra.mxu1 %v14241_v31  ;;  %v14222_v31 = vld [vmem:[#allocation8 + $0x6c] ss:$16 sps:$4 sm:$0xff]  }
 0x5d2   :  { %11431 = vmatprep.subr.bf16.mxu1 %v14249_v50  ;;  %11389 = vmatpush1.bf16.msra.mxu0 %v14172_v24  ;;  %v9316_v50 = vpop.f32.mrf.mxu0  ;;  %v9359_v24 = vpop.f32.mrf.mxu1 }
 0x5d3   :  { %11390 = vmatprep.subr.bf16.mxu0 %v14177_v63  ;;  %v14220_v63 = vld [vmem:[#allocation8 + $0x68] ss:$16 sps:$4 sm:$0xff]  }
 0x5d5   :  { %11432 = vmatpush1.bf16.msra.mxu1 %v14247_v2  ;;  %v9318_v2 = vpop.f32.mrf.mxu0 }
 0x5d6   :  { %11433 = vmatprep.subr.bf16.mxu1 %v14255_v48  ;;  %11391 = vmatpush1.bf16.msra.mxu0 %v14175_v11  ;;  %v9361_v48 = vpop.f32.mrf.mxu1  ;;  %v14226_v11 = vld [vmem:[#allocation8 + $0x48] ss:$16 sps:$4 sm:$0xff]  }
 0x5d7   :  { %11392 = vmatprep.subr.bf16.mxu0 %v14180_v14  ;;  %v14234_v14 = vld [vmem:[#allocation8 + $0x2c] ss:$16 sps:$4 sm:$0xff]  }
 0x5d9   :  { %11434 = vmatpush1.bf16.msra.mxu1 %v14253_v30  ;;  %v9320_v30 = vpop.f32.mrf.mxu0 }
 0x5da   :  { %11435 = vmatprep.subr.bf16.mxu1 %v14261_v56  ;;  %11393 = vmatpush1.bf16.msra.mxu0 %v14178_v60  ;;  %v15222_v56 = vpop.f32.mrf.mxu1  ;;  %v14232_v60 = vld [vmem:[#allocation8 + $0x28] ss:$16 sps:$4 sm:$0xff]  }
 0x5db   :  { %11394 = vmatprep.subr.bf16.mxu0 %v14183_v23  ;;  %v9400_v23 = vpop.f32.mrf.mxu0 }
 0x5dd   :  { %11436 = vmatpush1.bf16.msra.mxu1 %v14259_v4  ;;  %v14240_v4 = vld [vmem:[#allocation8 + $0xc] ss:$16 sps:$4 sm:$0xff]  }
 0x5de   :  { %11437 = vmatprep.subr.bf16.mxu1 %v14267_v33  ;;  %11395 = vmatpush2.bf16.msra.mxu0 %v14181_v49  ;;  %v15224_v33 = vpop.f32.mrf.mxu1  ;;  %v14238_v49 = vld [vmem:[#allocation8 + $0x8] ss:$16 sps:$4 sm:$0xff]  }
 0x5df   :  { %11396 = vmatprep.subr.bf16.mxu0 %v14186_v25  ;;  %v9402_v25 = vpop.f32.mrf.mxu0 }
 0x5e1   :  { %11438 = vmatpush2.bf16.msra.mxu1 %v14265_v22  ;;  %v14246_v22 = vld [vmem:[#allocation8 + $0x1ec] ss:$16 sps:$4 sm:$0xff]  }
 0x5e2   :  { %11439 = vmatprep.subr.bf16.mxu1 %v14273_v39  ;;  %11397 = vmatpush2.bf16.msra.mxu0 %v14184_v21  ;;  %v9445_v39 = vpop.f32.mrf.mxu1  ;;  %v14244_v21 = vld [vmem:[#allocation8 + $0x1e8] ss:$16 sps:$4 sm:$0xff]  }
 0x5e3   :  { %11398 = vmatprep.subr.bf16.mxu0 %v14189_v34  ;;  %v9404_v34 = vpop.f32.mrf.mxu0 }
 0x5e5   :  { %11440 = vmatpush2.bf16.msra.mxu1 %v14271_v29  ;;  %v14252_v29 = vld [vmem:[#allocation8 + $0x1cc] ss:$16 sps:$4 sm:$0xff]  }
 0x5e6   :  { %11441 = vmatprep.subr.bf16.mxu1 %v14279_v27  ;;  %11399 = vmatpush2.bf16.msra.mxu0 %v14187_v13  ;;  %v9447_v27 = vpop.f32.mrf.mxu1  ;;  %v14250_v13 = vld [vmem:[#allocation8 + $0x1c8] ss:$16 sps:$4 sm:$0xff]  }
 0x5e7   :  { %11400 = vmatprep.subr.bf16.mxu0 %v14192_v28  ;;  %v9406_v28 = vpop.f32.mrf.mxu0 }
 0x5e9   :  { %11442 = vmatpush2.bf16.msra.mxu1 %v14277_v7  ;;  %v14258_v7 = vld [vmem:[#allocation8 + $0x1ac] ss:$16 sps:$4 sm:$0xff]  }
 0x5ea   :  { %11443 = vmatprep.subr.bf16.mxu1 %v14285_v5  ;;  %11401 = vmatpush2.bf16.msra.mxu0 %v14190_v37  ;;  %v1480_v5 = vsub.s32 7, %v14932_v9  ;;  %v9449_v37 = vpop.f32.mrf.mxu1 }
 0x5eb   :  { %11402 = vmatprep.subr.bf16.mxu0 %v14195_v54  ;;  %v1476_v54 = vsub.s32 6, %v14932_v9 }
 0x5ed   :  { %11444 = vmatpush2.bf16.msra.mxu1 %v14283_v42  ;;  %v9486_v42 = vpop.f32.mrf.mxu0 }
 0x5ee   :  { %11445 = vmatprep.subr.bf16.mxu1 %v14291_v55  ;;  %11403 = vmatpush2.bf16.msra.mxu0 %v14193_v3  ;;  %v9529_v55 = vpop.f32.mrf.mxu1  ;;  %v14256_v3 = vld [vmem:[#allocation8 + $0x1a8] ss:$16 sps:$4 sm:$0xff]  }
 0x5ef   :  { %11404 = vmatprep.subr.bf16.mxu0 %v14198_v40  ;;  %v14264_v40 = vld [vmem:[#allocation8 + $0x18c] ss:$16 sps:$4 sm:$0xff]  }
 0x5f1   :  { %11446 = vmatpush2.bf16.msra.mxu1 %v14289_v51  ;;  %v1481_v51 = vrot.slane %v15140_v15, %v1480_v5 }
 0x5f2   :  { %11447 = vmatprep.subr.bf16.mxu1 %v14297_v17  ;;  %11405 = vmatpush2.bf16.msra.mxu0 %v14196_v0  ;;  %v1477_v17 = vrot.slane %v15140_v15, %v1476_v54  ;;  %v9488_v0 = vpop.f32.mrf.mxu0  ;;  %v14300_v54 = vld [vmem:[#allocation8 + $0x4cc] ss:$16 sps:$4 sm:$0xff]  }
 0x5f3   :  { %11406 = vmatprep.subr.bf16.mxu0 %v14201_v46  ;;  %v9531_v46 = vpop.f32.mrf.mxu1 }
 0x5f5   :  { %11448 = vmatpush2.bf16.msra.mxu1 %v14295_v59  ;;  %v14262_v59 = vld [vmem:[#allocation8 + $0x188] ss:$16 sps:$4 sm:$0xff]  }
 0x5f6   :  { %11449 = vmatprep.subr.bf16.mxu1 %v14303_v35  ;;  %11407 = vmatpush2.bf16.msra.mxu0 %v14199_v32  ;;  %v14270_v35 = vld [vmem:[#allocation8 + $0x16c] ss:$16 sps:$4 sm:$0xff]   ;;  %v9317_v32 = vadd.f32 %v9316_v50, %v1481_v51 }
 0x5f7   :  { %11408 = vmatprep.subr.bf16.mxu0 %v14204_v44  ;;  %v9315_v44 = vadd.f32 %v9314_v61, %v1477_v17  ;;  %v14282_v61 = vld [vmem:[#allocation8 + $0x12c] ss:$16 sps:$4 sm:$0xff]  }
 0x5f9   :  { %11450 = vmatpush2.bf16.msra.mxu1 %v14301_v62  ;;  %v9490_v62 = vpop.f32.mrf.mxu0 }
 0x5fa   :  { %11451 = vmatprep.subr.bf16.mxu1 %v14309_v41  ;;  %11409 = vmatpush2.bf16.msra.mxu0 %v14202_v8  ;;  %v9319_v41 = vadd.f32 %v9318_v2, %v1477_v17  ;;  %v9533_v8 = vpop.f32.mrf.mxu1 }
 0x5fb   :  { %11464 = vmatprep.subr.bf16.mxu0 %v14207_v47  ;;  %v14268_v47 = vld [vmem:[#allocation8 + $0x168] ss:$16 sps:$4 sm:$0xff]   ;;  %v9492_v15 = vpop.f32.mrf.mxu0 }
 0x5fd   :  { %11452 = vmatpush2.bf16.msra.mxu1 %v14307_v52  ;;  %11411 = vmatmul.mubr.bf16.vlgmr.msra.gmra.mxu0 %v15134_v18  ;;  %v14276_v52 = vld [vmem:[#allocation8 + $0x14c] ss:$16 sps:$4 sm:$0xff]  }
 0x5fe   :  { %11507 = vmatprep.subr.bf16.mxu1 %v14315_v1  ;;  %11465 = vmatpush1.bf16.msra.mxu0 %v14205_v53  ;;  %v9360_v1 = vadd.f32 %v9359_v24, %v9317_v32  ;;  %v9321_v53 = vadd.f32 %v9320_v30, %v1481_v51  ;;  %v14280_v24 = vld [vmem:[#allocation8 + $0x128] ss:$16 sps:$4 sm:$0xff]  }
 0x5ff   :  { %11496 = vmatprep.mubr.bf16.mxu0 %v15187_v16  ;;  %11466 = vmatprep.subr.bf16.mxu0 %v14210_v6  ;;  %v14228_v16 = vld [vmem:[#allocation8 + $0x4c] ss:$16 sps:$4 sm:$0xff]   ;;  %v9358_v6 = vadd.f32 %v15220_v19, %v9315_v44 }
 0x600   :  { %v9364_v50 = vadd.f32 %v15222_v56, %v9321_v53 }
 0x602   :  { %11467 = vmatpush1.bf16.msra.mxu0 %v14208_v57  ;;  %v9362_v57 = vadd.f32 %v9361_v48, %v9319_v41  ;;  %v14288_v48 = vld [vmem:[#allocation8 + $0x10c] ss:$16 sps:$4 sm:$0xff]  }
 0x603   :  { %11468 = vmatprep.subr.bf16.mxu0 %v14213_v58  ;;  %v9403_v58 = vadd.f32 %v9402_v25, %v9360_v1 }
 0x605   :  { %v9446_v2 = vadd.f32 %v9445_v39, %v9403_v58 }
 0x606   :  { %11469 = vmatpush1.bf16.msra.mxu0 %v14211_v20  ;;  %v9535_v20 = vpop.f32.mrf.mxu1 }
 0x607   :  { %11470 = vmatprep.subr.bf16.mxu0 %v14216_v45  ;;  %v14274_v45 = vld [vmem:[#allocation8 + $0x148] ss:$16 sps:$4 sm:$0xff]  }
 0x60a   :  { %11471 = vmatpush1.bf16.msra.mxu0 %v14214_v26  ;;  %v9401_v26 = vadd.f32 %v9400_v23, %v9358_v6  ;;  %v14312_v6 = vld [vmem:[#allocation8 + $0x48c] ss:$16 sps:$4 sm:$0xff]  }
 0x60b   :  { %11472 = vmatprep.subr.bf16.mxu0 %v14222_v31  ;;  %v9572_v31 = vpop.f32.mrf.mxu0 }
 0x60c   :  { %v9444_v19 = vadd.f32 %v15224_v33, %v9401_v26  ;;  %v14310_v26 = vld [vmem:[#allocation8 + $0x488] ss:$16 sps:$4 sm:$0xff]  }
 0x60e   :  { %11473 = vmatpush1.bf16.msra.mxu0 %v14220_v63  ;;  %v9405_v63 = vadd.f32 %v9404_v34, %v9362_v57  ;;  %v9487_v23 = vadd.f32 %v9486_v42, %v9444_v19  ;;  %v14316_v19 = vld [vmem:[#allocation8 + $0x468] ss:$16 sps:$4 sm:$0xff]  }
 0x60f   :  { %11474 = vmatprep.subr.bf16.mxu0 %v14228_v16  ;;  %v9615_v16 = vpop.f32.mrf.mxu1 }
 0x610   :  { %v9448_v30 = vadd.f32 %v9447_v27, %v9405_v63 }
 0x612   :  { %11475 = vmatpush1.bf16.msra.mxu0 %v14226_v11  ;;  %v9407_v11 = vadd.f32 %v9406_v28, %v9364_v50  ;;  %v9491_v25 = vadd.f32 %v9490_v62, %v9448_v30  ;;  %v14319_v30 = vld [vmem:[#allocation8 + $0x2c8] ss:$16 sps:$4 sm:$0xff]  }
 0x613   :  { %11476 = vmatprep.subr.bf16.mxu0 %v14234_v14  ;;  %v9574_v14 = vpop.f32.mrf.mxu0 }
 0x614   :  { %v9534_v28 = vadd.f32 %v9533_v8, %v9491_v25  ;;  %v14328_v25 = vld [vmem:[#allocation8 + $0x428] ss:$16 sps:$4 sm:$0xff]  }
 0x615   :  { %v9576_v56 = vpop.f32.mrf.mxu0 }
 0x616   :  { %11477 = vmatpush1.bf16.msra.mxu0 %v14232_v60  ;;  %v9489_v60 = vadd.f32 %v9488_v0, %v9446_v2 }
 0x617   :  { %11478 = vmatprep.subr.bf16.mxu0 %v14240_v4  ;;  %v9617_v4 = vpop.f32.mrf.mxu1  ;;  %v9578_v27 = vpop.f32.mrf.mxu0 }
 0x618   :  { %v9532_v39 = vadd.f32 %v9531_v46, %v9489_v60  ;;  %v14322_v60 = vld [vmem:[#allocation8 + $0x448] ss:$16 sps:$4 sm:$0xff]  }
 0x61a   :  { %11479 = vmatpush1.bf16.msra.mxu0 %v14238_v49  ;;  %v9450_v49 = vadd.f32 %v9449_v37, %v9407_v11  ;;  %v9575_v33 = vadd.f32 %v9574_v14, %v9532_v39  ;;  %v9577_v37 = vadd.f32 %v9576_v56, %v9534_v28  ;;  %v14313_v11 = vld [vmem:[#allocation8 + $0x2e8] ss:$16 sps:$4 sm:$0xff]   ;;  %v14321_v14 = vld [vmem:[#allocation8 + $0x2cc] ss:$16 sps:$4 sm:$0xff]  }
 0x61b   :  { %11480 = vmatprep.subr.bf16.mxu0 %v14246_v22  ;;  %v14286_v22 = vld [vmem:[#allocation8 + $0x108] ss:$16 sps:$4 sm:$0xff]   ;;  %v14336_v56 = vld [vmem:[#allocation8 + $0x40c] ss:$16 sps:$4 sm:$0xff]  }
 0x61c   :  { %v9493_v34 = vadd.f32 %v9492_v15, %v9450_v49  ;;  %v9618_v51 = vadd.f32 %v9617_v4, %v9575_v33  ;;  %v14327_v4 = vld [vmem:[#allocation8 + $0x2ac] ss:$16 sps:$4 sm:$0xff]   ;;  %v14325_v49 = vld [vmem:[#allocation8 + $0x2a8] ss:$16 sps:$4 sm:$0xff]  }
 0x61d   :  { %v14339_v39 = vld [vmem:[#allocation8 + $0x26c] ss:$16 sps:$4 sm:$0xff]  }
 0x61e   :  { %11481 = vmatpush2.bf16.msra.mxu0 %v14244_v21  ;;  %v14294_v21 = vld [vmem:[#allocation8 + $0x4ec] ss:$16 sps:$4 sm:$0xff]   ;;  %v9536_v42 = vadd.f32 %v9535_v20, %v9493_v34 }
 0x61f   :  { %11482 = vmatprep.subr.bf16.mxu0 %v14252_v29  ;;  %v9619_v29 = vpop.f32.mrf.mxu1  ;;  %v14342_v34 = vld [vmem:[#allocation8 + $0x5ec] ss:$16 sps:$4 sm:$0xff]  }
 0x620   :  { %v9579_v17 = vadd.f32 %v9578_v27, %v9536_v42  ;;  %v9620_v32 = vadd.f32 %v9619_v29, %v9577_v37  ;;  %v14337_v29 = vld [vmem:[#allocation8 + $0x268] ss:$16 sps:$4 sm:$0xff]   ;;  %v14345_v28 = vld [vmem:[#allocation8 + $0x24c] ss:$16 sps:$4 sm:$0xff]  }
 0x621   :  { %v14348_v33 = vld [vmem:[#allocation8 + $0x5cc] ss:$16 sps:$4 sm:$0xff]   ;;  %v14349_v42 = vld [vmem:[#allocation8 + $0x228] ss:$16 sps:$4 sm:$0xff]  }
 0x622   :  { %11483 = vmatpush2.bf16.msra.mxu0 %v14250_v13  ;;  %v9530_v13 = vadd.f32 %v9529_v55, %v9487_v23  ;;  %v14298_v55 = vld [vmem:[#allocation8 + $0x4c8] ss:$16 sps:$4 sm:$0xff]   ;;  %v14330_v23 = vld [vmem:[#allocation8 + $0x42c] ss:$16 sps:$4 sm:$0xff]  }
 0x623   :  { %11484 = vmatprep.subr.bf16.mxu0 %v14258_v7  ;;  %v14292_v7 = vld [vmem:[#allocation8 + $0x4e8] ss:$16 sps:$4 sm:$0xff]   ;;  %v14351_v27 = vld [vmem:[#allocation8 + $0x22c] ss:$16 sps:$4 sm:$0xff]  }
 0x624   :  { %v9573_v5 = vadd.f32 %v9572_v31, %v9530_v13  ;;  %v14340_v13 = vld [vmem:[#allocation8 + $0x5e8] ss:$16 sps:$4 sm:$0xff]  }
 0x625   :  { %v14352_v37 = vld [vmem:[#allocation8 + $0x5a8] ss:$16 sps:$4 sm:$0xff]  }
 0x626   :  { %11485 = vmatpush2.bf16.msra.mxu0 %v14256_v3  ;;  %v9621_v3 = vpop.f32.mrf.mxu1  ;;  %v9616_v46 = vadd.f32 %v9615_v16, %v9573_v5  ;;  %v14346_v5 = vld [vmem:[#allocation8 + $0x5c8] ss:$16 sps:$4 sm:$0xff]  }
 0x627   :  { %11486 = vmatprep.subr.bf16.mxu0 %v14264_v40 }
 0x62a   :  { %11487 = vmatpush2.bf16.msra.mxu0 %v14262_v59 }
 0x62b   :  { %11488 = vmatprep.subr.bf16.mxu0 %v14270_v35  ;;  %v14306_v35 = vld [vmem:[#allocation8 + $0x4ac] ss:$16 sps:$4 sm:$0xff]  }
 0x62e   :  { %11489 = vmatpush2.bf16.msra.mxu0 %v14268_v47  ;;  %v9622_v47 = vadd.f32 %v9621_v3, %v9579_v17  ;;  %v14357_v3 = vld [vmem:[#allocation8 + $0x20c] ss:$16 sps:$4 sm:$0xff]   ;;  %v14358_v17 = vld [vmem:[#allocation8 + $0x588] ss:$16 sps:$4 sm:$0xff]  }
 0x62f   :  { %11490 = vmatprep.subr.bf16.mxu0 %v14276_v52 }
 0x632   :  { %11491 = vmatpush2.bf16.msra.mxu0 %v14274_v45 }
 0x633   :  { %11492 = vmatprep.subr.bf16.mxu0 %v14282_v61  ;;  %v14318_v61 = vld [vmem:[#allocation8 + $0x46c] ss:$16 sps:$4 sm:$0xff]  }
 0x636   :  { %11493 = vmatpush2.bf16.msra.mxu0 %v14280_v24 }
 0x637   :  { %11494 = vmatprep.subr.bf16.mxu0 %v14288_v48  ;;  %v14324_v48 = vld [vmem:[#allocation8 + $0x44c] ss:$16 sps:$4 sm:$0xff]  }
 0x63a   :  { %11495 = vmatpush2.bf16.msra.mxu0 %v14286_v22  ;;  %v14333_v22 = vld [vmem:[#allocation8 + $0x28c] ss:$16 sps:$4 sm:$0xff]  }
 0x63b   :  { %11550 = vmatprep.subr.bf16.mxu0 %v14294_v21  ;;  %v14331_v21 = vld [vmem:[#allocation8 + $0x288] ss:$16 sps:$4 sm:$0xff]  }
 0x63d   :  { %v9658_v40 = vpop.f32.mrf.mxu0  ;;  %11497 = vmatmul.mubr.bf16.vlgmr.msra.gmra.mxu0 %v15333_v12  ;;  %v14304_v12 = vld [vmem:[#allocation8 + $0x4a8] ss:$16 sps:$4 sm:$0xff]  }
 0x63e   :  { %11551 = vmatpush1.bf16.msra.mxu0 %v14292_v7  ;;  %11582 = vmatprep.mubr.bf16.mxu0 %v15213_v36  ;;  %v9659_v41 = vadd.f32 %v9658_v40, %v9616_v46  ;;  %v14343_v7 = vld [vmem:[#allocation8 + $0x248] ss:$16 sps:$4 sm:$0xff]   ;;  %v14360_v40 = vld [vmem:[#allocation8 + $0x58c] ss:$16 sps:$4 sm:$0xff]  }
 0x63f   :  { %v9660_v59 = vpop.f32.mrf.mxu0  ;;  %11552 = vmatprep.subr.bf16.mxu0 %v14300_v54  ;;  %v14354_v54 = vld [vmem:[#allocation8 + $0x5ac] ss:$16 sps:$4 sm:$0xff]   ;;  %v14361_v46 = vld [vmem:[#allocation8 + $0x3e8] ss:$16 sps:$4 sm:$0xff]  }
 0x640   :  { %v9701_v0 = vpop.f32.mrf.mxu1  ;;  %v9661_v44 = vadd.f32 %v9660_v59, %v9618_v51  ;;  %v14355_v51 = vld [vmem:[#allocation8 + $0x208] ss:$16 sps:$4 sm:$0xff]  }
 0x641   :  { %v9662_v8 = vpop.f32.mrf.mxu0  ;;  %v9702_v58 = vadd.f32 %v9701_v0, %v9659_v41  ;;  %v14363_v0 = vld [vmem:[#allocation8 + $0x3ec] ss:$16 sps:$4 sm:$0xff]   ;;  %v14364_v59 = vld [vmem:[#allocation8 + $0x568] ss:$16 sps:$4 sm:$0xff]  }
 0x642   :  { %v9703_v62 = vpop.f32.mrf.mxu1  ;;  %v9663_v52 = vadd.f32 %v9662_v8, %v9620_v32  ;;  %11553 = vmatpush1.bf16.msra.mxu0 %v14298_v55  ;;  %v14366_v55 = vld [vmem:[#allocation8 + $0x56c] ss:$16 sps:$4 sm:$0xff]  }
 0x643   :  { %v9664_v53 = vpop.f32.mrf.mxu0  ;;  %11554 = vmatprep.subr.bf16.mxu0 %v14306_v35  ;;  %v9704_v15 = vadd.f32 %v9703_v62, %v9661_v44  ;;  %v9716_v16 = vmax.f32 %v9702_v58, 0.0  ;;  %v14369_v35 = vld [vmem:[#allocation8 + $0x3cc] ss:$16 sps:$4 sm:$0xff]   ;;  %v14367_v44 = vld [vmem:[#allocation8 + $0x3c8] ss:$16 sps:$4 sm:$0xff]  }
 0x644   :  { %v9705_v1 = vpop.f32.mrf.mxu1  ;;  %v9665_v57 = vadd.f32 %v9664_v53, %v9622_v47  ;;  %v14372_v32 = vld [vmem:[#allocation8 + $0x54c] ss:$16 sps:$4 sm:$0xff]   ;;  %v14370_v62 = vld [vmem:[#allocation8 + $0x548] ss:$16 sps:$4 sm:$0xff]  }
 0x645   :  { %v9706_v36 = vadd.f32 %v9705_v1, %v9663_v52  ;;  %v9717_v50 = vmax.f32 %v9704_v15, 0.0  ;;  %v14375_v41 = vld [vmem:[#allocation8 + $0x3ac] ss:$16 sps:$4 sm:$0xff]   ;;  %v14373_v47 = vld [vmem:[#allocation8 + $0x3a8] ss:$16 sps:$4 sm:$0xff]  }
 0x646   :  { %v9707_v20 = vpop.f32.mrf.mxu1  ;;  %11555 = vmatpush1.bf16.msra.mxu0 %v14304_v12  ;;  %v14378_v8 = vld [vmem:[#allocation8 + $0x52c] ss:$16 sps:$4 sm:$0xff]   ;;  %v14376_v52 = vld [vmem:[#allocation8 + $0x528] ss:$16 sps:$4 sm:$0xff]  }
 0x647   :  { %v9708_v45 = vadd.f32 %v9707_v20, %v9665_v57  ;;  %v9724_v31 = vmax.f32 %v9706_v36, 0.0  ;;  %11556 = vmatprep.subr.bf16.mxu0 %v14312_v6  ;;  %v14381_v1 = vld [vmem:[#allocation8 + $0x38c] ss:$16 sps:$4 sm:$0xff]   ;;  %v14379_v53 = vld [vmem:[#allocation8 + $0x388] ss:$16 sps:$4 sm:$0xff]  }
 0x648   :  { %v14384_v12 = vld [vmem:[#allocation8 + $0x50c] ss:$16 sps:$4 sm:$0xff]   ;;  %v14382_v6 = vld [vmem:[#allocation8 + $0x508] ss:$16 sps:$4 sm:$0xff]  }
 0x649   :  { %v9725_v63 = vmax.f32 %v9708_v45, 0.0  ;;  %v15237_v24 = vpack.c.bf16 %v9724_v31, %v9716_v16  ;;  %v14387_v15 = vld [vmem:[#allocation8 + $0x36c] ss:$16 sps:$4 sm:$0xff]   ;;  %v14447_v36 = vld [vmem:[#allocation11 + $0x74] ss:$8 sps:$4 sm:$0xff]  }
 0x64a   :  { %11557 = vmatpush1.bf16.msra.mxu0 %v14310_v26  ;;  %v14385_v57 = vld [vmem:[#allocation8 + $0x368] ss:$16 sps:$4 sm:$0xff]   ;;  %v14390_v58 = vld [vmem:[#allocation8 + $0x34c] ss:$16 sps:$4 sm:$0xff]  }
 0x64b   :  { %v15235_v2 = vpack.c.bf16 %v9725_v63, %v9717_v50  ;;  %11558 = vmatprep.subr.bf16.mxu0 %v14318_v61  ;;  %v14445_v20 = vld [vmem:[#allocation11 + $0x70] ss:$8 sps:$4 sm:$0xff]   ;;  %v14450_v45 = vld [vmem:[#allocation11 + $0x64] ss:$8 sps:$4 sm:$0xff]   ;;  %v14448_v61 = vld [vmem:[#allocation11 + $0x60] ss:$8 sps:$4 sm:$0xff]  }
 0x64c   :  { %v14388_v26 = vld [vmem:[#allocation8 + $0x348] ss:$16 sps:$4 sm:$0xff]   ;;  %v14393_v31 = vld [vmem:[#allocation8 + $0x32c] ss:$16 sps:$4 sm:$0xff]  }
 0x64d   :  { %11453 = vmatprep.mubr.bf16.mxu1 %v15235_v2  ;;  %v14453_v50 = vld [vmem:[#allocation11 + $0x54] ss:$8 sps:$4 sm:$0xff]   ;;  %v14396_v16 = vld [vmem:[#allocation8 + $0x30c] ss:$16 sps:$4 sm:$0xff]  }
 0x64e   :  { %11454 = vmatmul.mubr.bf16.vlgmr.msra.gmra.mxu1 %v15237_v24  ;;  %11559 = vmatpush1.bf16.msra.mxu0 %v14316_v19  ;;  %v14391_v63 = vld [vmem:[#allocation8 + $0x328] ss:$16 sps:$4 sm:$0xff]  }
 0x64f   :  { %11508 = vmatpush1.bf16.msra.mxu1 %v14313_v11  ;;  %11539 = vmatprep.mubr.bf16.mxu1 %v15189_v43  ;;  %v14334_v43 = vld [vmem:[#allocation8 + $0x408] ss:$16 sps:$4 sm:$0xff]   ;;  %v14451_v11 = vld [vmem:[#allocation11 + $0x50] ss:$8 sps:$4 sm:$0xff]  }
 0x650   :  { %11509 = vmatprep.subr.bf16.mxu1 %v14321_v14  ;;  %11560 = vmatprep.subr.bf16.mxu0 %v14324_v48  ;;  %v14456_v19 = vld [vmem:[#allocation11 + $0x44] ss:$8 sps:$4 sm:$0xff]   ;;  %v14399_v48 = vld [vmem:[#allocation8 + $0x6ec] ss:$16 sps:$4 sm:$0xff]  }
 0x651   :  { %v14394_v14 = vld [vmem:[#allocation8 + $0x308] ss:$16 sps:$4 sm:$0xff]  }
 0x652   :  { %11561 = vmatpush1.bf16.msra.mxu0 %v14322_v60  ;;  %v14397_v60 = vld [vmem:[#allocation8 + $0x6e8] ss:$16 sps:$4 sm:$0xff]  }
 0x653   :  { %11510 = vmatpush1.bf16.msra.mxu1 %v14319_v30  ;;  %11562 = vmatprep.subr.bf16.mxu0 %v14330_v23  ;;  %v14459_v30 = vld [vmem:[#allocation11 + $0x34] ss:$8 sps:$4 sm:$0xff]   ;;  %v14457_v23 = vld [vmem:[#allocation11 + $0x30] ss:$8 sps:$4 sm:$0xff]  }
 0x654   :  { %11511 = vmatprep.subr.bf16.mxu1 %v14327_v4  ;;  %v14402_v4 = vld [vmem:[#allocation8 + $0x6cc] ss:$16 sps:$4 sm:$0xff]  }
 0x656   :  { %11563 = vmatpush1.bf16.msra.mxu0 %v14328_v25  ;;  %v14400_v25 = vld [vmem:[#allocation8 + $0x6c8] ss:$16 sps:$4 sm:$0xff]  }
 0x657   :  { %11512 = vmatpush1.bf16.msra.mxu1 %v14325_v49  ;;  %11564 = vmatprep.subr.bf16.mxu0 %v14336_v56  ;;  %v14462_v49 = vld [vmem:[#allocation11 + $0x24] ss:$8 sps:$4 sm:$0xff]   ;;  %v14460_v56 = vld [vmem:[#allocation11 + $0x20] ss:$8 sps:$4 sm:$0xff]  }
 0x658   :  { %11513 = vmatprep.subr.bf16.mxu1 %v14333_v22  ;;  %v14405_v22 = vld [vmem:[#allocation8 + $0x6ac] ss:$16 sps:$4 sm:$0xff]  }
 0x65a   :  { %11565 = vmatpush1.bf16.msra.mxu0 %v14334_v43  ;;  %v14403_v43 = vld [vmem:[#allocation8 + $0x6a8] ss:$16 sps:$4 sm:$0xff]  }
 0x65b   :  { %11514 = vmatpush1.bf16.msra.mxu1 %v14331_v21  ;;  %11566 = vmatprep.subr.bf16.mxu0 %v14342_v34  ;;  %v14465_v21 = vld [vmem:[#allocation11 + $0x14] ss:$8 sps:$4 sm:$0xff]   ;;  %v14463_v34 = vld [vmem:[#allocation11 + $0x10] ss:$8 sps:$4 sm:$0xff]  }
 0x65c   :  { %11515 = vmatprep.subr.bf16.mxu1 %v14339_v39  ;;  %v14408_v39 = vld [vmem:[#allocation8 + $0x68c] ss:$16 sps:$4 sm:$0xff]  }
 0x65e   :  { %11567 = vmatpush2.bf16.msra.mxu0 %v14340_v13  ;;  %v14411_v13 = vld [vmem:[#allocation8 + $0x66c] ss:$16 sps:$4 sm:$0xff]  }
 0x65f   :  { %11516 = vmatpush1.bf16.msra.mxu1 %v14337_v29  ;;  %11568 = vmatprep.subr.bf16.mxu0 %v14348_v33  ;;  %v14468_v29 = vld [vmem:[#allocation11 + $0x4] ss:$8 sps:$4 sm:$0xff]  }
 0x660   :  { %11517 = vmatprep.subr.bf16.mxu1 %v14345_v28  ;;  %v14471_v28 = vld [vmem:[#allocation11 + $0xf4] ss:$8 sps:$4 sm:$0xff]  }
 0x661   :  { %v14409_v33 = vld [vmem:[#allocation8 + $0x668] ss:$16 sps:$4 sm:$0xff]  }
 0x662   :  { %11569 = vmatpush2.bf16.msra.mxu0 %v14346_v5  ;;  %v14469_v5 = vld [vmem:[#allocation11 + $0xf0] ss:$8 sps:$4 sm:$0xff]  }
 0x663   :  { %11518 = vmatpush1.bf16.msra.mxu1 %v14343_v7  ;;  %11570 = vmatprep.subr.bf16.mxu0 %v14354_v54  ;;  %v14414_v7 = vld [vmem:[#allocation8 + $0x64c] ss:$16 sps:$4 sm:$0xff]   ;;  %v14412_v54 = vld [vmem:[#allocation8 + $0x648] ss:$16 sps:$4 sm:$0xff]  }
 0x664   :  { %11519 = vmatprep.subr.bf16.mxu1 %v14351_v27  ;;  %v14474_v27 = vld [vmem:[#allocation11 + $0xe4] ss:$8 sps:$4 sm:$0xff]  }
 0x666   :  { %11571 = vmatpush2.bf16.msra.mxu0 %v14352_v37  ;;  %v14472_v37 = vld [vmem:[#allocation11 + $0xe0] ss:$8 sps:$4 sm:$0xff]  }
 0x667   :  { %11520 = vmatpush1.bf16.msra.mxu1 %v14349_v42  ;;  %11572 = vmatprep.subr.bf16.mxu0 %v14360_v40  ;;  %v14417_v42 = vld [vmem:[#allocation8 + $0x62c] ss:$16 sps:$4 sm:$0xff]   ;;  %v14415_v40 = vld [vmem:[#allocation8 + $0x628] ss:$16 sps:$4 sm:$0xff]  }
 0x668   :  { %11521 = vmatprep.subr.bf16.mxu1 %v14357_v3  ;;  %v14477_v3 = vld [vmem:[#allocation11 + $0xd4] ss:$8 sps:$4 sm:$0xff]  }
 0x66a   :  { %11573 = vmatpush2.bf16.msra.mxu0 %v14358_v17  ;;  %v14475_v17 = vld [vmem:[#allocation11 + $0xd0] ss:$8 sps:$4 sm:$0xff]  }
 0x66b   :  { %11522 = vmatpush1.bf16.msra.mxu1 %v14355_v51  ;;  %11574 = vmatprep.subr.bf16.mxu0 %v14366_v55  ;;  %v14420_v51 = vld [vmem:[#allocation8 + $0x60c] ss:$16 sps:$4 sm:$0xff]   ;;  %v14418_v55 = vld [vmem:[#allocation8 + $0x608] ss:$16 sps:$4 sm:$0xff]  }
 0x66c   :  { %11523 = vmatprep.subr.bf16.mxu1 %v14363_v0  ;;  %v14480_v0 = vld [vmem:[#allocation11 + $0xc4] ss:$8 sps:$4 sm:$0xff]  }
 0x66e   :  { %11575 = vmatpush2.bf16.msra.mxu0 %v14364_v59  ;;  %v14478_v59 = vld [vmem:[#allocation11 + $0xc0] ss:$8 sps:$4 sm:$0xff]  }
 0x66f   :  { %11524 = vmatpush2.bf16.msra.mxu1 %v14361_v46  ;;  %11576 = vmatprep.subr.bf16.mxu0 %v14372_v32  ;;  %v14423_v46 = vld [vmem:[#allocation8 + $0x7ec] ss:$16 sps:$4 sm:$0xff]   ;;  %v14421_v32 = vld [vmem:[#allocation8 + $0x7e8] ss:$16 sps:$4 sm:$0xff]  }
 0x670   :  { %11525 = vmatprep.subr.bf16.mxu1 %v14369_v35  ;;  %v14483_v35 = vld [vmem:[#allocation11 + $0xb4] ss:$8 sps:$4 sm:$0xff]  }
 0x672   :  { %11577 = vmatpush2.bf16.msra.mxu0 %v14370_v62  ;;  %v14481_v62 = vld [vmem:[#allocation11 + $0xb0] ss:$8 sps:$4 sm:$0xff]  }
 0x673   :  { %11526 = vmatpush2.bf16.msra.mxu1 %v14367_v44  ;;  %11578 = vmatprep.subr.bf16.mxu0 %v14378_v8  ;;  %v14426_v44 = vld [vmem:[#allocation8 + $0x7cc] ss:$16 sps:$4 sm:$0xff]   ;;  %v14424_v8 = vld [vmem:[#allocation8 + $0x7c8] ss:$16 sps:$4 sm:$0xff]  }
 0x674   :  { %11527 = vmatprep.subr.bf16.mxu1 %v14375_v41  ;;  %v14486_v41 = vld [vmem:[#allocation11 + $0xa4] ss:$8 sps:$4 sm:$0xff]  }
 0x676   :  { %11579 = vmatpush2.bf16.msra.mxu0 %v14376_v52  ;;  %v14484_v52 = vld [vmem:[#allocation11 + $0xa0] ss:$8 sps:$4 sm:$0xff]  }
 0x677   :  { %11528 = vmatpush2.bf16.msra.mxu1 %v14373_v47  ;;  %11580 = vmatprep.subr.bf16.mxu0 %v14384_v12  ;;  %v14429_v47 = vld [vmem:[#allocation8 + $0x7ac] ss:$16 sps:$4 sm:$0xff]   ;;  %v14427_v12 = vld [vmem:[#allocation8 + $0x7a8] ss:$16 sps:$4 sm:$0xff]  }
 0x678   :  { %11529 = vmatprep.subr.bf16.mxu1 %v14381_v1  ;;  %v14489_v1 = vld [vmem:[#allocation11 + $0x94] ss:$8 sps:$4 sm:$0xff]  }
 0x67a   :  { %11581 = vmatpush2.bf16.msra.mxu0 %v14382_v6  ;;  %v14487_v6 = vld [vmem:[#allocation11 + $0x90] ss:$8 sps:$4 sm:$0xff]  }
 0x67b   :  { %11530 = vmatpush2.bf16.msra.mxu1 %v14379_v53  ;;  %12044 = vmatprep.subr.bf16.mxu0 %v14447_v36  ;;  %v14432_v53 = vld [vmem:[#allocation8 + $0x78c] ss:$16 sps:$4 sm:$0xff]   ;;  %v14430_v36 = vld [vmem:[#allocation8 + $0x788] ss:$16 sps:$4 sm:$0xff]  }
 0x67c   :  { %11531 = vmatprep.subr.bf16.mxu1 %v14387_v15  ;;  %v14492_v15 = vld [vmem:[#allocation11 + $0x84] ss:$8 sps:$4 sm:$0xff]  }
 0x67d   :  { %11583 = vmatmul.mubr.bf16.vlgmr.msra.gmra.mxu0 %v15134_v18  ;;  %v14454_v18 = vld [vmem:[#allocation11 + $0x40] ss:$8 sps:$4 sm:$0xff]  }
 0x67e   :  { %12045 = vmatpush1.bf16.msra.mxu0 %v14445_v20  ;;  %v14433_v20 = vld [vmem:[#allocation8 + $0x768] ss:$16 sps:$4 sm:$0xff]  }
 0x67f   :  { %11532 = vmatpush2.bf16.msra.mxu1 %v14385_v57  ;;  %12046 = vmatprep.subr.bf16.mxu0 %v14450_v45  ;;  %v14435_v57 = vld [vmem:[#allocation8 + $0x76c] ss:$16 sps:$4 sm:$0xff]  }
 0x680   :  { %11533 = vmatprep.subr.bf16.mxu1 %v14390_v58  ;;  %v14490_v58 = vld [vmem:[#allocation11 + $0x80] ss:$8 sps:$4 sm:$0xff]  }
 0x681   :  { %v14438_v45 = vld [vmem:[#allocation8 + $0x74c] ss:$16 sps:$4 sm:$0xff]  }
 0x682   :  { %12047 = vmatpush1.bf16.msra.mxu0 %v14448_v61  ;;  %v14439_v61 = vld [vmem:[#allocation8 + $0x728] ss:$16 sps:$4 sm:$0xff]  }
 0x683   :  { %11534 = vmatpush2.bf16.msra.mxu1 %v14388_v26  ;;  %12048 = vmatprep.subr.bf16.mxu0 %v14453_v50  ;;  %v14436_v26 = vld [vmem:[#allocation8 + $0x748] ss:$16 sps:$4 sm:$0xff]   ;;  %v14444_v50 = vld [vmem:[#allocation8 + $0x70c] ss:$16 sps:$4 sm:$0xff]  }
 0x684   :  { %11535 = vmatprep.subr.bf16.mxu1 %v14393_v31  ;;  %v14441_v31 = vld [vmem:[#allocation8 + $0x72c] ss:$16 sps:$4 sm:$0xff]  }
 0x686   :  { %12049 = vmatpush1.bf16.msra.mxu0 %v14451_v11  ;;  %v14495_v11 = vld [vmem:[#allocation11 + $0x174] ss:$8 sps:$4 sm:$0xff]  }
 0x687   :  { %11536 = vmatpush2.bf16.msra.mxu1 %v14391_v63  ;;  %12050 = vmatprep.subr.bf16.mxu0 %v14456_v19  ;;  %v14442_v63 = vld [vmem:[#allocation8 + $0x708] ss:$16 sps:$4 sm:$0xff]  }
 0x688   :  { %11537 = vmatprep.subr.bf16.mxu1 %v14396_v16  ;;  %v14493_v16 = vld [vmem:[#allocation11 + $0x170] ss:$8 sps:$4 sm:$0xff]   ;;  %v14498_v19 = vld [vmem:[#allocation11 + $0x164] ss:$8 sps:$4 sm:$0xff]  }
 0x68a   :  { %12051 = vmatpush1.bf16.msra.mxu0 %v14454_v18  ;;  %v14499_v18 = vld [vmem:[#allocation11 + $0x150] ss:$8 sps:$4 sm:$0xff]  }
 0x68b   :  { %11538 = vmatpush2.bf16.msra.mxu1 %v14394_v14  ;;  %12052 = vmatprep.subr.bf16.mxu0 %v14459_v30  ;;  %v14496_v14 = vld [vmem:[#allocation11 + $0x160] ss:$8 sps:$4 sm:$0xff]   ;;  %v14504_v30 = vld [vmem:[#allocation11 + $0x144] ss:$8 sps:$4 sm:$0xff]  }
 0x68c   :  { %11593 = vmatprep.subr.bf16.mxu1 %v14399_v48  ;;  %v14501_v48 = vld [vmem:[#allocation11 + $0x154] ss:$8 sps:$4 sm:$0xff]  }
 0x68e   :  { %11540 = vmatmul.mubr.bf16.vlgmr.msra.gmra.mxu1 %v15334_v10  ;;  %12053 = vmatpush1.bf16.msra.mxu0 %v14457_v23  ;;  %v14406_v10 = vld [vmem:[#allocation8 + $0x688] ss:$16 sps:$4 sm:$0xff]   ;;  %v14505_v23 = vld [vmem:[#allocation11 + $0x130] ss:$8 sps:$4 sm:$0xff]  }
 0x68f   :  { %11594 = vmatpush1.bf16.msra.mxu1 %v14397_v60  ;;  %11625 = vmatprep.mubr.bf16.mxu1 %v15235_v2  ;;  %v14466_v2 = vld [vmem:[#allocation11] ss:$8 sps:$4 sm:$0xff]  }
 0x690   :  { %11595 = vmatprep.subr.bf16.mxu1 %v14402_v4  ;;  %12054 = vmatprep.subr.bf16.mxu0 %v14462_v49  ;;  %v14502_v60 = vld [vmem:[#allocation11 + $0x140] ss:$8 sps:$4 sm:$0xff]   ;;  %v14507_v4 = vld [vmem:[#allocation11 + $0x134] ss:$8 sps:$4 sm:$0xff]  }
 0x691   :  { %v14508_v49 = vld [vmem:[#allocation11 + $0x120] ss:$8 sps:$4 sm:$0xff]  }
 0x692   :  { %12055 = vmatpush1.bf16.msra.mxu0 %v14460_v56  ;;  %v14516_v56 = vld [vmem:[#allocation11 + $0x104] ss:$8 sps:$4 sm:$0xff]  }
 0x693   :  { %11596 = vmatpush1.bf16.msra.mxu1 %v14400_v25  ;;  %12056 = vmatprep.subr.bf16.mxu0 %v14465_v21  ;;  %v14513_v25 = vld [vmem:[#allocation11 + $0x114] ss:$8 sps:$4 sm:$0xff]   ;;  %v14514_v21 = vld [vmem:[#allocation11 + $0x100] ss:$8 sps:$4 sm:$0xff]  }
 0x694   :  { %11597 = vmatprep.subr.bf16.mxu1 %v14405_v22  ;;  %v14511_v22 = vld [vmem:[#allocation11 + $0x110] ss:$8 sps:$4 sm:$0xff]  }
 0x696   :  { %12057 = vmatpush1.bf16.msra.mxu0 %v14463_v34  ;;  %v14522_v34 = vld [vmem:[#allocation11 + $0x1e4] ss:$8 sps:$4 sm:$0xff]  }
 0x697   :  { %11598 = vmatpush1.bf16.msra.mxu1 %v14403_v43  ;;  %12058 = vmatprep.subr.bf16.mxu0 %v14468_v29  ;;  %v14519_v43 = vld [vmem:[#allocation11 + $0x1f4] ss:$8 sps:$4 sm:$0xff]   ;;  %v11326_v29 = vpop.f32.mrf.mxu0 }
 0x698   :  { %11599 = vmatprep.subr.bf16.mxu1 %v14408_v39  ;;  %v14517_v39 = vld [vmem:[#allocation11 + $0x1f0] ss:$8 sps:$4 sm:$0xff]  }
 0x69a   :  { %12059 = vmatpush1.bf16.msra.mxu0 %v14466_v2  ;;  %v11328_v2 = vpop.f32.mrf.mxu0 }
 0x69b   :  { %11600 = vmatpush1.bf16.msra.mxu1 %v14406_v10  ;;  %12060 = vmatprep.subr.bf16.mxu0 %v14471_v28  ;;  %v14520_v10 = vld [vmem:[#allocation11 + $0x1e0] ss:$8 sps:$4 sm:$0xff]   ;;  %v14523_v28 = vld [vmem:[#allocation11 + $0x1d0] ss:$8 sps:$4 sm:$0xff]  }
 0x69c   :  { %11601 = vmatprep.subr.bf16.mxu1 %v14411_v13  ;;  %v14525_v13 = vld [vmem:[#allocation11 + $0x1d4] ss:$8 sps:$4 sm:$0xff]  }
 0x69e   :  { %12061 = vmatpush2.bf16.msra.mxu0 %v14469_v5  ;;  %v11369_v5 = vpop.f32.mrf.mxu1 }
 0x69f   :  { %11602 = vmatpush1.bf16.msra.mxu1 %v14409_v33  ;;  %12062 = vmatprep.subr.bf16.mxu0 %v14474_v27  ;;  %v14528_v33 = vld [vmem:[#allocation11 + $0x1c4] ss:$8 sps:$4 sm:$0xff]   ;;  %v14526_v27 = vld [vmem:[#allocation11 + $0x1c0] ss:$8 sps:$4 sm:$0xff]  }
 0x6a0   :  { %11603 = vmatprep.subr.bf16.mxu1 %v14414_v7  ;;  %v11330_v7 = vpop.f32.mrf.mxu0 }
 0x6a2   :  { %12063 = vmatpush2.bf16.msra.mxu0 %v14472_v37  ;;  %v11371_v37 = vpop.f32.mrf.mxu1 }
 0x6a3   :  { %11604 = vmatpush1.bf16.msra.mxu1 %v14412_v54  ;;  %12064 = vmatprep.subr.bf16.mxu0 %v14477_v3  ;;  %v14531_v54 = vld [vmem:[#allocation11 + $0x1b4] ss:$8 sps:$4 sm:$0xff]  }
 0x6a4   :  { %11605 = vmatprep.subr.bf16.mxu1 %v14417_v42  ;;  %v11332_v42 = vpop.f32.mrf.mxu0 }
 0x6a6   :  { %12065 = vmatpush2.bf16.msra.mxu0 %v14475_v17 }
 0x6a7   :  { %11606 = vmatpush1.bf16.msra.mxu1 %v14415_v40  ;;  %12066 = vmatprep.subr.bf16.mxu0 %v14480_v0  ;;  %v14529_v40 = vld [vmem:[#allocation11 + $0x1b0] ss:$8 sps:$4 sm:$0xff]  }
 0x6a8   :  { %11607 = vmatprep.subr.bf16.mxu1 %v14420_v51  ;;  %v15246_v51 = vld [vmem:[#allocation10] sm:$0xf]  ;;  %v15335_v0 = vld [vmem:[#allocation24_spill] sm:$0xff] }
 0x6a9   :  { %v9999_v17 = vrot.slane %v15246_v51, %v15137_v38 }
 0x6aa   :  { %12067 = vmatpush2.bf16.msra.mxu0 %v14478_v59 }
 0x6ab   :  { %11608 = vmatpush1.bf16.msra.mxu1 %v14418_v55  ;;  %12068 = vmatprep.subr.bf16.mxu0 %v14483_v35  ;;  %v9995_v55 = vrot.slane %v15246_v51, %v15335_v0  ;;  %v11329_v35 = vadd.f32 %v11328_v2, %v9999_v17 }
 0x6ac   :  { %11609 = vmatprep.subr.bf16.mxu1 %v14423_v46  ;;  %v11373_v46 = vpop.f32.mrf.mxu1 }
 0x6ae   :  { %12069 = vmatpush2.bf16.msra.mxu0 %v14481_v62  ;;  %v11375_v62 = vpop.f32.mrf.mxu1 }
 0x6af   :  { %11610 = vmatpush2.bf16.msra.mxu1 %v14421_v32  ;;  %12070 = vmatprep.subr.bf16.mxu0 %v14486_v41  ;;  %v11331_v32 = vadd.f32 %v11330_v7, %v9995_v55 }
 0x6b0   :  { %11611 = vmatprep.subr.bf16.mxu1 %v14426_v44  ;;  %v11327_v44 = vadd.f32 %v11326_v29, %v9995_v55  ;;  %v14548_v29 = vld [vmem:[#allocation14 + $0x20] sm:$0xff]  }
 0x6b2   :  { %12071 = vmatpush2.bf16.msra.mxu0 %v14484_v52  ;;  %v11372_v52 = vadd.f32 %v11371_v37, %v11329_v35 }
 0x6b3   :  { %11612 = vmatpush2.bf16.msra.mxu1 %v14424_v8  ;;  %12072 = vmatprep.subr.bf16.mxu0 %v14489_v1  ;;  %v11333_v8 = vadd.f32 %v11332_v42, %v9999_v17  ;;  %v11374_v1 = vadd.f32 %v11373_v46, %v11331_v32  ;;  %v15336_v42 = vsub.s32 3, %v14932_v9 }
 0x6b4   :  { %11613 = vmatprep.subr.bf16.mxu1 %v14429_v47 }
 0x6b5   :  { %v10007_v37 = vrot.slane %v15246_v51, %v15336_v42 }
 0x6b6   :  { %12073 = vmatpush2.bf16.msra.mxu0 %v14487_v6 }
 0x6b7   :  { %11614 = vmatpush2.bf16.msra.mxu1 %v14427_v12  ;;  %12074 = vmatprep.subr.bf16.mxu0 %v14492_v15  ;;  %v14534_v12 = vld [vmem:[#allocation11 + $0x1a4] ss:$8 sps:$4 sm:$0xff]  }
 0x6b8   :  { %11615 = vmatprep.subr.bf16.mxu1 %v14432_v53  ;;  %v11370_v53 = vadd.f32 %v11369_v5, %v11327_v44 }
 0x6ba   :  { %12075 = vmatpush2.bf16.msra.mxu0 %v14490_v58 }
 0x6bb   :  { %11616 = vmatpush2.bf16.msra.mxu1 %v14430_v36  ;;  %v14532_v36 = vld [vmem:[#allocation11 + $0x1a0] ss:$8 sps:$4 sm:$0xff]  }
 0x6bc   :  { %11617 = vmatprep.subr.bf16.mxu1 %v14435_v57  ;;  %v11376_v57 = vadd.f32 %v11375_v62, %v11333_v8 }
 0x6bd   :  { %v11412_v3 = vpop.f32.mrf.mxu0 }
 0x6bf   :  { %11618 = vmatpush2.bf16.msra.mxu1 %v14433_v20  ;;  %v11414_v59 = vpop.f32.mrf.mxu0 }
 0x6c0   :  { %11619 = vmatprep.subr.bf16.mxu1 %v14438_v45  ;;  %v11415_v58 = vadd.f32 %v11414_v59, %v11372_v52  ;;  %v11413_v45 = vadd.f32 %v11412_v3, %v11370_v53  ;;  %v15337_v3 = vsub.s32 2, %v14932_v9 }
 0x6c1   :  { %v11416_v41 = vpop.f32.mrf.mxu0 }
 0x6c2   :  { %v11417_v20 = vadd.f32 %v11416_v41, %v11374_v1 }
 0x6c3   :  { %11620 = vmatpush2.bf16.msra.mxu1 %v14436_v26  ;;  %v11418_v6 = vpop.f32.mrf.mxu0 }
 0x6c4   :  { %11621 = vmatprep.subr.bf16.mxu1 %v14441_v31  ;;  %v11419_v31 = vadd.f32 %v11418_v6, %v11376_v57 }
 0x6c7   :  { %11622 = vmatpush2.bf16.msra.mxu1 %v14439_v61 }
 0x6c8   :  { %11623 = vmatprep.subr.bf16.mxu1 %v14444_v50 }
 0x6cb   :  { %11624 = vmatpush2.bf16.msra.mxu1 %v14442_v63  ;;  %v14537_v63 = vld [vmem:[#allocation11 + $0x194] ss:$8 sps:$4 sm:$0xff]  }
 0x6cc   :  { %12087 = vmatprep.subr.bf16.mxu1 %v14495_v11 }
 0x6ce   :  { %11626 = vmatmul.mubr.bf16.vlgmr.msra.gmra.mxu1 %v15237_v24  ;;  %v14510_v24 = vld [vmem:[#allocation11 + $0x124] ss:$8 sps:$4 sm:$0xff]  }
 0x6cf   :  { %12088 = vmatpush1.bf16.msra.mxu1 %v14493_v16 }
 0x6d0   :  { %12089 = vmatprep.subr.bf16.mxu1 %v14498_v19  ;;  %v14535_v19 = vld [vmem:[#allocation11 + $0x190] ss:$8 sps:$4 sm:$0xff]  }
 0x6d3   :  { %12090 = vmatpush1.bf16.msra.mxu1 %v14496_v14 }
 0x6d4   :  { %12091 = vmatprep.subr.bf16.mxu1 %v14501_v48 }
 0x6d7   :  { %12092 = vmatpush1.bf16.msra.mxu1 %v14499_v18 }
 0x6d8   :  { %12093 = vmatprep.subr.bf16.mxu1 %v14504_v30 }
 0x6db   :  { %12094 = vmatpush1.bf16.msra.mxu1 %v14502_v60  ;;  %v14540_v60 = vld [vmem:[#allocation11 + $0x184] ss:$8 sps:$4 sm:$0xff]  }
 0x6dc   :  { %12095 = vmatprep.subr.bf16.mxu1 %v14507_v4 }
 0x6df   :  { %12096 = vmatpush1.bf16.msra.mxu1 %v14505_v23  ;;  %v14538_v23 = vld [vmem:[#allocation11 + $0x180] ss:$8 sps:$4 sm:$0xff]  }
 0x6e0   :  { %12097 = vmatprep.subr.bf16.mxu1 %v14510_v24 }
 0x6e3   :  { %12098 = vmatpush1.bf16.msra.mxu1 %v14508_v49 }
 0x6e4   :  { %12099 = vmatprep.subr.bf16.mxu1 %v14513_v25  ;;  %v14541_v25 = vld [vmem:[#allocation14 + $0x78] sm:$0xff]  }
 0x6e5   :  { %13989 = vmatprep.subr.bf16.mxu0 %v14541_v25 }
 0x6e7   :  { %12100 = vmatpush1.bf16.msra.mxu1 %v14511_v22  ;;  %v14542_v22 = vld [vmem:[#allocation14 + $0x38] sm:$0xff]  }
 0x6e8   :  { %12101 = vmatprep.subr.bf16.mxu1 %v14516_v56  ;;  %v14543_v56 = vld [vmem:[#allocation14 + $0x70] sm:$0xff]  }
 0x6eb   :  { %12102 = vmatpush1.bf16.msra.mxu1 %v14514_v21  ;;  %v14544_v21 = vld [vmem:[#allocation14 + $0x30] sm:$0xff]  }
 0x6ec   :  { %12103 = vmatprep.subr.bf16.mxu1 %v14519_v43  ;;  %v14545_v43 = vld [vmem:[#allocation14 + $0x68] sm:$0xff]  }
 0x6ef   :  { %12104 = vmatpush2.bf16.msra.mxu1 %v14517_v39  ;;  %v14546_v39 = vld [vmem:[#allocation14 + $0x28] sm:$0xff]  }
 0x6f0   :  { %12105 = vmatprep.subr.bf16.mxu1 %v14522_v34  ;;  %v14547_v34 = vld [vmem:[#allocation14 + $0x60] sm:$0xff]  }
 0x6f3   :  { %12106 = vmatpush2.bf16.msra.mxu1 %v14520_v10  ;;  %v14549_v10 = vld [vmem:[#allocation14 + $0x58] sm:$0xff]  }
 0x6f4   :  { %12107 = vmatprep.subr.bf16.mxu1 %v14525_v13  ;;  %v14550_v13 = vld [vmem:[#allocation14 + $0x18] sm:$0xff]  }
 0x6f7   :  { %12108 = vmatpush2.bf16.msra.mxu1 %v14523_v28 }
 0x6f8   :  { %12109 = vmatprep.subr.bf16.mxu1 %v14528_v33 }
 0x6fb   :  { %12110 = vmatpush2.bf16.msra.mxu1 %v14526_v27 }
 0x6fc   :  { %12111 = vmatprep.subr.bf16.mxu1 %v14531_v54 }
 0x6fd   :  { %v11498_v2 = vpop.f32.mrf.mxu0 }
 0x6ff   :  { %12112 = vmatpush2.bf16.msra.mxu1 %v14529_v40  ;;  %v11500_v28 = vpop.f32.mrf.mxu0  ;;  %v10003_v40 = vrot.slane %v15246_v51, %v15337_v3 }
 0x700   :  { %12113 = vmatprep.subr.bf16.mxu1 %v14534_v12  ;;  %v11501_v46 = vadd.f32 %v11500_v28, %v10007_v37 }
 0x701   :  { %v11502_v33 = vpop.f32.mrf.mxu0  ;;  %v11499_v35 = vadd.f32 %v11498_v2, %v10003_v40 }
 0x702   :  { %v11503_v59 = vadd.f32 %v11502_v33, %v10003_v40 }
 0x703   :  { %12114 = vmatpush2.bf16.msra.mxu1 %v14532_v36  ;;  %v11504_v5 = vpop.f32.mrf.mxu0 }
 0x704   :  { %12115 = vmatprep.subr.bf16.mxu1 %v14537_v63  ;;  %v11505_v44 = vadd.f32 %v11504_v5, %v10007_v37 }
 0x707   :  { %12116 = vmatpush2.bf16.msra.mxu1 %v14535_v19  ;;  %v14551_v19 = vld [vmem:[#allocation14 + $0x50] sm:$0xff]  }
 0x708   :  { %12117 = vmatprep.subr.bf16.mxu1 %v14540_v60  ;;  %v14556_v60 = vld [vmem:[#allocation14] sm:$0xff]  }
 0x70b   :  { %12118 = vmatpush2.bf16.msra.mxu1 %v14538_v23 }
 0x70e   :  { %v11455_v47 = vpop.f32.mrf.mxu1 }
 0x70f   :  { %v11456_v16 = vadd.f32 %v11455_v47, %v11413_v45 }
 0x710   :  { %v11457_v15 = vpop.f32.mrf.mxu1 }
 0x711   :  { %v11458_v61 = vadd.f32 %v11457_v15, %v11415_v58  ;;  %v11636_v4 = vmax.f32 %v11456_v16, 0.0 }
 0x712   :  { %v11459_v26 = vpop.f32.mrf.mxu1 }
 0x713   :  { %v11460_v50 = vadd.f32 %v11459_v26, %v11417_v20  ;;  %v11637_v18 = vmax.f32 %v11458_v61, 0.0 }
 0x714   :  { %v11461_v11 = vpop.f32.mrf.mxu1 }
 0x715   :  { %v11462_v14 = vadd.f32 %v11461_v11, %v11419_v31  ;;  %v11640_v48 = vmax.f32 %v11460_v50, 0.0 }
 0x717   :  { %v11641_v30 = vmax.f32 %v11462_v14, 0.0  ;;  %v11644_v49 = vpack.c.bf16 %v11640_v48, %v11636_v4  ;;  %v14552_v14 = vld [vmem:[#allocation14 + $0x10] sm:$0xff]   ;;  %v14553_v48 = vld [vmem:[#allocation14 + $0x48] sm:$0xff]  }
 0x719   :  { %v11645_v24 = vpack.c.bf16 %v11641_v30, %v11637_v18  ;;  %v14554_v18 = vld [vmem:[#allocation14 + $0x8] sm:$0xff]   ;;  %v14555_v30 = vld [vmem:[#allocation14 + $0x40] sm:$0xff]  }
 0x71b   :  { %12076 = vmatprep.mubr.bf16.mxu0 %v11645_v24  ;;  %v11712_v24 = vld [vmem:[#allocation13] sm:$0x3] }
 0x71c   :  { %12077 = vmatmul.mubr.bf16.vlgmr.msra.gmra.mxu0 %v11644_v49  ;;  %v11721_v25 = vrot.slane %v11712_v24, %v15137_v38 }
 0x71d   :  { %13990 = vmatpush3.bf16.msra.mxu0 %v14542_v22  ;;  %v11717_v22 = vrot.slane %v11712_v24, %v15335_v0 }
 0x71e   :  { %13991 = vmatprep.subr.bf16.mxu0 %v14543_v56 }
 0x721   :  { %13992 = vmatpush3.bf16.msra.mxu0 %v14544_v21 }
 0x722   :  { %13993 = vmatprep.subr.bf16.mxu0 %v14545_v43 }
 0x725   :  { %13994 = vmatpush3.bf16.msra.mxu0 %v14546_v39 }
 0x726   :  { %13995 = vmatprep.subr.bf16.mxu0 %v14547_v34 }
 0x729   :  { %13996 = vmatpush3.bf16.msra.mxu0 %v14548_v29 }
 0x72a   :  { %13997 = vmatprep.subr.bf16.mxu0 %v14549_v10 }
 0x72d   :  { %13998 = vmatpush3.bf16.msra.mxu0 %v14550_v13 }
 0x72e   :  { %13999 = vmatprep.subr.bf16.mxu0 %v14551_v19 }
 0x731   :  { %14000 = vmatpush3.bf16.msra.mxu0 %v14552_v14 }
 0x732   :  { %14001 = vmatprep.subr.bf16.mxu0 %v14553_v48 }
 0x735   :  { %14002 = vmatpush3.bf16.msra.mxu0 %v14554_v18 }
 0x736   :  { %14003 = vmatprep.subr.bf16.mxu0 %v14555_v30 }
 0x739   :  { %14004 = vmatpush3.bf16.msra.mxu0 %v14556_v60 }
 0x73d   :  { %v11584_v54 = vpop.f32.mrf.mxu0 }
 0x73f   :  { %v11586_v55 = vpop.f32.mrf.mxu0 }
 0x741   :  { %v11588_v8 = vpop.f32.mrf.mxu0 }
 0x743   :  { %v11590_v15 = vpop.f32.mrf.mxu0 }
 0x74e   :  { %v11541_v7 = vpop.f32.mrf.mxu1 }
 0x74f   :  { %v11542_v47 = vadd.f32 %v11541_v7, %v11499_v35 }
 0x750   :  { %v11543_v27 = vpop.f32.mrf.mxu1 }
 0x751   :  { %v11544_v62 = vadd.f32 %v11543_v27, %v11501_v46  ;;  %v11585_v9 = vadd.f32 %v11584_v54, %v11542_v47  ;;  %v13963_v46 = vld [vmem:[#allocation16] ss:$0 sm:$0xff] }
 0x752   :  { %v11545_v17 = vpop.f32.mrf.mxu1 }
 0x753   :  { %v11546_v41 = vadd.f32 %v11545_v17, %v11503_v59  ;;  %v11587_v53 = vadd.f32 %v11586_v55, %v11544_v62 }
 0x754   :  { %v11547_v32 = vpop.f32.mrf.mxu1 }
 0x755   :  { %v11548_v1 = vadd.f32 %v11547_v32, %v11505_v44  ;;  %v11589_v6 = vadd.f32 %v11588_v8, %v11546_v41 }
 0x757   :  { %v11591_v58 = vadd.f32 %v11590_v15, %v11548_v1 }
 0x78e   :  { %v11627_v52 = vpop.f32.mrf.mxu1 }
 0x78f   :  { %v11628_v20 = vadd.f32 %v11627_v52, %v11585_v9 }
 0x790   :  { %v11629_v12 = vpop.f32.mrf.mxu1 }
 0x791   :  { %v11630_v51 = vadd.f32 %v11629_v12, %v11587_v53  ;;  %v11638_v63 = vmax.f32 %v11628_v20, 0.0 }
 0x792   :  { %v11631_v36 = vpop.f32.mrf.mxu1 }
 0x793   :  { %v11632_v57 = vadd.f32 %v11631_v36, %v11589_v6  ;;  %v11639_v61 = vmax.f32 %v11630_v51, 0.0 }
 0x794   :  { %v11633_v45 = vpop.f32.mrf.mxu1 }
 0x795   :  { %v11634_v26 = vadd.f32 %v11633_v45, %v11591_v58  ;;  %v11642_v31 = vmax.f32 %v11632_v57, 0.0 }
 0x797   :  { %v11643_v50 = vmax.f32 %v11634_v26, 0.0  ;;  %v11646_v11 = vpack.c.bf16 %v11642_v31, %v11638_v63 }
 0x799   :  { %v11647_v16 = vpack.c.bf16 %v11643_v50, %v11639_v61 }
 0x79b   :  { %12119 = vmatprep.mubr.bf16.mxu1 %v11647_v16 }
 0x79c   :  { %12120 = vmatmul.mubr.bf16.vlgmr.msra.gmra.mxu1 %v11646_v11 }
 0x7dc   :  { %v12078_v4 = vpop.f32.mrf.mxu0 }
 0x7dd   :  { %v12079_v29 = vadd.f32 %v12078_v4, %v11717_v22 }
 0x7de   :  { %v12080_v23 = vpop.f32.mrf.mxu0 }
 0x7df   :  { %v12081_v39 = vadd.f32 %v12080_v23, %v11721_v25 }
 0x7e0   :  { %v12082_v49 = vpop.f32.mrf.mxu0 }
 0x7e1   :  { %v12083_v34 = vadd.f32 %v12082_v49, %v11717_v22 }
 0x7e2   :  { %v12084_v21 = vpop.f32.mrf.mxu0 }
 0x7e3   :  { %v12085_v13 = vadd.f32 %v12084_v21, %v11721_v25 }
 0x85c   :  { %v12121_v56 = vpop.f32.mrf.mxu1 }
 0x85d   :  { %v12122_v33 = vadd.f32 %v12121_v56, %v12079_v29 }
 0x85e   :  { %v12123_v43 = vpop.f32.mrf.mxu1 }
 0x85f   :  { %v12124_v2 = vadd.f32 %v12123_v43, %v12081_v39  ;;  %v12130_v37 = vmax.f32 %v12122_v33, 0.0 }
 0x860   :  { %v12125_v10 = vpop.f32.mrf.mxu1 }
 0x861   :  { %v12126_v28 = vadd.f32 %v12125_v10, %v12083_v34  ;;  %v12131_v54 = vmax.f32 %v12124_v2, 0.0 }
 0x862   :  { %v12127_v7 = vpop.f32.mrf.mxu1 }
 0x863   :  { %v12128_v5 = vadd.f32 %v12127_v7, %v12085_v13  ;;  %v12132_v27 = vmax.f32 %v12126_v28, 0.0 }
 0x865   :  { %v12133_v42 = vmax.f32 %v12128_v5, 0.0  ;;  %v12134_v3 = vpack.c.bf16 %v12132_v27, %v12130_v37 }
 0x867   :  { %v12135_v38 = vpack.c.bf16 %v12133_v42, %v12131_v54 }
 0x869   :  { %12303 = vmatprep.mubr.bf16.mxu0 %v12135_v38 }
 0x86a   :  { %12304 = vmatmul.mubr.bf16.vlgmr.msra.gmra.mxu0 %v12134_v3 }
 0x92a   :  { %v14005_v0 = vpop.f32.mrf.mxu0 }
 0x92c   :  { %v14006_v40 = vpop.f32.mrf.mxu0 }
 0x92d   :  { %v14007_v55 = vadd.f32 %v14006_v40, %v14005_v0 }
 0x92e   :  { %v14008_v17 = vpop.f32.mrf.mxu0 }
 0x92f   :  { %v12306_v32 = vadd.f32 %v14007_v55, %v13963_v46 }
 0x930   :  { %v14009_v59 = vpop.f32.mrf.mxu0 }
 0x931   :  { %v14010_v35 = vadd.f32 %v14009_v59, %v14008_v17 }
 0x933   :  { %v12309_v44 = vadd.f32 %v14010_v35, %v13963_v46 }
 0x935   :  { %v13987_v62 = vpack.c.bf16 %v12309_v44, %v12306_v32 }
 0x937   :  { %13988 = vst [vmem:[#allocation17] sm:$0xff] %v13987_v62  }
 0x938   :  { %14811 = shalt.err (!%p14808_p7)
}
 0x939   :  { %12333 = dma.vmem_to_hbm [thread:$0]  %s12328_s8, 128, %s15275_s9, [#allocation4], %s14842_s10, %s14842_s10, %s14843_s11  }
 0x93a   :  { %14830 = dma.done.wait [#allocation4], 128  }
 0x93b   :  { %14831 = vsyncadd [#allocation4], 4294967168 }
 0x93c   :  { %12337 = vsyncpa [#allocation3], 1 }
 0x93d   :  { %12338 = vsyncpa [#allocation6], 1 }
 0x93e   :  { %12339 = vsyncpa [#allocation9], 1 }
 0x93f   :  { %12340 = vsyncpa [#allocation12], 1 }
 0x940   :  { %12341 = vsyncpa [#allocation15], 1 }
 0x941   :  { %12342 = vsyncpa [#allocation4], 1 }

</bundles_post_ra>
